<compile_context>
chip_gen: v7x
topology: tpu7x:2x2x1
jax: 0.10.0
libtpu: 0.0.40
codegen_flags: <defaults>
</compile_context>

<pallas_src>
import functools

import jax
import jax.numpy as jnp
from jax.experimental import pallas as pl
from jax.experimental.pallas import tpu as pltpu


def _round_up(x, m):
    return ((x + m - 1) // m) * m


def _vmem_limit_bytes():
    """Per-generation VMEM budget: ~75% of physical, capped at 96 MiB.

    v5e/v6e (128 MiB) -> 96 MiB; v7x (64 MiB) -> 48 MiB."""
    try:
        cap = int(pltpu.get_tpu_info().vmem_capacity_bytes)
    except Exception:
        cap = 64 * 1024 * 1024  # conservative (v7x-sized) fallback
    return int(min(cap * 3 // 4, 96 * 1024 * 1024))


_ROW_CHUNK = 256  # output-row chunk inside the fire kernel (bounds vreg spill)


# ----------------------------------------------------------------------------
# Pallas kernels
# ----------------------------------------------------------------------------
def _mm_bias_relu_kernel(a_ref, w_ref, b_ref, o_ref):
    acc = jnp.dot(a_ref[...], w_ref[...], preferred_element_type=jnp.float32)
    o_ref[...] = jnp.maximum(acc + b_ref[...], 0.0).astype(o_ref.dtype)


def _fire_kernel(x_ref, wsq_ref, bsq_ref, wce_ref, bfull_ref, we3_ref,
                 out_ref, spad_ref, *, H, W, E1, E3, OFF, RC):
    """One Fire module for one batch element.

    x_ref:    (1, H*W, Cin)   bf16
    wce_ref:  (Sq, E1+E3)     bf16  [expand1x1 | centre tap of expand3x3]
    we3_ref:  (8, Sq, E3)     bf16  the 8 off-centre 3x3 taps (row-major, no centre)
    out_ref:  (1, H*W, E1+E3) bf16  channels [0,E1)=expand1x1, [E1,..)=expand3x3
    spad_ref: (SPR, Sq)       bf16  vertically zero-padded, row-flattened squeeze
                                    activation; valid rows start at DATA=OFF+W
                                    (16-aligned so the single data store is
                                    sublane-aligned).
    """
    HW = H * W
    DATA = OFF + W
    SPR, SQ = spad_ref.shape
    n_chunks = -(-HW // RC)

    # Zero only the pad bands (interior fully overwritten every step).
    spad_ref[pl.ds(0, DATA), :] = jnp.zeros((DATA, SQ), spad_ref.dtype)
    tail = SPR - (DATA + HW)
    spad_ref[pl.ds(DATA + HW, tail), :] = jnp.zeros((tail, SQ), spad_ref.dtype)

    # --- phase 1: squeeze 1x1 + ReLU, streamed (bf16) into the padded buffer --
    for c in range(n_chunks):
        cs = c * RC
        cl = min(RC, HW - cs)
        xc = x_ref[0, pl.ds(cs, cl), :]
        s = jnp.dot(xc, wsq_ref[...], preferred_element_type=jnp.float32)
        s = jnp.maximum(s + bsq_ref[...], 0.0)
        spad_ref[pl.ds(DATA + cs, cl), :] = s.astype(spad_ref.dtype)

    # --- phase 2: expand1x1 + expand3x3 (centre tap fused with expand1x1) ----
    for c in range(n_chunks):
        cs = c * RC
        cl = min(RC, HW - cs)
        col = (jax.lax.broadcasted_iota(jnp.int32, (cl, 1), 0) + cs) % W
        not_left = col != 0            # kx == 0 taps read pixel x-1
        not_right = col != (W - 1)     # kx == 2 taps read pixel x+1

        s_c = spad_ref[pl.ds(DATA + cs, cl), :]
        acc = jnp.dot(s_c, wce_ref[...],
                      preferred_element_type=jnp.float32)        # (cl, E1+E3)

        e3 = jnp.zeros((cl, E3), jnp.float32)
        t = 0
        for ky in range(3):
            for kx in range(3):
                if ky == 1 and kx == 1:
                    continue                                      # fused above
                start = DATA + cs + (ky - 1) * W + (kx - 1)
                win = spad_ref[pl.ds(start, cl), :]
                if kx == 0:
                    win = jnp.where(not_left, win, jnp.zeros_like(win))
                elif kx == 2:
                    win = jnp.where(not_right, win, jnp.zeros_like(win))
                e3 = e3 + jnp.dot(win, we3_ref[t],
                                  preferred_element_type=jnp.float32)
                t += 1

        acc = acc + jnp.concatenate(
            [jnp.zeros((cl, E1), jnp.float32), e3], axis=1)
        out = jnp.maximum(acc + bfull_ref[...], 0.0).astype(out_ref.dtype)
        out_ref[0, pl.ds(cs, cl), :] = out          # single lane-dense store


def _head_kernel(x_ref, w_ref, b_ref, o_ref):
    """Conv1x1 + ReLU + global average pool for one batch element."""
    y = jnp.dot(x_ref[0], w_ref[...], preferred_element_type=jnp.float32)
    y = jnp.maximum(y + b_ref[...], 0.0)                          # (HW, NCP)
    o_ref[0] = jnp.mean(y, axis=0, keepdims=True)                 # (1, NCP)


# ----------------------------------------------------------------------------
# Pallas wrappers
# ----------------------------------------------------------------------------
def matmul_bias_relu(a, w, b, out_dtype=jnp.bfloat16, tm_max=512):
    """a: (M, K) bf16, w: (K, Nc) bf16, b: (1, Nc) f32 -> relu(a@w + b) (M, Nc)."""
    M, K = a.shape
    Kw, Nc = w.shape
    assert K == Kw
    steps = max(1, -(-M // tm_max))
    tm = _round_up(-(-M // steps), 16)          # adaptive, 16-sublane aligned
    Mp = tm * steps
    a_p = a if Mp == M else jnp.pad(a, ((0, Mp - M), (0, 0)))
    out = pl.pallas_call(
        _mm_bias_relu_kernel,
        out_shape=jax.ShapeDtypeStruct((Mp, Nc), out_dtype),
        grid=(steps,),
        in_specs=[
            pl.BlockSpec((tm, K), lambda i: (i, 0)),
            pl.BlockSpec((K, Nc), lambda i: (0, 0)),
            pl.BlockSpec((1, Nc), lambda i: (0, 0)),
        ],
        out_specs=pl.BlockSpec((tm, Nc), lambda i: (i, 0)),
        compiler_params=pltpu.CompilerParams(
            dimension_semantics=("parallel",),
            vmem_limit_bytes=_vmem_limit_bytes()),
    )(a_p, w, b)
    return out if Mp == M else out[:M]


def conv1_3x3_s2(x, p):
    """First layer: Conv2d(3, 64, k=3, stride=2) + ReLU, NHWC in/out.
    Cout is zero-padded 64 -> 128 so all downstream stores stay lane-dense."""
    N, H, W, _ = x.shape
    oh = (H - 3) // 2 + 1
    ow = (W - 3) // 2 + 1
    taps = []
    for dy in range(3):
        for dx in range(3):
            taps.append(x[:, dy:dy + 2 * oh:2, dx:dx + 2 * ow:2, :])
    patches = jnp.concatenate(taps, axis=-1)                      # (N, oh, ow, 27)
    kp = p["w"].shape[0]                                          # 32 (K padded)
    patches = jnp.pad(patches,
                      ((0, 0), (0, 0), (0, 0), (0, kp - patches.shape[-1])))
    a = patches.reshape(N * oh * ow, kp).astype(jnp.bfloat16)
    out = matmul_bias_relu(a, p["w"], p["b"])                     # (N*oh*ow, 128)
    return out.reshape(N, oh, ow, -1)


def maxpool_3x3_s2_ceil(x):
    """MaxPool2d(3, stride=2, ceil_mode=True) on NHWC as a fused XLA 9-way max."""
    # TODO(synk): fuse into the producing fire epilogue to save an HBM round trip.
    N, H, W, C = x.shape
    k, s = 3, 2
    oh = -(-(H - k) // s) + 1
    ow = -(-(W - k) // s) + 1
    hp = (oh - 1) * s + k
    wp = (ow - 1) * s + k
    xp = jnp.pad(x, ((0, 0), (0, hp - H), (0, wp - W), (0, 0)),
                 constant_values=-jnp.inf)
    out = None
    for dy in range(k):
        for dx in range(k):
            win = xp[:, dy:dy + s * oh:s, dx:dx + s * ow:s, :]
            out = win if out is None else jnp.maximum(out, win)
    return out


def fire(x, p):
    """Fused Fire module: squeeze1x1+ReLU -> [expand1x1 | expand3x3]+ReLU."""
    N, H, W, Cin = x.shape
    HW = H * W
    Sq = p["w_sq"].shape[1]
    Etot = p["w_ce"].shape[1]
    E3 = p["w_e3"].shape[2]
    E1 = Etot - E3
    OFF = ((-W) % 16) or 16              # data start OFF+W is 16-aligned, OFF>=1
    sp_rows = _round_up(OFF + 2 * W + HW + 1, 16)
    kern = functools.partial(_fire_kernel, H=H, W=W, E1=E1, E3=E3,
                             OFF=OFF, RC=_ROW_CHUNK)
    out = pl.pallas_call(
        kern,
        out_shape=jax.ShapeDtypeStruct((N, HW, Etot), jnp.bfloat16),
        grid=(N,),
        in_specs=[
            pl.BlockSpec((1, HW, Cin), lambda n: (n, 0, 0)),
            pl.BlockSpec((Cin, Sq), lambda n: (0, 0)),
            pl.BlockSpec((1, Sq), lambda n: (0, 0)),
            pl.BlockSpec((Sq, Etot), lambda n: (0, 0)),
            pl.BlockSpec((1, Etot), lambda n: (0, 0)),
            pl.BlockSpec((8, Sq, E3), lambda n: (0, 0, 0)),
        ],
        out_specs=pl.BlockSpec((1, HW, Etot), lambda n: (n, 0, 0)),
        scratch_shapes=[pltpu.VMEM((sp_rows, Sq), jnp.bfloat16)],
        compiler_params=pltpu.CompilerParams(
            dimension_semantics=("parallel",),
            vmem_limit_bytes=_vmem_limit_bytes()),
    )(x.reshape(N, HW, Cin), p["w_sq"], p["b_sq"], p["w_ce"], p["b_full"],
      p["w_e3"])
    return out.reshape(N, H, W, Etot)


def classifier_head(x, p, num_classes):
    """Conv2d(512, nc, 1) + ReLU + AdaptiveAvgPool2d(1) + flatten, fused.
    (Dropout(0.5) is identity at inference and therefore omitted.)"""
    N, H, W, C = x.shape
    HW = H * W
    ncp = p["w"].shape[1]                                         # nc padded to 128
    out = pl.pallas_call(
        _head_kernel,
        out_shape=jax.ShapeDtypeStruct((N, 1, ncp), jnp.float32),
        grid=(N,),
        in_specs=[
            pl.BlockSpec((1, HW, C), lambda n: (n, 0, 0)),
            pl.BlockSpec((C, ncp), lambda n: (0, 0)),
            pl.BlockSpec((1, ncp), lambda n: (0, 0)),
        ],
        out_specs=pl.BlockSpec((1, 1, ncp), lambda n: (n, 0, 0)),
        compiler_params=pltpu.CompilerParams(
            dimension_semantics=("parallel",),
            vmem_limit_bytes=_vmem_limit_bytes()),
    )(x.reshape(N, HW, C), p["w"], p["b"])
    return out[:, 0, :num_classes]


# ----------------------------------------------------------------------------
# SqueezeNet 1.1 parameters (randomly initialized, PyTorch-equivalent layout)
# ----------------------------------------------------------------------------
# (in_ch, squeeze, expand1x1, expand3x3) -- torchvision squeezenet1_1 features
FIRE_CFG = [
    (64, 16, 64, 64),
    (128, 16, 64, 64),
    (128, 32, 128, 128),
    (256, 32, 128, 128),
    (256, 48, 192, 192),
    (384, 48, 192, 192),
    (384, 64, 256, 256),
    (512, 64, 256, 256),
]


def _conv_init(key, kh, kw, cin, cout):
    wk, bk = jax.random.split(key)
    fan_in = kh * kw * cin
    w = jax.random.normal(wk, (kh, kw, cin, cout), jnp.float32) / jnp.sqrt(float(fan_in))
    b = 0.01 * jax.random.normal(bk, (cout,), jnp.float32)
    return w, b


def init_params(key, num_classes=10):
    keys = jax.random.split(key, 2 + 3 * len(FIRE_CFG))
    # conv1: (3,3,3,64) -> matmul matrix (27,64), K padded to 32, Cout to 128.
    w, b = _conv_init(keys[0], 3, 3, 3, 64)
    w = jnp.pad(w.reshape(27, 64), ((0, 5), (0, 64)))
    b = jnp.pad(b, (0, 64))
    params = {"conv1": {"w": w.astype(jnp.bfloat16), "b": b.reshape(1, -1)}}

    fire_params = []
    ki = 1
    for idx, (cin, sq, e1, e3) in enumerate(FIRE_CFG):
        wsq, bsq = _conv_init(keys[ki], 1, 1, cin, sq)
        we1, be1 = _conv_init(keys[ki + 1], 1, 1, sq, e1)
        we3, be3 = _conv_init(keys[ki + 2], 3, 3, sq, e3)
        ki += 3
        wsq = wsq.reshape(cin, sq)
        if idx == 0:  # conv1's Cout was lane-padded 64 -> 128: add zero rows
            wsq = jnp.pad(wsq, ((0, 128 - cin), (0, 0)))
        we3_taps = we3.reshape(9, sq, e3)                 # tap index = ky*3+kx
        # expand1x1 fused with the centre (ky=1,kx=1) tap of expand3x3
        w_ce = jnp.concatenate([we1.reshape(sq, e1), we3_taps[4]], axis=1)
        w_off = jnp.concatenate([we3_taps[:4], we3_taps[5:]], axis=0)  # 8 taps
        b_full = jnp.concatenate([be1, be3]).reshape(1, -1)
        fire_params.append({
            "w_sq": wsq.astype(jnp.bfloat16), "b_sq": bsq.reshape(1, -1),
            "w_ce": w_ce.astype(jnp.bfloat16), "b_full": b_full,
            "w_e3": w_off.astype(jnp.bfloat16),
        })
    params["fire"] = fire_params

    # classifier conv: (512, nc) -> lane-padded to (512, 128)
    wf, bf_ = _conv_init(keys[ki], 1, 1, 512, num_classes)
    ncp = _round_up(num_classes, 128)
    wf = jnp.pad(wf.reshape(512, num_classes), ((0, 0), (0, ncp - num_classes)))
    bf_ = jnp.pad(bf_, (0, ncp - num_classes))
    params["final"] = {"w": wf.astype(jnp.bfloat16), "b": bf_.reshape(1, -1)}
    return params


# ----------------------------------------------------------------------------
# Forward pass (matches torchvision squeezenet1_1 with a num_classes-wide head)
# ----------------------------------------------------------------------------
def squeezenet11_forward(x_nchw, params, *, num_classes=10):
    # NCHW (PyTorch) -> NHWC (kernel layout), bf16 on the MXU
    x = jnp.transpose(x_nchw, (0, 2, 3, 1)).astype(jnp.bfloat16)
    x = conv1_3x3_s2(x, params["conv1"])
    x = maxpool_3x3_s2_ceil(x)
    x = fire(x, params["fire"][0])
    x = fire(x, params["fire"][1])
    x = maxpool_3x3_s2_ceil(x)
    x = fire(x, params["fire"][2])
    x = fire(x, params["fire"][3])
    x = maxpool_3x3_s2_ceil(x)
    x = fire(x, params["fire"][4])
    x = fire(x, params["fire"][5])
    x = fire(x, params["fire"][6])
    x = fire(x, params["fire"][7])
    # classifier: Dropout is identity at inference; conv+ReLU+avgpool+flatten fused
    return classifier_head(x, params["final"], num_classes)


if __name__ == "__main__":
    key = jax.random.PRNGKey(0)
    pkey, xkey = jax.random.split(key)
    num_classes = 10
    params = init_params(pkey, num_classes=num_classes)
    # small spatial size that still survives the strided conv + 3 ceil-mode pools
    x = jax.random.normal(xkey, (2, 3, 48, 48), jnp.float32)

    fwd = jax.jit(functools.partial(squeezenet11_forward, num_classes=num_classes))
    out = jax.block_until_ready(fwd(x, params))

    assert out.shape == (2, num_classes), out.shape
    assert bool(jnp.all(jnp.isfinite(out)))
    print("KERNEL_OK")
</pallas_src>

<mosaic_0001>
module attributes {stable_mosaic.version = 11 : i64} {
  func.func @_mm_bias_relu_kernel(%arg0: i32, %arg1: memref<368x32xbf16, #tpu.memory_space<vmem>>, %arg2: memref<32x128xbf16, #tpu.memory_space<vmem>>, %arg3: memref<1x128xf32, #tpu.memory_space<vmem>>, %arg4: memref<368x128xbf16, #tpu.memory_space<vmem>>) attributes {dimension_semantics = [#tpu.dimension_semantics<parallel>], iteration_bounds = array<i64: 3>, scalar_prefetch = 0 : i64, scratch_operands = 0 : i64, tpu.core_type = #tpu.core_type<tc>, window_params = [{transform_indices = @transform_0, window_bounds = array<i64: 368, 32>}, {pipeline_mode = #tpu.pipeline_mode<synchronous>, transform_indices = @transform_1, window_bounds = array<i64: 32, 128>}, {pipeline_mode = #tpu.pipeline_mode<synchronous>, transform_indices = @transform_2, window_bounds = array<i64: 1, 128>}, {transform_indices = @transform_3, window_bounds = array<i64: 368, 128>}]} {
    %c0 = arith.constant 0 : index
    %c0_0 = arith.constant 0 : index
    %0 = vector.load %arg1[%c0, %c0_0] : memref<368x32xbf16, #tpu.memory_space<vmem>>, vector<368x32xbf16>
    %c0_1 = arith.constant 0 : index
    %c0_2 = arith.constant 0 : index
    %1 = vector.load %arg2[%c0_1, %c0_2] : memref<32x128xbf16, #tpu.memory_space<vmem>>, vector<32x128xbf16>
    %cst = arith.constant dense<0.000000e+00> : vector<368x128xf32>
    %2 = tpu.matmul %0, %1, %cst {dimension_numbers = #tpu.dot_dimension_numbers<[1], [0], [0], [1], [0, 0, 1, 1], [], []>} : vector<368x32xbf16>, vector<32x128xbf16>, vector<368x128xf32> -> vector<368x128xf32>
    %c0_3 = arith.constant 0 : index
    %c0_4 = arith.constant 0 : index
    %3 = vector.load %arg3[%c0_3, %c0_4] : memref<1x128xf32, #tpu.memory_space<vmem>>, vector<1x128xf32>
    %4 = vector.broadcast %3 : vector<1x128xf32> to vector<368x128xf32>
    %5 = arith.addf %2, %4 : vector<368x128xf32>
    %cst_5 = arith.constant 0.000000e+00 : f32
    %6 = vector.broadcast %cst_5 : f32 to vector<368x128xf32>
    %7 = arith.maximumf %5, %6 : vector<368x128xf32>
    %8 = arith.truncf %7 : vector<368x128xf32> to vector<368x128xbf16>
    %c0_6 = arith.constant 0 : index
    %c0_7 = arith.constant 0 : index
    %9 = vector.load %arg4[%c0_6, %c0_7] : memref<368x128xbf16, #tpu.memory_space<vmem>>, vector<368x128xbf16>
    tpu.vector_store %arg4[%c0_6, %c0_7], %8 {strides = array<i32>} : memref<368x128xbf16, #tpu.memory_space<vmem>>, vector<368x128xbf16>,
    return
  }
  func.func @transform_0(%arg0: i32) -> (i32, i32) {
    %c0_i32 = arith.constant 0 : i32
    %c0_i32_0 = arith.constant 0 : i32
    return %arg0, %c0_i32 : i32, i32
  }
  func.func @transform_1(%arg0: i32) -> (i32, i32) {
    %c0_i32 = arith.constant 0 : i32
    %c0_i32_0 = arith.constant 0 : i32
    %c0_i32_1 = arith.constant 0 : i32
    return %c0_i32, %c0_i32_0 : i32, i32
  }
  func.func @transform_2(%arg0: i32) -> (i32, i32) {
    %c0_i32 = arith.constant 0 : i32
    %c0_i32_0 = arith.constant 0 : i32
    %c0_i32_1 = arith.constant 0 : i32
    return %c0_i32, %c0_i32_0 : i32, i32
  }
  func.func @transform_3(%arg0: i32) -> (i32, i32) {
    %c0_i32 = arith.constant 0 : i32
    %c0_i32_0 = arith.constant 0 : i32
    return %arg0, %c0_i32 : i32, i32
  }
}

module attributes {stable_mosaic.version = 11 : i64} {
  func.func @_fire_kernel(%arg0: i32, %arg1: memref<1x121x128xbf16, #tpu.memory_space<vmem>>, %arg2: memref<128x16xbf16, #tpu.memory_space<vmem>>, %arg3: memref<1x16xf32, #tpu.memory_space<vmem>>, %arg4: memref<16x128xbf16, #tpu.memory_space<vmem>>, %arg5: memref<1x128xf32, #tpu.memory_space<vmem>>, %arg6: memref<8x16x64xbf16, #tpu.memory_space<vmem>>, %arg7: memref<1x121x128xbf16, #tpu.memory_space<vmem>>, %arg8: memref<160x16xbf16, #tpu.memory_space<vmem>>) attributes {dimension_semantics = [#tpu.dimension_semantics<parallel>], iteration_bounds = array<i64: 2>, scalar_prefetch = 0 : i64, scratch_operands = 1 : i64, tpu.core_type = #tpu.core_type<tc>, window_params = [{transform_indices = @transform_0, window_bounds = array<i64: 1, 121, 128>}, {pipeline_mode = #tpu.pipeline_mode<synchronous>, transform_indices = @transform_1, window_bounds = array<i64: 128, 16>}, {pipeline_mode = #tpu.pipeline_mode<synchronous>, transform_indices = @transform_2, window_bounds = array<i64: 1, 16>}, {pipeline_mode = #tpu.pipeline_mode<synchronous>, transform_indices = @transform_3, window_bounds = array<i64: 16, 128>}, {pipeline_mode = #tpu.pipeline_mode<synchronous>, transform_indices = @transform_4, window_bounds = array<i64: 1, 128>}, {pipeline_mode = #tpu.pipeline_mode<synchronous>, transform_indices = @transform_5, window_bounds = array<i64: 8, 16, 64>}, {transform_indices = @transform_6, window_bounds = array<i64: 1, 121, 128>}]} {
    %cst = arith.constant 0.000000e+00 : bf16
    %0 = vector.broadcast %cst : bf16 to vector<16x16xbf16>
    %c0 = arith.constant 0 : index
    %c0_0 = arith.constant 0 : index
    %1 = vector.load %arg8[%c0, %c0_0] : memref<160x16xbf16, #tpu.memory_space<vmem>>, vector<16x16xbf16>
    tpu.vector_store %arg8[%c0, %c0_0], %0 {strides = array<i32>} : memref<160x16xbf16, #tpu.memory_space<vmem>>, vector<16x16xbf16>,
    %cst_1 = arith.constant 0.000000e+00 : bf16
    %2 = vector.broadcast %cst_1 : bf16 to vector<23x16xbf16>
    %c137 = arith.constant 137 : index
    %c0_2 = arith.constant 0 : index
    %3 = vector.load %arg8[%c137, %c0_2] : memref<160x16xbf16, #tpu.memory_space<vmem>>, vector<23x16xbf16>
    tpu.vector_store %arg8[%c137, %c0_2], %2 {strides = array<i32>} : memref<160x16xbf16, #tpu.memory_space<vmem>>, vector<23x16xbf16>,
    %c0_3 = arith.constant 0 : index
    %c0_4 = arith.constant 0 : index
    %c0_5 = arith.constant 0 : index
    %4 = vector.load %arg1[%c0_3, %c0_4, %c0_5] : memref<1x121x128xbf16, #tpu.memory_space<vmem>>, vector<1x121x128xbf16>
    %5 = vector.shape_cast %4 : vector<1x121x128xbf16> to vector<121x128xbf16>
    %c0_6 = arith.constant 0 : index
    %c0_7 = arith.constant 0 : index
    %6 = vector.load %arg2[%c0_6, %c0_7] : memref<128x16xbf16, #tpu.memory_space<vmem>>, vector<128x16xbf16>
    %cst_8 = arith.constant dense<0.000000e+00> : vector<121x16xf32>
    %7 = tpu.matmul %5, %6, %cst_8 {dimension_numbers = #tpu.dot_dimension_numbers<[1], [0], [0], [1], [0, 0, 1, 1], [], []>} : vector<121x128xbf16>, vector<128x16xbf16>, vector<121x16xf32> -> vector<121x16xf32>
    %c0_9 = arith.constant 0 : index
    %c0_10 = arith.constant 0 : index
    %8 = vector.load %arg3[%c0_9, %c0_10] : memref<1x16xf32, #tpu.memory_space<vmem>>, vector<1x16xf32>
    %9 = vector.broadcast %8 : vector<1x16xf32> to vector<121x16xf32>
    %10 = arith.addf %7, %9 : vector<121x16xf32>
    %cst_11 = arith.constant 0.000000e+00 : f32
    %11 = vector.broadcast %cst_11 : f32 to vector<121x16xf32>
    %12 = arith.maximumf %10, %11 : vector<121x16xf32>
    %13 = arith.truncf %12 : vector<121x16xf32> to vector<121x16xbf16>
    %c16 = arith.constant 16 : index
    %c0_12 = arith.constant 0 : index
    %14 = vector.load %arg8[%c16, %c0_12] : memref<160x16xbf16, #tpu.memory_space<vmem>>, vector<121x16xbf16>
    tpu.vector_store %arg8[%c16, %c0_12], %13 {strides = array<i32>} : memref<160x16xbf16, #tpu.memory_space<vmem>>, vector<121x16xbf16>,
    %15 = tpu.iota {dimensions = array<i32: 0>} : vector<121x1xi32>
    %c0_i32 = arith.constant 0 : i32
    %16 = vector.broadcast %c0_i32 : i32 to vector<121x1xi32>
    %17 = arith.addi %15, %16 : vector<121x1xi32>
    %c11_i32 = arith.constant 11 : i32
    %c0_i32_13 = arith.constant 0 : i32
    %18 = arith.cmpi eq, %c11_i32, %c0_i32_13 : i32
    %c1_i32 = arith.constant 1 : i32
    %19 = arith.select %18, %c1_i32, %c11_i32 : i32
    %20 = vector.broadcast %19 : i32 to vector<121x1xi32>
    %21 = arith.remsi %17, %20 : vector<121x1xi32>
    %c0_i32_14 = arith.constant 0 : i32
    %22 = vector.broadcast %c0_i32_14 : i32 to vector<121x1xi32>
    %23 = arith.cmpi ne, %21, %22 : vector<121x1xi32>
    %c0_i32_15 = arith.constant 0 : i32
    %24 = vector.broadcast %c0_i32_15 : i32 to vector<121x1xi32>
    %25 = arith.cmpi slt, %21, %24 : vector<121x1xi32>
    %c0_i32_16 = arith.constant 0 : i32
    %26 = arith.cmpi slt, %19, %c0_i32_16 : i32
    %27 = vector.broadcast %26 : i1 to vector<121x1xi1>
    %28 = vector.broadcast %27 : vector<121x1xi1> to vector<121x1xi1>
    %29 = arith.xori %25, %28 : vector<121x1xi1>
    %30 = arith.andi %29, %23 : vector<121x1xi1>
    %31 = vector.broadcast %19 : i32 to vector<121x1xi32>
    %32 = arith.addi %21, %31 : vector<121x1xi32>
    %33 = arith.select %30, %32, %21 : vector<121x1xi1>, vector<121x1xi32>
    %c0_i32_17 = arith.constant 0 : i32
    %34 = vector.broadcast %c0_i32_17 : i32 to vector<121x1xi32>
    %35 = arith.cmpi ne, %33, %34 : vector<121x1xi32>
    %c10_i32 = arith.constant 10 : i32
    %36 = vector.broadcast %c10_i32 : i32 to vector<121x1xi32>
    %37 = arith.cmpi ne, %33, %36 : vector<121x1xi32>
    %c16_18 = arith.constant 16 : index
    %c0_19 = arith.constant 0 : index
    %38 = vector.load %arg8[%c16_18, %c0_19] : memref<160x16xbf16, #tpu.memory_space<vmem>>, vector<121x16xbf16>
    %c0_20 = arith.constant 0 : index
    %c0_21 = arith.constant 0 : index
    %39 = vector.load %arg4[%c0_20, %c0_21] : memref<16x128xbf16, #tpu.memory_space<vmem>>, vector<16x128xbf16>
    %cst_22 = arith.constant dense<0.000000e+00> : vector<121x128xf32>
    %40 = tpu.matmul %38, %39, %cst_22 {dimension_numbers = #tpu.dot_dimension_numbers<[1], [0], [0], [1], [0, 0, 1, 1], [], []>} : vector<121x16xbf16>, vector<16x128xbf16>, vector<121x128xf32> -> vector<121x128xf32>
    %cst_23 = arith.constant 0.000000e+00 : f32
    %41 = vector.broadcast %cst_23 : f32 to vector<121x64xf32>
    %c4 = arith.constant 4 : index
    %c0_24 = arith.constant 0 : index
    %42 = vector.load %arg8[%c4, %c0_24] : memref<160x16xbf16, #tpu.memory_space<vmem>>, vector<121x16xbf16>
    %cst_25 = arith.constant 0.000000e+00 : bf16
    %43 = vector.broadcast %cst_25 : bf16 to vector<121x16xbf16>
    %44 = vector.shape_cast %35 : vector<121x1xi1> to vector<121x1xi1>
    %45 = vector.broadcast %44 : vector<121x1xi1> to vector<121x16xi1>
    %46 = arith.select %45, %42, %43 : vector<121x16xi1>, vector<121x16xbf16>
    %c0_26 = arith.constant 0 : index
    %c0_27 = arith.constant 0 : index
    %c0_28 = arith.constant 0 : index
    %47 = vector.load %arg6[%c0_26, %c0_27, %c0_28] : memref<8x16x64xbf16, #tpu.memory_space<vmem>>, vector<1x16x64xbf16>
    %48 = vector.shape_cast %47 : vector<1x16x64xbf16> to vector<16x64xbf16>
    %cst_29 = arith.constant dense<0.000000e+00> : vector<121x64xf32>
    %49 = tpu.matmul %46, %48, %cst_29 {dimension_numbers = #tpu.dot_dimension_numbers<[1], [0], [0], [1], [0, 0, 1, 1], [], []>} : vector<121x16xbf16>, vector<16x64xbf16>, vector<121x64xf32> -> vector<121x64xf32>
    %50 = arith.addf %41, %49 : vector<121x64xf32>
    %c5 = arith.constant 5 : index
    %c0_30 = arith.constant 0 : index
    %51 = vector.load %arg8[%c5, %c0_30] : memref<160x16xbf16, #tpu.memory_space<vmem>>, vector<121x16xbf16>
    %c1 = arith.constant 1 : index
    %c0_31 = arith.constant 0 : index
    %c0_32 = arith.constant 0 : index
    %52 = vector.load %arg6[%c1, %c0_31, %c0_32] : memref<8x16x64xbf16, #tpu.memory_space<vmem>>, vector<1x16x64xbf16>
    %53 = vector.shape_cast %52 : vector<1x16x64xbf16> to vector<16x64xbf16>
    %cst_33 = arith.constant dense<0.000000e+00> : vector<121x64xf32>
    %54 = tpu.matmul %51, %53, %cst_33 {dimension_numbers = #tpu.dot_dimension_numbers<[1], [0], [0], [1], [0, 0, 1, 1], [], []>} : vector<121x16xbf16>, vector<16x64xbf16>, vector<121x64xf32> -> vector<121x64xf32>
    %55 = arith.addf %50, %54 : vector<121x64xf32>
    %c6 = arith.constant 6 : index
    %c0_34 = arith.constant 0 : index
    %56 = vector.load %arg8[%c6, %c0_34] : memref<160x16xbf16, #tpu.memory_space<vmem>>, vector<121x16xbf16>
    %cst_35 = arith.constant 0.000000e+00 : bf16
    %57 = vector.broadcast %cst_35 : bf16 to vector<121x16xbf16>
    %58 = vector.shape_cast %37 : vector<121x1xi1> to vector<121x1xi1>
    %59 = vector.broadcast %58 : vector<121x1xi1> to vector<121x16xi1>
    %60 = arith.select %59, %56, %57 : vector<121x16xi1>, vector<121x16xbf16>
    %c2 = arith.constant 2 : index
    %c0_36 = arith.constant 0 : index
    %c0_37 = arith.constant 0 : index
    %61 = vector.load %arg6[%c2, %c0_36, %c0_37] : memref<8x16x64xbf16, #tpu.memory_space<vmem>>, vector<1x16x64xbf16>
    %62 = vector.shape_cast %61 : vector<1x16x64xbf16> to vector<16x64xbf16>
    %cst_38 = arith.constant dense<0.000000e+00> : vector<121x64xf32>
    %63 = tpu.matmul %60, %62, %cst_38 {dimension_numbers = #tpu.dot_dimension_numbers<[1], [0], [0], [1], [0, 0, 1, 1], [], []>} : vector<121x16xbf16>, vector<16x64xbf16>, vector<121x64xf32> -> vector<121x64xf32>
    %64 = arith.addf %55, %63 : vector<121x64xf32>
    %c15 = arith.constant 15 : index
    %c0_39 = arith.constant 0 : index
    %65 = vector.load %arg8[%c15, %c0_39] : memref<160x16xbf16, #tpu.memory_space<vmem>>, vector<121x16xbf16>
    %cst_40 = arith.constant 0.000000e+00 : bf16
    %66 = vector.broadcast %cst_40 : bf16 to vector<121x16xbf16>
    %67 = vector.shape_cast %35 : vector<121x1xi1> to vector<121x1xi1>
    %68 = vector.broadcast %67 : vector<121x1xi1> to vector<121x16xi1>
    %69 = arith.select %68, %65, %66 : vector<121x16xi1>, vector<121x16xbf16>
    %c3 = arith.constant 3 : index
    %c0_41 = arith.constant 0 : index
    %c0_42 = arith.constant 0 : index
    %70 = vector.load %arg6[%c3, %c0_41, %c0_42] : memref<8x16x64xbf16, #tpu.memory_space<vmem>>, vector<1x16x64xbf16>
    %71 = vector.shape_cast %70 : vector<1x16x64xbf16> to vector<16x64xbf16>
    %cst_43 = arith.constant dense<0.000000e+00> : vector<121x64xf32>
    %72 = tpu.matmul %69, %71, %cst_43 {dimension_numbers = #tpu.dot_dimension_numbers<[1], [0], [0], [1], [0, 0, 1, 1], [], []>} : vector<121x16xbf16>, vector<16x64xbf16>, vector<121x64xf32> -> vector<121x64xf32>
    %73 = arith.addf %64, %72 : vector<121x64xf32>
    %c17 = arith.constant 17 : index
    %c0_44 = arith.constant 0 : index
    %74 = vector.load %arg8[%c17, %c0_44] : memref<160x16xbf16, #tpu.memory_space<vmem>>, vector<121x16xbf16>
    %cst_45 = arith.constant 0.000000e+00 : bf16
    %75 = vector.broadcast %cst_45 : bf16 to vector<121x16xbf16>
    %76 = vector.shape_cast %37 : vector<121x1xi1> to vector<121x1xi1>
    %77 = vector.broadcast %76 : vector<121x1xi1> to vector<121x16xi1>
    %78 = arith.select %77, %74, %75 : vector<121x16xi1>, vector<121x16xbf16>
    %c4_46 = arith.constant 4 : index
    %c0_47 = arith.constant 0 : index
    %c0_48 = arith.constant 0 : index
    %79 = vector.load %arg6[%c4_46, %c0_47, %c0_48] : memref<8x16x64xbf16, #tpu.memory_space<vmem>>, vector<1x16x64xbf16>
    %80 = vector.shape_cast %79 : vector<1x16x64xbf16> to vector<16x64xbf16>
    %cst_49 = arith.constant dense<0.000000e+00> : vector<121x64xf32>
    %81 = tpu.matmul %78, %80, %cst_49 {dimension_numbers = #tpu.dot_dimension_numbers<[1], [0], [0], [1], [0, 0, 1, 1], [], []>} : vector<121x16xbf16>, vector<16x64xbf16>, vector<121x64xf32> -> vector<121x64xf32>
    %82 = arith.addf %73, %81 : vector<121x64xf32>
    %c26 = arith.constant 26 : index
    %c0_50 = arith.constant 0 : index
    %83 = vector.load %arg8[%c26, %c0_50] : memref<160x16xbf16, #tpu.memory_space<vmem>>, vector<121x16xbf16>
    %cst_51 = arith.constant 0.000000e+00 : bf16
    %84 = vector.broadcast %cst_51 : bf16 to vector<121x16xbf16>
    %85 = vector.shape_cast %35 : vector<121x1xi1> to vector<121x1xi1>
    %86 = vector.broadcast %85 : vector<121x1xi1> to vector<121x16xi1>
    %87 = arith.select %86, %83, %84 : vector<121x16xi1>, vector<121x16xbf16>
    %c5_52 = arith.constant 5 : index
    %c0_53 = arith.constant 0 : index
    %c0_54 = arith.constant 0 : index
    %88 = vector.load %arg6[%c5_52, %c0_53, %c0_54] : memref<8x16x64xbf16, #tpu.memory_space<vmem>>, vector<1x16x64xbf16>
    %89 = vector.shape_cast %88 : vector<1x16x64xbf16> to vector<16x64xbf16>
    %cst_55 = arith.constant dense<0.000000e+00> : vector<121x64xf32>
    %90 = tpu.matmul %87, %89, %cst_55 {dimension_numbers = #tpu.dot_dimension_numbers<[1], [0], [0], [1], [0, 0, 1, 1], [], []>} : vector<121x16xbf16>, vector<16x64xbf16>, vector<121x64xf32> -> vector<121x64xf32>
    %91 = arith.addf %82, %90 : vector<121x64xf32>
    %c27 = arith.constant 27 : index
    %c0_56 = arith.constant 0 : index
    %92 = vector.load %arg8[%c27, %c0_56] : memref<160x16xbf16, #tpu.memory_space<vmem>>, vector<121x16xbf16>
    %c6_57 = arith.constant 6 : index
    %c0_58 = arith.constant 0 : index
    %c0_59 = arith.constant 0 : index
    %93 = vector.load %arg6[%c6_57, %c0_58, %c0_59] : memref<8x16x64xbf16, #tpu.memory_space<vmem>>, vector<1x16x64xbf16>
    %94 = vector.shape_cast %93 : vector<1x16x64xbf16> to vector<16x64xbf16>
    %cst_60 = arith.constant dense<0.000000e+00> : vector<121x64xf32>
    %95 = tpu.matmul %92, %94, %cst_60 {dimension_numbers = #tpu.dot_dimension_numbers<[1], [0], [0], [1], [0, 0, 1, 1], [], []>} : vector<121x16xbf16>, vector<16x64xbf16>, vector<121x64xf32> -> vector<121x64xf32>
    %96 = arith.addf %91, %95 : vector<121x64xf32>
    %c28 = arith.constant 28 : index
    %c0_61 = arith.constant 0 : index
    %97 = vector.load %arg8[%c28, %c0_61] : memref<160x16xbf16, #tpu.memory_space<vmem>>, vector<121x16xbf16>
    %cst_62 = arith.constant 0.000000e+00 : bf16
    %98 = vector.broadcast %cst_62 : bf16 to vector<121x16xbf16>
    %99 = vector.shape_cast %37 : vector<121x1xi1> to vector<121x1xi1>
    %100 = vector.broadcast %99 : vector<121x1xi1> to vector<121x16xi1>
    %101 = arith.select %100, %97, %98 : vector<121x16xi1>, vector<121x16xbf16>
    %c7 = arith.constant 7 : index
    %c0_63 = arith.constant 0 : index
    %c0_64 = arith.constant 0 : index
    %102 = vector.load %arg6[%c7, %c0_63, %c0_64] : memref<8x16x64xbf16, #tpu.memory_space<vmem>>, vector<1x16x64xbf16>
    %103 = vector.shape_cast %102 : vector<1x16x64xbf16> to vector<16x64xbf16>
    %cst_65 = arith.constant dense<0.000000e+00> : vector<121x64xf32>
    %104 = tpu.matmul %101, %103, %cst_65 {dimension_numbers = #tpu.dot_dimension_numbers<[1], [0], [0], [1], [0, 0, 1, 1], [], []>} : vector<121x16xbf16>, vector<16x64xbf16>, vector<121x64xf32> -> vector<121x64xf32>
    %105 = arith.addf %96, %104 : vector<121x64xf32>
    %cst_66 = arith.constant 0.000000e+00 : f32
    %106 = vector.broadcast %cst_66 : f32 to vector<121x64xf32>
    %107 = tpu.concatenate %106, %105 in 1 : vector<121x64xf32>, vector<121x64xf32> -> vector<121x128xf32>
    %108 = arith.addf %40, %107 : vector<121x128xf32>
    %c0_67 = arith.constant 0 : index
    %c0_68 = arith.constant 0 : index
    %109 = vector.load %arg5[%c0_67, %c0_68] : memref<1x128xf32, #tpu.memory_space<vmem>>, vector<1x128xf32>
    %110 = vector.broadcast %109 : vector<1x128xf32> to vector<121x128xf32>
    %111 = arith.addf %108, %110 : vector<121x128xf32>
    %cst_69 = arith.constant 0.000000e+00 : f32
    %112 = vector.broadcast %cst_69 : f32 to vector<121x128xf32>
    %113 = arith.maximumf %111, %112 : vector<121x128xf32>
    %114 = arith.truncf %113 : vector<121x128xf32> to vector<121x128xbf16>
    %c0_70 = arith.constant 0 : index
    %c0_71 = arith.constant 0 : index
    %c0_72 = arith.constant 0 : index
    %115 = vector.load %arg7[%c0_70, %c0_71, %c0_72] : memref<1x121x128xbf16, #tpu.memory_space<vmem>>, vector<1x121x128xbf16>
    %116 = vector.shape_cast %115 : vector<1x121x128xbf16> to vector<121x128xbf16>
    %117 = vector.shape_cast %114 : vector<121x128xbf16> to vector<1x121x128xbf16>
    tpu.vector_store %arg7[%c0_70, %c0_71, %c0_72], %117 {strides = array<i32>} : memref<1x121x128xbf16, #tpu.memory_space<vmem>>, vector<1x121x128xbf16>,
    return
  }
  func.func @transform_0(%arg0: i32) -> (i32, i32, i32) {
    %c0_i32 = arith.constant 0 : i32
    %c0_i32_0 = arith.constant 0 : i32
    %c0_i32_1 = arith.constant 0 : i32
    return %arg0, %c0_i32, %c0_i32_0 : i32, i32, i32
  }
  func.func @transform_1(%arg0: i32) -> (i32, i32) {
    %c0_i32 = arith.constant 0 : i32
    %c0_i32_0 = arith.constant 0 : i32
    %c0_i32_1 = arith.constant 0 : i32
    return %c0_i32, %c0_i32_0 : i32, i32
  }
  func.func @transform_2(%arg0: i32) -> (i32, i32) {
    %c0_i32 = arith.constant 0 : i32
    %c0_i32_0 = arith.constant 0 : i32
    %c0_i32_1 = arith.constant 0 : i32
    return %c0_i32, %c0_i32_0 : i32, i32
  }
  func.func @transform_3(%arg0: i32) -> (i32, i32) {
    %c0_i32 = arith.constant 0 : i32
    %c0_i32_0 = arith.constant 0 : i32
    %c0_i32_1 = arith.constant 0 : i32
    return %c0_i32, %c0_i32_0 : i32, i32
  }
  func.func @transform_4(%arg0: i32) -> (i32, i32) {
    %c0_i32 = arith.constant 0 : i32
    %c0_i32_0 = arith.constant 0 : i32
    %c0_i32_1 = arith.constant 0 : i32
    return %c0_i32, %c0_i32_0 : i32, i32
  }
  func.func @transform_5(%arg0: i32) -> (i32, i32, i32) {
    %c0_i32 = arith.constant 0 : i32
    %c0_i32_0 = arith.constant 0 : i32
    %c0_i32_1 = arith.constant 0 : i32
    %c0_i32_2 = arith.constant 0 : i32
    return %c0_i32, %c0_i32_0, %c0_i32_1 : i32, i32, i32
  }
  func.func @transform_6(%arg0: i32) -> (i32, i32, i32) {
    %c0_i32 = arith.constant 0 : i32
    %c0_i32_0 = arith.constant 0 : i32
    %c0_i32_1 = arith.constant 0 : i32
    return %arg0, %c0_i32, %c0_i32_0 : i32, i32, i32
  }
}

module attributes {stable_mosaic.version = 11 : i64} {
  func.func @_fire_kernel(%arg0: i32, %arg1: memref<1x25x128xbf16, #tpu.memory_space<vmem>>, %arg2: memref<128x32xbf16, #tpu.memory_space<vmem>>, %arg3: memref<1x32xf32, #tpu.memory_space<vmem>>, %arg4: memref<32x256xbf16, #tpu.memory_space<vmem>>, %arg5: memref<1x256xf32, #tpu.memory_space<vmem>>, %arg6: memref<8x32x128xbf16, #tpu.memory_space<vmem>>, %arg7: memref<1x25x256xbf16, #tpu.memory_space<vmem>>, %arg8: memref<48x32xbf16, #tpu.memory_space<vmem>>) attributes {dimension_semantics = [#tpu.dimension_semantics<parallel>], iteration_bounds = array<i64: 2>, scalar_prefetch = 0 : i64, scratch_operands = 1 : i64, tpu.core_type = #tpu.core_type<tc>, window_params = [{transform_indices = @transform_0, window_bounds = array<i64: 1, 25, 128>}, {pipeline_mode = #tpu.pipeline_mode<synchronous>, transform_indices = @transform_1, window_bounds = array<i64: 128, 32>}, {pipeline_mode = #tpu.pipeline_mode<synchronous>, transform_indices = @transform_2, window_bounds = array<i64: 1, 32>}, {pipeline_mode = #tpu.pipeline_mode<synchronous>, transform_indices = @transform_3, window_bounds = array<i64: 32, 256>}, {pipeline_mode = #tpu.pipeline_mode<synchronous>, transform_indices = @transform_4, window_bounds = array<i64: 1, 256>}, {pipeline_mode = #tpu.pipeline_mode<synchronous>, transform_indices = @transform_5, window_bounds = array<i64: 8, 32, 128>}, {transform_indices = @transform_6, window_bounds = array<i64: 1, 25, 256>}]} {
    %cst = arith.constant 0.000000e+00 : bf16
    %0 = vector.broadcast %cst : bf16 to vector<16x32xbf16>
    %c0 = arith.constant 0 : index
    %c0_0 = arith.constant 0 : index
    %1 = vector.load %arg8[%c0, %c0_0] : memref<48x32xbf16, #tpu.memory_space<vmem>>, vector<16x32xbf16>
    tpu.vector_store %arg8[%c0, %c0_0], %0 {strides = array<i32>} : memref<48x32xbf16, #tpu.memory_space<vmem>>, vector<16x32xbf16>,
    %cst_1 = arith.constant 0.000000e+00 : bf16
    %2 = vector.broadcast %cst_1 : bf16 to vector<7x32xbf16>
    %c41 = arith.constant 41 : index
    %c0_2 = arith.constant 0 : index
    %3 = vector.load %arg8[%c41, %c0_2] : memref<48x32xbf16, #tpu.memory_space<vmem>>, vector<7x32xbf16>
    tpu.vector_store %arg8[%c41, %c0_2], %2 {strides = array<i32>} : memref<48x32xbf16, #tpu.memory_space<vmem>>, vector<7x32xbf16>,
    %c0_3 = arith.constant 0 : index
    %c0_4 = arith.constant 0 : index
    %c0_5 = arith.constant 0 : index
    %4 = vector.load %arg1[%c0_3, %c0_4, %c0_5] : memref<1x25x128xbf16, #tpu.memory_space<vmem>>, vector<1x25x128xbf16>
    %5 = vector.shape_cast %4 : vector<1x25x128xbf16> to vector<25x128xbf16>
    %c0_6 = arith.constant 0 : index
    %c0_7 = arith.constant 0 : index
    %6 = vector.load %arg2[%c0_6, %c0_7] : memref<128x32xbf16, #tpu.memory_space<vmem>>, vector<128x32xbf16>
    %cst_8 = arith.constant dense<0.000000e+00> : vector<25x32xf32>
    %7 = tpu.matmul %5, %6, %cst_8 {dimension_numbers = #tpu.dot_dimension_numbers<[1], [0], [0], [1], [0, 0, 1, 1], [], []>} : vector<25x128xbf16>, vector<128x32xbf16>, vector<25x32xf32> -> vector<25x32xf32>
    %c0_9 = arith.constant 0 : index
    %c0_10 = arith.constant 0 : index
    %8 = vector.load %arg3[%c0_9, %c0_10] : memref<1x32xf32, #tpu.memory_space<vmem>>, vector<1x32xf32>
    %9 = vector.broadcast %8 : vector<1x32xf32> to vector<25x32xf32>
    %10 = arith.addf %7, %9 : vector<25x32xf32>
    %cst_11 = arith.constant 0.000000e+00 : f32
    %11 = vector.broadcast %cst_11 : f32 to vector<25x32xf32>
    %12 = arith.maximumf %10, %11 : vector<25x32xf32>
    %13 = arith.truncf %12 : vector<25x32xf32> to vector<25x32xbf16>
    %c16 = arith.constant 16 : index
    %c0_12 = arith.constant 0 : index
    %14 = vector.load %arg8[%c16, %c0_12] : memref<48x32xbf16, #tpu.memory_space<vmem>>, vector<25x32xbf16>
    tpu.vector_store %arg8[%c16, %c0_12], %13 {strides = array<i32>} : memref<48x32xbf16, #tpu.memory_space<vmem>>, vector<25x32xbf16>,
    %15 = tpu.iota {dimensions = array<i32: 0>} : vector<25x1xi32>
    %c0_i32 = arith.constant 0 : i32
    %16 = vector.broadcast %c0_i32 : i32 to vector<25x1xi32>
    %17 = arith.addi %15, %16 : vector<25x1xi32>
    %c5_i32 = arith.constant 5 : i32
    %c0_i32_13 = arith.constant 0 : i32
    %18 = arith.cmpi eq, %c5_i32, %c0_i32_13 : i32
    %c1_i32 = arith.constant 1 : i32
    %19 = arith.select %18, %c1_i32, %c5_i32 : i32
    %20 = vector.broadcast %19 : i32 to vector<25x1xi32>
    %21 = arith.remsi %17, %20 : vector<25x1xi32>
    %c0_i32_14 = arith.constant 0 : i32
    %22 = vector.broadcast %c0_i32_14 : i32 to vector<25x1xi32>
    %23 = arith.cmpi ne, %21, %22 : vector<25x1xi32>
    %c0_i32_15 = arith.constant 0 : i32
    %24 = vector.broadcast %c0_i32_15 : i32 to vector<25x1xi32>
    %25 = arith.cmpi slt, %21, %24 : vector<25x1xi32>
    %c0_i32_16 = arith.constant 0 : i32
    %26 = arith.cmpi slt, %19, %c0_i32_16 : i32
    %27 = vector.broadcast %26 : i1 to vector<25x1xi1>
    %28 = vector.broadcast %27 : vector<25x1xi1> to vector<25x1xi1>
    %29 = arith.xori %25, %28 : vector<25x1xi1>
    %30 = arith.andi %29, %23 : vector<25x1xi1>
    %31 = vector.broadcast %19 : i32 to vector<25x1xi32>
    %32 = arith.addi %21, %31 : vector<25x1xi32>
    %33 = arith.select %30, %32, %21 : vector<25x1xi1>, vector<25x1xi32>
    %c0_i32_17 = arith.constant 0 : i32
    %34 = vector.broadcast %c0_i32_17 : i32 to vector<25x1xi32>
    %35 = arith.cmpi ne, %33, %34 : vector<25x1xi32>
    %c4_i32 = arith.constant 4 : i32
    %36 = vector.broadcast %c4_i32 : i32 to vector<25x1xi32>
    %37 = arith.cmpi ne, %33, %36 : vector<25x1xi32>
    %c16_18 = arith.constant 16 : index
    %c0_19 = arith.constant 0 : index
    %38 = vector.load %arg8[%c16_18, %c0_19] : memref<48x32xbf16, #tpu.memory_space<vmem>>, vector<25x32xbf16>
    %c0_20 = arith.constant 0 : index
    %c0_21 = arith.constant 0 : index
    %39 = vector.load %arg4[%c0_20, %c0_21] : memref<32x256xbf16, #tpu.memory_space<vmem>>, vector<32x256xbf16>
    %cst_22 = arith.constant dense<0.000000e+00> : vector<25x256xf32>
    %40 = tpu.matmul %38, %39, %cst_22 {dimension_numbers = #tpu.dot_dimension_numbers<[1], [0], [0], [1], [0, 0, 1, 1], [], []>} : vector<25x32xbf16>, vector<32x256xbf16>, vector<25x256xf32> -> vector<25x256xf32>
    %cst_23 = arith.constant 0.000000e+00 : f32
    %41 = vector.broadcast %cst_23 : f32 to vector<25x128xf32>
    %c10 = arith.constant 10 : index
    %c0_24 = arith.constant 0 : index
    %42 = vector.load %arg8[%c10, %c0_24] : memref<48x32xbf16, #tpu.memory_space<vmem>>, vector<25x32xbf16>
    %cst_25 = arith.constant 0.000000e+00 : bf16
    %43 = vector.broadcast %cst_25 : bf16 to vector<25x32xbf16>
    %44 = vector.shape_cast %35 : vector<25x1xi1> to vector<25x1xi1>
    %45 = vector.broadcast %44 : vector<25x1xi1> to vector<25x32xi1>
    %46 = arith.select %45, %42, %43 : vector<25x32xi1>, vector<25x32xbf16>
    %c0_26 = arith.constant 0 : index
    %c0_27 = arith.constant 0 : index
    %c0_28 = arith.constant 0 : index
    %47 = vector.load %arg6[%c0_26, %c0_27, %c0_28] : memref<8x32x128xbf16, #tpu.memory_space<vmem>>, vector<1x32x128xbf16>
    %48 = vector.shape_cast %47 : vector<1x32x128xbf16> to vector<32x128xbf16>
    %cst_29 = arith.constant dense<0.000000e+00> : vector<25x128xf32>
    %49 = tpu.matmul %46, %48, %cst_29 {dimension_numbers = #tpu.dot_dimension_numbers<[1], [0], [0], [1], [0, 0, 1, 1], [], []>} : vector<25x32xbf16>, vector<32x128xbf16>, vector<25x128xf32> -> vector<25x128xf32>
    %50 = arith.addf %41, %49 : vector<25x128xf32>
    %c11 = arith.constant 11 : index
    %c0_30 = arith.constant 0 : index
    %51 = vector.load %arg8[%c11, %c0_30] : memref<48x32xbf16, #tpu.memory_space<vmem>>, vector<25x32xbf16>
    %c1 = arith.constant 1 : index
    %c0_31 = arith.constant 0 : index
    %c0_32 = arith.constant 0 : index
    %52 = vector.load %arg6[%c1, %c0_31, %c0_32] : memref<8x32x128xbf16, #tpu.memory_space<vmem>>, vector<1x32x128xbf16>
    %53 = vector.shape_cast %52 : vector<1x32x128xbf16> to vector<32x128xbf16>
    %cst_33 = arith.constant dense<0.000000e+00> : vector<25x128xf32>
    %54 = tpu.matmul %51, %53, %cst_33 {dimension_numbers = #tpu.dot_dimension_numbers<[1], [0], [0], [1], [0, 0, 1, 1], [], []>} : vector<25x32xbf16>, vector<32x128xbf16>, vector<25x128xf32> -> vector<25x128xf32>
    %55 = arith.addf %50, %54 : vector<25x128xf32>
    %c12 = arith.constant 12 : index
    %c0_34 = arith.constant 0 : index
    %56 = vector.load %arg8[%c12, %c0_34] : memref<48x32xbf16, #tpu.memory_space<vmem>>, vector<25x32xbf16>
    %cst_35 = arith.constant 0.000000e+00 : bf16
    %57 = vector.broadcast %cst_35 : bf16 to vector<25x32xbf16>
    %58 = vector.shape_cast %37 : vector<25x1xi1> to vector<25x1xi1>
    %59 = vector.broadcast %58 : vector<25x1xi1> to vector<25x32xi1>
    %60 = arith.select %59, %56, %57 : vector<25x32xi1>, vector<25x32xbf16>
    %c2 = arith.constant 2 : index
    %c0_36 = arith.constant 0 : index
    %c0_37 = arith.constant 0 : index
    %61 = vector.load %arg6[%c2, %c0_36, %c0_37] : memref<8x32x128xbf16, #tpu.memory_space<vmem>>, vector<1x32x128xbf16>
    %62 = vector.shape_cast %61 : vector<1x32x128xbf16> to vector<32x128xbf16>
    %cst_38 = arith.constant dense<0.000000e+00> : vector<25x128xf32>
    %63 = tpu.matmul %60, %62, %cst_38 {dimension_numbers = #tpu.dot_dimension_numbers<[1], [0], [0], [1], [0, 0, 1, 1], [], []>} : vector<25x32xbf16>, vector<32x128xbf16>, vector<25x128xf32> -> vector<25x128xf32>
    %64 = arith.addf %55, %63 : vector<25x128xf32>
    %c15 = arith.constant 15 : index
    %c0_39 = arith.constant 0 : index
    %65 = vector.load %arg8[%c15, %c0_39] : memref<48x32xbf16, #tpu.memory_space<vmem>>, vector<25x32xbf16>
    %cst_40 = arith.constant 0.000000e+00 : bf16
    %66 = vector.broadcast %cst_40 : bf16 to vector<25x32xbf16>
    %67 = vector.shape_cast %35 : vector<25x1xi1> to vector<25x1xi1>
    %68 = vector.broadcast %67 : vector<25x1xi1> to vector<25x32xi1>
    %69 = arith.select %68, %65, %66 : vector<25x32xi1>, vector<25x32xbf16>
    %c3 = arith.constant 3 : index
    %c0_41 = arith.constant 0 : index
    %c0_42 = arith.constant 0 : index
    %70 = vector.load %arg6[%c3, %c0_41, %c0_42] : memref<8x32x128xbf16, #tpu.memory_space<vmem>>, vector<1x32x128xbf16>
    %71 = vector.shape_cast %70 : vector<1x32x128xbf16> to vector<32x128xbf16>
    %cst_43 = arith.constant dense<0.000000e+00> : vector<25x128xf32>
    %72 = tpu.matmul %69, %71, %cst_43 {dimension_numbers = #tpu.dot_dimension_numbers<[1], [0], [0], [1], [0, 0, 1, 1], [], []>} : vector<25x32xbf16>, vector<32x128xbf16>, vector<25x128xf32> -> vector<25x128xf32>
    %73 = arith.addf %64, %72 : vector<25x128xf32>
    %c17 = arith.constant 17 : index
    %c0_44 = arith.constant 0 : index
    %74 = vector.load %arg8[%c17, %c0_44] : memref<48x32xbf16, #tpu.memory_space<vmem>>, vector<25x32xbf16>
    %cst_45 = arith.constant 0.000000e+00 : bf16
    %75 = vector.broadcast %cst_45 : bf16 to vector<25x32xbf16>
    %76 = vector.shape_cast %37 : vector<25x1xi1> to vector<25x1xi1>
    %77 = vector.broadcast %76 : vector<25x1xi1> to vector<25x32xi1>
    %78 = arith.select %77, %74, %75 : vector<25x32xi1>, vector<25x32xbf16>
    %c4 = arith.constant 4 : index
    %c0_46 = arith.constant 0 : index
    %c0_47 = arith.constant 0 : index
    %79 = vector.load %arg6[%c4, %c0_46, %c0_47] : memref<8x32x128xbf16, #tpu.memory_space<vmem>>, vector<1x32x128xbf16>
    %80 = vector.shape_cast %79 : vector<1x32x128xbf16> to vector<32x128xbf16>
    %cst_48 = arith.constant dense<0.000000e+00> : vector<25x128xf32>
    %81 = tpu.matmul %78, %80, %cst_48 {dimension_numbers = #tpu.dot_dimension_numbers<[1], [0], [0], [1], [0, 0, 1, 1], [], []>} : vector<25x32xbf16>, vector<32x128xbf16>, vector<25x128xf32> -> vector<25x128xf32>
    %82 = arith.addf %73, %81 : vector<25x128xf32>
    %c20 = arith.constant 20 : index
    %c0_49 = arith.constant 0 : index
    %83 = vector.load %arg8[%c20, %c0_49] : memref<48x32xbf16, #tpu.memory_space<vmem>>, vector<25x32xbf16>
    %cst_50 = arith.constant 0.000000e+00 : bf16
    %84 = vector.broadcast %cst_50 : bf16 to vector<25x32xbf16>
    %85 = vector.shape_cast %35 : vector<25x1xi1> to vector<25x1xi1>
    %86 = vector.broadcast %85 : vector<25x1xi1> to vector<25x32xi1>
    %87 = arith.select %86, %83, %84 : vector<25x32xi1>, vector<25x32xbf16>
    %c5 = arith.constant 5 : index
    %c0_51 = arith.constant 0 : index
    %c0_52 = arith.constant 0 : index
    %88 = vector.load %arg6[%c5, %c0_51, %c0_52] : memref<8x32x128xbf16, #tpu.memory_space<vmem>>, vector<1x32x128xbf16>
    %89 = vector.shape_cast %88 : vector<1x32x128xbf16> to vector<32x128xbf16>
    %cst_53 = arith.constant dense<0.000000e+00> : vector<25x128xf32>
    %90 = tpu.matmul %87, %89, %cst_53 {dimension_numbers = #tpu.dot_dimension_numbers<[1], [0], [0], [1], [0, 0, 1, 1], [], []>} : vector<25x32xbf16>, vector<32x128xbf16>, vector<25x128xf32> -> vector<25x128xf32>
    %91 = arith.addf %82, %90 : vector<25x128xf32>
    %c21 = arith.constant 21 : index
    %c0_54 = arith.constant 0 : index
    %92 = vector.load %arg8[%c21, %c0_54] : memref<48x32xbf16, #tpu.memory_space<vmem>>, vector<25x32xbf16>
    %c6 = arith.constant 6 : index
    %c0_55 = arith.constant 0 : index
    %c0_56 = arith.constant 0 : index
    %93 = vector.load %arg6[%c6, %c0_55, %c0_56] : memref<8x32x128xbf16, #tpu.memory_space<vmem>>, vector<1x32x128xbf16>
    %94 = vector.shape_cast %93 : vector<1x32x128xbf16> to vector<32x128xbf16>
    %cst_57 = arith.constant dense<0.000000e+00> : vector<25x128xf32>
    %95 = tpu.matmul %92, %94, %cst_57 {dimension_numbers = #tpu.dot_dimension_numbers<[1], [0], [0], [1], [0, 0, 1, 1], [], []>} : vector<25x32xbf16>, vector<32x128xbf16>, vector<25x128xf32> -> vector<25x128xf32>
    %96 = arith.addf %91, %95 : vector<25x128xf32>
    %c22 = arith.constant 22 : index
    %c0_58 = arith.constant 0 : index
    %97 = vector.load %arg8[%c22, %c0_58] : memref<48x32xbf16, #tpu.memory_space<vmem>>, vector<25x32xbf16>
    %cst_59 = arith.constant 0.000000e+00 : bf16
    %98 = vector.broadcast %cst_59 : bf16 to vector<25x32xbf16>
    %99 = vector.shape_cast %37 : vector<25x1xi1> to vector<25x1xi1>
    %100 = vector.broadcast %99 : vector<25x1xi1> to vector<25x32xi1>
    %101 = arith.select %100, %97, %98 : vector<25x32xi1>, vector<25x32xbf16>
    %c7 = arith.constant 7 : index
    %c0_60 = arith.constant 0 : index
    %c0_61 = arith.constant 0 : index
    %102 = vector.load %arg6[%c7, %c0_60, %c0_61] : memref<8x32x128xbf16, #tpu.memory_space<vmem>>, vector<1x32x128xbf16>
    %103 = vector.shape_cast %102 : vector<1x32x128xbf16> to vector<32x128xbf16>
    %cst_62 = arith.constant dense<0.000000e+00> : vector<25x128xf32>
    %104 = tpu.matmul %101, %103, %cst_62 {dimension_numbers = #tpu.dot_dimension_numbers<[1], [0], [0], [1], [0, 0, 1, 1], [], []>} : vector<25x32xbf16>, vector<32x128xbf16>, vector<25x128xf32> -> vector<25x128xf32>
    %105 = arith.addf %96, %104 : vector<25x128xf32>
    %cst_63 = arith.constant 0.000000e+00 : f32
    %106 = vector.broadcast %cst_63 : f32 to vector<25x128xf32>
    %107 = tpu.concatenate %106, %105 in 1 : vector<25x128xf32>, vector<25x128xf32> -> vector<25x256xf32>
    %108 = arith.addf %40, %107 : vector<25x256xf32>
    %c0_64 = arith.constant 0 : index
    %c0_65 = arith.constant 0 : index
    %109 = vector.load %arg5[%c0_64, %c0_65] : memref<1x256xf32, #tpu.memory_space<vmem>>, vector<1x256xf32>
    %110 = vector.broadcast %109 : vector<1x256xf32> to vector<25x256xf32>
    %111 = arith.addf %108, %110 : vector<25x256xf32>
    %cst_66 = arith.constant 0.000000e+00 : f32
    %112 = vector.broadcast %cst_66 : f32 to vector<25x256xf32>
    %113 = arith.maximumf %111, %112 : vector<25x256xf32>
    %114 = arith.truncf %113 : vector<25x256xf32> to vector<25x256xbf16>
    %c0_67 = arith.constant 0 : index
    %c0_68 = arith.constant 0 : index
    %c0_69 = arith.constant 0 : index
    %115 = vector.load %arg7[%c0_67, %c0_68, %c0_69] : memref<1x25x256xbf16, #tpu.memory_space<vmem>>, vector<1x25x256xbf16>
    %116 = vector.shape_cast %115 : vector<1x25x256xbf16> to vector<25x256xbf16>
    %117 = vector.shape_cast %114 : vector<25x256xbf16> to vector<1x25x256xbf16>
    tpu.vector_store %arg7[%c0_67, %c0_68, %c0_69], %117 {strides = array<i32>} : memref<1x25x256xbf16, #tpu.memory_space<vmem>>, vector<1x25x256xbf16>,
    return
  }
  func.func @transform_0(%arg0: i32) -> (i32, i32, i32) {
    %c0_i32 = arith.constant 0 : i32
    %c0_i32_0 = arith.constant 0 : i32
    %c0_i32_1 = arith.constant 0 : i32
    return %arg0, %c0_i32, %c0_i32_0 : i32, i32, i32
  }
  func.func @transform_1(%arg0: i32) -> (i32, i32) {
    %c0_i32 = arith.constant 0 : i32
    %c0_i32_0 = arith.constant 0 : i32
    %c0_i32_1 = arith.constant 0 : i32
    return %c0_i32, %c0_i32_0 : i32, i32
  }
  func.func @transform_2(%arg0: i32) -> (i32, i32) {
    %c0_i32 = arith.constant 0 : i32
    %c0_i32_0 = arith.constant 0 : i32
    %c0_i32_1 = arith.constant 0 : i32
    return %c0_i32, %c0_i32_0 : i32, i32
  }
  func.func @transform_3(%arg0: i32) -> (i32, i32) {
    %c0_i32 = arith.constant 0 : i32
    %c0_i32_0 = arith.constant 0 : i32
    %c0_i32_1 = arith.constant 0 : i32
    return %c0_i32, %c0_i32_0 : i32, i32
  }
  func.func @transform_4(%arg0: i32) -> (i32, i32) {
    %c0_i32 = arith.constant 0 : i32
    %c0_i32_0 = arith.constant 0 : i32
    %c0_i32_1 = arith.constant 0 : i32
    return %c0_i32, %c0_i32_0 : i32, i32
  }
  func.func @transform_5(%arg0: i32) -> (i32, i32, i32) {
    %c0_i32 = arith.constant 0 : i32
    %c0_i32_0 = arith.constant 0 : i32
    %c0_i32_1 = arith.constant 0 : i32
    %c0_i32_2 = arith.constant 0 : i32
    return %c0_i32, %c0_i32_0, %c0_i32_1 : i32, i32, i32
  }
  func.func @transform_6(%arg0: i32) -> (i32, i32, i32) {
    %c0_i32 = arith.constant 0 : i32
    %c0_i32_0 = arith.constant 0 : i32
    %c0_i32_1 = arith.constant 0 : i32
    return %arg0, %c0_i32, %c0_i32_0 : i32, i32, i32
  }
}

module attributes {stable_mosaic.version = 11 : i64} {
  func.func @_fire_kernel(%arg0: i32, %arg1: memref<1x25x256xbf16, #tpu.memory_space<vmem>>, %arg2: memref<256x32xbf16, #tpu.memory_space<vmem>>, %arg3: memref<1x32xf32, #tpu.memory_space<vmem>>, %arg4: memref<32x256xbf16, #tpu.memory_space<vmem>>, %arg5: memref<1x256xf32, #tpu.memory_space<vmem>>, %arg6: memref<8x32x128xbf16, #tpu.memory_space<vmem>>, %arg7: memref<1x25x256xbf16, #tpu.memory_space<vmem>>, %arg8: memref<48x32xbf16, #tpu.memory_space<vmem>>) attributes {dimension_semantics = [#tpu.dimension_semantics<parallel>], iteration_bounds = array<i64: 2>, scalar_prefetch = 0 : i64, scratch_operands = 1 : i64, tpu.core_type = #tpu.core_type<tc>, window_params = [{transform_indices = @transform_0, window_bounds = array<i64: 1, 25, 256>}, {pipeline_mode = #tpu.pipeline_mode<synchronous>, transform_indices = @transform_1, window_bounds = array<i64: 256, 32>}, {pipeline_mode = #tpu.pipeline_mode<synchronous>, transform_indices = @transform_2, window_bounds = array<i64: 1, 32>}, {pipeline_mode = #tpu.pipeline_mode<synchronous>, transform_indices = @transform_3, window_bounds = array<i64: 32, 256>}, {pipeline_mode = #tpu.pipeline_mode<synchronous>, transform_indices = @transform_4, window_bounds = array<i64: 1, 256>}, {pipeline_mode = #tpu.pipeline_mode<synchronous>, transform_indices = @transform_5, window_bounds = array<i64: 8, 32, 128>}, {transform_indices = @transform_6, window_bounds = array<i64: 1, 25, 256>}]} {
    %cst = arith.constant 0.000000e+00 : bf16
    %0 = vector.broadcast %cst : bf16 to vector<16x32xbf16>
    %c0 = arith.constant 0 : index
    %c0_0 = arith.constant 0 : index
    %1 = vector.load %arg8[%c0, %c0_0] : memref<48x32xbf16, #tpu.memory_space<vmem>>, vector<16x32xbf16>
    tpu.vector_store %arg8[%c0, %c0_0], %0 {strides = array<i32>} : memref<48x32xbf16, #tpu.memory_space<vmem>>, vector<16x32xbf16>,
    %cst_1 = arith.constant 0.000000e+00 : bf16
    %2 = vector.broadcast %cst_1 : bf16 to vector<7x32xbf16>
    %c41 = arith.constant 41 : index
    %c0_2 = arith.constant 0 : index
    %3 = vector.load %arg8[%c41, %c0_2] : memref<48x32xbf16, #tpu.memory_space<vmem>>, vector<7x32xbf16>
    tpu.vector_store %arg8[%c41, %c0_2], %2 {strides = array<i32>} : memref<48x32xbf16, #tpu.memory_space<vmem>>, vector<7x32xbf16>,
    %c0_3 = arith.constant 0 : index
    %c0_4 = arith.constant 0 : index
    %c0_5 = arith.constant 0 : index
    %4 = vector.load %arg1[%c0_3, %c0_4, %c0_5] : memref<1x25x256xbf16, #tpu.memory_space<vmem>>, vector<1x25x256xbf16>
    %5 = vector.shape_cast %4 : vector<1x25x256xbf16> to vector<25x256xbf16>
    %c0_6 = arith.constant 0 : index
    %c0_7 = arith.constant 0 : index
    %6 = vector.load %arg2[%c0_6, %c0_7] : memref<256x32xbf16, #tpu.memory_space<vmem>>, vector<256x32xbf16>
    %cst_8 = arith.constant dense<0.000000e+00> : vector<25x32xf32>
    %7 = tpu.matmul %5, %6, %cst_8 {dimension_numbers = #tpu.dot_dimension_numbers<[1], [0], [0], [1], [0, 0, 1, 1], [], []>} : vector<25x256xbf16>, vector<256x32xbf16>, vector<25x32xf32> -> vector<25x32xf32>
    %c0_9 = arith.constant 0 : index
    %c0_10 = arith.constant 0 : index
    %8 = vector.load %arg3[%c0_9, %c0_10] : memref<1x32xf32, #tpu.memory_space<vmem>>, vector<1x32xf32>
    %9 = vector.broadcast %8 : vector<1x32xf32> to vector<25x32xf32>
    %10 = arith.addf %7, %9 : vector<25x32xf32>
    %cst_11 = arith.constant 0.000000e+00 : f32
    %11 = vector.broadcast %cst_11 : f32 to vector<25x32xf32>
    %12 = arith.maximumf %10, %11 : vector<25x32xf32>
    %13 = arith.truncf %12 : vector<25x32xf32> to vector<25x32xbf16>
    %c16 = arith.constant 16 : index
    %c0_12 = arith.constant 0 : index
    %14 = vector.load %arg8[%c16, %c0_12] : memref<48x32xbf16, #tpu.memory_space<vmem>>, vector<25x32xbf16>
    tpu.vector_store %arg8[%c16, %c0_12], %13 {strides = array<i32>} : memref<48x32xbf16, #tpu.memory_space<vmem>>, vector<25x32xbf16>,
    %15 = tpu.iota {dimensions = array<i32: 0>} : vector<25x1xi32>
    %c0_i32 = arith.constant 0 : i32
    %16 = vector.broadcast %c0_i32 : i32 to vector<25x1xi32>
    %17 = arith.addi %15, %16 : vector<25x1xi32>
    %c5_i32 = arith.constant 5 : i32
    %c0_i32_13 = arith.constant 0 : i32
    %18 = arith.cmpi eq, %c5_i32, %c0_i32_13 : i32
    %c1_i32 = arith.constant 1 : i32
    %19 = arith.select %18, %c1_i32, %c5_i32 : i32
    %20 = vector.broadcast %19 : i32 to vector<25x1xi32>
    %21 = arith.remsi %17, %20 : vector<25x1xi32>
    %c0_i32_14 = arith.constant 0 : i32
    %22 = vector.broadcast %c0_i32_14 : i32 to vector<25x1xi32>
    %23 = arith.cmpi ne, %21, %22 : vector<25x1xi32>
    %c0_i32_15 = arith.constant 0 : i32
    %24 = vector.broadcast %c0_i32_15 : i32 to vector<25x1xi32>
    %25 = arith.cmpi slt, %21, %24 : vector<25x1xi32>
    %c0_i32_16 = arith.constant 0 : i32
    %26 = arith.cmpi slt, %19, %c0_i32_16 : i32
    %27 = vector.broadcast %26 : i1 to vector<25x1xi1>
    %28 = vector.broadcast %27 : vector<25x1xi1> to vector<25x1xi1>
    %29 = arith.xori %25, %28 : vector<25x1xi1>
    %30 = arith.andi %29, %23 : vector<25x1xi1>
    %31 = vector.broadcast %19 : i32 to vector<25x1xi32>
    %32 = arith.addi %21, %31 : vector<25x1xi32>
    %33 = arith.select %30, %32, %21 : vector<25x1xi1>, vector<25x1xi32>
    %c0_i32_17 = arith.constant 0 : i32
    %34 = vector.broadcast %c0_i32_17 : i32 to vector<25x1xi32>
    %35 = arith.cmpi ne, %33, %34 : vector<25x1xi32>
    %c4_i32 = arith.constant 4 : i32
    %36 = vector.broadcast %c4_i32 : i32 to vector<25x1xi32>
    %37 = arith.cmpi ne, %33, %36 : vector<25x1xi32>
    %c16_18 = arith.constant 16 : index
    %c0_19 = arith.constant 0 : index
    %38 = vector.load %arg8[%c16_18, %c0_19] : memref<48x32xbf16, #tpu.memory_space<vmem>>, vector<25x32xbf16>
    %c0_20 = arith.constant 0 : index
    %c0_21 = arith.constant 0 : index
    %39 = vector.load %arg4[%c0_20, %c0_21] : memref<32x256xbf16, #tpu.memory_space<vmem>>, vector<32x256xbf16>
    %cst_22 = arith.constant dense<0.000000e+00> : vector<25x256xf32>
    %40 = tpu.matmul %38, %39, %cst_22 {dimension_numbers = #tpu.dot_dimension_numbers<[1], [0], [0], [1], [0, 0, 1, 1], [], []>} : vector<25x32xbf16>, vector<32x256xbf16>, vector<25x256xf32> -> vector<25x256xf32>
    %cst_23 = arith.constant 0.000000e+00 : f32
    %41 = vector.broadcast %cst_23 : f32 to vector<25x128xf32>
    %c10 = arith.constant 10 : index
    %c0_24 = arith.constant 0 : index
    %42 = vector.load %arg8[%c10, %c0_24] : memref<48x32xbf16, #tpu.memory_space<vmem>>, vector<25x32xbf16>
    %cst_25 = arith.constant 0.000000e+00 : bf16
    %43 = vector.broadcast %cst_25 : bf16 to vector<25x32xbf16>
    %44 = vector.shape_cast %35 : vector<25x1xi1> to vector<25x1xi1>
    %45 = vector.broadcast %44 : vector<25x1xi1> to vector<25x32xi1>
    %46 = arith.select %45, %42, %43 : vector<25x32xi1>, vector<25x32xbf16>
    %c0_26 = arith.constant 0 : index
    %c0_27 = arith.constant 0 : index
    %c0_28 = arith.constant 0 : index
    %47 = vector.load %arg6[%c0_26, %c0_27, %c0_28] : memref<8x32x128xbf16, #tpu.memory_space<vmem>>, vector<1x32x128xbf16>
    %48 = vector.shape_cast %47 : vector<1x32x128xbf16> to vector<32x128xbf16>
    %cst_29 = arith.constant dense<0.000000e+00> : vector<25x128xf32>
    %49 = tpu.matmul %46, %48, %cst_29 {dimension_numbers = #tpu.dot_dimension_numbers<[1], [0], [0], [1], [0, 0, 1, 1], [], []>} : vector<25x32xbf16>, vector<32x128xbf16>, vector<25x128xf32> -> vector<25x128xf32>
    %50 = arith.addf %41, %49 : vector<25x128xf32>
    %c11 = arith.constant 11 : index
    %c0_30 = arith.constant 0 : index
    %51 = vector.load %arg8[%c11, %c0_30] : memref<48x32xbf16, #tpu.memory_space<vmem>>, vector<25x32xbf16>
    %c1 = arith.constant 1 : index
    %c0_31 = arith.constant 0 : index
    %c0_32 = arith.constant 0 : index
    %52 = vector.load %arg6[%c1, %c0_31, %c0_32] : memref<8x32x128xbf16, #tpu.memory_space<vmem>>, vector<1x32x128xbf16>
    %53 = vector.shape_cast %52 : vector<1x32x128xbf16> to vector<32x128xbf16>
    %cst_33 = arith.constant dense<0.000000e+00> : vector<25x128xf32>
    %54 = tpu.matmul %51, %53, %cst_33 {dimension_numbers = #tpu.dot_dimension_numbers<[1], [0], [0], [1], [0, 0, 1, 1], [], []>} : vector<25x32xbf16>, vector<32x128xbf16>, vector<25x128xf32> -> vector<25x128xf32>
    %55 = arith.addf %50, %54 : vector<25x128xf32>
    %c12 = arith.constant 12 : index
    %c0_34 = arith.constant 0 : index
    %56 = vector.load %arg8[%c12, %c0_34] : memref<48x32xbf16, #tpu.memory_space<vmem>>, vector<25x32xbf16>
    %cst_35 = arith.constant 0.000000e+00 : bf16
    %57 = vector.broadcast %cst_35 : bf16 to vector<25x32xbf16>
    %58 = vector.shape_cast %37 : vector<25x1xi1> to vector<25x1xi1>
    %59 = vector.broadcast %58 : vector<25x1xi1> to vector<25x32xi1>
    %60 = arith.select %59, %56, %57 : vector<25x32xi1>, vector<25x32xbf16>
    %c2 = arith.constant 2 : index
    %c0_36 = arith.constant 0 : index
    %c0_37 = arith.constant 0 : index
    %61 = vector.load %arg6[%c2, %c0_36, %c0_37] : memref<8x32x128xbf16, #tpu.memory_space<vmem>>, vector<1x32x128xbf16>
    %62 = vector.shape_cast %61 : vector<1x32x128xbf16> to vector<32x128xbf16>
    %cst_38 = arith.constant dense<0.000000e+00> : vector<25x128xf32>
    %63 = tpu.matmul %60, %62, %cst_38 {dimension_numbers = #tpu.dot_dimension_numbers<[1], [0], [0], [1], [0, 0, 1, 1], [], []>} : vector<25x32xbf16>, vector<32x128xbf16>, vector<25x128xf32> -> vector<25x128xf32>
    %64 = arith.addf %55, %63 : vector<25x128xf32>
    %c15 = arith.constant 15 : index
    %c0_39 = arith.constant 0 : index
    %65 = vector.load %arg8[%c15, %c0_39] : memref<48x32xbf16, #tpu.memory_space<vmem>>, vector<25x32xbf16>
    %cst_40 = arith.constant 0.000000e+00 : bf16
    %66 = vector.broadcast %cst_40 : bf16 to vector<25x32xbf16>
    %67 = vector.shape_cast %35 : vector<25x1xi1> to vector<25x1xi1>
    %68 = vector.broadcast %67 : vector<25x1xi1> to vector<25x32xi1>
    %69 = arith.select %68, %65, %66 : vector<25x32xi1>, vector<25x32xbf16>
    %c3 = arith.constant 3 : index
    %c0_41 = arith.constant 0 : index
    %c0_42 = arith.constant 0 : index
    %70 = vector.load %arg6[%c3, %c0_41, %c0_42] : memref<8x32x128xbf16, #tpu.memory_space<vmem>>, vector<1x32x128xbf16>
    %71 = vector.shape_cast %70 : vector<1x32x128xbf16> to vector<32x128xbf16>
    %cst_43 = arith.constant dense<0.000000e+00> : vector<25x128xf32>
    %72 = tpu.matmul %69, %71, %cst_43 {dimension_numbers = #tpu.dot_dimension_numbers<[1], [0], [0], [1], [0, 0, 1, 1], [], []>} : vector<25x32xbf16>, vector<32x128xbf16>, vector<25x128xf32> -> vector<25x128xf32>
    %73 = arith.addf %64, %72 : vector<25x128xf32>
    %c17 = arith.constant 17 : index
    %c0_44 = arith.constant 0 : index
    %74 = vector.load %arg8[%c17, %c0_44] : memref<48x32xbf16, #tpu.memory_space<vmem>>, vector<25x32xbf16>
    %cst_45 = arith.constant 0.000000e+00 : bf16
    %75 = vector.broadcast %cst_45 : bf16 to vector<25x32xbf16>
    %76 = vector.shape_cast %37 : vector<25x1xi1> to vector<25x1xi1>
    %77 = vector.broadcast %76 : vector<25x1xi1> to vector<25x32xi1>
    %78 = arith.select %77, %74, %75 : vector<25x32xi1>, vector<25x32xbf16>
    %c4 = arith.constant 4 : index
    %c0_46 = arith.constant 0 : index
    %c0_47 = arith.constant 0 : index
    %79 = vector.load %arg6[%c4, %c0_46, %c0_47] : memref<8x32x128xbf16, #tpu.memory_space<vmem>>, vector<1x32x128xbf16>
    %80 = vector.shape_cast %79 : vector<1x32x128xbf16> to vector<32x128xbf16>
    %cst_48 = arith.constant dense<0.000000e+00> : vector<25x128xf32>
    %81 = tpu.matmul %78, %80, %cst_48 {dimension_numbers = #tpu.dot_dimension_numbers<[1], [0], [0], [1], [0, 0, 1, 1], [], []>} : vector<25x32xbf16>, vector<32x128xbf16>, vector<25x128xf32> -> vector<25x128xf32>
    %82 = arith.addf %73, %81 : vector<25x128xf32>
    %c20 = arith.constant 20 : index
    %c0_49 = arith.constant 0 : index
    %83 = vector.load %arg8[%c20, %c0_49] : memref<48x32xbf16, #tpu.memory_space<vmem>>, vector<25x32xbf16>
    %cst_50 = arith.constant 0.000000e+00 : bf16
    %84 = vector.broadcast %cst_50 : bf16 to vector<25x32xbf16>
    %85 = vector.shape_cast %35 : vector<25x1xi1> to vector<25x1xi1>
    %86 = vector.broadcast %85 : vector<25x1xi1> to vector<25x32xi1>
    %87 = arith.select %86, %83, %84 : vector<25x32xi1>, vector<25x32xbf16>
    %c5 = arith.constant 5 : index
    %c0_51 = arith.constant 0 : index
    %c0_52 = arith.constant 0 : index
    %88 = vector.load %arg6[%c5, %c0_51, %c0_52] : memref<8x32x128xbf16, #tpu.memory_space<vmem>>, vector<1x32x128xbf16>
    %89 = vector.shape_cast %88 : vector<1x32x128xbf16> to vector<32x128xbf16>
    %cst_53 = arith.constant dense<0.000000e+00> : vector<25x128xf32>
    %90 = tpu.matmul %87, %89, %cst_53 {dimension_numbers = #tpu.dot_dimension_numbers<[1], [0], [0], [1], [0, 0, 1, 1], [], []>} : vector<25x32xbf16>, vector<32x128xbf16>, vector<25x128xf32> -> vector<25x128xf32>
    %91 = arith.addf %82, %90 : vector<25x128xf32>
    %c21 = arith.constant 21 : index
    %c0_54 = arith.constant 0 : index
    %92 = vector.load %arg8[%c21, %c0_54] : memref<48x32xbf16, #tpu.memory_space<vmem>>, vector<25x32xbf16>
    %c6 = arith.constant 6 : index
    %c0_55 = arith.constant 0 : index
    %c0_56 = arith.constant 0 : index
    %93 = vector.load %arg6[%c6, %c0_55, %c0_56] : memref<8x32x128xbf16, #tpu.memory_space<vmem>>, vector<1x32x128xbf16>
    %94 = vector.shape_cast %93 : vector<1x32x128xbf16> to vector<32x128xbf16>
    %cst_57 = arith.constant dense<0.000000e+00> : vector<25x128xf32>
    %95 = tpu.matmul %92, %94, %cst_57 {dimension_numbers = #tpu.dot_dimension_numbers<[1], [0], [0], [1], [0, 0, 1, 1], [], []>} : vector<25x32xbf16>, vector<32x128xbf16>, vector<25x128xf32> -> vector<25x128xf32>
    %96 = arith.addf %91, %95 : vector<25x128xf32>
    %c22 = arith.constant 22 : index
    %c0_58 = arith.constant 0 : index
    %97 = vector.load %arg8[%c22, %c0_58] : memref<48x32xbf16, #tpu.memory_space<vmem>>, vector<25x32xbf16>
    %cst_59 = arith.constant 0.000000e+00 : bf16
    %98 = vector.broadcast %cst_59 : bf16 to vector<25x32xbf16>
    %99 = vector.shape_cast %37 : vector<25x1xi1> to vector<25x1xi1>
    %100 = vector.broadcast %99 : vector<25x1xi1> to vector<25x32xi1>
    %101 = arith.select %100, %97, %98 : vector<25x32xi1>, vector<25x32xbf16>
    %c7 = arith.constant 7 : index
    %c0_60 = arith.constant 0 : index
    %c0_61 = arith.constant 0 : index
    %102 = vector.load %arg6[%c7, %c0_60, %c0_61] : memref<8x32x128xbf16, #tpu.memory_space<vmem>>, vector<1x32x128xbf16>
    %103 = vector.shape_cast %102 : vector<1x32x128xbf16> to vector<32x128xbf16>
    %cst_62 = arith.constant dense<0.000000e+00> : vector<25x128xf32>
    %104 = tpu.matmul %101, %103, %cst_62 {dimension_numbers = #tpu.dot_dimension_numbers<[1], [0], [0], [1], [0, 0, 1, 1], [], []>} : vector<25x32xbf16>, vector<32x128xbf16>, vector<25x128xf32> -> vector<25x128xf32>
    %105 = arith.addf %96, %104 : vector<25x128xf32>
    %cst_63 = arith.constant 0.000000e+00 : f32
    %106 = vector.broadcast %cst_63 : f32 to vector<25x128xf32>
    %107 = tpu.concatenate %106, %105 in 1 : vector<25x128xf32>, vector<25x128xf32> -> vector<25x256xf32>
    %108 = arith.addf %40, %107 : vector<25x256xf32>
    %c0_64 = arith.constant 0 : index
    %c0_65 = arith.constant 0 : index
    %109 = vector.load %arg5[%c0_64, %c0_65] : memref<1x256xf32, #tpu.memory_space<vmem>>, vector<1x256xf32>
    %110 = vector.broadcast %109 : vector<1x256xf32> to vector<25x256xf32>
    %111 = arith.addf %108, %110 : vector<25x256xf32>
    %cst_66 = arith.constant 0.000000e+00 : f32
    %112 = vector.broadcast %cst_66 : f32 to vector<25x256xf32>
    %113 = arith.maximumf %111, %112 : vector<25x256xf32>
    %114 = arith.truncf %113 : vector<25x256xf32> to vector<25x256xbf16>
    %c0_67 = arith.constant 0 : index
    %c0_68 = arith.constant 0 : index
    %c0_69 = arith.constant 0 : index
    %115 = vector.load %arg7[%c0_67, %c0_68, %c0_69] : memref<1x25x256xbf16, #tpu.memory_space<vmem>>, vector<1x25x256xbf16>
    %116 = vector.shape_cast %115 : vector<1x25x256xbf16> to vector<25x256xbf16>
    %117 = vector.shape_cast %114 : vector<25x256xbf16> to vector<1x25x256xbf16>
    tpu.vector_store %arg7[%c0_67, %c0_68, %c0_69], %117 {strides = array<i32>} : memref<1x25x256xbf16, #tpu.memory_space<vmem>>, vector<1x25x256xbf16>,
    return
  }
  func.func @transform_0(%arg0: i32) -> (i32, i32, i32) {
    %c0_i32 = arith.constant 0 : i32
    %c0_i32_0 = arith.constant 0 : i32
    %c0_i32_1 = arith.constant 0 : i32
    return %arg0, %c0_i32, %c0_i32_0 : i32, i32, i32
  }
  func.func @transform_1(%arg0: i32) -> (i32, i32) {
    %c0_i32 = arith.constant 0 : i32
    %c0_i32_0 = arith.constant 0 : i32
    %c0_i32_1 = arith.constant 0 : i32
    return %c0_i32, %c0_i32_0 : i32, i32
  }
  func.func @transform_2(%arg0: i32) -> (i32, i32) {
    %c0_i32 = arith.constant 0 : i32
    %c0_i32_0 = arith.constant 0 : i32
    %c0_i32_1 = arith.constant 0 : i32
    return %c0_i32, %c0_i32_0 : i32, i32
  }
  func.func @transform_3(%arg0: i32) -> (i32, i32) {
    %c0_i32 = arith.constant 0 : i32
    %c0_i32_0 = arith.constant 0 : i32
    %c0_i32_1 = arith.constant 0 : i32
    return %c0_i32, %c0_i32_0 : i32, i32
  }
  func.func @transform_4(%arg0: i32) -> (i32, i32) {
    %c0_i32 = arith.constant 0 : i32
    %c0_i32_0 = arith.constant 0 : i32
    %c0_i32_1 = arith.constant 0 : i32
    return %c0_i32, %c0_i32_0 : i32, i32
  }
  func.func @transform_5(%arg0: i32) -> (i32, i32, i32) {
    %c0_i32 = arith.constant 0 : i32
    %c0_i32_0 = arith.constant 0 : i32
    %c0_i32_1 = arith.constant 0 : i32
    %c0_i32_2 = arith.constant 0 : i32
    return %c0_i32, %c0_i32_0, %c0_i32_1 : i32, i32, i32
  }
  func.func @transform_6(%arg0: i32) -> (i32, i32, i32) {
    %c0_i32 = arith.constant 0 : i32
    %c0_i32_0 = arith.constant 0 : i32
    %c0_i32_1 = arith.constant 0 : i32
    return %arg0, %c0_i32, %c0_i32_0 : i32, i32, i32
  }
}

module attributes {stable_mosaic.version = 11 : i64} {
  func.func @_fire_kernel(%arg0: i32, %arg1: memref<1x4x256xbf16, #tpu.memory_space<vmem>>, %arg2: memref<256x48xbf16, #tpu.memory_space<vmem>>, %arg3: memref<1x48xf32, #tpu.memory_space<vmem>>, %arg4: memref<48x384xbf16, #tpu.memory_space<vmem>>, %arg5: memref<1x384xf32, #tpu.memory_space<vmem>>, %arg6: memref<8x48x192xbf16, #tpu.memory_space<vmem>>, %arg7: memref<1x4x384xbf16, #tpu.memory_space<vmem>>, %arg8: memref<32x48xbf16, #tpu.memory_space<vmem>>) attributes {dimension_semantics = [#tpu.dimension_semantics<parallel>], iteration_bounds = array<i64: 2>, scalar_prefetch = 0 : i64, scratch_operands = 1 : i64, tpu.core_type = #tpu.core_type<tc>, window_params = [{transform_indices = @transform_0, window_bounds = array<i64: 1, 4, 256>}, {pipeline_mode = #tpu.pipeline_mode<synchronous>, transform_indices = @transform_1, window_bounds = array<i64: 256, 48>}, {pipeline_mode = #tpu.pipeline_mode<synchronous>, transform_indices = @transform_2, window_bounds = array<i64: 1, 48>}, {pipeline_mode = #tpu.pipeline_mode<synchronous>, transform_indices = @transform_3, window_bounds = array<i64: 48, 384>}, {pipeline_mode = #tpu.pipeline_mode<synchronous>, transform_indices = @transform_4, window_bounds = array<i64: 1, 384>}, {pipeline_mode = #tpu.pipeline_mode<synchronous>, transform_indices = @transform_5, window_bounds = array<i64: 8, 48, 192>}, {transform_indices = @transform_6, window_bounds = array<i64: 1, 4, 384>}]} {
    %cst = arith.constant 0.000000e+00 : bf16
    %0 = vector.broadcast %cst : bf16 to vector<16x48xbf16>
    %c0 = arith.constant 0 : index
    %c0_0 = arith.constant 0 : index
    %1 = vector.load %arg8[%c0, %c0_0] : memref<32x48xbf16, #tpu.memory_space<vmem>>, vector<16x48xbf16>
    tpu.vector_store %arg8[%c0, %c0_0], %0 {strides = array<i32>} : memref<32x48xbf16, #tpu.memory_space<vmem>>, vector<16x48xbf16>,
    %cst_1 = arith.constant 0.000000e+00 : bf16
    %2 = vector.broadcast %cst_1 : bf16 to vector<12x48xbf16>
    %c20 = arith.constant 20 : index
    %c0_2 = arith.constant 0 : index
    %3 = vector.load %arg8[%c20, %c0_2] : memref<32x48xbf16, #tpu.memory_space<vmem>>, vector<12x48xbf16>
    tpu.vector_store %arg8[%c20, %c0_2], %2 {strides = array<i32>} : memref<32x48xbf16, #tpu.memory_space<vmem>>, vector<12x48xbf16>,
    %c0_3 = arith.constant 0 : index
    %c0_4 = arith.constant 0 : index
    %c0_5 = arith.constant 0 : index
    %4 = vector.load %arg1[%c0_3, %c0_4, %c0_5] : memref<1x4x256xbf16, #tpu.memory_space<vmem>>, vector<1x4x256xbf16>
    %5 = vector.shape_cast %4 : vector<1x4x256xbf16> to vector<4x256xbf16>
    %c0_6 = arith.constant 0 : index
    %c0_7 = arith.constant 0 : index
    %6 = vector.load %arg2[%c0_6, %c0_7] : memref<256x48xbf16, #tpu.memory_space<vmem>>, vector<256x48xbf16>
    %cst_8 = arith.constant dense<0.000000e+00> : vector<4x48xf32>
    %7 = tpu.matmul %5, %6, %cst_8 {dimension_numbers = #tpu.dot_dimension_numbers<[1], [0], [0], [1], [0, 0, 1, 1], [], []>} : vector<4x256xbf16>, vector<256x48xbf16>, vector<4x48xf32> -> vector<4x48xf32>
    %c0_9 = arith.constant 0 : index
    %c0_10 = arith.constant 0 : index
    %8 = vector.load %arg3[%c0_9, %c0_10] : memref<1x48xf32, #tpu.memory_space<vmem>>, vector<1x48xf32>
    %9 = vector.broadcast %8 : vector<1x48xf32> to vector<4x48xf32>
    %10 = arith.addf %7, %9 : vector<4x48xf32>
    %cst_11 = arith.constant 0.000000e+00 : f32
    %11 = vector.broadcast %cst_11 : f32 to vector<4x48xf32>
    %12 = arith.maximumf %10, %11 : vector<4x48xf32>
    %13 = arith.truncf %12 : vector<4x48xf32> to vector<4x48xbf16>
    %c16 = arith.constant 16 : index
    %c0_12 = arith.constant 0 : index
    %14 = vector.load %arg8[%c16, %c0_12] : memref<32x48xbf16, #tpu.memory_space<vmem>>, vector<4x48xbf16>
    tpu.vector_store %arg8[%c16, %c0_12], %13 {strides = array<i32>} : memref<32x48xbf16, #tpu.memory_space<vmem>>, vector<4x48xbf16>,
    %15 = tpu.iota {dimensions = array<i32: 0>} : vector<4x1xi32>
    %c0_i32 = arith.constant 0 : i32
    %16 = vector.broadcast %c0_i32 : i32 to vector<4x1xi32>
    %17 = arith.addi %15, %16 : vector<4x1xi32>
    %c2_i32 = arith.constant 2 : i32
    %c0_i32_13 = arith.constant 0 : i32
    %18 = arith.cmpi eq, %c2_i32, %c0_i32_13 : i32
    %c1_i32 = arith.constant 1 : i32
    %19 = arith.select %18, %c1_i32, %c2_i32 : i32
    %20 = vector.broadcast %19 : i32 to vector<4x1xi32>
    %21 = arith.remsi %17, %20 : vector<4x1xi32>
    %c0_i32_14 = arith.constant 0 : i32
    %22 = vector.broadcast %c0_i32_14 : i32 to vector<4x1xi32>
    %23 = arith.cmpi ne, %21, %22 : vector<4x1xi32>
    %c0_i32_15 = arith.constant 0 : i32
    %24 = vector.broadcast %c0_i32_15 : i32 to vector<4x1xi32>
    %25 = arith.cmpi slt, %21, %24 : vector<4x1xi32>
    %c0_i32_16 = arith.constant 0 : i32
    %26 = arith.cmpi slt, %19, %c0_i32_16 : i32
    %27 = vector.broadcast %26 : i1 to vector<4x1xi1>
    %28 = vector.broadcast %27 : vector<4x1xi1> to vector<4x1xi1>
    %29 = arith.xori %25, %28 : vector<4x1xi1>
    %30 = arith.andi %29, %23 : vector<4x1xi1>
    %31 = vector.broadcast %19 : i32 to vector<4x1xi32>
    %32 = arith.addi %21, %31 : vector<4x1xi32>
    %33 = arith.select %30, %32, %21 : vector<4x1xi1>, vector<4x1xi32>
    %c0_i32_17 = arith.constant 0 : i32
    %34 = vector.broadcast %c0_i32_17 : i32 to vector<4x1xi32>
    %35 = arith.cmpi ne, %33, %34 : vector<4x1xi32>
    %c1_i32_18 = arith.constant 1 : i32
    %36 = vector.broadcast %c1_i32_18 : i32 to vector<4x1xi32>
    %37 = arith.cmpi ne, %33, %36 : vector<4x1xi32>
    %c16_19 = arith.constant 16 : index
    %c0_20 = arith.constant 0 : index
    %38 = vector.load %arg8[%c16_19, %c0_20] : memref<32x48xbf16, #tpu.memory_space<vmem>>, vector<4x48xbf16>
    %c0_21 = arith.constant 0 : index
    %c0_22 = arith.constant 0 : index
    %39 = vector.load %arg4[%c0_21, %c0_22] : memref<48x384xbf16, #tpu.memory_space<vmem>>, vector<48x384xbf16>
    %cst_23 = arith.constant dense<0.000000e+00> : vector<4x384xf32>
    %40 = tpu.matmul %38, %39, %cst_23 {dimension_numbers = #tpu.dot_dimension_numbers<[1], [0], [0], [1], [0, 0, 1, 1], [], []>} : vector<4x48xbf16>, vector<48x384xbf16>, vector<4x384xf32> -> vector<4x384xf32>
    %cst_24 = arith.constant 0.000000e+00 : f32
    %41 = vector.broadcast %cst_24 : f32 to vector<4x192xf32>
    %c13 = arith.constant 13 : index
    %c0_25 = arith.constant 0 : index
    %42 = vector.load %arg8[%c13, %c0_25] : memref<32x48xbf16, #tpu.memory_space<vmem>>, vector<4x48xbf16>
    %cst_26 = arith.constant 0.000000e+00 : bf16
    %43 = vector.broadcast %cst_26 : bf16 to vector<4x48xbf16>
    %44 = vector.shape_cast %35 : vector<4x1xi1> to vector<4x1xi1>
    %45 = vector.broadcast %44 : vector<4x1xi1> to vector<4x48xi1>
    %46 = arith.select %45, %42, %43 : vector<4x48xi1>, vector<4x48xbf16>
    %c0_27 = arith.constant 0 : index
    %c0_28 = arith.constant 0 : index
    %c0_29 = arith.constant 0 : index
    %47 = vector.load %arg6[%c0_27, %c0_28, %c0_29] : memref<8x48x192xbf16, #tpu.memory_space<vmem>>, vector<1x48x192xbf16>
    %48 = vector.shape_cast %47 : vector<1x48x192xbf16> to vector<48x192xbf16>
    %cst_30 = arith.constant dense<0.000000e+00> : vector<4x192xf32>
    %49 = tpu.matmul %46, %48, %cst_30 {dimension_numbers = #tpu.dot_dimension_numbers<[1], [0], [0], [1], [0, 0, 1, 1], [], []>} : vector<4x48xbf16>, vector<48x192xbf16>, vector<4x192xf32> -> vector<4x192xf32>
    %50 = arith.addf %41, %49 : vector<4x192xf32>
    %c14 = arith.constant 14 : index
    %c0_31 = arith.constant 0 : index
    %51 = vector.load %arg8[%c14, %c0_31] : memref<32x48xbf16, #tpu.memory_space<vmem>>, vector<4x48xbf16>
    %c1 = arith.constant 1 : index
    %c0_32 = arith.constant 0 : index
    %c0_33 = arith.constant 0 : index
    %52 = vector.load %arg6[%c1, %c0_32, %c0_33] : memref<8x48x192xbf16, #tpu.memory_space<vmem>>, vector<1x48x192xbf16>
    %53 = vector.shape_cast %52 : vector<1x48x192xbf16> to vector<48x192xbf16>
    %cst_34 = arith.constant dense<0.000000e+00> : vector<4x192xf32>
    %54 = tpu.matmul %51, %53, %cst_34 {dimension_numbers = #tpu.dot_dimension_numbers<[1], [0], [0], [1], [0, 0, 1, 1], [], []>} : vector<4x48xbf16>, vector<48x192xbf16>, vector<4x192xf32> -> vector<4x192xf32>
    %55 = arith.addf %50, %54 : vector<4x192xf32>
    %c15 = arith.constant 15 : index
    %c0_35 = arith.constant 0 : index
    %56 = vector.load %arg8[%c15, %c0_35] : memref<32x48xbf16, #tpu.memory_space<vmem>>, vector<4x48xbf16>
    %cst_36 = arith.constant 0.000000e+00 : bf16
    %57 = vector.broadcast %cst_36 : bf16 to vector<4x48xbf16>
    %58 = vector.shape_cast %37 : vector<4x1xi1> to vector<4x1xi1>
    %59 = vector.broadcast %58 : vector<4x1xi1> to vector<4x48xi1>
    %60 = arith.select %59, %56, %57 : vector<4x48xi1>, vector<4x48xbf16>
    %c2 = arith.constant 2 : index
    %c0_37 = arith.constant 0 : index
    %c0_38 = arith.constant 0 : index
    %61 = vector.load %arg6[%c2, %c0_37, %c0_38] : memref<8x48x192xbf16, #tpu.memory_space<vmem>>, vector<1x48x192xbf16>
    %62 = vector.shape_cast %61 : vector<1x48x192xbf16> to vector<48x192xbf16>
    %cst_39 = arith.constant dense<0.000000e+00> : vector<4x192xf32>
    %63 = tpu.matmul %60, %62, %cst_39 {dimension_numbers = #tpu.dot_dimension_numbers<[1], [0], [0], [1], [0, 0, 1, 1], [], []>} : vector<4x48xbf16>, vector<48x192xbf16>, vector<4x192xf32> -> vector<4x192xf32>
    %64 = arith.addf %55, %63 : vector<4x192xf32>
    %c15_40 = arith.constant 15 : index
    %c0_41 = arith.constant 0 : index
    %65 = vector.load %arg8[%c15_40, %c0_41] : memref<32x48xbf16, #tpu.memory_space<vmem>>, vector<4x48xbf16>
    %cst_42 = arith.constant 0.000000e+00 : bf16
    %66 = vector.broadcast %cst_42 : bf16 to vector<4x48xbf16>
    %67 = vector.shape_cast %35 : vector<4x1xi1> to vector<4x1xi1>
    %68 = vector.broadcast %67 : vector<4x1xi1> to vector<4x48xi1>
    %69 = arith.select %68, %65, %66 : vector<4x48xi1>, vector<4x48xbf16>
    %c3 = arith.constant 3 : index
    %c0_43 = arith.constant 0 : index
    %c0_44 = arith.constant 0 : index
    %70 = vector.load %arg6[%c3, %c0_43, %c0_44] : memref<8x48x192xbf16, #tpu.memory_space<vmem>>, vector<1x48x192xbf16>
    %71 = vector.shape_cast %70 : vector<1x48x192xbf16> to vector<48x192xbf16>
    %cst_45 = arith.constant dense<0.000000e+00> : vector<4x192xf32>
    %72 = tpu.matmul %69, %71, %cst_45 {dimension_numbers = #tpu.dot_dimension_numbers<[1], [0], [0], [1], [0, 0, 1, 1], [], []>} : vector<4x48xbf16>, vector<48x192xbf16>, vector<4x192xf32> -> vector<4x192xf32>
    %73 = arith.addf %64, %72 : vector<4x192xf32>
    %c17 = arith.constant 17 : index
    %c0_46 = arith.constant 0 : index
    %74 = vector.load %arg8[%c17, %c0_46] : memref<32x48xbf16, #tpu.memory_space<vmem>>, vector<4x48xbf16>
    %cst_47 = arith.constant 0.000000e+00 : bf16
    %75 = vector.broadcast %cst_47 : bf16 to vector<4x48xbf16>
    %76 = vector.shape_cast %37 : vector<4x1xi1> to vector<4x1xi1>
    %77 = vector.broadcast %76 : vector<4x1xi1> to vector<4x48xi1>
    %78 = arith.select %77, %74, %75 : vector<4x48xi1>, vector<4x48xbf16>
    %c4 = arith.constant 4 : index
    %c0_48 = arith.constant 0 : index
    %c0_49 = arith.constant 0 : index
    %79 = vector.load %arg6[%c4, %c0_48, %c0_49] : memref<8x48x192xbf16, #tpu.memory_space<vmem>>, vector<1x48x192xbf16>
    %80 = vector.shape_cast %79 : vector<1x48x192xbf16> to vector<48x192xbf16>
    %cst_50 = arith.constant dense<0.000000e+00> : vector<4x192xf32>
    %81 = tpu.matmul %78, %80, %cst_50 {dimension_numbers = #tpu.dot_dimension_numbers<[1], [0], [0], [1], [0, 0, 1, 1], [], []>} : vector<4x48xbf16>, vector<48x192xbf16>, vector<4x192xf32> -> vector<4x192xf32>
    %82 = arith.addf %73, %81 : vector<4x192xf32>
    %c17_51 = arith.constant 17 : index
    %c0_52 = arith.constant 0 : index
    %83 = vector.load %arg8[%c17_51, %c0_52] : memref<32x48xbf16, #tpu.memory_space<vmem>>, vector<4x48xbf16>
    %cst_53 = arith.constant 0.000000e+00 : bf16
    %84 = vector.broadcast %cst_53 : bf16 to vector<4x48xbf16>
    %85 = vector.shape_cast %35 : vector<4x1xi1> to vector<4x1xi1>
    %86 = vector.broadcast %85 : vector<4x1xi1> to vector<4x48xi1>
    %87 = arith.select %86, %83, %84 : vector<4x48xi1>, vector<4x48xbf16>
    %c5 = arith.constant 5 : index
    %c0_54 = arith.constant 0 : index
    %c0_55 = arith.constant 0 : index
    %88 = vector.load %arg6[%c5, %c0_54, %c0_55] : memref<8x48x192xbf16, #tpu.memory_space<vmem>>, vector<1x48x192xbf16>
    %89 = vector.shape_cast %88 : vector<1x48x192xbf16> to vector<48x192xbf16>
    %cst_56 = arith.constant dense<0.000000e+00> : vector<4x192xf32>
    %90 = tpu.matmul %87, %89, %cst_56 {dimension_numbers = #tpu.dot_dimension_numbers<[1], [0], [0], [1], [0, 0, 1, 1], [], []>} : vector<4x48xbf16>, vector<48x192xbf16>, vector<4x192xf32> -> vector<4x192xf32>
    %91 = arith.addf %82, %90 : vector<4x192xf32>
    %c18 = arith.constant 18 : index
    %c0_57 = arith.constant 0 : index
    %92 = vector.load %arg8[%c18, %c0_57] : memref<32x48xbf16, #tpu.memory_space<vmem>>, vector<4x48xbf16>
    %c6 = arith.constant 6 : index
    %c0_58 = arith.constant 0 : index
    %c0_59 = arith.constant 0 : index
    %93 = vector.load %arg6[%c6, %c0_58, %c0_59] : memref<8x48x192xbf16, #tpu.memory_space<vmem>>, vector<1x48x192xbf16>
    %94 = vector.shape_cast %93 : vector<1x48x192xbf16> to vector<48x192xbf16>
    %cst_60 = arith.constant dense<0.000000e+00> : vector<4x192xf32>
    %95 = tpu.matmul %92, %94, %cst_60 {dimension_numbers = #tpu.dot_dimension_numbers<[1], [0], [0], [1], [0, 0, 1, 1], [], []>} : vector<4x48xbf16>, vector<48x192xbf16>, vector<4x192xf32> -> vector<4x192xf32>
    %96 = arith.addf %91, %95 : vector<4x192xf32>
    %c19 = arith.constant 19 : index
    %c0_61 = arith.constant 0 : index
    %97 = vector.load %arg8[%c19, %c0_61] : memref<32x48xbf16, #tpu.memory_space<vmem>>, vector<4x48xbf16>
    %cst_62 = arith.constant 0.000000e+00 : bf16
    %98 = vector.broadcast %cst_62 : bf16 to vector<4x48xbf16>
    %99 = vector.shape_cast %37 : vector<4x1xi1> to vector<4x1xi1>
    %100 = vector.broadcast %99 : vector<4x1xi1> to vector<4x48xi1>
    %101 = arith.select %100, %97, %98 : vector<4x48xi1>, vector<4x48xbf16>
    %c7 = arith.constant 7 : index
    %c0_63 = arith.constant 0 : index
    %c0_64 = arith.constant 0 : index
    %102 = vector.load %arg6[%c7, %c0_63, %c0_64] : memref<8x48x192xbf16, #tpu.memory_space<vmem>>, vector<1x48x192xbf16>
    %103 = vector.shape_cast %102 : vector<1x48x192xbf16> to vector<48x192xbf16>
    %cst_65 = arith.constant dense<0.000000e+00> : vector<4x192xf32>
    %104 = tpu.matmul %101, %103, %cst_65 {dimension_numbers = #tpu.dot_dimension_numbers<[1], [0], [0], [1], [0, 0, 1, 1], [], []>} : vector<4x48xbf16>, vector<48x192xbf16>, vector<4x192xf32> -> vector<4x192xf32>
    %105 = arith.addf %96, %104 : vector<4x192xf32>
    %cst_66 = arith.constant 0.000000e+00 : f32
    %106 = vector.broadcast %cst_66 : f32 to vector<4x192xf32>
    %107 = tpu.concatenate %106, %105 in 1 : vector<4x192xf32>, vector<4x192xf32> -> vector<4x384xf32>
    %108 = arith.addf %40, %107 : vector<4x384xf32>
    %c0_67 = arith.constant 0 : index
    %c0_68 = arith.constant 0 : index
    %109 = vector.load %arg5[%c0_67, %c0_68] : memref<1x384xf32, #tpu.memory_space<vmem>>, vector<1x384xf32>
    %110 = vector.broadcast %109 : vector<1x384xf32> to vector<4x384xf32>
    %111 = arith.addf %108, %110 : vector<4x384xf32>
    %cst_69 = arith.constant 0.000000e+00 : f32
    %112 = vector.broadcast %cst_69 : f32 to vector<4x384xf32>
    %113 = arith.maximumf %111, %112 : vector<4x384xf32>
    %114 = arith.truncf %113 : vector<4x384xf32> to vector<4x384xbf16>
    %c0_70 = arith.constant 0 : index
    %c0_71 = arith.constant 0 : index
    %c0_72 = arith.constant 0 : index
    %115 = vector.load %arg7[%c0_70, %c0_71, %c0_72] : memref<1x4x384xbf16, #tpu.memory_space<vmem>>, vector<1x4x384xbf16>
    %116 = vector.shape_cast %115 : vector<1x4x384xbf16> to vector<4x384xbf16>
    %117 = vector.shape_cast %114 : vector<4x384xbf16> to vector<1x4x384xbf16>
    tpu.vector_store %arg7[%c0_70, %c0_71, %c0_72], %117 {strides = array<i32>} : memref<1x4x384xbf16, #tpu.memory_space<vmem>>, vector<1x4x384xbf16>,
    return
  }
  func.func @transform_0(%arg0: i32) -> (i32, i32, i32) {
    %c0_i32 = arith.constant 0 : i32
    %c0_i32_0 = arith.constant 0 : i32
    %c0_i32_1 = arith.constant 0 : i32
    return %arg0, %c0_i32, %c0_i32_0 : i32, i32, i32
  }
  func.func @transform_1(%arg0: i32) -> (i32, i32) {
    %c0_i32 = arith.constant 0 : i32
    %c0_i32_0 = arith.constant 0 : i32
    %c0_i32_1 = arith.constant 0 : i32
    return %c0_i32, %c0_i32_0 : i32, i32
  }
  func.func @transform_2(%arg0: i32) -> (i32, i32) {
    %c0_i32 = arith.constant 0 : i32
    %c0_i32_0 = arith.constant 0 : i32
    %c0_i32_1 = arith.constant 0 : i32
    return %c0_i32, %c0_i32_0 : i32, i32
  }
  func.func @transform_3(%arg0: i32) -> (i32, i32) {
    %c0_i32 = arith.constant 0 : i32
    %c0_i32_0 = arith.constant 0 : i32
    %c0_i32_1 = arith.constant 0 : i32
    return %c0_i32, %c0_i32_0 : i32, i32
  }
  func.func @transform_4(%arg0: i32) -> (i32, i32) {
    %c0_i32 = arith.constant 0 : i32
    %c0_i32_0 = arith.constant 0 : i32
    %c0_i32_1 = arith.constant 0 : i32
    return %c0_i32, %c0_i32_0 : i32, i32
  }
  func.func @transform_5(%arg0: i32) -> (i32, i32, i32) {
    %c0_i32 = arith.constant 0 : i32
    %c0_i32_0 = arith.constant 0 : i32
    %c0_i32_1 = arith.constant 0 : i32
    %c0_i32_2 = arith.constant 0 : i32
    return %c0_i32, %c0_i32_0, %c0_i32_1 : i32, i32, i32
  }
  func.func @transform_6(%arg0: i32) -> (i32, i32, i32) {
    %c0_i32 = arith.constant 0 : i32
    %c0_i32_0 = arith.constant 0 : i32
    %c0_i32_1 = arith.constant 0 : i32
    return %arg0, %c0_i32, %c0_i32_0 : i32, i32, i32
  }
}

module attributes {stable_mosaic.version = 11 : i64} {
  func.func @_fire_kernel(%arg0: i32, %arg1: memref<1x4x384xbf16, #tpu.memory_space<vmem>>, %arg2: memref<384x48xbf16, #tpu.memory_space<vmem>>, %arg3: memref<1x48xf32, #tpu.memory_space<vmem>>, %arg4: memref<48x384xbf16, #tpu.memory_space<vmem>>, %arg5: memref<1x384xf32, #tpu.memory_space<vmem>>, %arg6: memref<8x48x192xbf16, #tpu.memory_space<vmem>>, %arg7: memref<1x4x384xbf16, #tpu.memory_space<vmem>>, %arg8: memref<32x48xbf16, #tpu.memory_space<vmem>>) attributes {dimension_semantics = [#tpu.dimension_semantics<parallel>], iteration_bounds = array<i64: 2>, scalar_prefetch = 0 : i64, scratch_operands = 1 : i64, tpu.core_type = #tpu.core_type<tc>, window_params = [{transform_indices = @transform_0, window_bounds = array<i64: 1, 4, 384>}, {pipeline_mode = #tpu.pipeline_mode<synchronous>, transform_indices = @transform_1, window_bounds = array<i64: 384, 48>}, {pipeline_mode = #tpu.pipeline_mode<synchronous>, transform_indices = @transform_2, window_bounds = array<i64: 1, 48>}, {pipeline_mode = #tpu.pipeline_mode<synchronous>, transform_indices = @transform_3, window_bounds = array<i64: 48, 384>}, {pipeline_mode = #tpu.pipeline_mode<synchronous>, transform_indices = @transform_4, window_bounds = array<i64: 1, 384>}, {pipeline_mode = #tpu.pipeline_mode<synchronous>, transform_indices = @transform_5, window_bounds = array<i64: 8, 48, 192>}, {transform_indices = @transform_6, window_bounds = array<i64: 1, 4, 384>}]} {
    %cst = arith.constant 0.000000e+00 : bf16
    %0 = vector.broadcast %cst : bf16 to vector<16x48xbf16>
    %c0 = arith.constant 0 : index
    %c0_0 = arith.constant 0 : index
    %1 = vector.load %arg8[%c0, %c0_0] : memref<32x48xbf16, #tpu.memory_space<vmem>>, vector<16x48xbf16>
    tpu.vector_store %arg8[%c0, %c0_0], %0 {strides = array<i32>} : memref<32x48xbf16, #tpu.memory_space<vmem>>, vector<16x48xbf16>,
    %cst_1 = arith.constant 0.000000e+00 : bf16
    %2 = vector.broadcast %cst_1 : bf16 to vector<12x48xbf16>
    %c20 = arith.constant 20 : index
    %c0_2 = arith.constant 0 : index
    %3 = vector.load %arg8[%c20, %c0_2] : memref<32x48xbf16, #tpu.memory_space<vmem>>, vector<12x48xbf16>
    tpu.vector_store %arg8[%c20, %c0_2], %2 {strides = array<i32>} : memref<32x48xbf16, #tpu.memory_space<vmem>>, vector<12x48xbf16>,
    %c0_3 = arith.constant 0 : index
    %c0_4 = arith.constant 0 : index
    %c0_5 = arith.constant 0 : index
    %4 = vector.load %arg1[%c0_3, %c0_4, %c0_5] : memref<1x4x384xbf16, #tpu.memory_space<vmem>>, vector<1x4x384xbf16>
    %5 = vector.shape_cast %4 : vector<1x4x384xbf16> to vector<4x384xbf16>
    %c0_6 = arith.constant 0 : index
    %c0_7 = arith.constant 0 : index
    %6 = vector.load %arg2[%c0_6, %c0_7] : memref<384x48xbf16, #tpu.memory_space<vmem>>, vector<384x48xbf16>
    %cst_8 = arith.constant dense<0.000000e+00> : vector<4x48xf32>
    %7 = tpu.matmul %5, %6, %cst_8 {dimension_numbers = #tpu.dot_dimension_numbers<[1], [0], [0], [1], [0, 0, 1, 1], [], []>} : vector<4x384xbf16>, vector<384x48xbf16>, vector<4x48xf32> -> vector<4x48xf32>
    %c0_9 = arith.constant 0 : index
    %c0_10 = arith.constant 0 : index
    %8 = vector.load %arg3[%c0_9, %c0_10] : memref<1x48xf32, #tpu.memory_space<vmem>>, vector<1x48xf32>
    %9 = vector.broadcast %8 : vector<1x48xf32> to vector<4x48xf32>
    %10 = arith.addf %7, %9 : vector<4x48xf32>
    %cst_11 = arith.constant 0.000000e+00 : f32
    %11 = vector.broadcast %cst_11 : f32 to vector<4x48xf32>
    %12 = arith.maximumf %10, %11 : vector<4x48xf32>
    %13 = arith.truncf %12 : vector<4x48xf32> to vector<4x48xbf16>
    %c16 = arith.constant 16 : index
    %c0_12 = arith.constant 0 : index
    %14 = vector.load %arg8[%c16, %c0_12] : memref<32x48xbf16, #tpu.memory_space<vmem>>, vector<4x48xbf16>
    tpu.vector_store %arg8[%c16, %c0_12], %13 {strides = array<i32>} : memref<32x48xbf16, #tpu.memory_space<vmem>>, vector<4x48xbf16>,
    %15 = tpu.iota {dimensions = array<i32: 0>} : vector<4x1xi32>
    %c0_i32 = arith.constant 0 : i32
    %16 = vector.broadcast %c0_i32 : i32 to vector<4x1xi32>
    %17 = arith.addi %15, %16 : vector<4x1xi32>
    %c2_i32 = arith.constant 2 : i32
    %c0_i32_13 = arith.constant 0 : i32
    %18 = arith.cmpi eq, %c2_i32, %c0_i32_13 : i32
    %c1_i32 = arith.constant 1 : i32
    %19 = arith.select %18, %c1_i32, %c2_i32 : i32
    %20 = vector.broadcast %19 : i32 to vector<4x1xi32>
    %21 = arith.remsi %17, %20 : vector<4x1xi32>
    %c0_i32_14 = arith.constant 0 : i32
    %22 = vector.broadcast %c0_i32_14 : i32 to vector<4x1xi32>
    %23 = arith.cmpi ne, %21, %22 : vector<4x1xi32>
    %c0_i32_15 = arith.constant 0 : i32
    %24 = vector.broadcast %c0_i32_15 : i32 to vector<4x1xi32>
    %25 = arith.cmpi slt, %21, %24 : vector<4x1xi32>
    %c0_i32_16 = arith.constant 0 : i32
    %26 = arith.cmpi slt, %19, %c0_i32_16 : i32
    %27 = vector.broadcast %26 : i1 to vector<4x1xi1>
    %28 = vector.broadcast %27 : vector<4x1xi1> to vector<4x1xi1>
    %29 = arith.xori %25, %28 : vector<4x1xi1>
    %30 = arith.andi %29, %23 : vector<4x1xi1>
    %31 = vector.broadcast %19 : i32 to vector<4x1xi32>
    %32 = arith.addi %21, %31 : vector<4x1xi32>
    %33 = arith.select %30, %32, %21 : vector<4x1xi1>, vector<4x1xi32>
    %c0_i32_17 = arith.constant 0 : i32
    %34 = vector.broadcast %c0_i32_17 : i32 to vector<4x1xi32>
    %35 = arith.cmpi ne, %33, %34 : vector<4x1xi32>
    %c1_i32_18 = arith.constant 1 : i32
    %36 = vector.broadcast %c1_i32_18 : i32 to vector<4x1xi32>
    %37 = arith.cmpi ne, %33, %36 : vector<4x1xi32>
    %c16_19 = arith.constant 16 : index
    %c0_20 = arith.constant 0 : index
    %38 = vector.load %arg8[%c16_19, %c0_20] : memref<32x48xbf16, #tpu.memory_space<vmem>>, vector<4x48xbf16>
    %c0_21 = arith.constant 0 : index
    %c0_22 = arith.constant 0 : index
    %39 = vector.load %arg4[%c0_21, %c0_22] : memref<48x384xbf16, #tpu.memory_space<vmem>>, vector<48x384xbf16>
    %cst_23 = arith.constant dense<0.000000e+00> : vector<4x384xf32>
    %40 = tpu.matmul %38, %39, %cst_23 {dimension_numbers = #tpu.dot_dimension_numbers<[1], [0], [0], [1], [0, 0, 1, 1], [], []>} : vector<4x48xbf16>, vector<48x384xbf16>, vector<4x384xf32> -> vector<4x384xf32>
    %cst_24 = arith.constant 0.000000e+00 : f32
    %41 = vector.broadcast %cst_24 : f32 to vector<4x192xf32>
    %c13 = arith.constant 13 : index
    %c0_25 = arith.constant 0 : index
    %42 = vector.load %arg8[%c13, %c0_25] : memref<32x48xbf16, #tpu.memory_space<vmem>>, vector<4x48xbf16>
    %cst_26 = arith.constant 0.000000e+00 : bf16
    %43 = vector.broadcast %cst_26 : bf16 to vector<4x48xbf16>
    %44 = vector.shape_cast %35 : vector<4x1xi1> to vector<4x1xi1>
    %45 = vector.broadcast %44 : vector<4x1xi1> to vector<4x48xi1>
    %46 = arith.select %45, %42, %43 : vector<4x48xi1>, vector<4x48xbf16>
    %c0_27 = arith.constant 0 : index
    %c0_28 = arith.constant 0 : index
    %c0_29 = arith.constant 0 : index
    %47 = vector.load %arg6[%c0_27, %c0_28, %c0_29] : memref<8x48x192xbf16, #tpu.memory_space<vmem>>, vector<1x48x192xbf16>
    %48 = vector.shape_cast %47 : vector<1x48x192xbf16> to vector<48x192xbf16>
    %cst_30 = arith.constant dense<0.000000e+00> : vector<4x192xf32>
    %49 = tpu.matmul %46, %48, %cst_30 {dimension_numbers = #tpu.dot_dimension_numbers<[1], [0], [0], [1], [0, 0, 1, 1], [], []>} : vector<4x48xbf16>, vector<48x192xbf16>, vector<4x192xf32> -> vector<4x192xf32>
    %50 = arith.addf %41, %49 : vector<4x192xf32>
    %c14 = arith.constant 14 : index
    %c0_31 = arith.constant 0 : index
    %51 = vector.load %arg8[%c14, %c0_31] : memref<32x48xbf16, #tpu.memory_space<vmem>>, vector<4x48xbf16>
    %c1 = arith.constant 1 : index
    %c0_32 = arith.constant 0 : index
    %c0_33 = arith.constant 0 : index
    %52 = vector.load %arg6[%c1, %c0_32, %c0_33] : memref<8x48x192xbf16, #tpu.memory_space<vmem>>, vector<1x48x192xbf16>
    %53 = vector.shape_cast %52 : vector<1x48x192xbf16> to vector<48x192xbf16>
    %cst_34 = arith.constant dense<0.000000e+00> : vector<4x192xf32>
    %54 = tpu.matmul %51, %53, %cst_34 {dimension_numbers = #tpu.dot_dimension_numbers<[1], [0], [0], [1], [0, 0, 1, 1], [], []>} : vector<4x48xbf16>, vector<48x192xbf16>, vector<4x192xf32> -> vector<4x192xf32>
    %55 = arith.addf %50, %54 : vector<4x192xf32>
    %c15 = arith.constant 15 : index
    %c0_35 = arith.constant 0 : index
    %56 = vector.load %arg8[%c15, %c0_35] : memref<32x48xbf16, #tpu.memory_space<vmem>>, vector<4x48xbf16>
    %cst_36 = arith.constant 0.000000e+00 : bf16
    %57 = vector.broadcast %cst_36 : bf16 to vector<4x48xbf16>
    %58 = vector.shape_cast %37 : vector<4x1xi1> to vector<4x1xi1>
    %59 = vector.broadcast %58 : vector<4x1xi1> to vector<4x48xi1>
    %60 = arith.select %59, %56, %57 : vector<4x48xi1>, vector<4x48xbf16>
    %c2 = arith.constant 2 : index
    %c0_37 = arith.constant 0 : index
    %c0_38 = arith.constant 0 : index
    %61 = vector.load %arg6[%c2, %c0_37, %c0_38] : memref<8x48x192xbf16, #tpu.memory_space<vmem>>, vector<1x48x192xbf16>
    %62 = vector.shape_cast %61 : vector<1x48x192xbf16> to vector<48x192xbf16>
    %cst_39 = arith.constant dense<0.000000e+00> : vector<4x192xf32>
    %63 = tpu.matmul %60, %62, %cst_39 {dimension_numbers = #tpu.dot_dimension_numbers<[1], [0], [0], [1], [0, 0, 1, 1], [], []>} : vector<4x48xbf16>, vector<48x192xbf16>, vector<4x192xf32> -> vector<4x192xf32>
    %64 = arith.addf %55, %63 : vector<4x192xf32>
    %c15_40 = arith.constant 15 : index
    %c0_41 = arith.constant 0 : index
    %65 = vector.load %arg8[%c15_40, %c0_41] : memref<32x48xbf16, #tpu.memory_space<vmem>>, vector<4x48xbf16>
    %cst_42 = arith.constant 0.000000e+00 : bf16
    %66 = vector.broadcast %cst_42 : bf16 to vector<4x48xbf16>
    %67 = vector.shape_cast %35 : vector<4x1xi1> to vector<4x1xi1>
    %68 = vector.broadcast %67 : vector<4x1xi1> to vector<4x48xi1>
    %69 = arith.select %68, %65, %66 : vector<4x48xi1>, vector<4x48xbf16>
    %c3 = arith.constant 3 : index
    %c0_43 = arith.constant 0 : index
    %c0_44 = arith.constant 0 : index
    %70 = vector.load %arg6[%c3, %c0_43, %c0_44] : memref<8x48x192xbf16, #tpu.memory_space<vmem>>, vector<1x48x192xbf16>
    %71 = vector.shape_cast %70 : vector<1x48x192xbf16> to vector<48x192xbf16>
    %cst_45 = arith.constant dense<0.000000e+00> : vector<4x192xf32>
    %72 = tpu.matmul %69, %71, %cst_45 {dimension_numbers = #tpu.dot_dimension_numbers<[1], [0], [0], [1], [0, 0, 1, 1], [], []>} : vector<4x48xbf16>, vector<48x192xbf16>, vector<4x192xf32> -> vector<4x192xf32>
    %73 = arith.addf %64, %72 : vector<4x192xf32>
    %c17 = arith.constant 17 : index
    %c0_46 = arith.constant 0 : index
    %74 = vector.load %arg8[%c17, %c0_46] : memref<32x48xbf16, #tpu.memory_space<vmem>>, vector<4x48xbf16>
    %cst_47 = arith.constant 0.000000e+00 : bf16
    %75 = vector.broadcast %cst_47 : bf16 to vector<4x48xbf16>
    %76 = vector.shape_cast %37 : vector<4x1xi1> to vector<4x1xi1>
    %77 = vector.broadcast %76 : vector<4x1xi1> to vector<4x48xi1>
    %78 = arith.select %77, %74, %75 : vector<4x48xi1>, vector<4x48xbf16>
    %c4 = arith.constant 4 : index
    %c0_48 = arith.constant 0 : index
    %c0_49 = arith.constant 0 : index
    %79 = vector.load %arg6[%c4, %c0_48, %c0_49] : memref<8x48x192xbf16, #tpu.memory_space<vmem>>, vector<1x48x192xbf16>
    %80 = vector.shape_cast %79 : vector<1x48x192xbf16> to vector<48x192xbf16>
    %cst_50 = arith.constant dense<0.000000e+00> : vector<4x192xf32>
    %81 = tpu.matmul %78, %80, %cst_50 {dimension_numbers = #tpu.dot_dimension_numbers<[1], [0], [0], [1], [0, 0, 1, 1], [], []>} : vector<4x48xbf16>, vector<48x192xbf16>, vector<4x192xf32> -> vector<4x192xf32>
    %82 = arith.addf %73, %81 : vector<4x192xf32>
    %c17_51 = arith.constant 17 : index
    %c0_52 = arith.constant 0 : index
    %83 = vector.load %arg8[%c17_51, %c0_52] : memref<32x48xbf16, #tpu.memory_space<vmem>>, vector<4x48xbf16>
    %cst_53 = arith.constant 0.000000e+00 : bf16
    %84 = vector.broadcast %cst_53 : bf16 to vector<4x48xbf16>
    %85 = vector.shape_cast %35 : vector<4x1xi1> to vector<4x1xi1>
    %86 = vector.broadcast %85 : vector<4x1xi1> to vector<4x48xi1>
    %87 = arith.select %86, %83, %84 : vector<4x48xi1>, vector<4x48xbf16>
    %c5 = arith.constant 5 : index
    %c0_54 = arith.constant 0 : index
    %c0_55 = arith.constant 0 : index
    %88 = vector.load %arg6[%c5, %c0_54, %c0_55] : memref<8x48x192xbf16, #tpu.memory_space<vmem>>, vector<1x48x192xbf16>
    %89 = vector.shape_cast %88 : vector<1x48x192xbf16> to vector<48x192xbf16>
    %cst_56 = arith.constant dense<0.000000e+00> : vector<4x192xf32>
    %90 = tpu.matmul %87, %89, %cst_56 {dimension_numbers = #tpu.dot_dimension_numbers<[1], [0], [0], [1], [0, 0, 1, 1], [], []>} : vector<4x48xbf16>, vector<48x192xbf16>, vector<4x192xf32> -> vector<4x192xf32>
    %91 = arith.addf %82, %90 : vector<4x192xf32>
    %c18 = arith.constant 18 : index
    %c0_57 = arith.constant 0 : index
    %92 = vector.load %arg8[%c18, %c0_57] : memref<32x48xbf16, #tpu.memory_space<vmem>>, vector<4x48xbf16>
    %c6 = arith.constant 6 : index
    %c0_58 = arith.constant 0 : index
    %c0_59 = arith.constant 0 : index
    %93 = vector.load %arg6[%c6, %c0_58, %c0_59] : memref<8x48x192xbf16, #tpu.memory_space<vmem>>, vector<1x48x192xbf16>
    %94 = vector.shape_cast %93 : vector<1x48x192xbf16> to vector<48x192xbf16>
    %cst_60 = arith.constant dense<0.000000e+00> : vector<4x192xf32>
    %95 = tpu.matmul %92, %94, %cst_60 {dimension_numbers = #tpu.dot_dimension_numbers<[1], [0], [0], [1], [0, 0, 1, 1], [], []>} : vector<4x48xbf16>, vector<48x192xbf16>, vector<4x192xf32> -> vector<4x192xf32>
    %96 = arith.addf %91, %95 : vector<4x192xf32>
    %c19 = arith.constant 19 : index
    %c0_61 = arith.constant 0 : index
    %97 = vector.load %arg8[%c19, %c0_61] : memref<32x48xbf16, #tpu.memory_space<vmem>>, vector<4x48xbf16>
    %cst_62 = arith.constant 0.000000e+00 : bf16
    %98 = vector.broadcast %cst_62 : bf16 to vector<4x48xbf16>
    %99 = vector.shape_cast %37 : vector<4x1xi1> to vector<4x1xi1>
    %100 = vector.broadcast %99 : vector<4x1xi1> to vector<4x48xi1>
    %101 = arith.select %100, %97, %98 : vector<4x48xi1>, vector<4x48xbf16>
    %c7 = arith.constant 7 : index
    %c0_63 = arith.constant 0 : index
    %c0_64 = arith.constant 0 : index
    %102 = vector.load %arg6[%c7, %c0_63, %c0_64] : memref<8x48x192xbf16, #tpu.memory_space<vmem>>, vector<1x48x192xbf16>
    %103 = vector.shape_cast %102 : vector<1x48x192xbf16> to vector<48x192xbf16>
    %cst_65 = arith.constant dense<0.000000e+00> : vector<4x192xf32>
    %104 = tpu.matmul %101, %103, %cst_65 {dimension_numbers = #tpu.dot_dimension_numbers<[1], [0], [0], [1], [0, 0, 1, 1], [], []>} : vector<4x48xbf16>, vector<48x192xbf16>, vector<4x192xf32> -> vector<4x192xf32>
    %105 = arith.addf %96, %104 : vector<4x192xf32>
    %cst_66 = arith.constant 0.000000e+00 : f32
    %106 = vector.broadcast %cst_66 : f32 to vector<4x192xf32>
    %107 = tpu.concatenate %106, %105 in 1 : vector<4x192xf32>, vector<4x192xf32> -> vector<4x384xf32>
    %108 = arith.addf %40, %107 : vector<4x384xf32>
    %c0_67 = arith.constant 0 : index
    %c0_68 = arith.constant 0 : index
    %109 = vector.load %arg5[%c0_67, %c0_68] : memref<1x384xf32, #tpu.memory_space<vmem>>, vector<1x384xf32>
    %110 = vector.broadcast %109 : vector<1x384xf32> to vector<4x384xf32>
    %111 = arith.addf %108, %110 : vector<4x384xf32>
    %cst_69 = arith.constant 0.000000e+00 : f32
    %112 = vector.broadcast %cst_69 : f32 to vector<4x384xf32>
    %113 = arith.maximumf %111, %112 : vector<4x384xf32>
    %114 = arith.truncf %113 : vector<4x384xf32> to vector<4x384xbf16>
    %c0_70 = arith.constant 0 : index
    %c0_71 = arith.constant 0 : index
    %c0_72 = arith.constant 0 : index
    %115 = vector.load %arg7[%c0_70, %c0_71, %c0_72] : memref<1x4x384xbf16, #tpu.memory_space<vmem>>, vector<1x4x384xbf16>
    %116 = vector.shape_cast %115 : vector<1x4x384xbf16> to vector<4x384xbf16>
    %117 = vector.shape_cast %114 : vector<4x384xbf16> to vector<1x4x384xbf16>
    tpu.vector_store %arg7[%c0_70, %c0_71, %c0_72], %117 {strides = array<i32>} : memref<1x4x384xbf16, #tpu.memory_space<vmem>>, vector<1x4x384xbf16>,
    return
  }
  func.func @transform_0(%arg0: i32) -> (i32, i32, i32) {
    %c0_i32 = arith.constant 0 : i32
    %c0_i32_0 = arith.constant 0 : i32
    %c0_i32_1 = arith.constant 0 : i32
    return %arg0, %c0_i32, %c0_i32_0 : i32, i32, i32
  }
  func.func @transform_1(%arg0: i32) -> (i32, i32) {
    %c0_i32 = arith.constant 0 : i32
    %c0_i32_0 = arith.constant 0 : i32
    %c0_i32_1 = arith.constant 0 : i32
    return %c0_i32, %c0_i32_0 : i32, i32
  }
  func.func @transform_2(%arg0: i32) -> (i32, i32) {
    %c0_i32 = arith.constant 0 : i32
    %c0_i32_0 = arith.constant 0 : i32
    %c0_i32_1 = arith.constant 0 : i32
    return %c0_i32, %c0_i32_0 : i32, i32
  }
  func.func @transform_3(%arg0: i32) -> (i32, i32) {
    %c0_i32 = arith.constant 0 : i32
    %c0_i32_0 = arith.constant 0 : i32
    %c0_i32_1 = arith.constant 0 : i32
    return %c0_i32, %c0_i32_0 : i32, i32
  }
  func.func @transform_4(%arg0: i32) -> (i32, i32) {
    %c0_i32 = arith.constant 0 : i32
    %c0_i32_0 = arith.constant 0 : i32
    %c0_i32_1 = arith.constant 0 : i32
    return %c0_i32, %c0_i32_0 : i32, i32
  }
  func.func @transform_5(%arg0: i32) -> (i32, i32, i32) {
    %c0_i32 = arith.constant 0 : i32
    %c0_i32_0 = arith.constant 0 : i32
    %c0_i32_1 = arith.constant 0 : i32
    %c0_i32_2 = arith.constant 0 : i32
    return %c0_i32, %c0_i32_0, %c0_i32_1 : i32, i32, i32
  }
  func.func @transform_6(%arg0: i32) -> (i32, i32, i32) {
    %c0_i32 = arith.constant 0 : i32
    %c0_i32_0 = arith.constant 0 : i32
    %c0_i32_1 = arith.constant 0 : i32
    return %arg0, %c0_i32, %c0_i32_0 : i32, i32, i32
  }
}

module attributes {stable_mosaic.version = 11 : i64} {
  func.func @_fire_kernel(%arg0: i32, %arg1: memref<1x4x384xbf16, #tpu.memory_space<vmem>>, %arg2: memref<384x64xbf16, #tpu.memory_space<vmem>>, %arg3: memref<1x64xf32, #tpu.memory_space<vmem>>, %arg4: memref<64x512xbf16, #tpu.memory_space<vmem>>, %arg5: memref<1x512xf32, #tpu.memory_space<vmem>>, %arg6: memref<8x64x256xbf16, #tpu.memory_space<vmem>>, %arg7: memref<1x4x512xbf16, #tpu.memory_space<vmem>>, %arg8: memref<32x64xbf16, #tpu.memory_space<vmem>>) attributes {dimension_semantics = [#tpu.dimension_semantics<parallel>], iteration_bounds = array<i64: 2>, scalar_prefetch = 0 : i64, scratch_operands = 1 : i64, tpu.core_type = #tpu.core_type<tc>, window_params = [{transform_indices = @transform_0, window_bounds = array<i64: 1, 4, 384>}, {pipeline_mode = #tpu.pipeline_mode<synchronous>, transform_indices = @transform_1, window_bounds = array<i64: 384, 64>}, {pipeline_mode = #tpu.pipeline_mode<synchronous>, transform_indices = @transform_2, window_bounds = array<i64: 1, 64>}, {pipeline_mode = #tpu.pipeline_mode<synchronous>, transform_indices = @transform_3, window_bounds = array<i64: 64, 512>}, {pipeline_mode = #tpu.pipeline_mode<synchronous>, transform_indices = @transform_4, window_bounds = array<i64: 1, 512>}, {pipeline_mode = #tpu.pipeline_mode<synchronous>, transform_indices = @transform_5, window_bounds = array<i64: 8, 64, 256>}, {transform_indices = @transform_6, window_bounds = array<i64: 1, 4, 512>}]} {
    %cst = arith.constant 0.000000e+00 : bf16
    %0 = vector.broadcast %cst : bf16 to vector<16x64xbf16>
    %c0 = arith.constant 0 : index
    %c0_0 = arith.constant 0 : index
    %1 = vector.load %arg8[%c0, %c0_0] : memref<32x64xbf16, #tpu.memory_space<vmem>>, vector<16x64xbf16>
    tpu.vector_store %arg8[%c0, %c0_0], %0 {strides = array<i32>} : memref<32x64xbf16, #tpu.memory_space<vmem>>, vector<16x64xbf16>,
    %cst_1 = arith.constant 0.000000e+00 : bf16
    %2 = vector.broadcast %cst_1 : bf16 to vector<12x64xbf16>
    %c20 = arith.constant 20 : index
    %c0_2 = arith.constant 0 : index
    %3 = vector.load %arg8[%c20, %c0_2] : memref<32x64xbf16, #tpu.memory_space<vmem>>, vector<12x64xbf16>
    tpu.vector_store %arg8[%c20, %c0_2], %2 {strides = array<i32>} : memref<32x64xbf16, #tpu.memory_space<vmem>>, vector<12x64xbf16>,
    %c0_3 = arith.constant 0 : index
    %c0_4 = arith.constant 0 : index
    %c0_5 = arith.constant 0 : index
    %4 = vector.load %arg1[%c0_3, %c0_4, %c0_5] : memref<1x4x384xbf16, #tpu.memory_space<vmem>>, vector<1x4x384xbf16>
    %5 = vector.shape_cast %4 : vector<1x4x384xbf16> to vector<4x384xbf16>
    %c0_6 = arith.constant 0 : index
    %c0_7 = arith.constant 0 : index
    %6 = vector.load %arg2[%c0_6, %c0_7] : memref<384x64xbf16, #tpu.memory_space<vmem>>, vector<384x64xbf16>
    %cst_8 = arith.constant dense<0.000000e+00> : vector<4x64xf32>
    %7 = tpu.matmul %5, %6, %cst_8 {dimension_numbers = #tpu.dot_dimension_numbers<[1], [0], [0], [1], [0, 0, 1, 1], [], []>} : vector<4x384xbf16>, vector<384x64xbf16>, vector<4x64xf32> -> vector<4x64xf32>
    %c0_9 = arith.constant 0 : index
    %c0_10 = arith.constant 0 : index
    %8 = vector.load %arg3[%c0_9, %c0_10] : memref<1x64xf32, #tpu.memory_space<vmem>>, vector<1x64xf32>
    %9 = vector.broadcast %8 : vector<1x64xf32> to vector<4x64xf32>
    %10 = arith.addf %7, %9 : vector<4x64xf32>
    %cst_11 = arith.constant 0.000000e+00 : f32
    %11 = vector.broadcast %cst_11 : f32 to vector<4x64xf32>
    %12 = arith.maximumf %10, %11 : vector<4x64xf32>
    %13 = arith.truncf %12 : vector<4x64xf32> to vector<4x64xbf16>
    %c16 = arith.constant 16 : index
    %c0_12 = arith.constant 0 : index
    %14 = vector.load %arg8[%c16, %c0_12] : memref<32x64xbf16, #tpu.memory_space<vmem>>, vector<4x64xbf16>
    tpu.vector_store %arg8[%c16, %c0_12], %13 {strides = array<i32>} : memref<32x64xbf16, #tpu.memory_space<vmem>>, vector<4x64xbf16>,
    %15 = tpu.iota {dimensions = array<i32: 0>} : vector<4x1xi32>
    %c0_i32 = arith.constant 0 : i32
    %16 = vector.broadcast %c0_i32 : i32 to vector<4x1xi32>
    %17 = arith.addi %15, %16 : vector<4x1xi32>
    %c2_i32 = arith.constant 2 : i32
    %c0_i32_13 = arith.constant 0 : i32
    %18 = arith.cmpi eq, %c2_i32, %c0_i32_13 : i32
    %c1_i32 = arith.constant 1 : i32
    %19 = arith.select %18, %c1_i32, %c2_i32 : i32
    %20 = vector.broadcast %19 : i32 to vector<4x1xi32>
    %21 = arith.remsi %17, %20 : vector<4x1xi32>
    %c0_i32_14 = arith.constant 0 : i32
    %22 = vector.broadcast %c0_i32_14 : i32 to vector<4x1xi32>
    %23 = arith.cmpi ne, %21, %22 : vector<4x1xi32>
    %c0_i32_15 = arith.constant 0 : i32
    %24 = vector.broadcast %c0_i32_15 : i32 to vector<4x1xi32>
    %25 = arith.cmpi slt, %21, %24 : vector<4x1xi32>
    %c0_i32_16 = arith.constant 0 : i32
    %26 = arith.cmpi slt, %19, %c0_i32_16 : i32
    %27 = vector.broadcast %26 : i1 to vector<4x1xi1>
    %28 = vector.broadcast %27 : vector<4x1xi1> to vector<4x1xi1>
    %29 = arith.xori %25, %28 : vector<4x1xi1>
    %30 = arith.andi %29, %23 : vector<4x1xi1>
    %31 = vector.broadcast %19 : i32 to vector<4x1xi32>
    %32 = arith.addi %21, %31 : vector<4x1xi32>
    %33 = arith.select %30, %32, %21 : vector<4x1xi1>, vector<4x1xi32>
    %c0_i32_17 = arith.constant 0 : i32
    %34 = vector.broadcast %c0_i32_17 : i32 to vector<4x1xi32>
    %35 = arith.cmpi ne, %33, %34 : vector<4x1xi32>
    %c1_i32_18 = arith.constant 1 : i32
    %36 = vector.broadcast %c1_i32_18 : i32 to vector<4x1xi32>
    %37 = arith.cmpi ne, %33, %36 : vector<4x1xi32>
    %c16_19 = arith.constant 16 : index
    %c0_20 = arith.constant 0 : index
    %38 = vector.load %arg8[%c16_19, %c0_20] : memref<32x64xbf16, #tpu.memory_space<vmem>>, vector<4x64xbf16>
    %c0_21 = arith.constant 0 : index
    %c0_22 = arith.constant 0 : index
    %39 = vector.load %arg4[%c0_21, %c0_22] : memref<64x512xbf16, #tpu.memory_space<vmem>>, vector<64x512xbf16>
    %cst_23 = arith.constant dense<0.000000e+00> : vector<4x512xf32>
    %40 = tpu.matmul %38, %39, %cst_23 {dimension_numbers = #tpu.dot_dimension_numbers<[1], [0], [0], [1], [0, 0, 1, 1], [], []>} : vector<4x64xbf16>, vector<64x512xbf16>, vector<4x512xf32> -> vector<4x512xf32>
    %cst_24 = arith.constant 0.000000e+00 : f32
    %41 = vector.broadcast %cst_24 : f32 to vector<4x256xf32>
    %c13 = arith.constant 13 : index
    %c0_25 = arith.constant 0 : index
    %42 = vector.load %arg8[%c13, %c0_25] : memref<32x64xbf16, #tpu.memory_space<vmem>>, vector<4x64xbf16>
    %cst_26 = arith.constant 0.000000e+00 : bf16
    %43 = vector.broadcast %cst_26 : bf16 to vector<4x64xbf16>
    %44 = vector.shape_cast %35 : vector<4x1xi1> to vector<4x1xi1>
    %45 = vector.broadcast %44 : vector<4x1xi1> to vector<4x64xi1>
    %46 = arith.select %45, %42, %43 : vector<4x64xi1>, vector<4x64xbf16>
    %c0_27 = arith.constant 0 : index
    %c0_28 = arith.constant 0 : index
    %c0_29 = arith.constant 0 : index
    %47 = vector.load %arg6[%c0_27, %c0_28, %c0_29] : memref<8x64x256xbf16, #tpu.memory_space<vmem>>, vector<1x64x256xbf16>
    %48 = vector.shape_cast %47 : vector<1x64x256xbf16> to vector<64x256xbf16>
    %cst_30 = arith.constant dense<0.000000e+00> : vector<4x256xf32>
    %49 = tpu.matmul %46, %48, %cst_30 {dimension_numbers = #tpu.dot_dimension_numbers<[1], [0], [0], [1], [0, 0, 1, 1], [], []>} : vector<4x64xbf16>, vector<64x256xbf16>, vector<4x256xf32> -> vector<4x256xf32>
    %50 = arith.addf %41, %49 : vector<4x256xf32>
    %c14 = arith.constant 14 : index
    %c0_31 = arith.constant 0 : index
    %51 = vector.load %arg8[%c14, %c0_31] : memref<32x64xbf16, #tpu.memory_space<vmem>>, vector<4x64xbf16>
    %c1 = arith.constant 1 : index
    %c0_32 = arith.constant 0 : index
    %c0_33 = arith.constant 0 : index
    %52 = vector.load %arg6[%c1, %c0_32, %c0_33] : memref<8x64x256xbf16, #tpu.memory_space<vmem>>, vector<1x64x256xbf16>
    %53 = vector.shape_cast %52 : vector<1x64x256xbf16> to vector<64x256xbf16>
    %cst_34 = arith.constant dense<0.000000e+00> : vector<4x256xf32>
    %54 = tpu.matmul %51, %53, %cst_34 {dimension_numbers = #tpu.dot_dimension_numbers<[1], [0], [0], [1], [0, 0, 1, 1], [], []>} : vector<4x64xbf16>, vector<64x256xbf16>, vector<4x256xf32> -> vector<4x256xf32>
    %55 = arith.addf %50, %54 : vector<4x256xf32>
    %c15 = arith.constant 15 : index
    %c0_35 = arith.constant 0 : index
    %56 = vector.load %arg8[%c15, %c0_35] : memref<32x64xbf16, #tpu.memory_space<vmem>>, vector<4x64xbf16>
    %cst_36 = arith.constant 0.000000e+00 : bf16
    %57 = vector.broadcast %cst_36 : bf16 to vector<4x64xbf16>
    %58 = vector.shape_cast %37 : vector<4x1xi1> to vector<4x1xi1>
    %59 = vector.broadcast %58 : vector<4x1xi1> to vector<4x64xi1>
    %60 = arith.select %59, %56, %57 : vector<4x64xi1>, vector<4x64xbf16>
    %c2 = arith.constant 2 : index
    %c0_37 = arith.constant 0 : index
    %c0_38 = arith.constant 0 : index
    %61 = vector.load %arg6[%c2, %c0_37, %c0_38] : memref<8x64x256xbf16, #tpu.memory_space<vmem>>, vector<1x64x256xbf16>
    %62 = vector.shape_cast %61 : vector<1x64x256xbf16> to vector<64x256xbf16>
    %cst_39 = arith.constant dense<0.000000e+00> : vector<4x256xf32>
    %63 = tpu.matmul %60, %62, %cst_39 {dimension_numbers = #tpu.dot_dimension_numbers<[1], [0], [0], [1], [0, 0, 1, 1], [], []>} : vector<4x64xbf16>, vector<64x256xbf16>, vector<4x256xf32> -> vector<4x256xf32>
    %64 = arith.addf %55, %63 : vector<4x256xf32>
    %c15_40 = arith.constant 15 : index
    %c0_41 = arith.constant 0 : index
    %65 = vector.load %arg8[%c15_40, %c0_41] : memref<32x64xbf16, #tpu.memory_space<vmem>>, vector<4x64xbf16>
    %cst_42 = arith.constant 0.000000e+00 : bf16
    %66 = vector.broadcast %cst_42 : bf16 to vector<4x64xbf16>
    %67 = vector.shape_cast %35 : vector<4x1xi1> to vector<4x1xi1>
    %68 = vector.broadcast %67 : vector<4x1xi1> to vector<4x64xi1>
    %69 = arith.select %68, %65, %66 : vector<4x64xi1>, vector<4x64xbf16>
    %c3 = arith.constant 3 : index
    %c0_43 = arith.constant 0 : index
    %c0_44 = arith.constant 0 : index
    %70 = vector.load %arg6[%c3, %c0_43, %c0_44] : memref<8x64x256xbf16, #tpu.memory_space<vmem>>, vector<1x64x256xbf16>
    %71 = vector.shape_cast %70 : vector<1x64x256xbf16> to vector<64x256xbf16>
    %cst_45 = arith.constant dense<0.000000e+00> : vector<4x256xf32>
    %72 = tpu.matmul %69, %71, %cst_45 {dimension_numbers = #tpu.dot_dimension_numbers<[1], [0], [0], [1], [0, 0, 1, 1], [], []>} : vector<4x64xbf16>, vector<64x256xbf16>, vector<4x256xf32> -> vector<4x256xf32>
    %73 = arith.addf %64, %72 : vector<4x256xf32>
    %c17 = arith.constant 17 : index
    %c0_46 = arith.constant 0 : index
    %74 = vector.load %arg8[%c17, %c0_46] : memref<32x64xbf16, #tpu.memory_space<vmem>>, vector<4x64xbf16>
    %cst_47 = arith.constant 0.000000e+00 : bf16
    %75 = vector.broadcast %cst_47 : bf16 to vector<4x64xbf16>
    %76 = vector.shape_cast %37 : vector<4x1xi1> to vector<4x1xi1>
    %77 = vector.broadcast %76 : vector<4x1xi1> to vector<4x64xi1>
    %78 = arith.select %77, %74, %75 : vector<4x64xi1>, vector<4x64xbf16>
    %c4 = arith.constant 4 : index
    %c0_48 = arith.constant 0 : index
    %c0_49 = arith.constant 0 : index
    %79 = vector.load %arg6[%c4, %c0_48, %c0_49] : memref<8x64x256xbf16, #tpu.memory_space<vmem>>, vector<1x64x256xbf16>
    %80 = vector.shape_cast %79 : vector<1x64x256xbf16> to vector<64x256xbf16>
    %cst_50 = arith.constant dense<0.000000e+00> : vector<4x256xf32>
    %81 = tpu.matmul %78, %80, %cst_50 {dimension_numbers = #tpu.dot_dimension_numbers<[1], [0], [0], [1], [0, 0, 1, 1], [], []>} : vector<4x64xbf16>, vector<64x256xbf16>, vector<4x256xf32> -> vector<4x256xf32>
    %82 = arith.addf %73, %81 : vector<4x256xf32>
    %c17_51 = arith.constant 17 : index
    %c0_52 = arith.constant 0 : index
    %83 = vector.load %arg8[%c17_51, %c0_52] : memref<32x64xbf16, #tpu.memory_space<vmem>>, vector<4x64xbf16>
    %cst_53 = arith.constant 0.000000e+00 : bf16
    %84 = vector.broadcast %cst_53 : bf16 to vector<4x64xbf16>
    %85 = vector.shape_cast %35 : vector<4x1xi1> to vector<4x1xi1>
    %86 = vector.broadcast %85 : vector<4x1xi1> to vector<4x64xi1>
    %87 = arith.select %86, %83, %84 : vector<4x64xi1>, vector<4x64xbf16>
    %c5 = arith.constant 5 : index
    %c0_54 = arith.constant 0 : index
    %c0_55 = arith.constant 0 : index
    %88 = vector.load %arg6[%c5, %c0_54, %c0_55] : memref<8x64x256xbf16, #tpu.memory_space<vmem>>, vector<1x64x256xbf16>
    %89 = vector.shape_cast %88 : vector<1x64x256xbf16> to vector<64x256xbf16>
    %cst_56 = arith.constant dense<0.000000e+00> : vector<4x256xf32>
    %90 = tpu.matmul %87, %89, %cst_56 {dimension_numbers = #tpu.dot_dimension_numbers<[1], [0], [0], [1], [0, 0, 1, 1], [], []>} : vector<4x64xbf16>, vector<64x256xbf16>, vector<4x256xf32> -> vector<4x256xf32>
    %91 = arith.addf %82, %90 : vector<4x256xf32>
    %c18 = arith.constant 18 : index
    %c0_57 = arith.constant 0 : index
    %92 = vector.load %arg8[%c18, %c0_57] : memref<32x64xbf16, #tpu.memory_space<vmem>>, vector<4x64xbf16>
    %c6 = arith.constant 6 : index
    %c0_58 = arith.constant 0 : index
    %c0_59 = arith.constant 0 : index
    %93 = vector.load %arg6[%c6, %c0_58, %c0_59] : memref<8x64x256xbf16, #tpu.memory_space<vmem>>, vector<1x64x256xbf16>
    %94 = vector.shape_cast %93 : vector<1x64x256xbf16> to vector<64x256xbf16>
    %cst_60 = arith.constant dense<0.000000e+00> : vector<4x256xf32>
    %95 = tpu.matmul %92, %94, %cst_60 {dimension_numbers = #tpu.dot_dimension_numbers<[1], [0], [0], [1], [0, 0, 1, 1], [], []>} : vector<4x64xbf16>, vector<64x256xbf16>, vector<4x256xf32> -> vector<4x256xf32>
    %96 = arith.addf %91, %95 : vector<4x256xf32>
    %c19 = arith.constant 19 : index
    %c0_61 = arith.constant 0 : index
    %97 = vector.load %arg8[%c19, %c0_61] : memref<32x64xbf16, #tpu.memory_space<vmem>>, vector<4x64xbf16>
    %cst_62 = arith.constant 0.000000e+00 : bf16
    %98 = vector.broadcast %cst_62 : bf16 to vector<4x64xbf16>
    %99 = vector.shape_cast %37 : vector<4x1xi1> to vector<4x1xi1>
    %100 = vector.broadcast %99 : vector<4x1xi1> to vector<4x64xi1>
    %101 = arith.select %100, %97, %98 : vector<4x64xi1>, vector<4x64xbf16>
    %c7 = arith.constant 7 : index
    %c0_63 = arith.constant 0 : index
    %c0_64 = arith.constant 0 : index
    %102 = vector.load %arg6[%c7, %c0_63, %c0_64] : memref<8x64x256xbf16, #tpu.memory_space<vmem>>, vector<1x64x256xbf16>
    %103 = vector.shape_cast %102 : vector<1x64x256xbf16> to vector<64x256xbf16>
    %cst_65 = arith.constant dense<0.000000e+00> : vector<4x256xf32>
    %104 = tpu.matmul %101, %103, %cst_65 {dimension_numbers = #tpu.dot_dimension_numbers<[1], [0], [0], [1], [0, 0, 1, 1], [], []>} : vector<4x64xbf16>, vector<64x256xbf16>, vector<4x256xf32> -> vector<4x256xf32>
    %105 = arith.addf %96, %104 : vector<4x256xf32>
    %cst_66 = arith.constant 0.000000e+00 : f32
    %106 = vector.broadcast %cst_66 : f32 to vector<4x256xf32>
    %107 = tpu.concatenate %106, %105 in 1 : vector<4x256xf32>, vector<4x256xf32> -> vector<4x512xf32>
    %108 = arith.addf %40, %107 : vector<4x512xf32>
    %c0_67 = arith.constant 0 : index
    %c0_68 = arith.constant 0 : index
    %109 = vector.load %arg5[%c0_67, %c0_68] : memref<1x512xf32, #tpu.memory_space<vmem>>, vector<1x512xf32>
    %110 = vector.broadcast %109 : vector<1x512xf32> to vector<4x512xf32>
    %111 = arith.addf %108, %110 : vector<4x512xf32>
    %cst_69 = arith.constant 0.000000e+00 : f32
    %112 = vector.broadcast %cst_69 : f32 to vector<4x512xf32>
    %113 = arith.maximumf %111, %112 : vector<4x512xf32>
    %114 = arith.truncf %113 : vector<4x512xf32> to vector<4x512xbf16>
    %c0_70 = arith.constant 0 : index
    %c0_71 = arith.constant 0 : index
    %c0_72 = arith.constant 0 : index
    %115 = vector.load %arg7[%c0_70, %c0_71, %c0_72] : memref<1x4x512xbf16, #tpu.memory_space<vmem>>, vector<1x4x512xbf16>
    %116 = vector.shape_cast %115 : vector<1x4x512xbf16> to vector<4x512xbf16>
    %117 = vector.shape_cast %114 : vector<4x512xbf16> to vector<1x4x512xbf16>
    tpu.vector_store %arg7[%c0_70, %c0_71, %c0_72], %117 {strides = array<i32>} : memref<1x4x512xbf16, #tpu.memory_space<vmem>>, vector<1x4x512xbf16>,
    return
  }
  func.func @transform_0(%arg0: i32) -> (i32, i32, i32) {
    %c0_i32 = arith.constant 0 : i32
    %c0_i32_0 = arith.constant 0 : i32
    %c0_i32_1 = arith.constant 0 : i32
    return %arg0, %c0_i32, %c0_i32_0 : i32, i32, i32
  }
  func.func @transform_1(%arg0: i32) -> (i32, i32) {
    %c0_i32 = arith.constant 0 : i32
    %c0_i32_0 = arith.constant 0 : i32
    %c0_i32_1 = arith.constant 0 : i32
    return %c0_i32, %c0_i32_0 : i32, i32
  }
  func.func @transform_2(%arg0: i32) -> (i32, i32) {
    %c0_i32 = arith.constant 0 : i32
    %c0_i32_0 = arith.constant 0 : i32
    %c0_i32_1 = arith.constant 0 : i32
    return %c0_i32, %c0_i32_0 : i32, i32
  }
  func.func @transform_3(%arg0: i32) -> (i32, i32) {
    %c0_i32 = arith.constant 0 : i32
    %c0_i32_0 = arith.constant 0 : i32
    %c0_i32_1 = arith.constant 0 : i32
    return %c0_i32, %c0_i32_0 : i32, i32
  }
  func.func @transform_4(%arg0: i32) -> (i32, i32) {
    %c0_i32 = arith.constant 0 : i32
    %c0_i32_0 = arith.constant 0 : i32
    %c0_i32_1 = arith.constant 0 : i32
    return %c0_i32, %c0_i32_0 : i32, i32
  }
  func.func @transform_5(%arg0: i32) -> (i32, i32, i32) {
    %c0_i32 = arith.constant 0 : i32
    %c0_i32_0 = arith.constant 0 : i32
    %c0_i32_1 = arith.constant 0 : i32
    %c0_i32_2 = arith.constant 0 : i32
    return %c0_i32, %c0_i32_0, %c0_i32_1 : i32, i32, i32
  }
  func.func @transform_6(%arg0: i32) -> (i32, i32, i32) {
    %c0_i32 = arith.constant 0 : i32
    %c0_i32_0 = arith.constant 0 : i32
    %c0_i32_1 = arith.constant 0 : i32
    return %arg0, %c0_i32, %c0_i32_0 : i32, i32, i32
  }
}

module attributes {stable_mosaic.version = 11 : i64} {
  func.func @_fire_kernel(%arg0: i32, %arg1: memref<1x4x512xbf16, #tpu.memory_space<vmem>>, %arg2: memref<512x64xbf16, #tpu.memory_space<vmem>>, %arg3: memref<1x64xf32, #tpu.memory_space<vmem>>, %arg4: memref<64x512xbf16, #tpu.memory_space<vmem>>, %arg5: memref<1x512xf32, #tpu.memory_space<vmem>>, %arg6: memref<8x64x256xbf16, #tpu.memory_space<vmem>>, %arg7: memref<1x4x512xbf16, #tpu.memory_space<vmem>>, %arg8: memref<32x64xbf16, #tpu.memory_space<vmem>>) attributes {dimension_semantics = [#tpu.dimension_semantics<parallel>], iteration_bounds = array<i64: 2>, scalar_prefetch = 0 : i64, scratch_operands = 1 : i64, tpu.core_type = #tpu.core_type<tc>, window_params = [{transform_indices = @transform_0, window_bounds = array<i64: 1, 4, 512>}, {pipeline_mode = #tpu.pipeline_mode<synchronous>, transform_indices = @transform_1, window_bounds = array<i64: 512, 64>}, {pipeline_mode = #tpu.pipeline_mode<synchronous>, transform_indices = @transform_2, window_bounds = array<i64: 1, 64>}, {pipeline_mode = #tpu.pipeline_mode<synchronous>, transform_indices = @transform_3, window_bounds = array<i64: 64, 512>}, {pipeline_mode = #tpu.pipeline_mode<synchronous>, transform_indices = @transform_4, window_bounds = array<i64: 1, 512>}, {pipeline_mode = #tpu.pipeline_mode<synchronous>, transform_indices = @transform_5, window_bounds = array<i64: 8, 64, 256>}, {transform_indices = @transform_6, window_bounds = array<i64: 1, 4, 512>}]} {
    %cst = arith.constant 0.000000e+00 : bf16
    %0 = vector.broadcast %cst : bf16 to vector<16x64xbf16>
    %c0 = arith.constant 0 : index
    %c0_0 = arith.constant 0 : index
    %1 = vector.load %arg8[%c0, %c0_0] : memref<32x64xbf16, #tpu.memory_space<vmem>>, vector<16x64xbf16>
    tpu.vector_store %arg8[%c0, %c0_0], %0 {strides = array<i32>} : memref<32x64xbf16, #tpu.memory_space<vmem>>, vector<16x64xbf16>,
    %cst_1 = arith.constant 0.000000e+00 : bf16
    %2 = vector.broadcast %cst_1 : bf16 to vector<12x64xbf16>
    %c20 = arith.constant 20 : index
    %c0_2 = arith.constant 0 : index
    %3 = vector.load %arg8[%c20, %c0_2] : memref<32x64xbf16, #tpu.memory_space<vmem>>, vector<12x64xbf16>
    tpu.vector_store %arg8[%c20, %c0_2], %2 {strides = array<i32>} : memref<32x64xbf16, #tpu.memory_space<vmem>>, vector<12x64xbf16>,
    %c0_3 = arith.constant 0 : index
    %c0_4 = arith.constant 0 : index
    %c0_5 = arith.constant 0 : index
    %4 = vector.load %arg1[%c0_3, %c0_4, %c0_5] : memref<1x4x512xbf16, #tpu.memory_space<vmem>>, vector<1x4x512xbf16>
    %5 = vector.shape_cast %4 : vector<1x4x512xbf16> to vector<4x512xbf16>
    %c0_6 = arith.constant 0 : index
    %c0_7 = arith.constant 0 : index
    %6 = vector.load %arg2[%c0_6, %c0_7] : memref<512x64xbf16, #tpu.memory_space<vmem>>, vector<512x64xbf16>
    %cst_8 = arith.constant dense<0.000000e+00> : vector<4x64xf32>
    %7 = tpu.matmul %5, %6, %cst_8 {dimension_numbers = #tpu.dot_dimension_numbers<[1], [0], [0], [1], [0, 0, 1, 1], [], []>} : vector<4x512xbf16>, vector<512x64xbf16>, vector<4x64xf32> -> vector<4x64xf32>
    %c0_9 = arith.constant 0 : index
    %c0_10 = arith.constant 0 : index
    %8 = vector.load %arg3[%c0_9, %c0_10] : memref<1x64xf32, #tpu.memory_space<vmem>>, vector<1x64xf32>
    %9 = vector.broadcast %8 : vector<1x64xf32> to vector<4x64xf32>
    %10 = arith.addf %7, %9 : vector<4x64xf32>
    %cst_11 = arith.constant 0.000000e+00 : f32
    %11 = vector.broadcast %cst_11 : f32 to vector<4x64xf32>
    %12 = arith.maximumf %10, %11 : vector<4x64xf32>
    %13 = arith.truncf %12 : vector<4x64xf32> to vector<4x64xbf16>
    %c16 = arith.constant 16 : index
    %c0_12 = arith.constant 0 : index
    %14 = vector.load %arg8[%c16, %c0_12] : memref<32x64xbf16, #tpu.memory_space<vmem>>, vector<4x64xbf16>
    tpu.vector_store %arg8[%c16, %c0_12], %13 {strides = array<i32>} : memref<32x64xbf16, #tpu.memory_space<vmem>>, vector<4x64xbf16>,
    %15 = tpu.iota {dimensions = array<i32: 0>} : vector<4x1xi32>
    %c0_i32 = arith.constant 0 : i32
    %16 = vector.broadcast %c0_i32 : i32 to vector<4x1xi32>
    %17 = arith.addi %15, %16 : vector<4x1xi32>
    %c2_i32 = arith.constant 2 : i32
    %c0_i32_13 = arith.constant 0 : i32
    %18 = arith.cmpi eq, %c2_i32, %c0_i32_13 : i32
    %c1_i32 = arith.constant 1 : i32
    %19 = arith.select %18, %c1_i32, %c2_i32 : i32
    %20 = vector.broadcast %19 : i32 to vector<4x1xi32>
    %21 = arith.remsi %17, %20 : vector<4x1xi32>
    %c0_i32_14 = arith.constant 0 : i32
    %22 = vector.broadcast %c0_i32_14 : i32 to vector<4x1xi32>
    %23 = arith.cmpi ne, %21, %22 : vector<4x1xi32>
    %c0_i32_15 = arith.constant 0 : i32
    %24 = vector.broadcast %c0_i32_15 : i32 to vector<4x1xi32>
    %25 = arith.cmpi slt, %21, %24 : vector<4x1xi32>
    %c0_i32_16 = arith.constant 0 : i32
    %26 = arith.cmpi slt, %19, %c0_i32_16 : i32
    %27 = vector.broadcast %26 : i1 to vector<4x1xi1>
    %28 = vector.broadcast %27 : vector<4x1xi1> to vector<4x1xi1>
    %29 = arith.xori %25, %28 : vector<4x1xi1>
    %30 = arith.andi %29, %23 : vector<4x1xi1>
    %31 = vector.broadcast %19 : i32 to vector<4x1xi32>
    %32 = arith.addi %21, %31 : vector<4x1xi32>
    %33 = arith.select %30, %32, %21 : vector<4x1xi1>, vector<4x1xi32>
    %c0_i32_17 = arith.constant 0 : i32
    %34 = vector.broadcast %c0_i32_17 : i32 to vector<4x1xi32>
    %35 = arith.cmpi ne, %33, %34 : vector<4x1xi32>
    %c1_i32_18 = arith.constant 1 : i32
    %36 = vector.broadcast %c1_i32_18 : i32 to vector<4x1xi32>
    %37 = arith.cmpi ne, %33, %36 : vector<4x1xi32>
    %c16_19 = arith.constant 16 : index
    %c0_20 = arith.constant 0 : index
    %38 = vector.load %arg8[%c16_19, %c0_20] : memref<32x64xbf16, #tpu.memory_space<vmem>>, vector<4x64xbf16>
    %c0_21 = arith.constant 0 : index
    %c0_22 = arith.constant 0 : index
    %39 = vector.load %arg4[%c0_21, %c0_22] : memref<64x512xbf16, #tpu.memory_space<vmem>>, vector<64x512xbf16>
    %cst_23 = arith.constant dense<0.000000e+00> : vector<4x512xf32>
    %40 = tpu.matmul %38, %39, %cst_23 {dimension_numbers = #tpu.dot_dimension_numbers<[1], [0], [0], [1], [0, 0, 1, 1], [], []>} : vector<4x64xbf16>, vector<64x512xbf16>, vector<4x512xf32> -> vector<4x512xf32>
    %cst_24 = arith.constant 0.000000e+00 : f32
    %41 = vector.broadcast %cst_24 : f32 to vector<4x256xf32>
    %c13 = arith.constant 13 : index
    %c0_25 = arith.constant 0 : index
    %42 = vector.load %arg8[%c13, %c0_25] : memref<32x64xbf16, #tpu.memory_space<vmem>>, vector<4x64xbf16>
    %cst_26 = arith.constant 0.000000e+00 : bf16
    %43 = vector.broadcast %cst_26 : bf16 to vector<4x64xbf16>
    %44 = vector.shape_cast %35 : vector<4x1xi1> to vector<4x1xi1>
    %45 = vector.broadcast %44 : vector<4x1xi1> to vector<4x64xi1>
    %46 = arith.select %45, %42, %43 : vector<4x64xi1>, vector<4x64xbf16>
    %c0_27 = arith.constant 0 : index
    %c0_28 = arith.constant 0 : index
    %c0_29 = arith.constant 0 : index
    %47 = vector.load %arg6[%c0_27, %c0_28, %c0_29] : memref<8x64x256xbf16, #tpu.memory_space<vmem>>, vector<1x64x256xbf16>
    %48 = vector.shape_cast %47 : vector<1x64x256xbf16> to vector<64x256xbf16>
    %cst_30 = arith.constant dense<0.000000e+00> : vector<4x256xf32>
    %49 = tpu.matmul %46, %48, %cst_30 {dimension_numbers = #tpu.dot_dimension_numbers<[1], [0], [0], [1], [0, 0, 1, 1], [], []>} : vector<4x64xbf16>, vector<64x256xbf16>, vector<4x256xf32> -> vector<4x256xf32>
    %50 = arith.addf %41, %49 : vector<4x256xf32>
    %c14 = arith.constant 14 : index
    %c0_31 = arith.constant 0 : index
    %51 = vector.load %arg8[%c14, %c0_31] : memref<32x64xbf16, #tpu.memory_space<vmem>>, vector<4x64xbf16>
    %c1 = arith.constant 1 : index
    %c0_32 = arith.constant 0 : index
    %c0_33 = arith.constant 0 : index
    %52 = vector.load %arg6[%c1, %c0_32, %c0_33] : memref<8x64x256xbf16, #tpu.memory_space<vmem>>, vector<1x64x256xbf16>
    %53 = vector.shape_cast %52 : vector<1x64x256xbf16> to vector<64x256xbf16>
    %cst_34 = arith.constant dense<0.000000e+00> : vector<4x256xf32>
    %54 = tpu.matmul %51, %53, %cst_34 {dimension_numbers = #tpu.dot_dimension_numbers<[1], [0], [0], [1], [0, 0, 1, 1], [], []>} : vector<4x64xbf16>, vector<64x256xbf16>, vector<4x256xf32> -> vector<4x256xf32>
    %55 = arith.addf %50, %54 : vector<4x256xf32>
    %c15 = arith.constant 15 : index
    %c0_35 = arith.constant 0 : index
    %56 = vector.load %arg8[%c15, %c0_35] : memref<32x64xbf16, #tpu.memory_space<vmem>>, vector<4x64xbf16>
    %cst_36 = arith.constant 0.000000e+00 : bf16
    %57 = vector.broadcast %cst_36 : bf16 to vector<4x64xbf16>
    %58 = vector.shape_cast %37 : vector<4x1xi1> to vector<4x1xi1>
    %59 = vector.broadcast %58 : vector<4x1xi1> to vector<4x64xi1>
    %60 = arith.select %59, %56, %57 : vector<4x64xi1>, vector<4x64xbf16>
    %c2 = arith.constant 2 : index
    %c0_37 = arith.constant 0 : index
    %c0_38 = arith.constant 0 : index
    %61 = vector.load %arg6[%c2, %c0_37, %c0_38] : memref<8x64x256xbf16, #tpu.memory_space<vmem>>, vector<1x64x256xbf16>
    %62 = vector.shape_cast %61 : vector<1x64x256xbf16> to vector<64x256xbf16>
    %cst_39 = arith.constant dense<0.000000e+00> : vector<4x256xf32>
    %63 = tpu.matmul %60, %62, %cst_39 {dimension_numbers = #tpu.dot_dimension_numbers<[1], [0], [0], [1], [0, 0, 1, 1], [], []>} : vector<4x64xbf16>, vector<64x256xbf16>, vector<4x256xf32> -> vector<4x256xf32>
    %64 = arith.addf %55, %63 : vector<4x256xf32>
    %c15_40 = arith.constant 15 : index
    %c0_41 = arith.constant 0 : index
    %65 = vector.load %arg8[%c15_40, %c0_41] : memref<32x64xbf16, #tpu.memory_space<vmem>>, vector<4x64xbf16>
    %cst_42 = arith.constant 0.000000e+00 : bf16
    %66 = vector.broadcast %cst_42 : bf16 to vector<4x64xbf16>
    %67 = vector.shape_cast %35 : vector<4x1xi1> to vector<4x1xi1>
    %68 = vector.broadcast %67 : vector<4x1xi1> to vector<4x64xi1>
    %69 = arith.select %68, %65, %66 : vector<4x64xi1>, vector<4x64xbf16>
    %c3 = arith.constant 3 : index
    %c0_43 = arith.constant 0 : index
    %c0_44 = arith.constant 0 : index
    %70 = vector.load %arg6[%c3, %c0_43, %c0_44] : memref<8x64x256xbf16, #tpu.memory_space<vmem>>, vector<1x64x256xbf16>
    %71 = vector.shape_cast %70 : vector<1x64x256xbf16> to vector<64x256xbf16>
    %cst_45 = arith.constant dense<0.000000e+00> : vector<4x256xf32>
    %72 = tpu.matmul %69, %71, %cst_45 {dimension_numbers = #tpu.dot_dimension_numbers<[1], [0], [0], [1], [0, 0, 1, 1], [], []>} : vector<4x64xbf16>, vector<64x256xbf16>, vector<4x256xf32> -> vector<4x256xf32>
    %73 = arith.addf %64, %72 : vector<4x256xf32>
    %c17 = arith.constant 17 : index
    %c0_46 = arith.constant 0 : index
    %74 = vector.load %arg8[%c17, %c0_46] : memref<32x64xbf16, #tpu.memory_space<vmem>>, vector<4x64xbf16>
    %cst_47 = arith.constant 0.000000e+00 : bf16
    %75 = vector.broadcast %cst_47 : bf16 to vector<4x64xbf16>
    %76 = vector.shape_cast %37 : vector<4x1xi1> to vector<4x1xi1>
    %77 = vector.broadcast %76 : vector<4x1xi1> to vector<4x64xi1>
    %78 = arith.select %77, %74, %75 : vector<4x64xi1>, vector<4x64xbf16>
    %c4 = arith.constant 4 : index
    %c0_48 = arith.constant 0 : index
    %c0_49 = arith.constant 0 : index
    %79 = vector.load %arg6[%c4, %c0_48, %c0_49] : memref<8x64x256xbf16, #tpu.memory_space<vmem>>, vector<1x64x256xbf16>
    %80 = vector.shape_cast %79 : vector<1x64x256xbf16> to vector<64x256xbf16>
    %cst_50 = arith.constant dense<0.000000e+00> : vector<4x256xf32>
    %81 = tpu.matmul %78, %80, %cst_50 {dimension_numbers = #tpu.dot_dimension_numbers<[1], [0], [0], [1], [0, 0, 1, 1], [], []>} : vector<4x64xbf16>, vector<64x256xbf16>, vector<4x256xf32> -> vector<4x256xf32>
    %82 = arith.addf %73, %81 : vector<4x256xf32>
    %c17_51 = arith.constant 17 : index
    %c0_52 = arith.constant 0 : index
    %83 = vector.load %arg8[%c17_51, %c0_52] : memref<32x64xbf16, #tpu.memory_space<vmem>>, vector<4x64xbf16>
    %cst_53 = arith.constant 0.000000e+00 : bf16
    %84 = vector.broadcast %cst_53 : bf16 to vector<4x64xbf16>
    %85 = vector.shape_cast %35 : vector<4x1xi1> to vector<4x1xi1>
    %86 = vector.broadcast %85 : vector<4x1xi1> to vector<4x64xi1>
    %87 = arith.select %86, %83, %84 : vector<4x64xi1>, vector<4x64xbf16>
    %c5 = arith.constant 5 : index
    %c0_54 = arith.constant 0 : index
    %c0_55 = arith.constant 0 : index
    %88 = vector.load %arg6[%c5, %c0_54, %c0_55] : memref<8x64x256xbf16, #tpu.memory_space<vmem>>, vector<1x64x256xbf16>
    %89 = vector.shape_cast %88 : vector<1x64x256xbf16> to vector<64x256xbf16>
    %cst_56 = arith.constant dense<0.000000e+00> : vector<4x256xf32>
    %90 = tpu.matmul %87, %89, %cst_56 {dimension_numbers = #tpu.dot_dimension_numbers<[1], [0], [0], [1], [0, 0, 1, 1], [], []>} : vector<4x64xbf16>, vector<64x256xbf16>, vector<4x256xf32> -> vector<4x256xf32>
    %91 = arith.addf %82, %90 : vector<4x256xf32>
    %c18 = arith.constant 18 : index
    %c0_57 = arith.constant 0 : index
    %92 = vector.load %arg8[%c18, %c0_57] : memref<32x64xbf16, #tpu.memory_space<vmem>>, vector<4x64xbf16>
    %c6 = arith.constant 6 : index
    %c0_58 = arith.constant 0 : index
    %c0_59 = arith.constant 0 : index
    %93 = vector.load %arg6[%c6, %c0_58, %c0_59] : memref<8x64x256xbf16, #tpu.memory_space<vmem>>, vector<1x64x256xbf16>
    %94 = vector.shape_cast %93 : vector<1x64x256xbf16> to vector<64x256xbf16>
    %cst_60 = arith.constant dense<0.000000e+00> : vector<4x256xf32>
    %95 = tpu.matmul %92, %94, %cst_60 {dimension_numbers = #tpu.dot_dimension_numbers<[1], [0], [0], [1], [0, 0, 1, 1], [], []>} : vector<4x64xbf16>, vector<64x256xbf16>, vector<4x256xf32> -> vector<4x256xf32>
    %96 = arith.addf %91, %95 : vector<4x256xf32>
    %c19 = arith.constant 19 : index
    %c0_61 = arith.constant 0 : index
    %97 = vector.load %arg8[%c19, %c0_61] : memref<32x64xbf16, #tpu.memory_space<vmem>>, vector<4x64xbf16>
    %cst_62 = arith.constant 0.000000e+00 : bf16
    %98 = vector.broadcast %cst_62 : bf16 to vector<4x64xbf16>
    %99 = vector.shape_cast %37 : vector<4x1xi1> to vector<4x1xi1>
    %100 = vector.broadcast %99 : vector<4x1xi1> to vector<4x64xi1>
    %101 = arith.select %100, %97, %98 : vector<4x64xi1>, vector<4x64xbf16>
    %c7 = arith.constant 7 : index
    %c0_63 = arith.constant 0 : index
    %c0_64 = arith.constant 0 : index
    %102 = vector.load %arg6[%c7, %c0_63, %c0_64] : memref<8x64x256xbf16, #tpu.memory_space<vmem>>, vector<1x64x256xbf16>
    %103 = vector.shape_cast %102 : vector<1x64x256xbf16> to vector<64x256xbf16>
    %cst_65 = arith.constant dense<0.000000e+00> : vector<4x256xf32>
    %104 = tpu.matmul %101, %103, %cst_65 {dimension_numbers = #tpu.dot_dimension_numbers<[1], [0], [0], [1], [0, 0, 1, 1], [], []>} : vector<4x64xbf16>, vector<64x256xbf16>, vector<4x256xf32> -> vector<4x256xf32>
    %105 = arith.addf %96, %104 : vector<4x256xf32>
    %cst_66 = arith.constant 0.000000e+00 : f32
    %106 = vector.broadcast %cst_66 : f32 to vector<4x256xf32>
    %107 = tpu.concatenate %106, %105 in 1 : vector<4x256xf32>, vector<4x256xf32> -> vector<4x512xf32>
    %108 = arith.addf %40, %107 : vector<4x512xf32>
    %c0_67 = arith.constant 0 : index
    %c0_68 = arith.constant 0 : index
    %109 = vector.load %arg5[%c0_67, %c0_68] : memref<1x512xf32, #tpu.memory_space<vmem>>, vector<1x512xf32>
    %110 = vector.broadcast %109 : vector<1x512xf32> to vector<4x512xf32>
    %111 = arith.addf %108, %110 : vector<4x512xf32>
    %cst_69 = arith.constant 0.000000e+00 : f32
    %112 = vector.broadcast %cst_69 : f32 to vector<4x512xf32>
    %113 = arith.maximumf %111, %112 : vector<4x512xf32>
    %114 = arith.truncf %113 : vector<4x512xf32> to vector<4x512xbf16>
    %c0_70 = arith.constant 0 : index
    %c0_71 = arith.constant 0 : index
    %c0_72 = arith.constant 0 : index
    %115 = vector.load %arg7[%c0_70, %c0_71, %c0_72] : memref<1x4x512xbf16, #tpu.memory_space<vmem>>, vector<1x4x512xbf16>
    %116 = vector.shape_cast %115 : vector<1x4x512xbf16> to vector<4x512xbf16>
    %117 = vector.shape_cast %114 : vector<4x512xbf16> to vector<1x4x512xbf16>
    tpu.vector_store %arg7[%c0_70, %c0_71, %c0_72], %117 {strides = array<i32>} : memref<1x4x512xbf16, #tpu.memory_space<vmem>>, vector<1x4x512xbf16>,
    return
  }
  func.func @transform_0(%arg0: i32) -> (i32, i32, i32) {
    %c0_i32 = arith.constant 0 : i32
    %c0_i32_0 = arith.constant 0 : i32
    %c0_i32_1 = arith.constant 0 : i32
    return %arg0, %c0_i32, %c0_i32_0 : i32, i32, i32
  }
  func.func @transform_1(%arg0: i32) -> (i32, i32) {
    %c0_i32 = arith.constant 0 : i32
    %c0_i32_0 = arith.constant 0 : i32
    %c0_i32_1 = arith.constant 0 : i32
    return %c0_i32, %c0_i32_0 : i32, i32
  }
  func.func @transform_2(%arg0: i32) -> (i32, i32) {
    %c0_i32 = arith.constant 0 : i32
    %c0_i32_0 = arith.constant 0 : i32
    %c0_i32_1 = arith.constant 0 : i32
    return %c0_i32, %c0_i32_0 : i32, i32
  }
  func.func @transform_3(%arg0: i32) -> (i32, i32) {
    %c0_i32 = arith.constant 0 : i32
    %c0_i32_0 = arith.constant 0 : i32
    %c0_i32_1 = arith.constant 0 : i32
    return %c0_i32, %c0_i32_0 : i32, i32
  }
  func.func @transform_4(%arg0: i32) -> (i32, i32) {
    %c0_i32 = arith.constant 0 : i32
    %c0_i32_0 = arith.constant 0 : i32
    %c0_i32_1 = arith.constant 0 : i32
    return %c0_i32, %c0_i32_0 : i32, i32
  }
  func.func @transform_5(%arg0: i32) -> (i32, i32, i32) {
    %c0_i32 = arith.constant 0 : i32
    %c0_i32_0 = arith.constant 0 : i32
    %c0_i32_1 = arith.constant 0 : i32
    %c0_i32_2 = arith.constant 0 : i32
    return %c0_i32, %c0_i32_0, %c0_i32_1 : i32, i32, i32
  }
  func.func @transform_6(%arg0: i32) -> (i32, i32, i32) {
    %c0_i32 = arith.constant 0 : i32
    %c0_i32_0 = arith.constant 0 : i32
    %c0_i32_1 = arith.constant 0 : i32
    return %arg0, %c0_i32, %c0_i32_0 : i32, i32, i32
  }
}

module attributes {stable_mosaic.version = 11 : i64} {
  func.func @_head_kernel(%arg0: i32, %arg1: memref<1x4x512xbf16, #tpu.memory_space<vmem>>, %arg2: memref<512x128xbf16, #tpu.memory_space<vmem>>, %arg3: memref<1x128xf32, #tpu.memory_space<vmem>>, %arg4: memref<1x1x128xf32, #tpu.memory_space<vmem>>) attributes {dimension_semantics = [#tpu.dimension_semantics<parallel>], iteration_bounds = array<i64: 2>, scalar_prefetch = 0 : i64, scratch_operands = 0 : i64, tpu.core_type = #tpu.core_type<tc>, window_params = [{transform_indices = @transform_0, window_bounds = array<i64: 1, 4, 512>}, {pipeline_mode = #tpu.pipeline_mode<synchronous>, transform_indices = @transform_1, window_bounds = array<i64: 512, 128>}, {pipeline_mode = #tpu.pipeline_mode<synchronous>, transform_indices = @transform_2, window_bounds = array<i64: 1, 128>}, {transform_indices = @transform_3, window_bounds = array<i64: 1, 1, 128>}]} {
    %c0 = arith.constant 0 : index
    %c0_0 = arith.constant 0 : index
    %c0_1 = arith.constant 0 : index
    %0 = vector.load %arg1[%c0, %c0_0, %c0_1] : memref<1x4x512xbf16, #tpu.memory_space<vmem>>, vector<1x4x512xbf16>
    %1 = vector.shape_cast %0 : vector<1x4x512xbf16> to vector<4x512xbf16>
    %c0_2 = arith.constant 0 : index
    %c0_3 = arith.constant 0 : index
    %2 = vector.load %arg2[%c0_2, %c0_3] : memref<512x128xbf16, #tpu.memory_space<vmem>>, vector<512x128xbf16>
    %cst = arith.constant dense<0.000000e+00> : vector<4x128xf32>
    %3 = tpu.matmul %1, %2, %cst {dimension_numbers = #tpu.dot_dimension_numbers<[1], [0], [0], [1], [0, 0, 1, 1], [], []>} : vector<4x512xbf16>, vector<512x128xbf16>, vector<4x128xf32> -> vector<4x128xf32>
    %c0_4 = arith.constant 0 : index
    %c0_5 = arith.constant 0 : index
    %4 = vector.load %arg3[%c0_4, %c0_5] : memref<1x128xf32, #tpu.memory_space<vmem>>, vector<1x128xf32>
    %5 = vector.broadcast %4 : vector<1x128xf32> to vector<4x128xf32>
    %6 = arith.addf %3, %5 : vector<4x128xf32>
    %cst_6 = arith.constant 0.000000e+00 : f32
    %7 = vector.broadcast %cst_6 : f32 to vector<4x128xf32>
    %8 = arith.maximumf %6, %7 : vector<4x128xf32>
    %cst_7 = arith.constant dense<0.000000e+00> : vector<128xf32>
    %9 = vector.multi_reduction <add>, %8, %cst_7 [0] : vector<4x128xf32> to vector<128xf32>
    %10 = vector.shape_cast %9 : vector<128xf32> to vector<1x128xf32>
    %cst_8 = arith.constant 4.000000e+00 : f32
    %11 = vector.broadcast %cst_8 : f32 to vector<1x128xf32>
    %12 = arith.divf %10, %11 : vector<1x128xf32>
    %c0_9 = arith.constant 0 : index
    %c0_10 = arith.constant 0 : index
    %c0_11 = arith.constant 0 : index
    %13 = vector.load %arg4[%c0_9, %c0_10, %c0_11] : memref<1x1x128xf32, #tpu.memory_space<vmem>>, vector<1x1x128xf32>
    %14 = vector.shape_cast %13 : vector<1x1x128xf32> to vector<1x128xf32>
    %15 = vector.shape_cast %12 : vector<1x128xf32> to vector<1x1x128xf32>
    tpu.vector_store %arg4[%c0_9, %c0_10, %c0_11], %15 {strides = array<i32>} : memref<1x1x128xf32, #tpu.memory_space<vmem>>, vector<1x1x128xf32>,
    return
  }
  func.func @transform_0(%arg0: i32) -> (i32, i32, i32) {
    %c0_i32 = arith.constant 0 : i32
    %c0_i32_0 = arith.constant 0 : i32
    %c0_i32_1 = arith.constant 0 : i32
    return %arg0, %c0_i32, %c0_i32_0 : i32, i32, i32
  }
  func.func @transform_1(%arg0: i32) -> (i32, i32) {
    %c0_i32 = arith.constant 0 : i32
    %c0_i32_0 = arith.constant 0 : i32
    %c0_i32_1 = arith.constant 0 : i32
    return %c0_i32, %c0_i32_0 : i32, i32
  }
  func.func @transform_2(%arg0: i32) -> (i32, i32) {
    %c0_i32 = arith.constant 0 : i32
    %c0_i32_0 = arith.constant 0 : i32
    %c0_i32_1 = arith.constant 0 : i32
    return %c0_i32, %c0_i32_0 : i32, i32
  }
  func.func @transform_3(%arg0: i32) -> (i32, i32, i32) {
    %c0_i32 = arith.constant 0 : i32
    %c0_i32_0 = arith.constant 0 : i32
    %c0_i32_1 = arith.constant 0 : i32
    return %arg0, %c0_i32, %c0_i32_0 : i32, i32, i32
  }
}

</mosaic_0001>

<bundles_post_ra>
// kernel: squeezenet11_forward.10
= control target key start
LH: loop header
LB: loop body
LE: loop exit
PB: predicated region body
PF: predicated region fallthrough
CT: control target
= control target key end

     0   :  { %s1455_s12 = smov 0   ;;  %s1659_s0 = inlined_call_operand.vmem [shape: bf16[1104,32], index: 0, kind: input, shape index: {}]   ;;  %s1660_s1 = inlined_call_operand.vmem [shape: bf16[32,128], index: 1, kind: input, shape index: {}]   ;;  %s1661_s2 = inlined_call_operand.vmem [shape: f32[1,128], index: 2, kind: input, shape index: {}]   ;;  %s1662_s3 = inlined_call_operand.vmem [shape: bf16[1104,128], index: 3, kind: output, shape index: {}]  }
   0x1 LB: > { %s978_s13 = sadd.s32 4294967295, %s1431_s12   ;;  %p982_p0 = scmp.ge.s32.totalorder %s1431_s12, 1  ;;  %s1431_s12 = sphi %s1455_s12, %s13_s12  }
   0x2   : > { %p138_p1 = scmp.lt.s32.totalorder %s1431_s12, 4 }
   0x4   : > { %p139_p2 = pnand %p982_p0, %p138_p1 }
   0x5   : > { %v1400_v0 = vld [vmem:[%s1660_s1] sm:$0xff] (!%p139_p2)   ;;  %v1433_v1 = vmov (!%p139_p2), 0.0   ;;  %v1401_v2 = vld [vmem:[%s1660_s1 + $0x8] sm:$0xff] (!%p139_p2)   ;;  %s162_s18 = smul.u32 (!%p139_p2), 46, %s978_s13  ;;  %vm1434_vm0 = vmmov (!%p139_p2), 0   ;;  %vm359_vm1 = vcmask (!%p139_p2), 261120  }
   0x6   : > { %142 = sbr.rel (%p139_p2) target bundleno = 326 (0x146), region = 32  ;;  %1290 = vmatprep.subr.bf16.mxu0 (!%p139_p2), %v1433_v1  ;;  %1386 = vmatprep.subr.bf16.mxu1 (!%p139_p2), %v1433_v1  ;;  %v1578_v26 = vld [vmem:[%s1661_s2] ss:$0 sm:$0xff] (!%p139_p2) }
   0x7   : > { %1291 = vmatpush3.bf16.msra.mxu0 (!%p139_p2), %v1400_v0  ;;  %1388 = vmatpush3.bf16.msra.mxu1 (!%p139_p2), %v1400_v0  ;;  %p163_p3 = scmp.lt.s32.totalorder (!%p139_p2), %s162_s18, 137 }
   0x8   : > { %1292 = vmatprep.subr.bf16.mxu0 (!%p139_p2), %v1433_v1  ;;  %1294 = vmatprep.mubr.msk.bf16.mxu0 (!%p139_p2), %vm1434_vm0, %v1433_v1 }
   0x9   : > { %1387 = vmatprep.subr.bf16.mxu1 (!%p139_p2), %v1433_v1  ;;  %1342 = vmatprep.mubr.msk.bf16.mxu1 (!%p139_p2), %vm1434_vm0, %v1433_v1 }
   0xb   : > { %1293 = vmatpush3.bf16.msra.mxu0 (!%p139_p2), %v1401_v2  ;;  %1389 = vmatpush3.bf16.msra.mxu1 (!%p139_p2), %v1401_v2 }
   0xd   : > { %s1664_s18 = smov (!%p163_p3, %s162_s18), 137 }
   0xe   : > { %s983_s19 = sshll.u32 %s1664_s18, 2 }
   0xf   : > { %s1485_s22 = scalar_lea.vmem %s1659_s0, %s983_s19  ;;  %s1589_s27 = scalar_lea.vmem %s1662_s3, %s983_s19 }
  0x10   : > { %v1402_v3 = vld [vmem:[%s1485_s22] sm:$0xff]   ;;  %v1404_v5 = vld [vmem:[%s1485_s22 + $0x8] sm:$0xff]   ;;  %v1406_v7 = vld [vmem:[%s1485_s22 + $0x10] sm:$0xff]  }
  0x11   : > { %v1403_v4 = vld [vmem:[%s1485_s22 + $0x60] sm:$0xff]   ;;  %1295 = vmatmul.mubr.msk.bf16.vlgmr.msra.gmra.mrb[0].mxu0 %vm359_vm1, %v1402_v3  ;;  %v1405_v6 = vld [vmem:[%s1485_s22 + $0x68] sm:$0xff]   ;;  %v1407_v8 = vld [vmem:[%s1485_s22 + $0x70] sm:$0xff]  }
  0x12   : > { %1343 = vmatmul.mubr.msk.bf16.vlgmr.msra.gmra.mrb[0].mxu1 %vm359_vm1, %v1403_v4  ;;  %1298 = vmatprep.mubr.msk.bf16.mxu0 %vm1434_vm0, %v1433_v1  ;;  %v1408_v9 = vld [vmem:[%s1485_s22 + $0x18] sm:$0xff]   ;;  %v1410_v11 = vld [vmem:[%s1485_s22 + $0x20] sm:$0xff]   ;;  %v1412_v13 = vld [vmem:[%s1485_s22 + $0x28] sm:$0xff]  }
  0x13   : > { %1346 = vmatprep.mubr.msk.bf16.mxu1 %vm1434_vm0, %v1433_v1  ;;  %v1409_v10 = vld [vmem:[%s1485_s22 + $0x78] sm:$0xff]   ;;  %v1411_v12 = vld [vmem:[%s1485_s22 + $0x80] sm:$0xff]   ;;  %v1413_v14 = vld [vmem:[%s1485_s22 + $0x88] sm:$0xff]  }
  0x14   : > { %v1414_v15 = vld [vmem:[%s1485_s22 + $0x30] sm:$0xff]   ;;  %v1416_v17 = vld [vmem:[%s1485_s22 + $0x38] sm:$0xff]   ;;  %v1418_v19 = vld [vmem:[%s1485_s22 + $0x40] sm:$0xff]  }
  0x15   : > { %v1415_v16 = vld [vmem:[%s1485_s22 + $0x90] sm:$0xff]   ;;  %v1417_v18 = vld [vmem:[%s1485_s22 + $0x98] sm:$0xff]   ;;  %v1419_v20 = vld [vmem:[%s1485_s22 + $0xa0] sm:$0xff]  }
  0x16   : > { %v1420_v21 = vld [vmem:[%s1485_s22 + $0x48] sm:$0xff]   ;;  %v1422_v23 = vld [vmem:[%s1485_s22 + $0x50] sm:$0xff]   ;;  %v1424_v25 = vld [vmem:[%s1485_s22 + $0x58] sm:$0xff]  }
  0x17   : > { %v1421_v22 = vld [vmem:[%s1485_s22 + $0xa8] sm:$0xff]   ;;  %v1423_v24 = vld [vmem:[%s1485_s22 + $0xb0] sm:$0xff]  }
  0x19   : > { %1299 = vmatmul.mubr.msk.bf16.gmra.mrb[4].mxu0 %vm359_vm1, %v1404_v5 }
  0x1a   : > { %1347 = vmatmul.mubr.msk.bf16.gmra.mrb[4].mxu1 %vm359_vm1, %v1405_v6  ;;  %1302 = vmatprep.mubr.msk.bf16.mxu0 %vm1434_vm0, %v1433_v1 }
  0x1b   : > { %1350 = vmatprep.mubr.msk.bf16.mxu1 %vm1434_vm0, %v1433_v1 }
  0x21   : > { %1303 = vmatmul.mubr.msk.bf16.gmra.mrb[8].mxu0 %vm359_vm1, %v1406_v7 }
  0x22   : > { %1351 = vmatmul.mubr.msk.bf16.gmra.mrb[8].mxu1 %vm359_vm1, %v1407_v8  ;;  %1306 = vmatprep.mubr.msk.bf16.mxu0 %vm1434_vm0, %v1433_v1 }
  0x23   : > { %1354 = vmatprep.mubr.msk.bf16.mxu1 %vm1434_vm0, %v1433_v1 }
  0x29   : > { %1307 = vmatmul.mubr.msk.bf16.gmra.mrb[12].mxu0 %vm359_vm1, %v1408_v9 }
  0x2a   : > { %1355 = vmatmul.mubr.msk.bf16.gmra.mrb[12].mxu1 %vm359_vm1, %v1409_v10  ;;  %1310 = vmatprep.mubr.msk.bf16.mxu0 %vm1434_vm0, %v1433_v1 }
  0x2b   : > { %1358 = vmatprep.mubr.msk.bf16.mxu1 %vm1434_vm0, %v1433_v1 }
  0x31   : > { %1311 = vmatmul.mubr.msk.bf16.gmra.mrb[16].mxu0 %vm359_vm1, %v1410_v11 }
  0x32   : > { %1359 = vmatmul.mubr.msk.bf16.gmra.mrb[16].mxu1 %vm359_vm1, %v1411_v12  ;;  %1314 = vmatprep.mubr.msk.bf16.mxu0 %vm1434_vm0, %v1433_v1 }
  0x33   : > { %1362 = vmatprep.mubr.msk.bf16.mxu1 %vm1434_vm0, %v1433_v1 }
  0x39   : > { %1315 = vmatmul.mubr.msk.bf16.gmra.mrb[20].mxu0 %vm359_vm1, %v1412_v13 }
  0x3a   : > { %1363 = vmatmul.mubr.msk.bf16.gmra.mrb[20].mxu1 %vm359_vm1, %v1413_v14  ;;  %1318 = vmatprep.mubr.msk.bf16.mxu0 %vm1434_vm0, %v1433_v1 }
  0x3b   : > { %1366 = vmatprep.mubr.msk.bf16.mxu1 %vm1434_vm0, %v1433_v1 }
  0x41   : > { %1319 = vmatmul.mubr.msk.bf16.gmra.mrb[24].mxu0 %vm359_vm1, %v1414_v15 }
  0x42   : > { %1367 = vmatmul.mubr.msk.bf16.gmra.mrb[24].mxu1 %vm359_vm1, %v1415_v16  ;;  %1322 = vmatprep.mubr.msk.bf16.mxu0 %vm1434_vm0, %v1433_v1 }
  0x43   : > { %1370 = vmatprep.mubr.msk.bf16.mxu1 %vm1434_vm0, %v1433_v1 }
  0x49   : > { %1323 = vmatmul.mubr.msk.bf16.gmra.mrb[28].mxu0 %vm359_vm1, %v1416_v17 }
  0x4a   : > { %1371 = vmatmul.mubr.msk.bf16.gmra.mrb[28].mxu1 %vm359_vm1, %v1417_v18  ;;  %1326 = vmatprep.mubr.msk.bf16.mxu0 %vm1434_vm0, %v1433_v1 }
  0x4b   : > { %1374 = vmatprep.mubr.msk.bf16.mxu1 %vm1434_vm0, %v1433_v1 }
  0x51   : > { %1327 = vmatmul.mubr.msk.bf16.gmra.mrb[32].mxu0 %vm359_vm1, %v1418_v19 }
  0x52   : > { %1375 = vmatmul.mubr.msk.bf16.gmra.mrb[32].mxu1 %vm359_vm1, %v1419_v20  ;;  %1330 = vmatprep.mubr.msk.bf16.mxu0 %vm1434_vm0, %v1433_v1 }
  0x53   : > { %1378 = vmatprep.mubr.msk.bf16.mxu1 %vm1434_vm0, %v1433_v1 }
  0x59   : > { %1331 = vmatmul.mubr.msk.bf16.gmra.mrb[36].mxu0 %vm359_vm1, %v1420_v21 }
  0x5a   : > { %1379 = vmatmul.mubr.msk.bf16.gmra.mrb[36].mxu1 %vm359_vm1, %v1421_v22  ;;  %1334 = vmatprep.mubr.msk.bf16.mxu0 %vm1434_vm0, %v1433_v1 }
  0x5b   : > { %1382 = vmatprep.mubr.msk.bf16.mxu1 %vm1434_vm0, %v1433_v1 }
  0x61   : > { %1335 = vmatmul.mubr.msk.bf16.gmra.mrb[40].mxu0 %vm359_vm1, %v1422_v23 }
  0x62   : > { %1383 = vmatmul.mubr.msk.bf16.gmra.mrb[40].mxu1 %vm359_vm1, %v1423_v24  ;;  %1338 = vmatprep.mubr.msk.bf16.mxu0 %vm1434_vm0, %v1433_v1 }
  0x69   : > { %1339 = vmatmul.mubr.msk.bf16.gmra.mrb[44].mxu0 %vm359_vm1, %v1424_v25 }
  0xe4   : > { %v463_v27 = vpop.f32.mrb[0].mxu0 }
  0xe5   : > { %v464_v28 = vadd.f32 %v1578_v26, %v463_v27  ;;  %v1296_v29 = vpop.f32.mrb[1].mxu0  ;;  %v559_v30 = vpop.f32.mrb[0].mxu1 }
  0xe6   : > { %v466_v31 = vpop.f32.mrb[2].mxu0  ;;  %v560_v32 = vadd.f32 %v1578_v26, %v559_v30  ;;  %v1344_v33 = vpop.f32.mrb[1].mxu1 }
  0xe7   : > { %v467_v34 = vadd.f32 %v1578_v26, %v466_v31  ;;  %v1297_v35 = vpop.f32.mrb[3].mxu0  ;;  %v562_v36 = vpop.f32.mrb[2].mxu1  ;;  %v646_v40 = vmax.f32 %v464_v28, 0.0 }
  0xe8   : > { %v670_v37 = vmax.f32 %v560_v32, 0.0  ;;  %v563_v38 = vadd.f32 %v1578_v26, %v562_v36  ;;  %v1345_v39 = vpop.f32.mrb[3].mxu1 }
  0xe9   : > { %v647_v41 = vmax.f32 %v467_v34, 0.0 }
  0xea   : > { %v671_v42 = vmax.f32 %v563_v38, 0.0 }
  0xeb   : > { %v1131_v43 = vpack.c.bf16 %v647_v41, %v646_v40 }
  0xec   : > { %v1191_v44 = vpack.c.bf16 %v671_v42, %v670_v37  ;;  %v471_v45 = vpop.f32.mrb[4].mxu0 }
  0xed   : > { %1132 = vst [vmem:[%s1589_s27] sm:$0xff] %v1131_v43   ;;  %v472_v46 = vadd.f32 %v1578_v26, %v471_v45  ;;  %v1300_v47 = vpop.f32.mrb[5].mxu0  ;;  %v567_v48 = vpop.f32.mrb[4].mxu1 }
  0xee   : > { %1254 = vst [vmem:[%s1589_s27 + $0x60] sm:$0xff] %v1191_v44   ;;  %v474_v49 = vpop.f32.mrb[6].mxu0  ;;  %v568_v50 = vadd.f32 %v1578_v26, %v567_v48  ;;  %v1348_v51 = vpop.f32.mrb[5].mxu1 }
  0xef   : > { %v475_v52 = vadd.f32 %v1578_v26, %v474_v49  ;;  %v1301_v53 = vpop.f32.mrb[7].mxu0  ;;  %v570_v54 = vpop.f32.mrb[6].mxu1  ;;  %v648_v58 = vmax.f32 %v472_v46, 0.0 }
  0xf0   : > { %v672_v55 = vmax.f32 %v568_v50, 0.0  ;;  %v571_v56 = vadd.f32 %v1578_v26, %v570_v54  ;;  %v1349_v57 = vpop.f32.mrb[7].mxu1 }
  0xf1   : > { %v649_v59 = vmax.f32 %v475_v52, 0.0 }
  0xf2   : > { %v673_v60 = vmax.f32 %v571_v56, 0.0 }
  0xf3   : > { %v1136_v61 = vpack.c.bf16 %v649_v59, %v648_v58 }
  0xf4   : > { %v1196_v62 = vpack.c.bf16 %v673_v60, %v672_v55  ;;  %v479_v63 = vpop.f32.mrb[8].mxu0 }
  0xf5   : > { %1243 = vst [vmem:[%s1589_s27 + $0x8] sm:$0xff] %v1136_v61   ;;  %v480_v0 = vadd.f32 %v1578_v26, %v479_v63  ;;  %v1304_v1 = vpop.f32.mrb[9].mxu0  ;;  %v575_v2 = vpop.f32.mrb[8].mxu1 }
  0xf6   : > { %1255 = vst [vmem:[%s1589_s27 + $0x68] sm:$0xff] %v1196_v62   ;;  %v482_v3 = vpop.f32.mrb[10].mxu0  ;;  %v576_v4 = vadd.f32 %v1578_v26, %v575_v2  ;;  %v1352_v5 = vpop.f32.mrb[9].mxu1 }
  0xf7   : > { %v483_v6 = vadd.f32 %v1578_v26, %v482_v3  ;;  %v1305_v7 = vpop.f32.mrb[11].mxu0  ;;  %v578_v8 = vpop.f32.mrb[10].mxu1  ;;  %v650_v12 = vmax.f32 %v480_v0, 0.0 }
  0xf8   : > { %v674_v9 = vmax.f32 %v576_v4, 0.0  ;;  %v579_v10 = vadd.f32 %v1578_v26, %v578_v8  ;;  %v1353_v11 = vpop.f32.mrb[11].mxu1 }
  0xf9   : > { %v651_v13 = vmax.f32 %v483_v6, 0.0 }
  0xfa   : > { %v675_v14 = vmax.f32 %v579_v10, 0.0 }
  0xfb   : > { %v1141_v15 = vpack.c.bf16 %v651_v13, %v650_v12 }
  0xfc   : > { %v1201_v16 = vpack.c.bf16 %v675_v14, %v674_v9  ;;  %v487_v17 = vpop.f32.mrb[12].mxu0 }
  0xfd   : > { %1244 = vst [vmem:[%s1589_s27 + $0x10] sm:$0xff] %v1141_v15   ;;  %v488_v18 = vadd.f32 %v1578_v26, %v487_v17  ;;  %v1308_v19 = vpop.f32.mrb[13].mxu0  ;;  %v583_v20 = vpop.f32.mrb[12].mxu1 }
  0xfe   : > { %1256 = vst [vmem:[%s1589_s27 + $0x70] sm:$0xff] %v1201_v16   ;;  %v490_v21 = vpop.f32.mrb[14].mxu0  ;;  %v584_v22 = vadd.f32 %v1578_v26, %v583_v20  ;;  %v1356_v23 = vpop.f32.mrb[13].mxu1 }
  0xff   : > { %v491_v24 = vadd.f32 %v1578_v26, %v490_v21  ;;  %v1309_v25 = vpop.f32.mrb[15].mxu0  ;;  %v586_v27 = vpop.f32.mrb[14].mxu1  ;;  %v652_v31 = vmax.f32 %v488_v18, 0.0 }
 0x100   : > { %v676_v28 = vmax.f32 %v584_v22, 0.0  ;;  %v587_v29 = vadd.f32 %v1578_v26, %v586_v27  ;;  %v1357_v30 = vpop.f32.mrb[15].mxu1 }
 0x101   : > { %v653_v32 = vmax.f32 %v491_v24, 0.0 }
 0x102   : > { %v677_v33 = vmax.f32 %v587_v29, 0.0 }
 0x103   : > { %v1146_v34 = vpack.c.bf16 %v653_v32, %v652_v31 }
 0x104   : > { %v1206_v35 = vpack.c.bf16 %v677_v33, %v676_v28  ;;  %v495_v36 = vpop.f32.mrb[16].mxu0 }
 0x105   : > { %1245 = vst [vmem:[%s1589_s27 + $0x18] sm:$0xff] %v1146_v34   ;;  %v496_v37 = vadd.f32 %v1578_v26, %v495_v36  ;;  %v1312_v38 = vpop.f32.mrb[17].mxu0  ;;  %v591_v39 = vpop.f32.mrb[16].mxu1 }
 0x106   : > { %1257 = vst [vmem:[%s1589_s27 + $0x78] sm:$0xff] %v1206_v35   ;;  %v498_v40 = vpop.f32.mrb[18].mxu0  ;;  %v592_v41 = vadd.f32 %v1578_v26, %v591_v39  ;;  %v1360_v42 = vpop.f32.mrb[17].mxu1 }
 0x107   : > { %v499_v43 = vadd.f32 %v1578_v26, %v498_v40  ;;  %v1313_v44 = vpop.f32.mrb[19].mxu0  ;;  %v594_v45 = vpop.f32.mrb[18].mxu1  ;;  %v654_v49 = vmax.f32 %v496_v37, 0.0 }
 0x108   : > { %v678_v46 = vmax.f32 %v592_v41, 0.0  ;;  %v595_v47 = vadd.f32 %v1578_v26, %v594_v45  ;;  %v1361_v48 = vpop.f32.mrb[19].mxu1 }
 0x109   : > { %v655_v50 = vmax.f32 %v499_v43, 0.0 }
 0x10a   : > { %v679_v51 = vmax.f32 %v595_v47, 0.0 }
 0x10b   : > { %v1151_v52 = vpack.c.bf16 %v655_v50, %v654_v49 }
 0x10c   : > { %v1211_v53 = vpack.c.bf16 %v679_v51, %v678_v46  ;;  %v503_v54 = vpop.f32.mrb[20].mxu0 }
 0x10d   : > { %1246 = vst [vmem:[%s1589_s27 + $0x20] sm:$0xff] %v1151_v52   ;;  %v504_v55 = vadd.f32 %v1578_v26, %v503_v54  ;;  %v1316_v56 = vpop.f32.mrb[21].mxu0  ;;  %v599_v57 = vpop.f32.mrb[20].mxu1 }
 0x10e   : > { %1258 = vst [vmem:[%s1589_s27 + $0x80] sm:$0xff] %v1211_v53   ;;  %v506_v58 = vpop.f32.mrb[22].mxu0  ;;  %v600_v59 = vadd.f32 %v1578_v26, %v599_v57  ;;  %v1364_v60 = vpop.f32.mrb[21].mxu1 }
 0x10f   : > { %v507_v61 = vadd.f32 %v1578_v26, %v506_v58  ;;  %v1317_v62 = vpop.f32.mrb[23].mxu0  ;;  %v602_v63 = vpop.f32.mrb[22].mxu1  ;;  %v656_v3 = vmax.f32 %v504_v55, 0.0 }
 0x110   : > { %v680_v0 = vmax.f32 %v600_v59, 0.0  ;;  %v603_v1 = vadd.f32 %v1578_v26, %v602_v63  ;;  %v1365_v2 = vpop.f32.mrb[23].mxu1 }
 0x111   : > { %v657_v4 = vmax.f32 %v507_v61, 0.0 }
 0x112   : > { %v681_v5 = vmax.f32 %v603_v1, 0.0 }
 0x113   : > { %v1156_v6 = vpack.c.bf16 %v657_v4, %v656_v3 }
 0x114   : > { %v1216_v7 = vpack.c.bf16 %v681_v5, %v680_v0  ;;  %v511_v8 = vpop.f32.mrb[24].mxu0 }
 0x115   : > { %1247 = vst [vmem:[%s1589_s27 + $0x28] sm:$0xff] %v1156_v6   ;;  %v512_v9 = vadd.f32 %v1578_v26, %v511_v8  ;;  %v1320_v10 = vpop.f32.mrb[25].mxu0  ;;  %v607_v11 = vpop.f32.mrb[24].mxu1 }
 0x116   : > { %1259 = vst [vmem:[%s1589_s27 + $0x88] sm:$0xff] %v1216_v7   ;;  %v514_v12 = vpop.f32.mrb[26].mxu0  ;;  %v608_v13 = vadd.f32 %v1578_v26, %v607_v11  ;;  %v1368_v14 = vpop.f32.mrb[25].mxu1 }
 0x117   : > { %v515_v15 = vadd.f32 %v1578_v26, %v514_v12  ;;  %v1321_v16 = vpop.f32.mrb[27].mxu0  ;;  %v610_v17 = vpop.f32.mrb[26].mxu1  ;;  %v658_v21 = vmax.f32 %v512_v9, 0.0 }
 0x118   : > { %v682_v18 = vmax.f32 %v608_v13, 0.0  ;;  %v611_v19 = vadd.f32 %v1578_v26, %v610_v17  ;;  %v1369_v20 = vpop.f32.mrb[27].mxu1 }
 0x119   : > { %v659_v22 = vmax.f32 %v515_v15, 0.0 }
 0x11a   : > { %v683_v23 = vmax.f32 %v611_v19, 0.0 }
 0x11b   : > { %v1161_v24 = vpack.c.bf16 %v659_v22, %v658_v21 }
 0x11c   : > { %v1221_v25 = vpack.c.bf16 %v683_v23, %v682_v18  ;;  %v519_v27 = vpop.f32.mrb[28].mxu0 }
 0x11d   : > { %1248 = vst [vmem:[%s1589_s27 + $0x30] sm:$0xff] %v1161_v24   ;;  %v520_v28 = vadd.f32 %v1578_v26, %v519_v27  ;;  %v1324_v29 = vpop.f32.mrb[29].mxu0  ;;  %v615_v30 = vpop.f32.mrb[28].mxu1 }
 0x11e   : > { %1260 = vst [vmem:[%s1589_s27 + $0x90] sm:$0xff] %v1221_v25   ;;  %v522_v31 = vpop.f32.mrb[30].mxu0  ;;  %v616_v32 = vadd.f32 %v1578_v26, %v615_v30  ;;  %v1372_v33 = vpop.f32.mrb[29].mxu1 }
 0x11f   : > { %v523_v34 = vadd.f32 %v1578_v26, %v522_v31  ;;  %v1325_v35 = vpop.f32.mrb[31].mxu0  ;;  %v618_v36 = vpop.f32.mrb[30].mxu1  ;;  %v660_v40 = vmax.f32 %v520_v28, 0.0 }
 0x120   : > { %v684_v37 = vmax.f32 %v616_v32, 0.0  ;;  %v619_v38 = vadd.f32 %v1578_v26, %v618_v36  ;;  %v1373_v39 = vpop.f32.mrb[31].mxu1 }
 0x121   : > { %v661_v41 = vmax.f32 %v523_v34, 0.0 }
 0x122   : > { %v685_v42 = vmax.f32 %v619_v38, 0.0 }
 0x123   : > { %v1166_v43 = vpack.c.bf16 %v661_v41, %v660_v40 }
 0x124   : > { %v1226_v44 = vpack.c.bf16 %v685_v42, %v684_v37  ;;  %v527_v45 = vpop.f32.mrb[32].mxu0 }
 0x125   : > { %1249 = vst [vmem:[%s1589_s27 + $0x38] sm:$0xff] %v1166_v43   ;;  %v528_v46 = vadd.f32 %v1578_v26, %v527_v45  ;;  %v1328_v47 = vpop.f32.mrb[33].mxu0  ;;  %v623_v48 = vpop.f32.mrb[32].mxu1 }
 0x126   : > { %1261 = vst [vmem:[%s1589_s27 + $0x98] sm:$0xff] %v1226_v44   ;;  %v530_v49 = vpop.f32.mrb[34].mxu0  ;;  %v624_v50 = vadd.f32 %v1578_v26, %v623_v48  ;;  %v1376_v51 = vpop.f32.mrb[33].mxu1 }
 0x127   : > { %v531_v52 = vadd.f32 %v1578_v26, %v530_v49  ;;  %v1329_v53 = vpop.f32.mrb[35].mxu0  ;;  %v626_v54 = vpop.f32.mrb[34].mxu1  ;;  %v662_v58 = vmax.f32 %v528_v46, 0.0 }
 0x128   : > { %v686_v55 = vmax.f32 %v624_v50, 0.0  ;;  %v627_v56 = vadd.f32 %v1578_v26, %v626_v54  ;;  %v1377_v57 = vpop.f32.mrb[35].mxu1 }
 0x129   : > { %v663_v59 = vmax.f32 %v531_v52, 0.0 }
 0x12a   : > { %v687_v60 = vmax.f32 %v627_v56, 0.0 }
 0x12b   : > { %v1171_v61 = vpack.c.bf16 %v663_v59, %v662_v58 }
 0x12c   : > { %v1231_v62 = vpack.c.bf16 %v687_v60, %v686_v55  ;;  %v535_v63 = vpop.f32.mrb[36].mxu0 }
 0x12d   : > { %1250 = vst [vmem:[%s1589_s27 + $0x40] sm:$0xff] %v1171_v61   ;;  %v536_v0 = vadd.f32 %v1578_v26, %v535_v63  ;;  %v1332_v1 = vpop.f32.mrb[37].mxu0  ;;  %v631_v2 = vpop.f32.mrb[36].mxu1 }
 0x12e   : > { %1262 = vst [vmem:[%s1589_s27 + $0xa0] sm:$0xff] %v1231_v62   ;;  %v538_v3 = vpop.f32.mrb[38].mxu0  ;;  %v632_v4 = vadd.f32 %v1578_v26, %v631_v2  ;;  %v1380_v5 = vpop.f32.mrb[37].mxu1 }
 0x12f   : > { %v539_v6 = vadd.f32 %v1578_v26, %v538_v3  ;;  %v1333_v7 = vpop.f32.mrb[39].mxu0  ;;  %v634_v8 = vpop.f32.mrb[38].mxu1  ;;  %v664_v12 = vmax.f32 %v536_v0, 0.0 }
 0x130   : > { %v688_v9 = vmax.f32 %v632_v4, 0.0  ;;  %v635_v10 = vadd.f32 %v1578_v26, %v634_v8  ;;  %v1381_v11 = vpop.f32.mrb[39].mxu1 }
 0x131   : > { %v665_v13 = vmax.f32 %v539_v6, 0.0 }
 0x132   : > { %v689_v14 = vmax.f32 %v635_v10, 0.0 }
 0x133   : > { %v1176_v15 = vpack.c.bf16 %v665_v13, %v664_v12 }
 0x134   : > { %v1236_v16 = vpack.c.bf16 %v689_v14, %v688_v9  ;;  %v543_v17 = vpop.f32.mrb[40].mxu0 }
 0x135   : > { %1251 = vst [vmem:[%s1589_s27 + $0x48] sm:$0xff] %v1176_v15   ;;  %v544_v18 = vadd.f32 %v1578_v26, %v543_v17  ;;  %v1336_v19 = vpop.f32.mrb[41].mxu0  ;;  %v639_v20 = vpop.f32.mrb[40].mxu1 }
 0x136   : > { %1263 = vst [vmem:[%s1589_s27 + $0xa8] sm:$0xff] %v1236_v16   ;;  %v546_v21 = vpop.f32.mrb[42].mxu0  ;;  %v640_v22 = vadd.f32 %v1578_v26, %v639_v20  ;;  %v1384_v23 = vpop.f32.mrb[41].mxu1 }
 0x137   : > { %v547_v24 = vadd.f32 %v1578_v26, %v546_v21  ;;  %v1337_v25 = vpop.f32.mrb[43].mxu0  ;;  %v642_v27 = vpop.f32.mrb[42].mxu1  ;;  %v666_v31 = vmax.f32 %v544_v18, 0.0 }
 0x138   : > { %v690_v28 = vmax.f32 %v640_v22, 0.0  ;;  %v643_v29 = vadd.f32 %v1578_v26, %v642_v27  ;;  %v1385_v30 = vpop.f32.mrb[43].mxu1 }
 0x139   : > { %v667_v32 = vmax.f32 %v547_v24, 0.0 }
 0x13a   : > { %v691_v33 = vmax.f32 %v643_v29, 0.0 }
 0x13b   : > { %v1181_v34 = vpack.c.bf16 %v667_v32, %v666_v31 }
 0x13c   : > { %v1241_v35 = vpack.c.bf16 %v691_v33, %v690_v28  ;;  %v551_v36 = vpop.f32.mrb[44].mxu0 }
 0x13d   : > { %1252 = vst [vmem:[%s1589_s27 + $0x50] sm:$0xff] %v1181_v34   ;;  %v552_v37 = vadd.f32 %v1578_v26, %v551_v36  ;;  %v1340_v38 = vpop.f32.mrb[45].mxu0 }
 0x13e   : > { %1264 = vst [vmem:[%s1589_s27 + $0xb0] sm:$0xff] %v1241_v35   ;;  %v554_v39 = vpop.f32.mrb[46].mxu0 }
 0x13f   : > { %v555_v40 = vadd.f32 %v1578_v26, %v554_v39  ;;  %v1341_v41 = vpop.f32.mrb[47].mxu0  ;;  %v668_v42 = vmax.f32 %v552_v37, 0.0 }
 0x141   : > { %v669_v43 = vmax.f32 %v555_v40, 0.0 }
 0x143   : > { %v1186_v44 = vpack.c.bf16 %v669_v43, %v668_v42 }
 0x145   : > { %1253 = vst [vmem:[%s1589_s27 + $0x58] sm:$0xff] %v1186_v44  }
 0x146 PF: > { %s13_s12 = sadd.s32 1, %s1431_s12  }
 0x147   : > { %p10_p4 = scmp.ge.s32.totalorder %s13_s12, 5  }
 0x149   :  { %12 = sbr.rel (!%p10_p4) target bundleno = 1 (0x1), region = 62 }

// kernel: squeezenet11_forward.13
= control target key start
LH: loop header
LB: loop body
LE: loop exit
PB: predicated region body
PF: predicated region fallthrough
CT: control target
= control target key end

     0   :  { %s1877_s21 = smov 0   ;;  %s2157_s0 = inlined_call_operand.vmem [shape: bf16[2,25,128], index: 0, kind: input, shape index: {}]   ;;  %s2158_s1 = inlined_call_operand.vmem [shape: bf16[128,32], index: 1, kind: input, shape index: {}]   ;;  %s2159_s2 = inlined_call_operand.vmem [shape: f32[1,32], index: 2, kind: input, shape index: {}]   ;;  %s2160_s3 = inlined_call_operand.vmem [shape: bf16[32,256], index: 3, kind: input, shape index: {}]   ;;  %s2161_s4 = inlined_call_operand.vmem [shape: f32[1,256], index: 4, kind: input, shape index: {}]   ;;  %s2162_s5 = inlined_call_operand.vmem [shape: bf16[8,32,128], index: 5, kind: input, shape index: {}]   ;;  %s2163_s6 = inlined_call_operand.vmem [shape: bf16[2,25,256], index: 6, kind: output, shape index: {}]  }
   0x1 LB: > { %s1528_s22 = sadd.s32 4294967295, %s1839_s21   ;;  %p1532_p0 = scmp.ge.s32.totalorder %s1839_s21, 1  ;;  %s1839_s21 = sphi %s1877_s21, %s16_s21  }
   0x2   : > { %p212_p1 = scmp.lt.s32.totalorder %s1839_s21, 3 }
   0x4   : > { %p213_p2 = pnand %p1532_p0, %p212_p1 }
   0x5   : > { %v1801_v0 = vld [vmem:[%s2158_s1] sm:$0xff] (!%p213_p2)   ;;  %p242_p3 = scmp.lt.s32.totalorder (!%p213_p2), %s1528_s22, 1  ;;  %v1802_v1 = vld [vmem:[%s2158_s1 + $0x8] sm:$0xff] (!%p213_p2)   ;;  %v1803_v2 = vld [vmem:[%s2158_s1 + $0x10] sm:$0xff] (!%p213_p2)   ;;  %vm257_vm0 = vcmask (!%p213_p2), 261124   ;;  %vm2164_vm3 = vcmask (!%p213_p2), 261120   ;;  %v412_v19 = vlaneseq (!%p213_p2) }
   0x6   : > { %216 = sbr.rel (%p213_p2) target bundleno = 570 (0x23a), region = 44  ;;  %1672 = vmatprep.subr.bf16.mxu0 (!%p213_p2), %v1801_v0  ;;  %v1804_v3 = vld [vmem:[%s2158_s1 + $0x18] sm:$0xff] (!%p213_p2)   ;;  %v1805_v5 = vld [vmem:[%s2158_s1 + $0x20] sm:$0xff] (!%p213_p2)   ;;  %v1806_v6 = vld [vmem:[%s2158_s1 + $0x28] sm:$0xff] (!%p213_p2)   ;;  %vm258_vm1 = vsmask.f32 (!%p213_p2), 7954 }
   0x7   : > { %1673 = vmatpush3.bf16.msra.mxu0 (!%p213_p2), %v1801_v0  ;;  %v1807_v7 = vld [vmem:[%s2158_s1 + $0x30] sm:$0xff] (!%p213_p2)   ;;  %v1808_v8 = vld [vmem:[%s2158_s1 + $0x38] sm:$0xff] (!%p213_p2)   ;;  %vm259_vm2 = vmand (!%p213_p2), %vm257_vm0, %vm258_vm1  ;;  %v1841_v15 = vmov (!%p213_p2), 0   ;;  %v1938_v20 = vshrl.u32 (!%p213_p2), %v412_v19, 7 }
   0x8   : > { %1674 = vmatprep.subr.bf16.mxu0 (!%p213_p2), %v1802_v1  ;;  %v260_v10 = vld [vmem:[#allocation2 + $0x10] sm:$0xf0] (!%p213_p2)  ;;  %v1811_v12 = vld [vmem:[%s2162_s5] sm:$0xff] (!%p213_p2)   ;;  %v1813_v14 = vld [vmem:[%s2162_s5 + $0x8] sm:$0xff] (!%p213_p2)   ;;  %256 = vst.msk [vmem:[#allocation2] sm:$0xff] (!%p213_p2), %vm2164_vm3, %v1841_v15 }
   0x9   : > { %v261_v11 = vsel (!%p213_p2), %vm259_vm2, 0, %v260_v10  ;;  %v1812_v13 = vld [vmem:[%s2162_s5 + $0x10] sm:$0xff] (!%p213_p2)   ;;  %v1814_v16 = vld [vmem:[%s2162_s5 + $0x18] sm:$0xff] (!%p213_p2)   ;;  %1700 = vmatprep.subr.bf16.mxu1 (!%p213_p2), %v1811_v12  ;;  %v1932_v17 = vld [vmem:[%s2162_s5 + $0x20] sm:$0xff] (!%p213_p2)   ;;  %v414_v21 = vadd.s32 (!%p213_p2), 8, %v1938_v20  ;;  %v415_v22 = vadd.s32 (!%p213_p2), 16, %v1938_v20 }
   0xa   : > { %262 = vst [vmem:[#allocation2 + $0x10] sm:$0xf0] (!%p213_p2), %v261_v11  ;;  %1701 = vmatpush3.bf16.msra.mxu1 (!%p213_p2), %v1811_v12  ;;  %v1818_v18 = vld [vmem:[%s2160_s3 + $0x4] ss:$8 sps:$4 sm:$0xff] (!%p213_p2)   ;;  %v416_v23 = vadd.s32 (!%p213_p2), 24, %v1938_v20 }
   0xb   : > { %1675 = vmatpush3.bf16.msra.mxu0 (!%p213_p2), %v1802_v1  ;;  %1702 = vmatprep.subr.bf16.mxu1 (!%p213_p2), %v1813_v14  ;;  %v1944_v24 = vmul.u32.u64.low (!%p213_p2), 3435973837, %v1938_v20  ;;  %v1945_v25 = vmul.u32.u64.high 3435973837, %v1938_v20, %v1944_v24  ;;  %v1947_v26 = vmul.u32.u64.low (!%p213_p2), 3435973837, %v414_v21  ;;  %v1948_v27 = vmul.u32.u64.high 3435973837, %v414_v21, %v1947_v26  ;;  %v1537_v54 = vld [vmem:[%s2159_s2] ss:$0 sm:$0xff] (!%p213_p2) }
   0xc   : > { %1676 = vmatprep.subr.bf16.mxu0 (!%p213_p2), %v1803_v2  ;;  %v1950_v28 = vmul.u32.u64.low (!%p213_p2), 3435973837, %v415_v22  ;;  %v1951_v29 = vmul.u32.u64.high 3435973837, %v415_v22, %v1950_v28  ;;  %v1953_v30 = vmul.u32.u64.low (!%p213_p2), 3435973837, %v416_v23  ;;  %v1954_v31 = vmul.u32.u64.high 3435973837, %v416_v23, %v1953_v30 }
   0xd   : > { %s2198_s22 = smov (!%p242_p3, %s1528_s22), 1  ;;  %v423_v32 = vshrl.u32 %v1945_v25, 2  ;;  %v434_v33 = vshrl.u32 %v1948_v27, 2 }
   0xe   : > { %s1624_s29 = sshll.u32 %s2198_s22, 4  ;;  %1703 = vmatpush3.bf16.msra.mxu1 %v1813_v14  ;;  %v445_v34 = vshrl.u32 %v1951_v29, 2  ;;  %v456_v35 = vshrl.u32 %v1954_v31, 2  ;;  %s1625_s19 = sshll.u32 %s2198_s22, 5 }
   0xf   : > { %s246_s8 = scalar_lea.vmem %s2157_s0, %s1624_s29  ;;  %1677 = vmatpush3.bf16.msra.mxu0 %v1803_v2  ;;  %1708 = vmatprep.subr.bf16.mxu1 %v1932_v17  ;;  %v424_v36 = vmul.u32 5, %v423_v32  ;;  %v435_v37 = vmul.u32 5, %v434_v33  ;;  %v495_v19 = vld [vmem:[#allocation2] sm:$0xe0]  ;;  %s251_s24 = scalar_lea.vmem %s2163_s6, %s1625_s19 }
  0x10   : > { %v1809_v4 = vld [vmem:[%s246_s8] sm:$0xff]   ;;  %1678 = vmatprep.subr.bf16.mxu0 %v1804_v3  ;;  %v1810_v9 = vld [vmem:[%s246_s8 + $0x8] sm:$0x1f]   ;;  %v446_v38 = vmul.u32 5, %v445_v34  ;;  %v457_v39 = vmul.u32 5, %v456_v35  ;;  %v540_v31 = vshrl.u32 %v495_v19, 16 }
  0x11   : > { %1688 = vmatprep.mubr.bf16.mxu0 %v1809_v4  ;;  %v425_v40 = vsub.s32 %v1938_v20, %v424_v36  ;;  %v436_v41 = vsub.s32 %v414_v21, %v435_v37  ;;  %v409_v12 = vld [vmem:[#allocation2 + $0x10] sm:$0x1f]  ;;  %v543_v32 = vshll.u32 %v495_v19, 16  ;;  %v708_v33 = vld [vmem:[#allocation2] sm:$0xc0] }
  0x12   : > { %v447_v42 = vsub.s32 %v415_v22, %v446_v38  ;;  %v458_v43 = vsub.s32 %v416_v23, %v457_v39 }
  0x13   : > { %1679 = vmatpush3.bf16.msra.mxu0 %v1804_v3  ;;  %vm461_vm4 = vcmp.ne.s32.totalorder %v425_v40, 0  ;;  %vm465_vm5 = vcmp.lt.s32.totalorder %v425_v40, 0  ;;  %vm462_vm6 = vcmp.ne.s32.totalorder %v436_v41, 0  ;;  %vm466_vm7 = vcmp.lt.s32.totalorder %v436_v41, 0 }
  0x14   : > { %1680 = vmatprep.subr.bf16.mxu0 %v1805_v5  ;;  %vm463_vm8 = vcmp.ne.s32.totalorder %v447_v42, 0  ;;  %vm467_vm9 = vcmp.lt.s32.totalorder %v447_v42, 0  ;;  %v473_v44 = vadd.s32 5, %v425_v40  ;;  %vm464_vm10 = vcmp.ne.s32.totalorder %v458_v43, 0  ;;  %vm469_vm12 = vmand %vm465_vm5, %vm461_vm4 }
  0x15   : > { %vm468_vm11 = vcmp.lt.s32.totalorder %v458_v43, 0  ;;  %v474_v45 = vadd.s32 5, %v436_v41  ;;  %vm470_vm13 = vmand %vm466_vm7, %vm462_vm6  ;;  %v475_v46 = vadd.s32 5, %v447_v42  ;;  %v476_v47 = vadd.s32 5, %v458_v43 }
  0x16   : > { %vm471_vm14 = vmand %vm467_vm9, %vm463_vm8  ;;  %v477_v48 = vsel %vm469_vm12, %v473_v44, %v425_v40 }
  0x17   : > { %1681 = vmatpush3.bf16.msra.mxu0 %v1805_v5  ;;  %vm472_vm15 = vmand %vm468_vm11, %vm464_vm10  ;;  %v478_v49 = vsel %vm470_vm13, %v474_v45, %v436_v41  ;;  %v479_v50 = vsel %vm471_vm14, %v475_v46, %v447_v42  ;;  %vm481_vm0 = vcmp.ne.s32.totalorder %v477_v48, 0  ;;  %vm485_vm5 = vcmp.ne.s32.totalorder %v477_v48, 4 }
  0x18   : > { %1682 = vmatprep.subr.bf16.mxu0 %v1806_v6  ;;  %v480_v51 = vsel %vm472_vm15, %v476_v47, %v458_v43  ;;  %vm482_vm1 = vcmp.ne.s32.totalorder %v478_v49, 0  ;;  %vm483_vm2 = vcmp.ne.s32.totalorder %v479_v50, 0  ;;  %vm505_vm4 = vmpackc.low %vm481_vm0, %vm481_vm0  ;;  %vm486_vm7 = vcmp.ne.s32.totalorder %v478_v49, 4 }
  0x19   : > { %vm484_vm3 = vcmp.ne.s32.totalorder %v480_v51, 0  ;;  %vm506_vm6 = vmpackc.low %vm482_vm1, %vm482_vm1  ;;  %vm487_vm9 = vcmp.ne.s32.totalorder %v479_v50, 4  ;;  %vm488_vm11 = vcmp.ne.s32.totalorder %v480_v51, 4  ;;  %v509_v52 = vsel %vm505_vm4, 65537, %v1841_v15 }
  0x1a   : > { %vm507_vm8 = vmpackc.low %vm483_vm2, %vm483_vm2  ;;  %v510_v53 = vsel %vm506_vm6, 65537, %v1841_v15  ;;  %vm407_vm0 = vsmask.f32 4352  ;;  %vm519_vm2 = vcmask 1044480   ;;  %vm2169_vm6 = vcmask 261120  }
  0x1b   : > { %1683 = vmatpush3.bf16.msra.mxu0 %v1806_v6  ;;  %vm508_vm10 = vmpackc.low %vm484_vm3, %vm484_vm3  ;;  %v511_v56 = vsel %vm507_vm8, 65537, %v1841_v15  ;;  %v1967_v57 = vcombine.low %v509_v52, %v510_v53  ;;  %vm406_vm3 = vcmask 258048   ;;  %v542_v41 = vrot.slane %v540_v31, 5  ;;  %v1822_v31 = vld [vmem:[%s2160_s3 + $0x14] ss:$8 sps:$4 sm:$0xff]  }
  0x1c   : > { %1684 = vmatprep.subr.bf16.mxu0 %v1807_v7  ;;  %vm718_vm12 = vmpackc.low %vm485_vm5, %vm485_vm5  ;;  %v512_v60 = vsel %vm508_vm10, 65537, %v1841_v15  ;;  %vm732_vm5 = vcmask 1045504   ;;  %v545_v42 = vrot.slane %v543_v32, 6  ;;  %vm829_vm8 = vsmask.f32 7424  ;;  %v1823_v32 = vld [vmem:[%s2162_s5 + $0x30] sm:$0xff]  }
  0x1d   : > { %vm719_vm13 = vmpackc.low %vm486_vm7, %vm486_vm7  ;;  %v722_v61 = vsel %vm718_vm12, 65537, %v1841_v15  ;;  %v520_v5 = vrot.slane %v1967_v57, 3  ;;  %v834_v28 = vshrl.u32 %v1967_v57, 16  ;;  %vm750_vm10 = vcmask 1041408  }
  0x1e   : > { %vm720_vm14 = vmpackc.low %vm487_vm9, %vm487_vm9  ;;  %v723_v62 = vsel %vm719_vm13, 65537, %v1841_v15  ;;  %vm635_vm9 = vcmask 1042432   ;;  %v546_v50 = vor.u32 %v545_v42, %v542_v41 }
  0x1f   : > { %1685 = vmatpush3.bf16.msra.mxu0 %v1807_v7  ;;  %vm721_vm15 = vmpackc.low %vm488_vm11, %vm488_vm11  ;;  %v724_v1 = vsel %vm720_vm14, 65537, %v1841_v15  ;;  %v1975_v7 = vcombine.low %v511_v56, %v512_v60  ;;  %vm1989_vm4 = vcmp.ne.s16.totalorder %v520_v5, 0  ;;  %vm538_vm14 = vsmask.f32 2304 }
  0x20   : > { %1686 = vmatprep.subr.bf16.mxu0 %v1808_v8  ;;  %v725_v2 = vsel %vm721_vm15, 65537, %v1841_v15  ;;  %vm1983_vm1 = vmand %vm406_vm3, %vm407_vm0  ;;  %v526_v35 = vsel %vm1989_vm4, %v495_v19, 0 }
  0x21   : > { %v521_v23 = vrot.slane %v1975_v7, 3  ;;  %v838_v29 = vshll.u32 %v1975_v7, 16  ;;  %v636_v43 = vrot.slane %v526_v35, 5  ;;  %v842_v56 = vshrl.u32 %v1975_v7, 16  ;;  %vm2176_vm4 = vmmov %vm2169_vm6 }
  0x23   : > { %1687 = vmatpush3.bf16.msra.mxu0 %v1808_v8  ;;  %v1977_v8 = vcombine.low %v722_v61, %v723_v62  ;;  %v522_v36 = vsel %vm519_vm2, %v520_v5, %v521_v23  ;;  %v840_v39 = vrot.slane %v838_v29, 1  ;;  %vm2012_vm12 = vcmp.ne.s16.totalorder %v521_v23, 0 }
  0x24   : > { %1692 = vmatprep.subr.bf16.mxu0 %v1812_v13  ;;  %vm524_vm11 = vcmp.ne.s16.totalorder %v522_v36, 0 }
  0x25   : > { %v733_v21 = vrot.slane %v1977_v8, 2  ;;  %v949_v51 = vshrl.u32 %v1977_v8, 16  ;;  %v952_v5 = vshll.u32 %v1977_v8, 16 }
  0x26   : > { %1689 = vmatmul.mubr.bf16.vlgmr.msra.gmra.mrb[0].mxu0 %v1810_v9  ;;  %v831_v9 = vshll.u32 %v1967_v57, 16 }
  0x27   : > { %1693 = vmatpush3.bf16.msra.mxu0 %v1812_v13  ;;  %v1980_v13 = vcombine.low %v724_v1, %v725_v2  ;;  %vm2001_vm7 = vcmp.ne.s16.totalorder %v733_v21, 0 }
  0x28   : > { %1694 = vmatprep.subr.bf16.mxu0 %v1814_v16  ;;  %v1994_v27 = vrot.slane %v831_v9, 1  ;;  %v739_v40 = vsel %vm2001_vm7, %v708_v33, 0  ;;  %vm2178_vm7 = vmmov %vm2176_vm4 }
  0x29   : > { %v734_v25 = vrot.slane %v1980_v13, 2  ;;  %v751_v45 = vrot.slane %v739_v40, 6  ;;  %v956_v52 = vshrl.u32 %v1980_v13, 16  ;;  %v959_v19 = vshll.u32 %v1980_v13, 16 }
  0x2a   : > { %v836_v38 = vor.u32 %v834_v28, %v1994_v27  ;;  %vm845_vm3 = vcmp.ne.s16.totalorder %v1994_v27, 0 }
  0x2b   : > { %1695 = vmatpush3.bf16.msra.mxu0 %v1814_v16  ;;  %v735_v37 = vsel %vm732_vm5, %v733_v21, %v734_v25  ;;  %vm2016_vm15 = vcmp.ne.s16.totalorder %v734_v25, 0  ;;  %v844_v25 = vor.u32 %v842_v56, %v840_v39 }
  0x2c   : > { %1357 = vmatprep.subr.bf16.mxu0 %v1818_v18  ;;  %vm737_vm13 = vcmp.ne.s16.totalorder %v735_v37, 0  ;;  %v841_v47 = vsel %vm829_vm8, %v836_v38, %v840_v39  ;;  %v1820_v37 = vld [vmem:[%s2160_s3 + $0x10] ss:$8 sps:$4 sm:$0xff]  }
  0xf9   : > { %v1690_v55 = vpop.f32.mrb[0].mxu0 }
  0xfa   : > { %v393_v58 = vadd.f32 %v1690_v55, %v1537_v54  ;;  %v384_v59 = vpop.f32.mrb[1].mxu0 }
  0xfb   : > { %v385_v63 = vadd.f32 %v1537_v54, %v384_v59  ;;  %v1691_v0 = vpop.f32.mrb[2].mxu0 }
  0xfc   : > { %v396_v3 = vadd.f32 %v1691_v0, %v1537_v54  ;;  %v387_v4 = vpop.f32.mrb[3].mxu0  ;;  %v401_v10 = vmax.f32 %v393_v58, 0.0 }
  0xfd   : > { %v388_v6 = vadd.f32 %v1537_v54, %v387_v4  ;;  %v399_v14 = vmax.f32 %v385_v63, 0.0  ;;  %v951_v4 = vrot.slane %v949_v51, 7 }
  0xfe   : > { %v402_v11 = vmax.f32 %v396_v3, 0.0  ;;  %v1819_v3 = vld [vmem:[%s2162_s5 + $0x28] sm:$0xff]  }
  0xff   : > { %v400_v18 = vmax.f32 %v388_v6, 0.0  ;;  %v954_v29 = vor.u32 %v952_v5, %v951_v4 }
 0x100   : > { %v404_v22 = vpack.c.bf16 %v402_v11, %v401_v10 }
 0x101   : > { %v403_v26 = vpack.c.bf16 %v400_v18, %v399_v14  ;;  %v958_v18 = vrot.slane %v956_v52, 7  ;;  %v1825_v52 = vld [vmem:[%s2162_s5 + $0x40] sm:$0xff]  }
 0x102   : > { %v410_v30 = vsel %vm1983_vm1, %v404_v22, %v409_v12  ;;  %vm846_vm1 = vcmp.ne.s16.totalorder %v841_v47, 0  ;;  %v827_v12 = vld [vmem:[#allocation2] sm:$0x80] }
 0x103   : > { %411 = vst [vmem:[#allocation2 + $0x10] sm:$0x1f] %v410_v30  ;;  %405 = vst.msk [vmem:[#allocation2 + $0x8] sm:$0xff] %vm2169_vm6, %v403_v26  ;;  %v1816_v26 = vld [vmem:[%s2160_s3] ss:$8 sps:$4 sm:$0xff]   ;;  %v848_v28 = vsel %vm845_vm3, %v827_v12, 0  ;;  %v961_v35 = vor.u32 %v959_v19, %v958_v18 }
 0x104   : > { %vm2177_vm6 = vmmov %vm2176_vm4  ;;  %v858_v27 = vshrl.u32 %v848_v28, 16  ;;  %vm963_vm3 = vcmp.ne.s16.totalorder %v954_v29, 0  ;;  %v1828_v12 = vld [vmem:[%s2162_s5 + $0x58] sm:$0xff]   ;;  %v1244_v28 = vrot.slane %v1977_v8, 5  ;;  %v1245_v29 = vrot.slane %v1980_v13, 5  ;;  %v1831_v8 = vld [vmem:[%s2162_s5 + $0x70] sm:$0xff]  }
 0x106   : > { %v860_v41 = vrot.slane %v858_v27, 7 }
 0x10a   : > { %v2021_v48 = vld [vmem:[#allocation2 + $0x8] sm:$0xff]  ;;  %v496_v49 = vld [vmem:[#allocation2 + $0x10] sm:$0x3] }
 0x10b   : > { %v527_v53 = vsel %vm524_vm11, %v2021_v48, 0  ;;  %v528_v54 = vsel %vm2012_vm12, %v496_v49, 0  ;;  %v2030_v55 = vsel %vm737_vm13, %v2021_v48, 0  ;;  %v548_v61 = vshrl.u32 %v2021_v48, 16  ;;  %v709_v23 = vld [vmem:[#allocation2 + $0x10] sm:$0x7]  ;;  %vm2179_vm11 = vmmov %vm2176_vm4 }
 0x10c   : > { %v637_v58 = vrot.slane %v527_v53, 5  ;;  %v639_v59 = vrot.slane %v528_v54, 5  ;;  %v752_v60 = vrot.slane %v2030_v55, 6  ;;  %v551_v62 = vshll.u32 %v2021_v48, 16  ;;  %vm2180_vm12 = vmmov %vm2176_vm4  ;;  %v828_v36 = vld [vmem:[#allocation2 + $0x10] sm:$0xf] }
 0x10d   : > { %v557_v63 = vshrl.u32 %v496_v49, 16  ;;  %v560_v0 = vshll.u32 %v496_v49, 16  ;;  %v550_v6 = vrot.slane %v548_v61, 5  ;;  %v849_v16 = vsel %vm846_vm1, %v2021_v48, 0  ;;  %v490_v49 = vld [vmem:[#allocation2 + $0x10] sm:$0x1f] }
 0x10e   : > { %v638_v1 = vsel %vm635_vm9, %v636_v43, %v637_v58  ;;  %v640_v2 = vsel %vm635_vm9, %v637_v58, %v639_v59  ;;  %v553_v9 = vrot.slane %v551_v62, 6  ;;  %v753_v14 = vsel %vm750_vm10, %v751_v45, %v752_v60  ;;  %v1824_v45 = vld [vmem:[%s2162_s5 + $0x38] sm:$0xff]   ;;  %v1243_v27 = vld [vmem:[#allocation2 + $0x10] sm:$0xff]  ;;  %v1242_v13 = vld [vmem:[#allocation2 + $0x8] sm:$0xf8] }
 0x10f   : > { %1704 = vmatprep.mubr.msk.bf16.mxu1 %vm2176_vm4, %v638_v1  ;;  %v559_v10 = vrot.slane %v557_v63, 5  ;;  %v562_v11 = vrot.slane %v560_v0, 6  ;;  %v862_v24 = vshrl.u32 %v849_v16, 16  ;;  %v741_v33 = vsel %vm2016_vm15, %v709_v23, 0  ;;  %vm2181_vm15 = vmmov %vm2176_vm4 }
 0x110   : > { %1705 = vmatmul.mubr.msk.bf16.vlgmr.msra.gmra.mrb[0].mxu1 %vm2177_vm6, %v640_v2  ;;  %v554_v21 = vor.u32 %v553_v9, %v550_v6  ;;  %vm847_vm13 = vcmp.ne.s16.totalorder %v844_v25, 0  ;;  %v754_v38 = vrot.slane %v741_v33, 6  ;;  %v865_v39 = vshll.u32 %v849_v16, 16  ;;  %vm2182_vm6 = vmmov %vm2176_vm4  ;;  %v1058_v2 = vld [vmem:[#allocation2 + $0x8] sm:$0xfc] }
 0x111   : > { %1709 = vmatpush3.bf16.msra.mxu1 %v1932_v17  ;;  %1712 = vmatprep.mubr.msk.bf16.mxu1 %vm2178_vm7, %v753_v14  ;;  %v563_v22 = vor.u32 %v562_v11, %v559_v10  ;;  %v864_v34 = vrot.slane %v862_v24, 7  ;;  %v850_v40 = vsel %vm847_vm13, %v828_v36, 0  ;;  %v965_v44 = vsel %vm963_vm3, %v2021_v48, 0  ;;  %vm2183_vm7 = vmmov %vm2176_vm4 }
 0x112   : > { %1710 = vmatprep.subr.bf16.mxu1 %v1819_v3  ;;  %v555_v30 = vsel %vm538_vm14, %v546_v50, %v554_v21  ;;  %v755_v46 = vsel %vm750_vm10, %v752_v60, %v754_v38  ;;  %v870_v47 = vshrl.u32 %v850_v40, 16  ;;  %v975_v50 = vshll.u32 %v965_v44, 16  ;;  %vm2185_vm13 = vmmov %vm2176_vm4  ;;  %v1832_v38 = vld [vmem:[%s2162_s5 + $0x78] sm:$0xff]  }
 0x113   : > { %v564_v17 = vsel %vm538_vm14, %v554_v21, %v563_v22  ;;  %1696 = vmatprep.mubr.msk.bf16.mxu0 %vm2179_vm11, %v555_v30  ;;  %vm856_vm14 = vsmask.f32 256  ;;  %v867_v42 = vor.u32 %v865_v39, %v864_v34  ;;  %v873_v56 = vshll.u32 %v850_v40, 16  ;;  %vm2184_vm11 = vmmov %vm2176_vm4  ;;  %v1829_v22 = vld [vmem:[%s2162_s5 + $0x60] sm:$0xff]  }
 0x114   : > { %1697 = vmatmul.mubr.msk.bf16.vlgmr.msra.gmra.mrb[4].mxu0 %vm2180_vm12, %v564_v17  ;;  %v962_v43 = vsel %vm856_vm14, %v951_v4, %v961_v35  ;;  %v872_v54 = vrot.slane %v870_v47, 7  ;;  %v977_v55 = vrot.slane %v975_v50, 1  ;;  %v1060_v58 = vrot.slane %v1967_v57, 6  ;;  %vm2187_vm3 = vmmov %vm2176_vm4 }
 0x115   : > { %1711 = vmatpush3.bf16.msra.mxu1 %v1819_v3  ;;  %1358 = vmatpush1.bf16.msra.mxu0 %v1816_v26  ;;  %vm964_vm1 = vcmp.ne.s16.totalorder %v962_v43, 0  ;;  %v868_v51 = vsel %vm856_vm14, %v860_v41, %v867_v42  ;;  %v973_v60 = vshrl.u32 %v965_v44, 16  ;;  %v1059_v3 = vld [vmem:[#allocation2 + $0x10] sm:$0x7f]  ;;  %v1155_v14 = vshrl.u32 %v1058_v2, 16 }
 0x116   : > { %1389 = vmatprep.mubr.bf16.mxu0 %v1841_v15  ;;  %1359 = vmatprep.subr.bf16.mxu0 %v1822_v31  ;;  %v966_v53 = vsel %vm964_vm1, %v490_v49, 0  ;;  %v875_v61 = vor.u32 %v873_v56, %v872_v54  ;;  %v1158_v18 = vshll.u32 %v1058_v2, 16  ;;  %v1163_v19 = vshrl.u32 %v1059_v3, 16  ;;  %v1830_v31 = vld [vmem:[%s2162_s5 + $0x68] sm:$0xff]   ;;  %vm2189_vm1 = vmmov %vm2187_vm3  ;;  %v1410_v54 = vld [vmem:[%s2161_s4] sm:$0x3] }
 0x117   : > { %1716 = vmatprep.subr.bf16.mxu1 %v1823_v32  ;;  %v980_v59 = vshll.u32 %v966_v53, 16  ;;  %v978_v62 = vor.u32 %v977_v55, %v973_v60  ;;  %v984_v6 = vshrl.u32 %v966_v53, 16  ;;  %v1166_v21 = vshll.u32 %v1059_v3, 16 }
 0x118   : > { %v876_v1 = vsel %vm856_vm14, %v864_v34, %v875_v61  ;;  %v1157_v23 = vrot.slane %v1155_v14, 2  ;;  %v1160_v24 = vrot.slane %v1158_v18, 3  ;;  %v1165_v25 = vrot.slane %v1163_v19, 2 }
 0x119   : > { %1360 = vmatpush1.bf16.msra.mxu0 %v1820_v37  ;;  %v982_v0 = vrot.slane %v980_v59, 1  ;;  %v1168_v26 = vrot.slane %v1166_v21, 3  ;;  %v1414_v53 = vsub.s32 0, %v1938_v20  ;;  %v1418_v55 = vsub.s32 1, %v1938_v20 }
 0x11a   : > { %v1161_v30 = vor.u32 %v1160_v24, %v1157_v23 }
 0x11b   : > { %v983_v57 = vsel %vm829_vm8, %v978_v62, %v982_v0  ;;  %v986_v11 = vor.u32 %v984_v6, %v982_v0  ;;  %vm2186_vm8 = vmmov %vm2176_vm4  ;;  %v1169_v17 = vor.u32 %v1168_v26, %v1165_v25  ;;  %v1415_v56 = vrot.slane %v1410_v54, %v1414_v53 }
 0x11c   : > { %1713 = vmatmul.mubr.msk.bf16.vlgmr.msra.gmra.mrb[0].mxu1 %vm2181_vm15, %v755_v46  ;;  %1616 = vmatmul.mubr.msk.bf16.vlgmr.msra.gmra.mrb[8].mxu0 %vm2176_vm4, %v2021_v48  ;;  %v1061_v48 = vrot.slane %v1975_v7, 6  ;;  %v1827_v7 = vld [vmem:[%s2162_s5 + $0x50] sm:$0xff]   ;;  %vm2188_vm15 = vmmov %vm2187_vm3 }
 0x11d   : > { %1717 = vmatpush3.bf16.msra.mxu1 %v1823_v32  ;;  %1720 = vmatprep.mubr.msk.bf16.mxu1 %vm2182_vm6, %v868_v51  ;;  %v1246_v32 = vsel %vm635_vm9, %v1244_v28, %v1245_v29  ;;  %vm1247_vm6 = vcmp.ne.s16.totalorder %v1244_v28, 0  ;;  %vm2190_vm9 = vmmov %vm2189_vm1  ;;  %v1470_v28 = vld [vmem:[%s251_s24 + $0x18] sm:$0x11] }
 0x11e   : > { %1718 = vmatprep.subr.bf16.mxu1 %v1824_v45  ;;  %1399 = vmatprep.mubr.bf16.mxu0 %v1841_v15  ;;  %v1062_v63 = vsel %vm750_vm10, %v1060_v58, %v1061_v48  ;;  %v1826_v15 = vld [vmem:[%s2162_s5 + $0x48] sm:$0xff]   ;;  %vm1063_vm10 = vcmp.ne.s16.totalorder %v1060_v58, 0  ;;  %vm1248_vm4 = vcmp.ne.s16.totalorder %v1246_v32, 0  ;;  %v1249_v35 = vsel %vm1247_vm6, %v1242_v13, 0 }
 0x11f   : > { %vm1064_vm12 = vcmp.ne.s16.totalorder %v1062_v63, 0  ;;  %v1065_v4 = vsel %vm1063_vm10, %v1058_v2, 0  ;;  %v1250_v34 = vsel %vm1248_vm4, %v1243_v27, 0  ;;  %v1258_v37 = vrot.slane %v1249_v35, 3 }
 0x120   : > { %v1066_v5 = vsel %vm1064_vm12, %v1059_v3, 0  ;;  %v1074_v9 = vrot.slane %v1065_v4, 2  ;;  %v1259_v36 = vrot.slane %v1250_v34, 3  ;;  %v1419_v48 = vrot.slane %v1410_v54, %v1418_v55 }
 0x121   : > { %1719 = vmatpush3.bf16.msra.mxu1 %v1824_v45  ;;  %v1075_v10 = vrot.slane %v1066_v5, 2  ;;  %vm1465_vm12 = vcmask 1040384  }
 0x122   : > { %1724 = vmatprep.subr.bf16.mxu1 %v1825_v52  ;;  %v1260_v39 = vsel %vm519_vm2, %v1258_v37, %v1259_v36  ;;  %vm1467_vm2 = vcmask 1044484   ;;  %vm2146_vm10 = vmand %vm1465_vm12, %vm856_vm14 }
 0x123   : > { %v1076_v16 = vsel %vm732_vm5, %v1074_v9, %v1075_v10  ;;  %vm1153_vm5 = vsmask.f32 5376 }
 0x124   : > { %1617 = vmatmul.mubr.msk.bf16.gmra.mrb[12].mxu0 %vm2183_vm7, %v490_v49  ;;  %v1170_v33 = vsel %vm1153_vm5, %v1161_v30, %v1169_v17  ;;  %vm2191_vm7 = vmmov %vm2189_vm1 }
 0x128   : > { %1721 = vmatmul.mubr.msk.bf16.vlgmr.msra.gmra.mrb[0].mxu1 %vm2184_vm11, %v876_v1  ;;  %vm2192_vm11 = vmmov %vm2189_vm1 }
 0x129   : > { %1725 = vmatpush3.bf16.msra.mxu1 %v1825_v52  ;;  %1728 = vmatprep.mubr.msk.bf16.mxu1 %vm2185_vm13, %v983_v57  ;;  %vm2138_vm13 = vmand %vm1467_vm2, %vm407_vm0 }
 0x12a   : > { %1726 = vmatprep.subr.bf16.mxu1 %v1826_v15  ;;  %vm1469_vm0 = vmor %vm2138_vm13, %vm2146_vm10 }
 0x12d   : > { %1727 = vmatpush3.bf16.msra.mxu1 %v1826_v15 }
 0x12e   : > { %1732 = vmatprep.subr.bf16.mxu1 %v1827_v7 }
 0x134   : > { %1729 = vmatmul.mubr.msk.bf16.vlgmr.msra.gmra.mrb[0].mxu1 %vm2186_vm8, %v986_v11 }
 0x135   : > { %1733 = vmatpush3.bf16.msra.mxu1 %v1827_v7  ;;  %1736 = vmatprep.mubr.msk.bf16.mxu1 %vm2187_vm3, %v1076_v16 }
 0x136   : > { %1734 = vmatprep.subr.bf16.mxu1 %v1828_v12 }
 0x139   : > { %1735 = vmatpush3.bf16.msra.mxu1 %v1828_v12 }
 0x13a   : > { %1740 = vmatprep.subr.bf16.mxu1 %v1829_v22 }
 0x140   : > { %1737 = vmatmul.mubr.msk.bf16.vlgmr.msra.gmra.mrb[0].mxu1 %vm2188_vm15, %v1075_v10 }
 0x141   : > { %1741 = vmatpush3.bf16.msra.mxu1 %v1829_v22  ;;  %1744 = vmatprep.mubr.msk.bf16.mxu1 %vm2189_vm1, %v1170_v33 }
 0x142   : > { %1742 = vmatprep.subr.bf16.mxu1 %v1830_v31 }
 0x145   : > { %1743 = vmatpush3.bf16.msra.mxu1 %v1830_v31 }
 0x146   : > { %1748 = vmatprep.subr.bf16.mxu1 %v1831_v8 }
 0x14c   : > { %1745 = vmatmul.mubr.msk.bf16.vlgmr.msra.gmra.mrb[0].mxu1 %vm2190_vm9, %v1169_v17 }
 0x14d   : > { %1749 = vmatpush3.bf16.msra.mxu1 %v1831_v8  ;;  %1752 = vmatprep.mubr.msk.bf16.mxu1 %vm2191_vm7, %v1260_v39 }
 0x14e   : > { %1750 = vmatprep.subr.bf16.mxu1 %v1832_v38 }
 0x151   : > { %1751 = vmatpush3.bf16.msra.mxu1 %v1832_v38 }
 0x158   : > { %1753 = vmatmul.mubr.msk.bf16.vlgmr.msra.gmra.mrb[0].mxu1 %vm2192_vm11, %v1259_v36 }
 0x1e7   : > { %v1698_v40 = vpop.f32.mrb[4].mxu0 }
 0x1e8   : > { %v617_v41 = vpop.f32.mrb[5].mxu0 }
 0x1e9   : > { %v1699_v42 = vpop.f32.mrb[6].mxu0 }
 0x1ea   : > { %v620_v43 = vpop.f32.mrb[7].mxu0 }
 0x1ef   : > { %v1391_v44 = vpop.f32.mrb[8].mxu0 }
 0x1f0   : > { %v1393_v45 = vpop.f32.mrb[9].mxu0  ;;  %v1422_v57 = vadd.f32 %v1415_v56, %v1391_v44 }
 0x1f1   : > { %v1395_v46 = vpop.f32.mrb[10].mxu0 }
 0x1f2   : > { %v1397_v47 = vpop.f32.mrb[11].mxu0  ;;  %v1424_v6 = vadd.f32 %v1415_v56, %v1395_v46  ;;  %v1430_v18 = vmax.f32 %v1422_v57, 0.0 }
 0x1f4   : > { %v1432_v25 = vmax.f32 %v1424_v6, 0.0 }
 0x1f7   : > { %v1401_v49 = vpop.f32.mrb[12].mxu0 }
 0x1f8   : > { %v1403_v50 = vpop.f32.mrb[13].mxu0  ;;  %v1426_v63 = vadd.f32 %v1415_v56, %v1401_v49 }
 0x1f9   : > { %v1405_v51 = vpop.f32.mrb[14].mxu0 }
 0x1fa   : > { %v1407_v52 = vpop.f32.mrb[15].mxu0  ;;  %v1428_v3 = vadd.f32 %v1415_v56, %v1405_v51  ;;  %v1434_v12 = vmax.f32 %v1426_v63, 0.0 }
 0x1fc   : > { %v1436_v22 = vmax.f32 %v1428_v3, 0.0 }
 0x22b   : > { %v1754_v58 = vpop.f32.mrb[0].mxu1 }
 0x22c   : > { %v1756_v59 = vadd.f32 %v1754_v58, %v1698_v40  ;;  %v1313_v60 = vpop.f32.mrb[1].mxu1 }
 0x22d   : > { %v1757_v61 = vadd.f32 %v1313_v60, %v617_v41  ;;  %v1755_v62 = vpop.f32.mrb[2].mxu1 }
 0x22e   : > { %v1404_v0 = vadd.f32 %v1756_v59, %v1403_v50  ;;  %v1758_v15 = vadd.f32 %v1755_v62, %v1699_v42  ;;  %v1316_v1 = vpop.f32.mrb[3].mxu1 }
 0x22f   : > { %v1394_v7 = vadd.f32 %v1757_v61, %v1393_v45  ;;  %v1759_v2 = vadd.f32 %v1316_v1, %v620_v43 }
 0x230   : > { %v1427_v4 = vadd.f32 %v1419_v48, %v1404_v0  ;;  %v1408_v20 = vadd.f32 %v1758_v15, %v1407_v52 }
 0x231   : > { %v1423_v9 = vadd.f32 %v1419_v48, %v1394_v7  ;;  %v1398_v10 = vadd.f32 %v1759_v2, %v1397_v47 }
 0x232   : > { %v1435_v14 = vmax.f32 %v1427_v4, 0.0  ;;  %v1429_v16 = vadd.f32 %v1419_v48, %v1408_v20 }
 0x233   : > { %v1431_v19 = vmax.f32 %v1423_v9, 0.0  ;;  %v1425_v21 = vadd.f32 %v1419_v48, %v1398_v10 }
 0x234   : > { %v1628_v23 = vpack.c.bf16 %v1435_v14, %v1434_v12  ;;  %v1437_v24 = vmax.f32 %v1429_v16, 0.0 }
 0x235   : > { %v1626_v26 = vpack.c.bf16 %v1431_v19, %v1430_v18  ;;  %v1433_v29 = vmax.f32 %v1425_v21, 0.0 }
 0x236   : > { %1464 = vst [vmem:[%s251_s24 + $0x10] sm:$0xff] %v1628_v23  ;;  %v1629_v30 = vpack.c.bf16 %v1437_v24, %v1436_v22 }
 0x237   : > { %1462 = vst [vmem:[%s251_s24] sm:$0xff] %v1626_v26  ;;  %v1627_v17 = vpack.c.bf16 %v1433_v29, %v1432_v25 }
 0x238   : > { %v1471_v31 = vsel %vm1469_vm0, %v1629_v30, %v1470_v28 }
 0x239   : > { %1472 = vst [vmem:[%s251_s24 + $0x18] sm:$0x11] %v1471_v31  ;;  %1463 = vst [vmem:[%s251_s24 + $0x8] sm:$0xff] %v1627_v17 }
 0x23a PF: > { %s16_s21 = sadd.s32 1, %s1839_s21  }
 0x23b   : > { %p13_p4 = scmp.ge.s32.totalorder %s16_s21, 4  }
 0x23d   :  { %15 = sbr.rel (!%p13_p4) target bundleno = 1 (0x1), region = 81 }

// kernel: squeezenet11_forward.14
= control target key start
LH: loop header
LB: loop body
LE: loop exit
PB: predicated region body
PF: predicated region fallthrough
CT: control target
= control target key end

     0   :  { %s1969_s21 = smov 0   ;;  %s2272_s0 = inlined_call_operand.vmem [shape: bf16[2,25,256], index: 0, kind: input, shape index: {}]   ;;  %s2273_s1 = inlined_call_operand.vmem [shape: bf16[256,32], index: 1, kind: input, shape index: {}]   ;;  %s2274_s2 = inlined_call_operand.vmem [shape: f32[1,32], index: 2, kind: input, shape index: {}]   ;;  %s2275_s3 = inlined_call_operand.vmem [shape: bf16[32,256], index: 3, kind: input, shape index: {}]   ;;  %s2276_s4 = inlined_call_operand.vmem [shape: f32[1,256], index: 4, kind: input, shape index: {}]   ;;  %s2277_s5 = inlined_call_operand.vmem [shape: bf16[8,32,128], index: 5, kind: input, shape index: {}]   ;;  %s2278_s6 = inlined_call_operand.vmem [shape: bf16[2,25,256], index: 6, kind: output, shape index: {}]  }
   0x1 LB: > { %s1600_s22 = sadd.s32 4294967295, %s1931_s21   ;;  %p1604_p0 = scmp.ge.s32.totalorder %s1931_s21, 1  ;;  %s1931_s21 = sphi %s1969_s21, %s16_s21  }
   0x2   : > { %p212_p1 = scmp.lt.s32.totalorder %s1931_s21, 3 }
   0x4   : > { %p213_p2 = pnand %p1604_p0, %p212_p1 }
   0x5   : > { %v1881_v0 = vld [vmem:[%s2273_s1 + $0x40] sm:$0xff] (!%p213_p2)   ;;  %v1883_v2 = vld [vmem:[%s2273_s1 + $0x48] sm:$0xff] (!%p213_p2)   ;;  %p242_p3 = scmp.lt.s32.totalorder (!%p213_p2), %s1600_s22, 1  ;;  %v1885_v4 = vld [vmem:[%s2273_s1 + $0x50] sm:$0xff] (!%p213_p2)   ;;  %vm255_vm0 = vcmask (!%p213_p2), 261120   ;;  %vm257_vm1 = vcmask (!%p213_p2), 261124   ;;  %v484_v30 = vlaneseq (!%p213_p2) }
   0x6   : > { %216 = sbr.rel (%p213_p2) target bundleno = 594 (0x252), region = 44  ;;  %v1882_v1 = vld [vmem:[%s2273_s1] sm:$0xff] (!%p213_p2)   ;;  %1712 = vmatprep.subr.bf16.mxu0 (!%p213_p2), %v1881_v0  ;;  %v1884_v3 = vld [vmem:[%s2273_s1 + $0x8] sm:$0xff] (!%p213_p2)   ;;  %v1886_v5 = vld [vmem:[%s2273_s1 + $0x10] sm:$0xff] (!%p213_p2)   ;;  %vm258_vm2 = vsmask.f32 (!%p213_p2), 7954 }
   0x7   : > { %1713 = vmatpush3.bf16.msra.mxu0 (!%p213_p2), %v1882_v1  ;;  %v1887_v6 = vld [vmem:[%s2273_s1 + $0x58] sm:$0xff] (!%p213_p2)   ;;  %v1889_v8 = vld [vmem:[%s2273_s1 + $0x60] sm:$0xff] (!%p213_p2)   ;;  %v1891_v10 = vld [vmem:[%s2273_s1 + $0x68] sm:$0xff] (!%p213_p2)   ;;  %v1933_v20 = vmov (!%p213_p2), 0   ;;  %v2060_v31 = vshrl.u32 (!%p213_p2), %v484_v30, 7 }
   0x8   : > { %1714 = vmatprep.subr.bf16.mxu0 (!%p213_p2), %v1883_v2  ;;  %v1888_v7 = vld [vmem:[%s2273_s1 + $0x18] sm:$0xff] (!%p213_p2)   ;;  %v1890_v9 = vld [vmem:[%s2273_s1 + $0x20] sm:$0xff] (!%p213_p2)   ;;  %v1892_v12 = vld [vmem:[%s2273_s1 + $0x28] sm:$0xff] (!%p213_p2)   ;;  %256 = vst.msk [vmem:[#allocation2] sm:$0xff] (!%p213_p2), %vm255_vm0, %v1933_v20 }
   0x9   : > { %v1893_v13 = vld [vmem:[%s2273_s1 + $0x70] sm:$0xff] (!%p213_p2)   ;;  %v1895_v15 = vld [vmem:[%s2273_s1 + $0x78] sm:$0xff] (!%p213_p2)   ;;  %vm259_vm3 = vmand (!%p213_p2), %vm257_vm1, %vm258_vm2  ;;  %v486_v32 = vadd.s32 (!%p213_p2), 8, %v2060_v31  ;;  %v487_v33 = vadd.s32 (!%p213_p2), 16, %v2060_v31  ;;  %v488_v34 = vadd.s32 (!%p213_p2), 24, %v2060_v31 }
   0xa   : > { %v1894_v14 = vld [vmem:[%s2273_s1 + $0x30] sm:$0xff] (!%p213_p2)   ;;  %v1896_v16 = vld [vmem:[%s2273_s1 + $0x38] sm:$0xff] (!%p213_p2)   ;;  %v1905_v22 = vld [vmem:[%s2275_s3 + $0x4] ss:$8 sps:$4 sm:$0xff] (!%p213_p2)   ;;  %v2066_v35 = vmul.u32.u64.low (!%p213_p2), 3435973837, %v2060_v31  ;;  %v2067_v36 = vmul.u32.u64.high 3435973837, %v2060_v31, %v2066_v35 }
   0xb   : > { %1715 = vmatpush3.bf16.msra.mxu0 (!%p213_p2), %v1884_v3  ;;  %v260_v21 = vld [vmem:[#allocation2 + $0x10] sm:$0xf0] (!%p213_p2)  ;;  %v1903_v24 = vld [vmem:[%s2275_s3] ss:$8 sps:$4 sm:$0xff] (!%p213_p2)   ;;  %v1906_v26 = vld [vmem:[%s2275_s3 + $0x10] ss:$8 sps:$4 sm:$0xff] (!%p213_p2)  }
   0xc   : > { %1716 = vmatprep.subr.bf16.mxu0 (!%p213_p2), %v1885_v4  ;;  %v261_v23 = vsel (!%p213_p2), %vm259_vm3, 0, %v260_v21  ;;  %v1908_v25 = vld [vmem:[%s2275_s3 + $0x14] ss:$8 sps:$4 sm:$0xff] (!%p213_p2)   ;;  %v2057_v29 = vld [vmem:[%s2277_s5] sm:$0xff] (!%p213_p2)   ;;  %v2069_v37 = vmul.u32.u64.low (!%p213_p2), 3435973837, %v486_v32  ;;  %v2070_v38 = vmul.u32.u64.high 3435973837, %v486_v32, %v2069_v37 }
   0xd   : > { %s2292_s22 = smov (!%p242_p3, %s1600_s22), 1  ;;  %262 = vst [vmem:[#allocation2 + $0x10] sm:$0xf0] %v261_v23  ;;  %v1909_v27 = vld [vmem:[%s2277_s5 + $0x10] sm:$0xff]   ;;  %v1910_v28 = vld [vmem:[%s2277_s5 + $0x18] sm:$0xff]   ;;  %v495_v43 = vshrl.u32 %v2067_v36, 2 }
   0xe   : > { %s1706_s15 = sshll.u32 %s2292_s22, 5  ;;  %1772 = vmatprep.subr.bf16.mxu1 %v1909_v27  ;;  %v2072_v39 = vmul.u32.u64.low 3435973837, %v487_v33  ;;  %v2073_v40 = vmul.u32.u64.high 3435973837, %v487_v33, %v2072_v39  ;;  %v2075_v41 = vmul.u32.u64.low 3435973837, %v488_v34  ;;  %v2076_v42 = vmul.u32.u64.high 3435973837, %v488_v34, %v2075_v41 }
   0xf   : > { %1717 = vmatpush3.bf16.msra.mxu0 %v1886_v5  ;;  %s246_s20 = scalar_lea.vmem %s2272_s0, %s1706_s15  ;;  %1773 = vmatpush3.bf16.msra.mxu1 %v1909_v27  ;;  %v506_v44 = vshrl.u32 %v2070_v38, 2  ;;  %v496_v47 = vmul.u32 5, %v495_v43  ;;  %v1609_v59 = vld [vmem:[%s2274_s2] ss:$0 sm:$0xff]  ;;  %s251_s18 = scalar_lea.vmem %s2278_s6, %s1706_s15 }
  0x10   : > { %1718 = vmatprep.subr.bf16.mxu0 %v1887_v6  ;;  %v1899_v11 = vld [vmem:[%s246_s20 + $0x4] ss:$8 sps:$4 sm:$0xff]   ;;  %v1897_v17 = vld [vmem:[%s246_s20] ss:$8 sps:$4 sm:$0xff]   ;;  %1774 = vmatprep.subr.bf16.mxu1 %v1910_v28  ;;  %v517_v45 = vshrl.u32 %v2073_v40, 2  ;;  %v528_v46 = vshrl.u32 %v2076_v42, 2 }
  0x11   : > { %454 = vmatprep.mubr.bf16.mxu0 %v1899_v11  ;;  %v1900_v18 = vld [vmem:[%s246_s20 + $0x14] ss:$8 sps:$4 sm:$0x1f]   ;;  %v1902_v19 = vld [vmem:[%s246_s20 + $0x10] ss:$8 sps:$4 sm:$0x1f]   ;;  %v497_v51 = vsub.s32 %v2060_v31, %v496_v47 }
  0x12   : > { %v507_v48 = vmul.u32 5, %v506_v44  ;;  %v518_v49 = vmul.u32 5, %v517_v45 }
  0x13   : > { %1719 = vmatpush3.bf16.msra.mxu0 %v1888_v7  ;;  %1775 = vmatpush3.bf16.msra.mxu1 %v1910_v28  ;;  %v529_v50 = vmul.u32 5, %v528_v46  ;;  %vm533_vm4 = vcmp.ne.s32.totalorder %v497_v51, 0  ;;  %vm537_vm5 = vcmp.lt.s32.totalorder %v497_v51, 0  ;;  %v545_v55 = vadd.s32 5, %v497_v51 }
  0x14   : > { %1720 = vmatprep.subr.bf16.mxu0 %v1889_v8  ;;  %1780 = vmatprep.subr.bf16.mxu1 %v2057_v29  ;;  %v508_v52 = vsub.s32 %v486_v32, %v507_v48  ;;  %v519_v53 = vsub.s32 %v487_v33, %v518_v49  ;;  %vm541_vm12 = vmand %vm537_vm5, %vm533_vm4  ;;  %v481_v32 = vld [vmem:[#allocation2 + $0x10] sm:$0x1f] }
  0x15   : > { %v530_v54 = vsub.s32 %v488_v34, %v529_v50  ;;  %v549_v0 = vsel %vm541_vm12, %v545_v55, %v497_v51 }
  0x16   : > { %vm534_vm6 = vcmp.ne.s32.totalorder %v508_v52, 0  ;;  %vm538_vm7 = vcmp.lt.s32.totalorder %v508_v52, 0  ;;  %vm535_vm8 = vcmp.ne.s32.totalorder %v519_v53, 0  ;;  %vm539_vm9 = vcmp.lt.s32.totalorder %v519_v53, 0 }
  0x17   : > { %1721 = vmatpush3.bf16.msra.mxu0 %v1890_v9  ;;  %vm536_vm10 = vcmp.ne.s32.totalorder %v530_v54, 0  ;;  %vm540_vm11 = vcmp.lt.s32.totalorder %v530_v54, 0  ;;  %v546_v56 = vadd.s32 5, %v508_v52  ;;  %vm542_vm13 = vmand %vm538_vm7, %vm534_vm6  ;;  %v547_v58 = vadd.s32 5, %v519_v53 }
  0x18   : > { %1722 = vmatprep.subr.bf16.mxu0 %v1891_v10  ;;  %vm543_vm14 = vmand %vm539_vm9, %vm535_vm8  ;;  %v548_v61 = vadd.s32 5, %v530_v54  ;;  %vm553_vm1 = vcmp.ne.s32.totalorder %v549_v0, 0  ;;  %vm478_vm9 = vcmask 258048  }
  0x19   : > { %vm544_vm15 = vmand %vm540_vm11, %vm536_vm10  ;;  %v2086_v2 = vsel %vm542_vm13, %v546_v56, %v508_v52  ;;  %v551_v5 = vsel %vm543_vm14, %v547_v58, %v519_v53  ;;  %vm479_vm10 = vsmask.f32 4352  ;;  %vm557_vm14 = vcmp.ne.s32.totalorder %v549_v0, 4 }
  0x1a   : > { %v552_v6 = vsel %vm544_vm15, %v548_v61, %v530_v54  ;;  %vm554_vm2 = vcmp.ne.s32.totalorder %v2086_v2, 0  ;;  %vm555_vm3 = vcmp.ne.s32.totalorder %v551_v5, 0  ;;  %vm577_vm5 = vmpackc.low %vm553_vm1, %vm553_vm1  ;;  %vm559_vm11 = vcmp.ne.s32.totalorder %v551_v5, 4 }
  0x1b   : > { %1723 = vmatpush3.bf16.msra.mxu0 %v1892_v12  ;;  %vm556_vm4 = vcmp.ne.s32.totalorder %v552_v6, 0  ;;  %vm578_vm6 = vmpackc.low %vm554_vm2, %vm554_vm2  ;;  %vm560_vm12 = vcmp.ne.s32.totalorder %v552_v6, 4  ;;  %vm558_vm1 = vcmp.ne.s32.totalorder %v2086_v2, 4 }
  0x1c   : > { %1724 = vmatprep.subr.bf16.mxu0 %v1893_v13  ;;  %vm579_vm7 = vmpackc.low %vm555_vm3, %vm555_vm3  ;;  %v582_v21 = vsel %vm578_vm6, 65537, %v1933_v20  ;;  %vm591_vm3 = vcmask 1044480   ;;  %vm610_vm6 = vsmask.f32 2304 }
  0x1d   : > { %vm580_vm8 = vmpackc.low %vm556_vm4, %vm556_vm4 }
  0x1e   : > { %vm2099_vm13 = vmand %vm478_vm9, %vm479_vm10  ;;  %vm804_vm9 = vcmask 1045504  }
  0x1f   : > { %1725 = vmatpush3.bf16.msra.mxu0 %v1894_v14  ;;  %vm792_vm15 = vmpackc.low %vm559_vm11, %vm559_vm11  ;;  %vm707_vm11 = vcmask 1042432  }
  0x20   : > { %1726 = vmatprep.subr.bf16.mxu0 %v1895_v15  ;;  %vm2110_vm2 = vmpackc.low %vm560_vm12, %vm560_vm12  ;;  %v796_v45 = vsel %vm792_vm15, 65537, %v1933_v20  ;;  %vm901_vm12 = vsmask.f32 7424 }
  0x21   : > { %vm790_vm4 = vmpackc.low %vm557_vm14, %vm557_vm14  ;;  %v797_v49 = vsel %vm2110_vm2, 65537, %v1933_v20  ;;  %vm822_vm2 = vcmask 1041408  }
  0x22   : > { %v794_v52 = vsel %vm790_vm4, 65537, %v1933_v20  ;;  %v2133_v54 = vcombine.low %v796_v45, %v797_v49 }
  0x23   : > { %1727 = vmatpush3.bf16.msra.mxu0 %v1896_v16  ;;  %v2089_v16 = vld [vmem:[#allocation2] sm:$0xe0] }
  0x24   : > { %1429 = vmatprep.subr.bf16.mxu0 %v1905_v22  ;;  %v583_v22 = vsel %vm579_vm7, 65537, %v1933_v20  ;;  %v1031_v39 = vshll.u32 %v2133_v54, 16 }
  0x26   : > { %455 = vmatmul.mubr.bf16.vlgmr.msra.gmra.mrb[0].mxu0 %v1897_v17 }
  0x27   : > { %462 = vmatprep.mubr.bf16.mxu0 %v1900_v18  ;;  %1430 = vmatpush1.bf16.msra.mxu0 %v1903_v24  ;;  %v612_v24 = vshrl.u32 %v2089_v16, 16 }
  0x28   : > { %1431 = vmatprep.subr.bf16.mxu0 %v1908_v25  ;;  %v615_v25 = vshll.u32 %v2089_v16, 16 }
  0x29   : > { %v614_v36 = vrot.slane %v612_v24, 5 }
  0x2a   : > { %v617_v37 = vrot.slane %v615_v25, 6 }
  0x2b   : > { %1432 = vmatpush1.bf16.msra.mxu0 %v1906_v26  ;;  %v584_v26 = vsel %vm580_vm8, 65537, %v1933_v20 }
  0x2c   : > { %v2105_v34 = vcombine.low %v583_v22, %v584_v26  ;;  %v618_v46 = vor.u32 %v617_v37, %v614_v36 }
  0x2e   : > { %463 = vmatmul.mubr.bf16.gmra.mrb[4].mxu0 %v1902_v19  ;;  %v581_v19 = vsel %vm577_vm5, 65537, %v1933_v20  ;;  %v593_v41 = vrot.slane %v2105_v34, 3  ;;  %vm791_vm5 = vmpackc.low %vm558_vm1, %vm558_vm1  ;;  %v910_v6 = vshll.u32 %v2105_v34, 16 }
  0x2f   : > { %1461 = vmatprep.mubr.bf16.mxu0 %v1933_v20  ;;  %v2103_v33 = vcombine.low %v581_v19, %v582_v21  ;;  %v795_v53 = vsel %vm791_vm5, 65537, %v1933_v20 }
  0x31   : > { %v592_v40 = vrot.slane %v2103_v33, 3  ;;  %v906_v5 = vshrl.u32 %v2103_v33, 16 }
  0x33   : > { %v594_v50 = vsel %vm591_vm3, %v592_v40, %v593_v41  ;;  %vm2136_vm7 = vcmp.ne.s16.totalorder %v592_v40, 0 }
  0x34   : > { %vm596_vm8 = vcmp.ne.s16.totalorder %v594_v50, 0 }
  0xf9   : > { %v1728_v57 = vpop.f32.mrb[0].mxu0 }
  0xfa   : > { %v1729_v60 = vpop.f32.mrb[1].mxu0 }
  0xfb   : > { %v1730_v62 = vadd.f32 %v1729_v60, %v1728_v57  ;;  %v1731_v63 = vpop.f32.mrb[2].mxu0  ;;  %v903_v57 = vshll.u32 %v2103_v33, 16 }
  0xfc   : > { %v1732_v1 = vpop.f32.mrb[3].mxu0 }
  0xfd   : > { %v457_v3 = vadd.f32 %v1730_v62, %v1609_v59  ;;  %v1733_v4 = vadd.f32 %v1732_v1, %v1731_v63  ;;  %v598_v62 = vsel %vm2136_vm7, %v2089_v16, 0  ;;  %v806_v1 = vrot.slane %v2133_v54, 2  ;;  %v1913_v16 = vld [vmem:[%s2277_s5 + $0x20] sm:$0xff]  }
  0xfe   : > { %v905_v2 = vrot.slane %v903_v57, 1 }
  0xff   : > { %v460_v7 = vadd.f32 %v1733_v4, %v1609_v59  ;;  %v471_v8 = vmax.f32 %v457_v3, 0.0  ;;  %vm2183_vm5 = vcmp.ne.s16.totalorder %v806_v1, 0 }
 0x100   : > { %vm917_vm4 = vcmp.ne.s16.totalorder %v905_v2, 0 }
 0x101   : > { %v472_v9 = vmax.f32 %v460_v7, 0.0  ;;  %v1734_v10 = vpop.f32.mrb[4].mxu0  ;;  %v708_v7 = vrot.slane %v598_v62, 5  ;;  %v1916_v62 = vld [vmem:[%s2277_s5 + $0x38] sm:$0xff]  }
 0x102   : > { %v1735_v11 = vpop.f32.mrb[5].mxu0 }
 0x103   : > { %v475_v12 = vpack.c.bf16 %v472_v9, %v471_v8  ;;  %v1736_v13 = vadd.f32 %v1735_v11, %v1734_v10  ;;  %v1737_v14 = vpop.f32.mrb[6].mxu0  ;;  %v1912_v10 = vld [vmem:[%s2277_s5 + $0x8] sm:$0xff]  }
 0x104   : > { %v1738_v15 = vpop.f32.mrb[7].mxu0 }
 0x105   : > { %477 = vst.msk [vmem:[#allocation2 + $0x8] sm:$0xff] %vm255_vm0, %v475_v12  ;;  %v465_v17 = vadd.f32 %v1736_v13, %v1609_v59  ;;  %v1739_v18 = vadd.f32 %v1738_v15, %v1737_v14  ;;  %v908_v13 = vor.u32 %v906_v5, %v905_v2  ;;  %v912_v14 = vrot.slane %v910_v6, 1 }
 0x107   : > { %v468_v23 = vadd.f32 %v1739_v18, %v1609_v59  ;;  %v473_v27 = vmax.f32 %v465_v17, 0.0  ;;  %v2144_v59 = vcombine.low %v794_v52, %v795_v53  ;;  %v780_v17 = vld [vmem:[#allocation2] sm:$0xc0]  ;;  %v913_v18 = vsel %vm901_vm12, %v908_v13, %v912_v14 }
 0x108   : > { %vm918_vm1 = vcmp.ne.s16.totalorder %v913_v18, 0 }
 0x109   : > { %v474_v28 = vmax.f32 %v468_v23, 0.0  ;;  %v805_v0 = vrot.slane %v2144_v59, 2  ;;  %v1028_v23 = vshrl.u32 %v2133_v54, 16  ;;  %v1024_v30 = vshll.u32 %v2144_v59, 16 }
 0x10b   : > { %v476_v35 = vpack.c.bf16 %v474_v28, %v473_v27  ;;  %v807_v12 = vsel %vm804_vm9, %v805_v0, %v806_v1  ;;  %vm808_vm14 = vcmp.ne.s16.totalorder %v805_v0, 0  ;;  %v914_v28 = vshrl.u32 %v2105_v34, 16 }
 0x10c   : > { %v2107_v38 = vld [vmem:[#allocation2 + $0x8] sm:$0xff]  ;;  %vm809_vm15 = vcmp.ne.s16.totalorder %v807_v12, 0  ;;  %v811_v21 = vsel %vm808_vm14, %v780_v17, 0  ;;  %v1030_v37 = vrot.slane %v1028_v23, 7  ;;  %v1132_v12 = vrot.slane %v2103_v33, 6  ;;  %v1919_v33 = vld [vmem:[%s2277_s5 + $0x50] sm:$0xff]  }
 0x10d   : > { %v482_v42 = vsel %vm2099_vm13, %v476_v35, %v481_v32  ;;  %1698 = vmatmul.mubr.msk.bf16.vlgmr.msra.gmra.mrb[8].mxu0 %vm255_vm0, %v2107_v38  ;;  %v620_v43 = vshrl.u32 %v2107_v38, 16  ;;  %v623_v44 = vshll.u32 %v2107_v38, 16  ;;  %v599_v63 = vsel %vm596_vm8, %v2107_v38, 0  ;;  %v1914_v32 = vld [vmem:[%s2277_s5 + $0x28] sm:$0xff]   ;;  %v899_v35 = vld [vmem:[#allocation2] sm:$0x80] }
 0x10e   : > { %483 = vst [vmem:[#allocation2 + $0x10] sm:$0x1f] %v482_v42  ;;  %1471 = vmatprep.mubr.bf16.mxu0 %v1933_v20  ;;  %v709_v8 = vrot.slane %v599_v63, 5  ;;  %vm597_vm13 = vcmp.ne.s16.totalorder %v593_v41, 0  ;;  %v812_v22 = vsel %vm809_vm15, %v2107_v38, 0  ;;  %v823_v25 = vrot.slane %v811_v21, 6 }
 0x10f   : > { %v622_v47 = vrot.slane %v620_v43, 5  ;;  %v625_v48 = vrot.slane %v623_v44, 6  ;;  %v824_v26 = vrot.slane %v812_v22, 6  ;;  %v921_v27 = vsel %vm918_vm1, %v2107_v38, 0  ;;  %v1130_v18 = vld [vmem:[#allocation2 + $0x8] sm:$0xfc] }
 0x110   : > { %v710_v15 = vsel %vm707_vm11, %v708_v7, %v709_v8  ;;  %v934_v42 = vshrl.u32 %v921_v27, 16  ;;  %v920_v45 = vsel %vm917_vm4, %v899_v35, 0  ;;  %v1033_v49 = vor.u32 %v1031_v39, %v1030_v37 }
 0x111   : > { %v626_v51 = vor.u32 %v625_v48, %v622_v47  ;;  %v825_v41 = vsel %vm822_vm2, %v823_v25, %v824_v26  ;;  %v1915_v47 = vld [vmem:[%s2277_s5 + $0x30] sm:$0xff]   ;;  %vm1135_vm15 = vcmp.ne.s16.totalorder %v1132_v12, 0  ;;  %v1920_v25 = vld [vmem:[%s2277_s5 + $0x58] sm:$0xff]   ;;  %v1230_v35 = vshll.u32 %v1130_v18, 16 }
 0x112   : > { %v936_v52 = vrot.slane %v934_v42, 7  ;;  %v1137_v21 = vsel %vm1135_vm15, %v1130_v18, 0 }
 0x113   : > { %v627_v55 = vsel %vm610_vm6, %v618_v46, %v626_v51  ;;  %v916_v46 = vor.u32 %v914_v28, %v912_v14  ;;  %v1918_v14 = vld [vmem:[%s2277_s5 + $0x48] sm:$0xff]  }
 0x114   : > { %1776 = vmatprep.mubr.msk.bf16.mxu1 %vm255_vm0, %v627_v55  ;;  %v937_v55 = vshll.u32 %v921_v27, 16 }
 0x115   : > { %v2142_v58 = vld [vmem:[#allocation2 + $0x10] sm:$0x1f]  ;;  %vm919_vm7 = vcmp.ne.s16.totalorder %v916_v46, 0 }
 0x116   : > { %v568_v60 = vld [vmem:[#allocation2 + $0x10] sm:$0x3]  ;;  %1699 = vmatmul.mubr.msk.bf16.gmra.mrb[12].mxu0 %vm255_vm0, %v2142_v58 }
 0x117   : > { %v629_v20 = vshrl.u32 %v568_v60, 16  ;;  %v632_v61 = vshll.u32 %v568_v60, 16  ;;  %v600_v19 = vsel %vm597_vm13, %v568_v60, 0  ;;  %v781_v43 = vld [vmem:[#allocation2 + $0x10] sm:$0x7] }
 0x118   : > { %v711_v24 = vrot.slane %v600_v19, 5  ;;  %v813_v50 = vsel %vm2183_vm5, %v781_v43, 0  ;;  %v900_v53 = vld [vmem:[#allocation2 + $0x10] sm:$0xf]  ;;  %v1316_v43 = vrot.slane %v2144_v59, 5 }
 0x119   : > { %v631_v3 = vrot.slane %v629_v20, 5  ;;  %v634_v4 = vrot.slane %v632_v61, 6  ;;  %v826_v57 = vrot.slane %v813_v50, 6  ;;  %v939_v20 = vor.u32 %v937_v55, %v936_v52 }
 0x11a   : > { %v712_v40 = vsel %vm707_vm11, %v709_v8, %v711_v24  ;;  %v922_v61 = vsel %vm919_vm7, %v900_v53, 0  ;;  %v1146_v24 = vrot.slane %v1137_v21, 2  ;;  %vm1319_vm1 = vcmp.ne.s16.totalorder %v1316_v43, 0  ;;  %v1924_v53 = vld [vmem:[%s2277_s5 + $0x78] sm:$0xff]  }
 0x11b   : > { %v635_v9 = vor.u32 %v634_v4, %v631_v3  ;;  %v827_v63 = vsel %vm822_vm2, %v824_v26, %v826_v57  ;;  %v942_v0 = vshrl.u32 %v922_v61, 16  ;;  %v1917_v4 = vld [vmem:[%s2277_s5 + $0x40] sm:$0xff]   ;;  %v945_v8 = vshll.u32 %v922_v61, 16 }
 0x11d   : > { %v636_v11 = vsel %vm610_vm6, %v626_v51, %v635_v9  ;;  %vm928_vm6 = vsmask.f32 256  ;;  %v930_v51 = vshrl.u32 %v920_v45, 16  ;;  %v944_v6 = vrot.slane %v942_v0, 7  ;;  %v1922_v45 = vld [vmem:[%s2277_s5 + $0x68] sm:$0xff]  }
 0x11e   : > { %1777 = vmatmul.mubr.msk.bf16.vlgmr.msra.gmra.mrb[0].mxu1 %vm255_vm0, %v636_v11  ;;  %v1133_v9 = vrot.slane %v2105_v34, 6  ;;  %v1131_v34 = vld [vmem:[#allocation2 + $0x10] sm:$0x7f] }
 0x11f   : > { %1781 = vmatpush3.bf16.msra.mxu1 %v2057_v29  ;;  %1784 = vmatprep.mubr.msk.bf16.mxu1 %vm255_vm0, %v710_v15  ;;  %v1021_v29 = vshrl.u32 %v2144_v59, 16  ;;  %v932_v60 = vrot.slane %v930_v51, 7  ;;  %v1235_v27 = vshrl.u32 %v1131_v34, 16  ;;  %v1238_v28 = vshll.u32 %v1131_v34, 16  ;;  %v1315_v59 = vld [vmem:[#allocation2 + $0x10] sm:$0xff] }
 0x120   : > { %1782 = vmatprep.subr.bf16.mxu1 %v1912_v10  ;;  %v1134_v15 = vsel %vm822_vm2, %v1132_v12, %v1133_v9 }
 0x121   : > { %v1023_v36 = vrot.slane %v1021_v29, 7  ;;  %v940_v2 = vsel %vm928_vm6, %v932_v60, %v939_v20  ;;  %vm1136_vm14 = vcmp.ne.s16.totalorder %v1134_v15, 0  ;;  %v1240_v37 = vrot.slane %v1238_v28, 3  ;;  %v1542_v28 = vld [vmem:[%s251_s18 + $0x18] sm:$0x11] }
 0x122   : > { %v1138_v19 = vsel %vm1136_vm14, %v1131_v34, 0 }
 0x123   : > { %1783 = vmatpush3.bf16.msra.mxu1 %v1912_v10  ;;  %v1026_v48 = vor.u32 %v1024_v30, %v1023_v36  ;;  %v1034_v56 = vsel %vm928_vm6, %v1023_v36, %v1033_v49  ;;  %v947_v10 = vor.u32 %v945_v8, %v944_v6  ;;  %v1147_v29 = vrot.slane %v1138_v19, 2  ;;  %v1921_v30 = vld [vmem:[%s2277_s5 + $0x60] sm:$0xff]  }
 0x124   : > { %1788 = vmatprep.subr.bf16.mxu1 %v1913_v16  ;;  %vm1036_vm13 = vcmp.ne.s16.totalorder %v1034_v56, 0  ;;  %v1237_v36 = vrot.slane %v1235_v27, 2 }
 0x125   : > { %vm1035_vm8 = vcmp.ne.s16.totalorder %v1026_v48, 0  ;;  %v1038_v3 = vsel %vm1036_vm13, %v2142_v58, 0  ;;  %v1148_v26 = vsel %vm804_vm9, %v1146_v24, %v1147_v29  ;;  %vm1225_vm9 = vsmask.f32 5376  ;;  %v1314_v48 = vld [vmem:[#allocation2 + $0x8] sm:$0xf8] }
 0x126   : > { %v1037_v1 = vsel %vm1035_vm8, %v2107_v38, 0  ;;  %v1052_v7 = vshll.u32 %v1038_v3, 16  ;;  %v1056_v22 = vshrl.u32 %v1038_v3, 16  ;;  %v1241_v42 = vor.u32 %v1240_v37, %v1237_v36 }
 0x127   : > { %v1047_v5 = vshll.u32 %v1037_v1, 16  ;;  %v1045_v58 = vshrl.u32 %v1037_v1, 16  ;;  %v1321_v50 = vsel %vm1319_vm1, %v1314_v48, 0  ;;  %v1486_v1 = vsub.s32 0, %v2060_v31 }
 0x128   : > { %v1054_v11 = vrot.slane %v1052_v7, 1  ;;  %v1490_v3 = vsub.s32 1, %v2060_v31 }
 0x129   : > { %v1049_v38 = vrot.slane %v1047_v5, 1 }
 0x12a   : > { %1785 = vmatmul.mubr.msk.bf16.vlgmr.msra.gmra.mrb[0].mxu1 %vm255_vm0, %v712_v40  ;;  %v1058_v23 = vor.u32 %v1056_v22, %v1054_v11  ;;  %v1232_v40 = vrot.slane %v1230_v35, 3 }
 0x12b   : > { %1789 = vmatpush3.bf16.msra.mxu1 %v1913_v16  ;;  %1792 = vmatprep.mubr.msk.bf16.mxu1 %vm255_vm0, %v825_v41  ;;  %v1050_v13 = vor.u32 %v1049_v38, %v1045_v58  ;;  %v948_v16 = vsel %vm928_vm6, %v936_v52, %v947_v10  ;;  %v1317_v41 = vrot.slane %v2133_v54, 5  ;;  %v1923_v54 = vld [vmem:[%s2277_s5 + $0x70] sm:$0xff]   ;;  %v1330_v52 = vrot.slane %v1321_v50, 3 }
 0x12c   : > { %1790 = vmatprep.subr.bf16.mxu1 %v1914_v32 }
 0x12d   : > { %v1055_v17 = vsel %vm901_vm12, %v1050_v13, %v1054_v11  ;;  %v1318_v46 = vsel %vm707_vm11, %v1316_v43, %v1317_v41 }
 0x12e   : > { %vm1320_vm12 = vcmp.ne.s16.totalorder %v1318_v46, 0 }
 0x12f   : > { %1791 = vmatpush3.bf16.msra.mxu1 %v1914_v32  ;;  %v1227_v32 = vshrl.u32 %v1130_v18, 16  ;;  %v1322_v49 = vsel %vm1320_vm12, %v1315_v59, 0 }
 0x130   : > { %1796 = vmatprep.subr.bf16.mxu1 %v1915_v47  ;;  %v1331_v51 = vrot.slane %v1322_v49, 3 }
 0x131   : > { %v1229_v39 = vrot.slane %v1227_v32, 2 }
 0x132   : > { %v1332_v55 = vsel %vm591_vm3, %v1330_v52, %v1331_v51  ;;  %vm1539_vm3 = vcmask 1044484  }
 0x133   : > { %v1233_v44 = vor.u32 %v1232_v40, %v1229_v39  ;;  %vm2261_vm2 = vmand %vm1539_vm3, %vm479_vm10 }
 0x136   : > { %1793 = vmatmul.mubr.msk.bf16.vlgmr.msra.gmra.mrb[0].mxu1 %vm255_vm0, %v827_v63 }
 0x137   : > { %1797 = vmatpush3.bf16.msra.mxu1 %v1915_v47  ;;  %1800 = vmatprep.mubr.msk.bf16.mxu1 %vm255_vm0, %v940_v2  ;;  %v1242_v47 = vsel %vm1225_vm9, %v1233_v44, %v1241_v42  ;;  %v1482_v2 = vld [vmem:[%s2276_s4] sm:$0x3] }
 0x138   : > { %1798 = vmatprep.subr.bf16.mxu1 %v1916_v62  ;;  %v1491_v5 = vrot.slane %v1482_v2, %v1490_v3 }
 0x13b   : > { %1799 = vmatpush3.bf16.msra.mxu1 %v1916_v62 }
 0x13c   : > { %1804 = vmatprep.subr.bf16.mxu1 %v1917_v4 }
 0x142   : > { %1801 = vmatmul.mubr.msk.bf16.vlgmr.msra.gmra.mrb[0].mxu1 %vm255_vm0, %v948_v16 }
 0x143   : > { %1805 = vmatpush3.bf16.msra.mxu1 %v1917_v4  ;;  %1808 = vmatprep.mubr.msk.bf16.mxu1 %vm255_vm0, %v1055_v17  ;;  %v1487_v4 = vrot.slane %v1482_v2, %v1486_v1 }
 0x144   : > { %1806 = vmatprep.subr.bf16.mxu1 %v1918_v14 }
 0x147   : > { %1807 = vmatpush3.bf16.msra.mxu1 %v1918_v14 }
 0x148   : > { %1812 = vmatprep.subr.bf16.mxu1 %v1919_v33 }
 0x14e   : > { %1809 = vmatmul.mubr.msk.bf16.vlgmr.msra.gmra.mrb[0].mxu1 %vm255_vm0, %v1058_v23 }
 0x14f   : > { %1813 = vmatpush3.bf16.msra.mxu1 %v1919_v33  ;;  %1816 = vmatprep.mubr.msk.bf16.mxu1 %vm255_vm0, %v1148_v26 }
 0x150   : > { %1814 = vmatprep.subr.bf16.mxu1 %v1920_v25 }
 0x153   : > { %1815 = vmatpush3.bf16.msra.mxu1 %v1920_v25 }
 0x154   : > { %1820 = vmatprep.subr.bf16.mxu1 %v1921_v30 }
 0x15a   : > { %1817 = vmatmul.mubr.msk.bf16.vlgmr.msra.gmra.mrb[0].mxu1 %vm255_vm0, %v1147_v29 }
 0x15b   : > { %1821 = vmatpush3.bf16.msra.mxu1 %v1921_v30  ;;  %1824 = vmatprep.mubr.msk.bf16.mxu1 %vm255_vm0, %v1242_v47 }
 0x15c   : > { %1822 = vmatprep.subr.bf16.mxu1 %v1922_v45 }
 0x15f   : > { %1823 = vmatpush3.bf16.msra.mxu1 %v1922_v45 }
 0x160   : > { %1828 = vmatprep.subr.bf16.mxu1 %v1923_v54 }
 0x166   : > { %1825 = vmatmul.mubr.msk.bf16.vlgmr.msra.gmra.mrb[0].mxu1 %vm255_vm0, %v1241_v42 }
 0x167   : > { %1829 = vmatpush3.bf16.msra.mxu1 %v1923_v54  ;;  %1832 = vmatprep.mubr.msk.bf16.mxu1 %vm255_vm0, %v1332_v55 }
 0x168   : > { %1830 = vmatprep.subr.bf16.mxu1 %v1924_v53 }
 0x16b   : > { %1831 = vmatpush3.bf16.msra.mxu1 %v1924_v53 }
 0x172   : > { %1833 = vmatmul.mubr.msk.bf16.vlgmr.msra.gmra.mrb[0].mxu1 %vm255_vm0, %v1331_v51  ;;  %vm1537_vm0 = vcmask 1040384  }
 0x173   : > { %vm2251_vm11 = vmand %vm1537_vm0, %vm928_vm6 }
 0x174   : > { %vm1541_vm4 = vmor %vm2261_vm2, %vm2251_vm11 }
 0x1e0   : > { %v1463_v56 = vpop.f32.mrb[8].mxu0 }
 0x1e1   : > { %v1465_v57 = vpop.f32.mrb[9].mxu0  ;;  %v1494_v9 = vadd.f32 %v1487_v4, %v1463_v56 }
 0x1e2   : > { %v1467_v60 = vpop.f32.mrb[10].mxu0 }
 0x1e3   : > { %v1469_v20 = vpop.f32.mrb[11].mxu0  ;;  %v1496_v15 = vadd.f32 %v1487_v4, %v1467_v60  ;;  %v1502_v21 = vmax.f32 %v1494_v9, 0.0 }
 0x1e5   : > { %v1504_v26 = vmax.f32 %v1496_v15, 0.0 }
 0x1e9   : > { %v1473_v61 = vpop.f32.mrb[12].mxu0 }
 0x1ea   : > { %v1475_v62 = vpop.f32.mrb[13].mxu0  ;;  %v1498_v7 = vadd.f32 %v1487_v4, %v1473_v61 }
 0x1eb   : > { %v1477_v63 = vpop.f32.mrb[14].mxu0 }
 0x1ec   : > { %v1479_v0 = vpop.f32.mrb[15].mxu0  ;;  %v1500_v58 = vadd.f32 %v1487_v4, %v1477_v63  ;;  %v1506_v33 = vmax.f32 %v1498_v7, 0.0 }
 0x1ee   : > { %v1508_v23 = vmax.f32 %v1500_v58, 0.0 }
 0x245   : > { %v1834_v6 = vpop.f32.mrb[0].mxu1 }
 0x246   : > { %v1476_v8 = vadd.f32 %v1834_v6, %v1475_v62  ;;  %v1385_v38 = vpop.f32.mrb[1].mxu1 }
 0x247   : > { %v1466_v10 = vadd.f32 %v1465_v57, %v1385_v38  ;;  %v1835_v11 = vpop.f32.mrb[2].mxu1 }
 0x248   : > { %v1499_v12 = vadd.f32 %v1491_v5, %v1476_v8  ;;  %v1480_v13 = vadd.f32 %v1835_v11, %v1479_v0  ;;  %v1388_v14 = vpop.f32.mrb[3].mxu1 }
 0x249   : > { %v1495_v16 = vadd.f32 %v1491_v5, %v1466_v10  ;;  %v1470_v17 = vadd.f32 %v1469_v20, %v1388_v14 }
 0x24a   : > { %v1507_v34 = vmax.f32 %v1499_v12, 0.0  ;;  %v1501_v18 = vadd.f32 %v1491_v5, %v1480_v13 }
 0x24b   : > { %v1503_v22 = vmax.f32 %v1495_v16, 0.0  ;;  %v1497_v29 = vadd.f32 %v1491_v5, %v1470_v17 }
 0x24c   : > { %v1710_v24 = vpack.c.bf16 %v1507_v34, %v1506_v33  ;;  %v1509_v25 = vmax.f32 %v1501_v18, 0.0 }
 0x24d   : > { %v1708_v27 = vpack.c.bf16 %v1503_v22, %v1502_v21  ;;  %v1505_v30 = vmax.f32 %v1497_v29, 0.0 }
 0x24e   : > { %1536 = vst [vmem:[%s251_s18 + $0x10] sm:$0xff] %v1710_v24  ;;  %v1711_v32 = vpack.c.bf16 %v1509_v25, %v1508_v23 }
 0x24f   : > { %1534 = vst [vmem:[%s251_s18] sm:$0xff] %v1708_v27  ;;  %v1709_v35 = vpack.c.bf16 %v1505_v30, %v1504_v26 }
 0x250   : > { %v1543_v36 = vsel %vm1541_vm4, %v1711_v32, %v1542_v28 }
 0x251   : > { %1544 = vst [vmem:[%s251_s18 + $0x18] sm:$0x11] %v1543_v36  ;;  %1535 = vst [vmem:[%s251_s18 + $0x8] sm:$0xff] %v1709_v35 }
 0x252 PF: > { %s16_s21 = sadd.s32 1, %s1931_s21  }
 0x253   : > { %p13_p4 = scmp.ge.s32.totalorder %s16_s21, 4  }
 0x255   :  { %15 = sbr.rel (!%p13_p4) target bundleno = 1 (0x1), region = 81 }

// kernel: squeezenet11_forward.11
= control target key start
LH: loop header
LB: loop body
LE: loop exit
PB: predicated region body
PF: predicated region fallthrough
CT: control target
= control target key end

     0   :  { %s3966_s21 = smov 0   ;;  %s5609_s0 = inlined_call_operand.vmem [shape: bf16[2,121,128], index: 0, kind: input, shape index: {}]   ;;  %s5610_s1 = inlined_call_operand.vmem [shape: bf16[128,16], index: 1, kind: input, shape index: {}]   ;;  %s5611_s2 = inlined_call_operand.vmem [shape: f32[1,16], index: 2, kind: input, shape index: {}]   ;;  %s5612_s3 = inlined_call_operand.vmem [shape: bf16[16,128], index: 3, kind: input, shape index: {}]   ;;  %s5613_s4 = inlined_call_operand.vmem [shape: f32[1,128], index: 4, kind: input, shape index: {}]   ;;  %s5614_s5 = inlined_call_operand.vmem [shape: bf16[8,16,64], index: 5, kind: input, shape index: {}]   ;;  %s5615_s6 = inlined_call_operand.vmem [shape: bf16[2,121,128], index: 6, kind: output, shape index: {}]  }
   0x1 LB: > { %s3232_s22 = sadd.s32 4294967295, %s3927_s21   ;;  %p3236_p0 = scmp.ge.s32.totalorder %s3927_s21, 1  ;;  %s3927_s21 = sphi %s3966_s21, %s16_s21  }
   0x2   : > { %p212_p1 = scmp.lt.s32.totalorder %s3927_s21, 3 }
   0x4   : > { %p213_p2 = pnand %p3236_p0, %p212_p1 }
   0x6   : > { %216 = sbr.rel (%p213_p2) target bundleno = 824 (0x338), region = 44 }
   0xd   : > { %v3894_v0 = vld [vmem:[%s5610_s1] sm:$0xff]   ;;  %p242_p3 = scmp.lt.s32.totalorder %s3232_s22, 1  ;;  %v3895_v1 = vld [vmem:[%s5610_s1 + $0x8] sm:$0xff]   ;;  %v3896_v2 = vld [vmem:[%s5610_s1 + $0x10] sm:$0xff]   ;;  %vm5616_vm0 = vcmask 130048   ;;  %v3929_v16 = vmov 0   ;;  %v533_v19 = vlaneseq }
   0xe   : > { %3544 = vmatprep.subr.bf16.mxu0 %v3894_v0  ;;  %v3897_v3 = vld [vmem:[%s5610_s1 + $0x18] sm:$0xff]   ;;  %v3898_v5 = vld [vmem:[%s5610_s1 + $0x20] sm:$0xff]   ;;  %v3899_v6 = vld [vmem:[%s5610_s1 + $0x28] sm:$0xff]   ;;  %256 = vst.msk [vmem:[#allocation2] sm:$0xff] %vm5616_vm0, %v3929_v16  ;;  %vm257_vm1 = vcmask 130052   ;;  %s3930_s24 = smov 64  }
   0xf   : > { %s5899_s22 = smov (!%p242_p3, %s3232_s22), 1  ;;  %3545 = vmatpush3.bf16.msra.mxu0 %v3894_v0  ;;  %v3900_v7 = vld [vmem:[%s5610_s1 + $0x30] sm:$0xff]   ;;  %v3901_v8 = vld [vmem:[%s5610_s1 + $0x38] sm:$0xff]   ;;  %263 = vst.msk [vmem:[#allocation2 + $0x48] sm:$0xff] %vm5616_vm0, %v3929_v16  ;;  %v3910_v17 = vld [vmem:[%s5614_s5 + $0x8] sm:$0xff]   ;;  %v4023_v21 = vshrl.u32 %v533_v19, 7 }
  0x10   : > { %3546 = vmatprep.subr.bf16.mxu0 %v3895_v1  ;;  %s3388_s29 = sshll.u32 %s5899_s22, 6  ;;  %vm258_vm2 = vsmask.f32 7954  ;;  %v260_v18 = vld [vmem:[#allocation2 + $0x40] sm:$0xf0]  ;;  %v4033_v25 = vld [vmem:[%s5614_s5 + $0x10] sm:$0xff]  }
  0x11   : > { %s3991_s8 = scalar_lea.vmem %s5609_s0, %s3388_s29  ;;  %vm259_vm3 = vmand %vm257_vm1, %vm258_vm2  ;;  %v540_v22 = vadd.s32 48, %v4023_v21  ;;  %v535_v23 = vadd.s32 8, %v4023_v21  ;;  %v4028_v24 = vadd.s32 16, %v4023_v21  ;;  %v541_v26 = vadd.s32 56, %v4023_v21  ;;  %3738 = vmatprep.subr.bf16.mxu1 %v4033_v25  ;;  %v3912_v43 = vld [vmem:[%s5614_s5 + $0x18] sm:$0xff]   ;;  %s5559_s30 = scalar_lea.vmem %s5615_s6, %s3388_s29 }
  0x12   : > { %v3902_v4 = vld [vmem:[%s3991_s8] sm:$0xff]   ;;  %v3903_v9 = vld [vmem:[%s3991_s8 + $0x8] sm:$0xff]   ;;  %v3904_v10 = vld [vmem:[%s3991_s8 + $0x10] sm:$0xff]   ;;  %v261_v20 = vsel %vm259_vm3, 0, %v260_v18  ;;  %v542_v27 = vadd.s32 64, %v4023_v21  ;;  %v4041_v30 = vadd.s32 24, %v4023_v21  ;;  %3739 = vmatpush3.bf16.msra.mxu1 %v4033_v25 }
  0x13   : > { %3547 = vmatpush3.bf16.msra.mxu0 %v3895_v1  ;;  %3560 = vmatprep.mubr.bf16.mxu0 %v3902_v4  ;;  %v3905_v11 = vld [vmem:[%s3991_s8 + $0x18] sm:$0xff]   ;;  %v3906_v12 = vld [vmem:[%s3991_s8 + $0x20] sm:$0xff]   ;;  %v3907_v13 = vld [vmem:[%s3991_s8 + $0x28] sm:$0xff]   ;;  %262 = vst [vmem:[#allocation2 + $0x40] sm:$0xf0] %v261_v20  ;;  %v543_v35 = vadd.s32 72, %v4023_v21 }
  0x14   : > { %3548 = vmatprep.subr.bf16.mxu0 %v3896_v2  ;;  %v3908_v14 = vld [vmem:[%s3991_s8 + $0x30] sm:$0xff]   ;;  %v3909_v15 = vld [vmem:[%s3991_s8 + $0x38] sm:$0x1f]   ;;  %v4037_v28 = vmul.u32.u64.low 3123612579, %v540_v22  ;;  %v4038_v29 = vmul.u32.u64.high 3123612579, %v540_v22, %v4037_v28  ;;  %v544_v38 = vadd.s32 80, %v4023_v21  ;;  %3630 = vmatprep.subr.bf16.mxu1 %v3912_v43 }
  0x15   : > { %v4045_v31 = vmul.u32.u64.low 3123612579, %v4023_v21  ;;  %v4046_v32 = vmul.u32.u64.high 3123612579, %v4023_v21, %v4045_v31  ;;  %v4048_v33 = vmul.u32.u64.low 3123612579, %v535_v23  ;;  %v4049_v34 = vmul.u32.u64.high 3123612579, %v535_v23, %v4048_v33 }
  0x16   : > { %v4054_v36 = vmul.u32.u64.low 3123612579, %v4028_v24  ;;  %v4055_v37 = vmul.u32.u64.high 3123612579, %v4028_v24, %v4054_v36  ;;  %v4058_v39 = vmul.u32.u64.low 3123612579, %v541_v26  ;;  %v4059_v40 = vmul.u32.u64.high 3123612579, %v541_v26, %v4058_v39 }
  0x17   : > { %3549 = vmatpush3.bf16.msra.mxu0 %v3896_v2  ;;  %v4061_v41 = vmul.u32.u64.low 3123612579, %v542_v27  ;;  %v4062_v42 = vmul.u32.u64.high 3123612579, %v542_v27, %v4061_v41  ;;  %v4068_v44 = vmul.u32.u64.low 3123612579, %v4041_v30  ;;  %v4069_v45 = vmul.u32.u64.high 3123612579, %v4041_v30, %v4068_v44 }
  0x18   : > { %3550 = vmatprep.subr.bf16.mxu0 %v3897_v3  ;;  %v4071_v46 = vmul.u32.u64.low 3123612579, %v543_v35  ;;  %v4072_v47 = vmul.u32.u64.high 3123612579, %v543_v35, %v4071_v46  ;;  %v4075_v48 = vadd.s32 88, %v4023_v21  ;;  %v622_v51 = vshrl.u32 %v4038_v29, 3 }
  0x19   : > { %v4077_v49 = vmul.u32.u64.low 3123612579, %v544_v38  ;;  %v4078_v50 = vmul.u32.u64.high 3123612579, %v544_v38, %v4077_v49  ;;  %v556_v52 = vshrl.u32 %v4046_v32, 3  ;;  %v567_v53 = vshrl.u32 %v4049_v34, 3 }
  0x1a   : > { %v633_v54 = vshrl.u32 %v4059_v40, 3  ;;  %v4085_v55 = vmul.u32.u64.low 3123612579, %v4075_v48  ;;  %v4086_v56 = vmul.u32.u64.high 3123612579, %v4075_v48, %v4085_v55  ;;  %v578_v57 = vshrl.u32 %v4055_v37, 3 }
  0x1b   : > { %3551 = vmatpush3.bf16.msra.mxu0 %v3897_v3  ;;  %v623_v58 = vmul.u32 11, %v622_v51  ;;  %v644_v59 = vshrl.u32 %v4062_v42, 3  ;;  %v589_v60 = vshrl.u32 %v4069_v45, 3  ;;  %v557_v61 = vmul.u32 11, %v556_v52 }
  0x1c   : > { %3552 = vmatprep.subr.bf16.mxu0 %v3898_v5  ;;  %v568_v62 = vmul.u32 11, %v567_v53  ;;  %v655_v63 = vshrl.u32 %v4072_v47, 3  ;;  %v4093_v0 = vadd.s32 96, %v4023_v21  ;;  %v634_v1 = vmul.u32 11, %v633_v54 }
  0x1d   : > { %v666_v2 = vshrl.u32 %v4078_v50, 3  ;;  %v579_v3 = vmul.u32 11, %v578_v57  ;;  %v4096_v4 = vsub.s32 %v540_v22, %v623_v58  ;;  %v677_v20 = vshrl.u32 %v4086_v56, 3 }
  0x1e   : > { %v635_v18 = vsub.s32 %v541_v26, %v634_v1  ;;  %v4126_v22 = vadd.s32 120, %v4023_v21 }
  0x1f   : > { %3553 = vmatpush3.bf16.msra.mxu0 %v3898_v5  ;;  %v645_v5 = vmul.u32 11, %v644_v59  ;;  %v667_v19 = vmul.u32 11, %v666_v2  ;;  %vm732_vm4 = vcmp.ne.s32.totalorder %v4096_v4, 0  ;;  %vm748_vm5 = vcmp.lt.s32.totalorder %v4096_v4, 0 }
  0x20   : > { %3554 = vmatprep.subr.bf16.mxu0 %v3899_v6  ;;  %v678_v37 = vmul.u32 11, %v677_v20  ;;  %v4148_v39 = vmul.u32.u64.low 3123612579, %v4126_v22  ;;  %v4149_v40 = vmul.u32.u64.high 3123612579, %v4126_v22, %v4148_v39  ;;  %vm733_vm6 = vcmp.ne.s32.totalorder %v635_v18, 0  ;;  %vm4163_vm14 = vmand %vm748_vm5, %vm732_vm4 }
  0x21   : > { %v668_v36 = vsub.s32 %v544_v38, %v667_v19  ;;  %vm749_vm7 = vcmp.lt.s32.totalorder %v635_v18, 0  ;;  %v4152_v41 = vsub.s32 %v4028_v24, %v579_v3  ;;  %v780_v24 = vadd.s32 11, %v4096_v4 }
  0x22   : > { %v679_v38 = vsub.s32 %v4075_v48, %v678_v37  ;;  %vm4172_vm2 = vmand %vm749_vm7, %vm733_vm6  ;;  %v781_v46 = vadd.s32 11, %v635_v18  ;;  %v721_v57 = vshrl.u32 %v4149_v40, 3 }
  0x23   : > { %3555 = vmatpush3.bf16.msra.mxu0 %v3899_v6  ;;  %v590_v6 = vmul.u32 11, %v589_v60  ;;  %vm736_vm15 = vcmp.ne.s32.totalorder %v668_v36, 0  ;;  %vm752_vm1 = vcmp.lt.s32.totalorder %v668_v36, 0  ;;  %v784_v52 = vadd.s32 11, %v668_v36 }
  0x24   : > { %3556 = vmatprep.subr.bf16.mxu0 %v3900_v7  ;;  %vm728_vm7 = vcmp.ne.s32.totalorder %v4152_v41, 0  ;;  %v4200_v54 = vsel %vm4163_vm14, %v780_v24, %v4096_v4  ;;  %v4207_v59 = vsel %vm4172_vm2, %v781_v46, %v635_v18  ;;  %vm744_vm14 = vcmp.lt.s32.totalorder %v4152_v41, 0 }
  0x25   : > { %v4155_v42 = vsub.s32 %v4041_v30, %v590_v6  ;;  %vm812_vm2 = vcmp.ne.s32.totalorder %v4200_v54, 0  ;;  %vm813_vm0 = vcmp.ne.s32.totalorder %v4207_v59, 0  ;;  %v776_v19 = vadd.s32 11, %v4152_v41 }
  0x27   : > { %3557 = vmatpush3.bf16.msra.mxu0 %v3900_v7  ;;  %v4099_v7 = vadd.s32 32, %v4023_v21 }
  0x28   : > { %3558 = vmatprep.subr.bf16.mxu0 %v3901_v8 }
  0x29   : > { %v4131_v28 = vmul.u32.u64.low 3123612579, %v4099_v7  ;;  %v4132_v29 = vmul.u32.u64.high 3123612579, %v4099_v7, %v4131_v28 }
  0x2a   : > { %v5667_v28 = vmov 0 }
  0x2b   : > { %3559 = vmatpush3.bf16.msra.mxu0 %v3901_v8  ;;  %v4102_v8 = vadd.s32 104, %v4023_v21  ;;  %v600_v44 = vshrl.u32 %v4132_v29, 3 }
  0x2c   : > { %3576 = vmatprep.subr.bf16.mxu0 %v3910_v17 }
  0x2d   : > { %v4135_v31 = vmul.u32.u64.low 3123612579, %v4102_v8  ;;  %v4136_v32 = vmul.u32.u64.high 3123612579, %v4102_v8, %v4135_v31  ;;  %v601_v58 = vmul.u32 11, %v600_v44 }
  0x2e   : > { %3561 = vmatmul.mubr.bf16.vlgmr.msra.gmra.mrb[0].mxu0 %v3903_v9  ;;  %v4105_v9 = vsub.s32 %v4023_v21, %v557_v61 }
  0x2f   : > { %3564 = vmatprep.mubr.bf16.mxu0 %v3904_v10  ;;  %3577 = vmatpush3.bf16.msra.mxu0 %v3910_v17  ;;  %v4107_v10 = vsub.s32 %v535_v23, %v568_v62  ;;  %v4122_v17 = vadd.s32 112, %v4023_v21  ;;  %v646_v23 = vsub.s32 %v542_v27, %v645_v5  ;;  %v699_v53 = vshrl.u32 %v4136_v32, 3 }
  0x30   : > { %vm726_vm10 = vcmp.ne.s32.totalorder %v4105_v9, 0  ;;  %vm742_vm11 = vcmp.lt.s32.totalorder %v4105_v9, 0  ;;  %v774_v48 = vadd.s32 11, %v4105_v9  ;;  %v785_v62 = vadd.s32 11, %v679_v38 }
  0x31   : > { %vm734_vm8 = vcmp.ne.s32.totalorder %v646_v23, 0  ;;  %vm750_vm9 = vcmp.lt.s32.totalorder %v646_v23, 0  ;;  %vm727_vm3 = vcmp.ne.s32.totalorder %v4107_v10, 0  ;;  %vm743_vm4 = vcmp.lt.s32.totalorder %v4107_v10, 0 }
  0x32   : > { %vm4181_vm5 = vmand %vm750_vm9, %vm734_vm8  ;;  %v782_v47 = vadd.s32 11, %v646_v23  ;;  %v700_v2 = vmul.u32 11, %v699_v53  ;;  %v722_v5 = vmul.u32 11, %v721_v57  ;;  %v602_v6 = vsub.s32 %v4099_v7, %v601_v58 }
  0x33   : > { %vm768_vm8 = vmand %vm752_vm1, %vm736_vm15  ;;  %v775_v18 = vadd.s32 11, %v4107_v10 }
  0x34   : > { %v4211_v60 = vsel %vm4181_vm5, %v782_v47, %v646_v23  ;;  %v4218_v1 = vsel %vm768_vm8, %v784_v52, %v668_v36  ;;  %vm758_vm15 = vmand %vm742_vm11, %vm726_vm10  ;;  %vm745_vm5 = vcmp.lt.s32.totalorder %v4155_v42, 0  ;;  %vm746_vm9 = vcmp.lt.s32.totalorder %v602_v6, 0 }
  0x35   : > { %v5665_v23 = vmov 0  ;;  %v778_v32 = vadd.s32 11, %v602_v6  ;;  %v5682_v36 = vmov 0 }
  0x36   : > { %3565 = vmatmul.mubr.bf16.gmra.mrb[4].mxu0 %v3905_v11  ;;  %v4112_v11 = vld [vmem:[%s5614_s5] sm:$0xff]  }
  0x37   : > { %3568 = vmatprep.mubr.bf16.mxu0 %v3906_v12  ;;  %v4115_v12 = vadd.s32 40, %v4023_v21  ;;  %3594 = vmatprep.subr.bf16.mxu0 %v4112_v11  ;;  %v4144_v21 = vmul.u32.u64.low 3123612579, %v4122_v17  ;;  %v4145_v27 = vmul.u32.u64.high 3123612579, %v4122_v17, %v4144_v21 }
  0x38   : > { %v5676_v21 = vmov 0 }
  0x39   : > { %v4139_v26 = vmul.u32.u64.low 3123612579, %v4115_v12  ;;  %v4140_v33 = vmul.u32.u64.high 3123612579, %v4115_v12, %v4139_v26  ;;  %v710_v56 = vshrl.u32 %v4145_v27, 3  ;;  %v5679_v27 = vmov 0 }
  0x3b   : > { %v611_v49 = vshrl.u32 %v4140_v33, 3  ;;  %v711_v4 = vmul.u32 11, %v710_v56  ;;  %v5671_v33 = vmov 0 }
  0x3d   : > { %v612_v61 = vmul.u32 11, %v611_v49  ;;  %v712_v7 = vsub.s32 %v4122_v17, %v711_v4 }
  0x3e   : > { %3569 = vmatmul.mubr.bf16.gmra.mrb[8].mxu0 %v3907_v13  ;;  %v656_v13 = vmul.u32 11, %v655_v63 }
  0x3f   : > { %3572 = vmatprep.mubr.bf16.mxu0 %v3908_v14 }
  0x40   : > { %v657_v34 = vsub.s32 %v543_v35, %v656_v13  ;;  %v4233_v13 = vsel %vm758_vm15, %v774_v48, %v4105_v9  ;;  %v788_v35 = vadd.s32 11, %v712_v7 }
  0x41   : > { %vm806_vm15 = vcmp.ne.s32.totalorder %v4233_v13, 0 }
  0x42   : > { %vm735_vm12 = vcmp.ne.s32.totalorder %v657_v34, 0  ;;  %vm751_vm13 = vcmp.lt.s32.totalorder %v657_v34, 0  ;;  %v783_v51 = vadd.s32 11, %v657_v34 }
  0x43   : > { %vm4189_vm6 = vmand %vm751_vm13, %vm735_vm12  ;;  %vm737_vm12 = vcmp.ne.s32.totalorder %v679_v38, 0  ;;  %vm753_vm13 = vcmp.lt.s32.totalorder %v679_v38, 0 }
  0x44   : > { %v4216_v63 = vsel %vm4189_vm6, %v783_v51, %v657_v34  ;;  %vm769_vm1 = vmand %vm753_vm13, %vm737_vm12 }
  0x45   : > { %vm4246_vm12 = vmand %vm743_vm4, %vm727_vm3  ;;  %vm5662_vm4 = vcmp.ne.s32.totalorder %v4155_v42, 0 }
  0x46   : > { %3573 = vmatmul.mubr.bf16.gmra.mrb[12].mxu0 %v3909_v15  ;;  %v4118_v14 = vmul.u32.u64.low 3123612579, %v4093_v0  ;;  %v4119_v15 = vmul.u32.u64.high 3123612579, %v4093_v0, %v4118_v14  ;;  %vm4256_vm13 = vmand %vm744_vm14, %vm728_vm7  ;;  %v4293_v31 = vsel %vm4246_vm12, %v775_v18, %v4107_v10 }
  0x47   : > { %v613_v14 = vsub.s32 %v4115_v12, %v612_v61  ;;  %v777_v12 = vadd.s32 11, %v4155_v42  ;;  %vm4266_vm8 = vmand %vm745_vm5, %vm5662_vm4  ;;  %v4298_v26 = vsel %vm4256_vm13, %v776_v19, %v4152_v41  ;;  %vm5678_vm13 = vcmp.ne.s32.totalorder %v4216_v63, 0 }
  0x48   : > { %v688_v30 = vshrl.u32 %v4119_v15, 3  ;;  %v701_v15 = vsub.s32 %v4102_v8, %v700_v2  ;;  %v723_v8 = vsub.s32 %v4126_v22, %v722_v5  ;;  %vm4273_vm14 = vmpackc.low %vm812_vm2, %vm812_vm2 }
  0x49   : > { %v5666_v23 = vsel %vm4273_vm14, 4294967295, %v5665_v23  ;;  %vm4280_vm3 = vmpackc.low %vm813_vm0, %vm813_vm0  ;;  %v779_v34 = vadd.s32 11, %v613_v14  ;;  %v4337_v39 = vsel %vm4266_vm8, %v777_v12, %v4155_v42  ;;  %vm5684_vm2 = vcmp.ne.s32.totalorder %v613_v14, 0 }
  0x4a   : > { %v689_v55 = vmul.u32 11, %v688_v30  ;;  %v5668_v28 = vsel %vm4280_vm3, 4294967295, %v5667_v28  ;;  %vm4303_vm0 = vmpackc.low %vm806_vm15, %vm806_vm15  ;;  %v787_v37 = vadd.s32 11, %v701_v15  ;;  %vm741_vm7 = vcmp.ne.s32.totalorder %v723_v8, 0 }
  0x4b   : > { %v5672_v33 = vsel %vm4303_vm0, 4294967295, %v5671_v33  ;;  %vm4323_vm15 = vmpackc.low %vm5678_vm13, %vm5678_vm13  ;;  %vm5685_vm13 = vcmp.lt.s32.totalorder %v613_v14, 0  ;;  %vm807_vm8 = vcmp.ne.s32.totalorder %v4293_v31, 0  ;;  %vm5691_vm0 = vcmp.ne.s32.totalorder %v712_v7, 0 }
  0x4c   : > { %v690_v3 = vsub.s32 %v4093_v0, %v689_v55  ;;  %v4236_v0 = vsel %vm769_vm1, %v785_v62, %v679_v38  ;;  %vm730_vm1 = vcmp.ne.s32.totalorder %v602_v6, 0  ;;  %v5680_v27 = vsel %vm4323_vm15, 4294967295, %v5679_v27  ;;  %vm763_vm4 = vmand %vm5685_vm13, %vm5684_vm2 }
  0x4d   : > { %vm5686_vm5 = vcmp.ne.s32.totalorder %v4236_v0, 0  ;;  %vm5692_vm3 = vcmp.lt.s32.totalorder %v712_v7, 0  ;;  %v789_v42 = vadd.s32 11, %v723_v8  ;;  %vm808_vm2 = vcmp.ne.s32.totalorder %v4298_v26, 0 }
  0x4e   : > { %vm738_vm10 = vcmp.ne.s32.totalorder %v690_v3, 0  ;;  %vm754_vm11 = vcmp.lt.s32.totalorder %v690_v3, 0  ;;  %v786_v17 = vadd.s32 11, %v690_v3  ;;  %vm4344_vm15 = vmpackc.low %vm5686_vm5, %vm5686_vm5  ;;  %vm809_vm13 = vcmp.ne.s32.totalorder %v4337_v39, 0 }
  0x4f   : > { %vm4286_vm6 = vmand %vm754_vm11, %vm738_vm10  ;;  %vm5675_vm11 = vcmp.ne.s32.totalorder %v4211_v60, 0  ;;  %v4359_v30 = vsel %vm763_vm4, %v779_v34, %v613_v14 }
  0x50   : > { %vm4309_vm10 = vmand %vm746_vm9, %vm730_vm1  ;;  %vm5681_vm9 = vcmp.ne.s32.totalorder %v4218_v1, 0  ;;  %v802_v41 = vsel %vm4286_vm6, %v786_v17, %v690_v3  ;;  %vm811_vm4 = vcmp.ne.s32.totalorder %v4359_v30, 0  ;;  %v909_v3 = vsel %vm4344_vm15, 65537, %v3929_v16 }
  0x51   : > { %vm4316_vm12 = vmpackc.low %vm5675_vm11, %vm5675_vm11  ;;  %vm757_vm11 = vcmp.lt.s32.totalorder %v723_v8, 0  ;;  %v794_v24 = vsel %vm4309_vm10, %v778_v32, %v602_v6  ;;  %vm818_vm6 = vcmp.ne.s32.totalorder %v802_v41, 0 }
  0x52   : > { %v5677_v21 = vsel %vm4316_vm12, 4294967295, %v5676_v21  ;;  %vm4330_vm1 = vmpackc.low %vm5681_vm9, %vm5681_vm9  ;;  %vm5689_vm9 = vcmp.ne.s32.totalorder %v701_v15, 0 }
  0x53   : > { %v5683_v36 = vsel %vm4330_vm1, 4294967295, %v5682_v36  ;;  %vm5690_vm1 = vcmp.lt.s32.totalorder %v701_v15, 0  ;;  %vm772_vm14 = vmand %vm5692_vm3, %vm5691_vm0  ;;  %vm810_vm0 = vcmp.ne.s32.totalorder %v794_v24, 0 }
  0x54   : > { %vm771_vm12 = vmand %vm5690_vm1, %vm5689_vm9  ;;  %v4367_v44 = vsel %vm772_vm14, %v788_v35, %v712_v7 }
  0x55   : > { %vm773_vm5 = vmand %vm757_vm11, %vm741_vm7  ;;  %v4361_v38 = vsel %vm771_vm12, %v787_v37, %v701_v15  ;;  %vm820_vm9 = vcmp.ne.s32.totalorder %v4367_v44, 0 }
  0x56   : > { %vm4363_vm1 = vmpackc.low %vm807_vm8, %vm807_vm8  ;;  %v4373_v46 = vsel %vm773_vm5, %v789_v42, %v723_v8  ;;  %vm819_vm10 = vcmp.ne.s32.totalorder %v4361_v38, 0  ;;  %vm5704_vm5 = vnez %v5668_v28 }
  0x57   : > { %vm4369_vm3 = vmpackc.low %vm808_vm2, %vm808_vm2  ;;  %vm5703_vm2 = vnez %v5666_v23  ;;  %v905_v51 = vsel %vm5704_vm5, 65537, %v3929_v16  ;;  %v899_v55 = vsel %vm4363_vm1, 65537, %v3929_v16  ;;  %vm5711_vm1 = vcmp.ne.s32.totalorder %v802_v41, 10 }
  0x58   : > { %vm4375_vm7 = vmpackc.low %vm809_vm13, %vm809_vm13  ;;  %v904_v50 = vsel %vm5703_vm2, 65537, %v3929_v16  ;;  %vm821_vm13 = vcmp.ne.s32.totalorder %v4373_v46, 0  ;;  %v900_v56 = vsel %vm4369_vm3, 65537, %v3929_v16  ;;  %vm5710_vm2 = vnez %v5683_v36 }
  0x59   : > { %vm4381_vm12 = vmpackc.low %vm818_vm6, %vm818_vm6  ;;  %vm822_vm6 = vcmp.ne.s32.totalorder %v4233_v13, 10  ;;  %v901_v57 = vsel %vm4375_vm7, 65537, %v3929_v16  ;;  %v908_v62 = vsel %vm5710_vm2, 65537, %v3929_v16  ;;  %vm823_vm7 = vcmp.ne.s32.totalorder %v4293_v31, 10 }
  0x5a   : > { %vm4386_vm8 = vmpackc.low %vm810_vm0, %vm810_vm0  ;;  %vm5707_vm0 = vnez %v5672_v33  ;;  %v4443_v14 = vcombine.low %v900_v56, %v901_v57  ;;  %v4445_v15 = vcombine.low %v904_v50, %v905_v51  ;;  %v910_v19 = vsel %vm4381_vm12, 65537, %v3929_v16 }
  0x5b   : > { %vm887_vm14 = vmpackc.low %vm811_vm4, %vm811_vm4  ;;  %v898_v53 = vsel %vm5707_vm0, 65537, %v3929_v16  ;;  %vm5708_vm4 = vnez %v5677_v21  ;;  %v902_v4 = vsel %vm4386_vm8, 65537, %v3929_v16  ;;  %vm826_vm8 = vcmp.ne.s32.totalorder %v794_v24, 10 }
  0x5c   : > { %vm4398_vm11 = vmpackc.low %vm819_vm10, %vm819_vm10  ;;  %v906_v58 = vsel %vm5708_vm4, 65537, %v3929_v16  ;;  %vm5709_vm10 = vnez %v5680_v27  ;;  %v903_v5 = vsel %vm887_vm14, 65537, %v3929_v16  ;;  %vm824_vm4 = vcmp.ne.s32.totalorder %v4298_v26, 10 }
  0x5d   : > { %v907_v61 = vsel %vm5709_vm10, 65537, %v3929_v16  ;;  %vm4425_vm5 = vmpackc.low %vm5711_vm1, %vm5711_vm1  ;;  %v4441_v6 = vcombine.low %v898_v53, %v899_v55  ;;  %v911_v7 = vsel %vm4398_vm11, 65537, %v3929_v16  ;;  %v4466_v13 = vcombine.low %v902_v4, %v903_v5 }
  0x5e   : > { %vm896_vm3 = vmpackc.low %vm820_vm9, %vm820_vm9  ;;  %vm825_vm9 = vcmp.ne.s32.totalorder %v4337_v39, 10  ;;  %vm827_vm12 = vcmp.ne.s32.totalorder %v4359_v30, 10  ;;  %vm835_vm11 = vcmp.ne.s32.totalorder %v4361_v38, 10  ;;  %v2214_v23 = vrot.slane %v4443_v14, 3 }
  0x5f   : > { %vm897_vm0 = vmpackc.low %vm821_vm13, %vm821_vm13  ;;  %v912_v9 = vsel %vm896_vm3, 65537, %v3929_v16  ;;  %v5622_v17 = vrot.slane %v4441_v6, 3  ;;  %vm837_vm2 = vcmp.ne.s32.totalorder %v4373_v46, 10  ;;  %v4483_v28 = vcombine.low %v906_v58, %v907_v61 }
  0x60   : > { %vm4451_vm15 = vmpackc.low %vm822_vm6, %vm822_vm6  ;;  %v913_v8 = vsel %vm897_vm0, 65537, %v3929_v16  ;;  %vm836_vm6 = vcmp.ne.s32.totalorder %v4367_v44, 10  ;;  %v2216_v29 = vrot.slane %v4466_v13, 3  ;;  %v2218_v31 = vrot.slane %v4445_v15, 3 }
  0x61   : > { %vm4462_vm14 = vmpackc.low %vm823_vm7, %vm823_vm7  ;;  %v4487_v32 = vcombine.low %v908_v62, %v909_v3  ;;  %v4489_v26 = vcombine.low %v910_v19, %v911_v7  ;;  %v4491_v33 = vcombine.low %v912_v9, %v913_v8  ;;  %vm5722_vm7 = vcmask 1044480   ;;  %v1617_v8 = vld [vmem:[#allocation2] sm:$0x80] }
  0x62   : > { %vm4469_vm13 = vmpackc.low %vm824_vm4, %vm824_vm4  ;;  %v4496_v10 = vsel %vm5722_vm7, %v5622_v17, %v2214_v23  ;;  %v1375_v34 = vsel %vm4451_vm15, 65537, %v3929_v16  ;;  %v1376_v21 = vsel %vm4462_vm14, 65537, %v3929_v16  ;;  %v2220_v41 = vrot.slane %v4483_v28, 3 }
  0x63   : > { %vm4477_vm10 = vmpackc.low %vm825_vm9, %vm825_vm9  ;;  %v1377_v37 = vsel %vm4469_vm13, 65537, %v3929_v16  ;;  %v2222_v42 = vrot.slane %v4487_v32, 3  ;;  %v2224_v24 = vrot.slane %v4489_v26, 3  ;;  %v5621_v30 = vrot.slane %v4491_v33, 3 }
  0x64   : > { %vm1363_vm1 = vmpackc.low %vm826_vm8, %vm826_vm8  ;;  %v1378_v39 = vsel %vm4477_vm10, 65537, %v3929_v16  ;;  %v1387_v38 = vsel %vm4425_vm5, 65537, %v3929_v16  ;;  %v4535_v45 = vcombine.low %v1375_v34, %v1376_v21  ;;  %vm830_vm10 = vcmp.ne.s32.totalorder %v4211_v60, 10  ;;  %v848_v60 = vld [vmem:[#allocation2] sm:$0xfc] }
  0x65   : > { %vm1364_vm3 = vmpackc.low %vm827_vm12, %vm827_vm12  ;;  %v1379_v40 = vsel %vm1363_vm1, 65537, %v3929_v16  ;;  %v4548_v50 = vcombine.low %v1377_v37, %v1378_v39  ;;  %vm829_vm1 = vcmp.ne.s32.totalorder %v4207_v59, 10  ;;  %v977_v18 = vshrl.u32 %v848_v60, 16 }
  0x66   : > { %vm1372_vm0 = vmpackc.low %vm835_vm11, %vm835_vm11  ;;  %v1380_v35 = vsel %vm1364_vm3, 65537, %v3929_v16  ;;  %5729 = vst [vmem:[#allocation6_spill] sm:$0xff] %v4535_v45  ;;  %vm1182_vm11 = vcmask 1045504   ;;  %v5620_v53 = vrot.slane %v4535_v45, 2  ;;  %v980_v7 = vshll.u32 %v848_v60, 16 }
  0x67   : > { %vm5723_vm4 = vmmov %vm5722_vm7  ;;  %v1388_v43 = vsel %vm1372_vm0, 65537, %v3929_v16  ;;  %v4550_v46 = vcombine.low %v1379_v40, %v1380_v35  ;;  %v2648_v56 = vrot.slane %v4548_v50, 2  ;;  %vm832_vm7 = vcmp.ne.s32.totalorder %v4218_v1, 10 }
  0x68   : > { %v4505_v27 = vsel %vm5723_vm4, %v2214_v23, %v2216_v29  ;;  %vm5725_vm9 = vmmov %vm5723_vm4  ;;  %v4555_v55 = vcombine.low %v1387_v38, %v1388_v43  ;;  %v939_v20 = vrot.slane %v4441_v6, 6  ;;  %v1624_v23 = vshrl.u32 %v4441_v6, 16 }
  0x69   : > { %5724 = vst [vmem:[#allocation3_spill] sm:$0xff] %v4505_v27  ;;  %v4508_v36 = vsel %vm5725_vm9, %v2216_v29, %v2218_v31  ;;  %vm1373_vm15 = vmpackc.low %vm836_vm6, %vm836_vm6  ;;  %v5619_v57 = vrot.slane %v4550_v46, 2  ;;  %v4564_v61 = vsel %vm1182_vm11, %v5620_v53, %v2648_v56  ;;  %vm828_vm6 = vcmp.ne.s32.totalorder %v4200_v54, 10 }
  0x6a   : > { %5726 = vst [vmem:[#allocation4_spill] sm:$0xff] %v4508_v36  ;;  %vm1374_vm14 = vmpackc.low %vm837_vm2, %vm837_vm2  ;;  %v1389_v51 = vsel %vm1373_vm15, 65537, %v3929_v16  ;;  %v5617_v2 = vrot.slane %v4555_v55, 2  ;;  %vm831_vm2 = vcmp.ne.s32.totalorder %v4216_v63, 10  ;;  %v1621_v54 = vshll.u32 %v4441_v6, 16 }
  0x6b   : > { %vm5727_vm8 = vmmov %vm5723_vm4  ;;  %v1390_v52 = vsel %vm1374_vm14, 65537, %v3929_v16  ;;  %5736 = vst [vmem:[#allocation10_spill] sm:$0xff] %v4564_v61  ;;  %v4569_v62 = vsel %vm1182_vm11, %v2648_v56, %v5619_v57  ;;  %v1628_v29 = vshll.u32 %v4443_v14, 16  ;;  %v4604_v21 = vrot.slane %v980_v7, 3  ;;  %v4620_v56 = vld [vmem:[%s5611_s2] ss:$0 sm:$0xff] }
  0x6c   : > { %v4533_v44 = vsel %vm5727_vm8, %v2218_v31, %v2220_v41  ;;  %vm5730_vm13 = vmmov %vm5723_vm4  ;;  %v4559_v58 = vcombine.low %v1389_v51, %v1390_v52  ;;  %5737 = vst [vmem:[#allocation11_spill] sm:$0xff] %v4569_v62  ;;  %v1623_v1 = vrot.slane %v1621_v54, 1  ;;  %v4600_v31 = vrot.slane %v977_v18, 2 }
  0x6d   : > { %5728 = vst [vmem:[#allocation5_spill] sm:$0xff] %v4533_v44  ;;  %v4538_v47 = vsel %vm5730_vm13, %v2220_v41, %v2222_v42  ;;  %vm5732_vm12 = vmmov %vm5723_vm4  ;;  %v1427_v41 = vrot.slane %v4555_v55, 5  ;;  %v1632_v38 = vshrl.u32 %v4443_v14, 16  ;;  %v5624_v43 = vrot.slane %v4443_v14, 6 }
  0x6e   : > { %5731 = vst [vmem:[#allocation7_spill] sm:$0xff] %v4538_v47  ;;  %v4541_v48 = vsel %vm5732_vm12, %v2222_v42, %v2224_v24  ;;  %vm5734_vm5 = vmmov %vm5723_vm4  ;;  %v5618_v3 = vrot.slane %v4559_v58, 2  ;;  %vm833_vm4 = vcmp.ne.s32.totalorder %v4236_v0, 10  ;;  %vm1683_vm13 = vcmp.ne.s16.totalorder %v1623_v1, 0 }
  0x6f   : > { %5733 = vst [vmem:[#allocation8_spill] sm:$0xff] %v4541_v48  ;;  %v4546_v49 = vsel %vm5734_vm5, %v2224_v24, %v5621_v30  ;;  %vm1365_vm3 = vmpackc.low %vm828_vm6, %vm828_vm6  ;;  %v1692_v39 = vsel %vm1683_vm13, %v1617_v8, 0  ;;  %vm5648_vm12 = vcmask 1042432   ;;  %vm4610_vm5 = vcmp.ne.s16.totalorder %v939_v20, 0 }
  0x70   : > { %5735 = vst [vmem:[#allocation9_spill] sm:$0xff] %v4546_v49  ;;  %v4581_v4 = vsel %vm1182_vm11, %v5617_v2, %v5618_v3  ;;  %vm1367_vm0 = vmpackc.low %vm830_vm10, %vm830_vm10  ;;  %v1381_v59 = vsel %vm1365_vm3, 65537, %v3929_v16  ;;  %v1626_v42 = vor.u32 %v1624_v23, %v1623_v1  ;;  %v1630_v24 = vrot.slane %v1628_v29, 1 }
  0x71   : > { %5738 = vst [vmem:[#allocation12_spill] sm:$0xff] %v4581_v4  ;;  %vm1368_vm9 = vmpackc.low %vm831_vm2, %vm831_vm2  ;;  %v1383_v63 = vsel %vm1367_vm0, 65537, %v3929_v16  ;;  %v1429_v51 = vrot.slane %v4559_v58, 5  ;;  %vm5647_vm6 = vsmask.f32 7424  ;;  %v1706_v52 = vshrl.u32 %v1692_v39, 16 }
  0x72   : > { %vm1366_vm15 = vmpackc.low %vm829_vm1, %vm829_vm1  ;;  %v1384_v5 = vsel %vm1368_vm9, 65537, %v3929_v16  ;;  %vm5646_vm10 = vcmask 1041408   ;;  %v1652_v1 = vshll.u32 %v4483_v28, 16  ;;  %v1660_v8 = vshll.u32 %v4487_v32, 16 }
  0x73   : > { %vm1369_vm14 = vmpackc.low %vm832_vm7, %vm832_vm7  ;;  %v1382_v19 = vsel %vm1366_vm15, 65537, %v3929_v16  ;;  %v4593_v12 = vcombine.low %v1383_v63, %v1384_v5  ;;  %v962_v5 = vsel %vm4610_vm5, %v848_v60, 0  ;;  %v4647_v60 = vsel %vm5646_vm10, %v939_v20, %v5624_v43 }
  0x74   : > { %vm1370_vm8 = vmpackc.low %vm833_vm4, %vm833_vm4  ;;  %v1385_v0 = vsel %vm1369_vm14, 65537, %v3929_v16  ;;  %v4596_v22 = vcombine.low %v1381_v59, %v1382_v19  ;;  %v1644_v19 = vshll.u32 %v4445_v15, 16  ;;  %v4654_v39 = vrot.slane %v1706_v52, 7 }
  0x75   : > { %v1386_v9 = vsel %vm1370_vm8, 65537, %v3929_v16  ;;  %5739 = vst [vmem:[#allocation13_spill] sm:$0xff] %v4593_v12  ;;  %v1423_v37 = vrot.slane %v4593_v12, 5  ;;  %v1648_v20 = vshrl.u32 %v4445_v15, 16  ;;  %v1654_v57 = vrot.slane %v1652_v1, 1 }
  0x76   : > { %v4602_v34 = vcombine.low %v1385_v0, %v1386_v9  ;;  %v5623_v16 = vrot.slane %v4596_v22, 5  ;;  %v4640_v0 = vsel %vm5647_vm6, %v1626_v42, %v1630_v24  ;;  %v4642_v9 = vor.u32 %v1632_v38, %v1630_v24 }
  0x77   : > { %v5627_v24 = vrot.slane %v4445_v15, 6  ;;  %v1656_v38 = vshrl.u32 %v4483_v28, 16  ;;  %v1646_v3 = vrot.slane %v1644_v19, 1  ;;  %v1662_v52 = vrot.slane %v1660_v8, 1 }
  0x78   : > { %5740 = vst [vmem:[#allocation14_spill] sm:$0xff] %v4602_v34  ;;  %v1425_v40 = vrot.slane %v4602_v34, 5  ;;  %v4627_v63 = vsel %vm5648_vm12, %v5623_v16, %v1423_v37  ;;  %v948_v17 = vrot.slane %v4487_v32, 6  ;;  %v1672_v16 = vshrl.u32 %v4489_v26, 16 }
  0x79   : > { %v1636_v19 = vshll.u32 %v4466_v13, 16  ;;  %v1676_v1 = vshll.u32 %v4491_v33, 16  ;;  %v1650_v43 = vor.u32 %v1648_v20, %v1646_v3  ;;  %vm5743_vm2 = vcmask 130048  }
  0x7a   : > { %v4632_v18 = vsel %vm5648_vm12, %v1423_v37, %v1425_v40  ;;  %v4635_v59 = vsel %vm5648_vm12, %v1425_v40, %v1427_v41  ;;  %v4652_v37 = vsel %vm5648_vm12, %v1427_v41, %v1429_v51  ;;  %v4656_v40 = vrot.slane %v962_v5, 2  ;;  %vm5744_vm1 = vmmov %vm5743_vm2 }
  0x7b   : > { %v946_v41 = vrot.slane %v4483_v28, 6  ;;  %v1664_v5 = vshrl.u32 %v4487_v32, 16  ;;  %v1640_v32 = vshrl.u32 %v4466_v13, 16  ;;  %v1680_v20 = vshrl.u32 %v4491_v33, 16  ;;  %vm5747_vm7 = vmmov %vm5744_vm1 }
  0x7c   : > { %v4687_v61 = vsel %vm5647_vm6, %v1650_v43, %v1654_v57  ;;  %vm975_vm3 = vsmask.f32 5376  ;;  %vm1684_vm0 = vcmp.ne.s16.totalorder %v4640_v0, 0  ;;  %vm5748_vm4 = vmmov %vm5744_vm1  ;;  %vm527_vm9 = vcmask 126976  }
  0x7d   : > { %v4674_v8 = vsel %vm5646_vm10, %v5627_v24, %v946_v41  ;;  %v1666_v4 = vor.u32 %v1664_v5, %v1662_v52  ;;  %v1678_v5 = vrot.slane %v1676_v1, 1  ;;  %vm528_vm15 = vsmask.f32 4352 }
  0x7e   : > { %vm1435_vm14 = vcmp.ne.s16.totalorder %v4627_v63, 0  ;;  %vm1437_vm8 = vcmp.ne.s16.totalorder %v4635_v59, 0  ;;  %vm1436_vm13 = vcmp.ne.s16.totalorder %v4632_v18, 0  ;;  %v5638_v18 = vrot.slane %v4550_v46, 5 }
 0x101   : > { %v3562_v7 = vpop.f32.mrb[0].mxu0 }
 0x102   : > { %v442_v23 = vadd.f32 %v3562_v7, %v4620_v56  ;;  %v433_v29 = vpop.f32.mrb[1].mxu0 }
 0x103   : > { %v434_v35 = vadd.f32 %v4620_v56, %v433_v29  ;;  %v3563_v42 = vpop.f32.mrb[2].mxu0  ;;  %v1668_v29 = vshll.u32 %v4489_v26, 16 }
 0x104   : > { %v445_v2 = vadd.f32 %v3563_v42, %v4620_v56  ;;  %v436_v7 = vpop.f32.mrb[3].mxu0  ;;  %v498_v53 = vmax.f32 %v442_v23, 0.0 }
 0x105   : > { %v437_v51 = vadd.f32 %v4620_v56, %v436_v7  ;;  %v496_v54 = vmax.f32 %v434_v35, 0.0  ;;  %v1658_v7 = vor.u32 %v1656_v38, %v1654_v57  ;;  %v1670_v62 = vrot.slane %v1668_v29, 1 }
 0x106   : > { %v499_v30 = vmax.f32 %v445_v2, 0.0 }
 0x107   : > { %v497_v42 = vmax.f32 %v437_v51, 0.0  ;;  %v1674_v24 = vor.u32 %v1672_v16, %v1670_v62  ;;  %v4697_v16 = vsel %vm5647_vm6, %v1666_v4, %v1670_v62  ;;  %v5745_v4 = vrot.slane %v4443_v14, 6 }
 0x108   : > { %v513_v28 = vpack.c.bf16 %v499_v30, %v498_v53  ;;  %v950_v30 = vrot.slane %v4489_v26, 6  ;;  %v952_v53 = vrot.slane %v4491_v33, 6  ;;  %v4690_v26 = vsel %vm5646_vm10, %v946_v41, %v948_v17 }
 0x109   : > { %v512_v23 = vpack.c.bf16 %v497_v42, %v496_v54  ;;  %v3566_v2 = vpop.f32.mrb[4].mxu0  ;;  %v1638_v42 = vrot.slane %v1636_v19, 1 }
 0x10a   : > { %521 = vst.msk [vmem:[#allocation2 + $0x10] sm:$0xff] %vm5743_vm2, %v513_v28  ;;  %v458_v35 = vadd.f32 %v3566_v2, %v4620_v56  ;;  %v449_v51 = vpop.f32.mrb[5].mxu0  ;;  %v942_v2 = vrot.slane %v4466_v13, 6  ;;  %v4700_v13 = vsel %vm5646_vm10, %v948_v17, %v950_v30  ;;  %v4703_v57 = vsel %vm5646_vm10, %v950_v30, %v952_v53  ;;  %vm5752_vm2 = vmmov %vm5744_vm1 }
 0x10b   : > { %520 = vst.msk [vmem:[#allocation2 + $0x8] sm:$0xff] %vm5744_vm1, %v512_v23  ;;  %v450_v54 = vadd.f32 %v4620_v56, %v449_v51  ;;  %v3567_v38 = vpop.f32.mrb[6].mxu0  ;;  %v1642_v23 = vor.u32 %v1640_v32, %v1638_v42  ;;  %v4694_v51 = vsel %vm5647_vm6, %v1658_v7, %v1662_v52  ;;  %v4708_v32 = vor.u32 %v1680_v20, %v1678_v5 }
 0x10c   : > { %v461_v29 = vadd.f32 %v3567_v38, %v4620_v56  ;;  %v452_v28 = vpop.f32.mrb[7].mxu0  ;;  %v502_v19 = vmax.f32 %v458_v35, 0.0  ;;  %v4706_v38 = vsel %vm5647_vm6, %v1674_v24, %v1678_v5  ;;  %v4712_v62 = vsel %vm5647_vm6, %v4642_v9, %v1638_v42 }
 0x10d   : > { %v453_v49 = vadd.f32 %v4620_v56, %v452_v28  ;;  %v500_v43 = vmax.f32 %v450_v54, 0.0  ;;  %v4717_v17 = vsel %vm5646_vm10, %v5745_v4, %v942_v2  ;;  %v5746_v7 = vrot.slane %v4445_v15, 6 }
 0x10e   : > { %v503_v1 = vmax.f32 %v461_v29, 0.0  ;;  %v4727_v53 = vsel %vm5647_vm6, %v1642_v23, %v1646_v3  ;;  %v1940_v9 = vshrl.u32 %v4596_v22, 16  ;;  %v1917_v3 = vshrl.u32 %v4535_v45, 16 }
 0x10f   : > { %v501_v41 = vmax.f32 %v453_v49, 0.0  ;;  %v4722_v35 = vsel %vm5646_vm10, %v942_v2, %v5746_v7  ;;  %v1924_v4 = vshrl.u32 %v4548_v50, 16 }
 0x110   : > { %v515_v52 = vpack.c.bf16 %v503_v1, %v502_v19 }
 0x111   : > { %v514_v49 = vpack.c.bf16 %v501_v41, %v500_v43  ;;  %v3570_v24 = vpop.f32.mrb[8].mxu0  ;;  %v4724_v30 = vld [vmem:[#allocation2 + $0x10] sm:$0xff] }
 0x112   : > { %523 = vst.msk [vmem:[#allocation2 + $0x20] sm:$0xff] %vm5747_vm7, %v515_v52  ;;  %v474_v14 = vadd.f32 %v3570_v24, %v4620_v56  ;;  %v465_v54 = vpop.f32.mrb[9].mxu0  ;;  %v4733_v15 = vld [vmem:[#allocation2 + $0x8] sm:$0xff]  ;;  %v994_v42 = vshrl.u32 %v4724_v30, 16  ;;  %v997_v5 = vshll.u32 %v4724_v30, 16  ;;  %vm5754_vm7 = vmmov %vm5744_vm1 }
 0x113   : > { %522 = vst.msk [vmem:[#allocation2 + $0x18] sm:$0xff] %vm5748_vm4, %v514_v49  ;;  %v466_v29 = vadd.f32 %v4620_v56, %v465_v54  ;;  %v3571_v28 = vpop.f32.mrb[10].mxu0  ;;  %v985_v2 = vshrl.u32 %v4733_v15, 16  ;;  %v988_v23 = vshll.u32 %v4733_v15, 16  ;;  %v1416_v54 = vrot.slane %v4535_v45, 5  ;;  %vm5755_vm4 = vmmov %vm5744_vm1 }
 0x114   : > { %v477_v1 = vadd.f32 %v3571_v28, %v4620_v56  ;;  %v468_v43 = vpop.f32.mrb[11].mxu0  ;;  %v996_v41 = vrot.slane %v994_v42, 2  ;;  %v999_v52 = vrot.slane %v997_v5, 3  ;;  %v506_v20 = vmax.f32 %v474_v14, 0.0 }
 0x115   : > { %v469_v7 = vadd.f32 %v4620_v56, %v468_v43  ;;  %v987_v49 = vrot.slane %v985_v2, 2  ;;  %v990_v24 = vrot.slane %v988_v23, 3  ;;  %v5635_v28 = vrot.slane %v4548_v50, 5 }
 0x116   : > { %v507_v48 = vmax.f32 %v477_v1, 0.0  ;;  %v4748_v47 = vor.u32 %v999_v52, %v996_v41  ;;  %v504_v19 = vmax.f32 %v466_v29, 0.0  ;;  %v1927_v5 = vshll.u32 %v4548_v50, 16 }
 0x117   : > { %v505_v44 = vmax.f32 %v469_v7, 0.0  ;;  %v991_v42 = vor.u32 %v990_v24, %v987_v49  ;;  %v4755_v2 = vrot.slane %v1917_v3, 7  ;;  %v4757_v14 = vrot.slane %v1924_v4, 7 }
 0x118   : > { %v517_v43 = vpack.c.bf16 %v507_v48, %v506_v20  ;;  %v4759_v23 = vrot.slane %v1940_v9, 7  ;;  %v5749_v29 = vor.u32 %v4604_v21, %v4600_v31  ;;  %v1325_v48 = vld [vmem:[#allocation2] sm:$0xf8]  ;;  %vm4769_vm5 = vcmp.ne.s16.totalorder %v1416_v54, 0 }
 0x119   : > { %v516_v1 = vpack.c.bf16 %v505_v44, %v504_v19  ;;  %v3574_v41 = vpop.f32.mrb[12].mxu0  ;;  %v1001_v7 = vsel %vm975_vm3, %v991_v42, %v4748_v47  ;;  %v4767_v49 = vld [vmem:[#allocation2 + $0x20] sm:$0xff]  ;;  %v4783_v19 = vsel %vm5648_vm12, %v1416_v54, %v5635_v28  ;;  %v1439_v54 = vsel %vm4769_vm5, %v1325_v48, 0  ;;  %vm4811_vm5 = vmand %vm527_vm9, %vm528_vm15 }
 0x11a   : > { %v992_v52 = vsel %vm975_vm3, %v5749_v29, %v991_v42  ;;  %525 = vst.msk [vmem:[#allocation2 + $0x30] sm:$0xff] %vm5752_vm2, %v517_v43  ;;  %v490_v44 = vadd.f32 %v3574_v41, %v4620_v56  ;;  %v481_v9 = vpop.f32.mrb[13].mxu0  ;;  %v4776_v31 = vld [vmem:[#allocation2 + $0x18] sm:$0xff]  ;;  %v1012_v21 = vshrl.u32 %v4767_v49, 16  ;;  %v1015_v3 = vshll.u32 %v4767_v49, 16  ;;  %5753 = vst [vmem:[#allocation15_spill] sm:$0xff] %v4783_v19 }
 0x11b   : > { %3578 = vmatprep.mubr.msk.bf16.mxu0 %vm5744_vm1, %v992_v52  ;;  %524 = vst.msk [vmem:[#allocation2 + $0x28] sm:$0xff] %vm5754_vm7, %v516_v1  ;;  %v482_v4 = vadd.f32 %v4620_v56, %v481_v9  ;;  %v3575_v24 = vpop.f32.mrb[14].mxu0  ;;  %v1003_v42 = vshrl.u32 %v4776_v31, 16  ;;  %v1006_v43 = vshll.u32 %v4776_v31, 16  ;;  %v1948_v41 = vshrl.u32 %v4593_v12, 16  ;;  %vm5761_vm15 = vmmov %vm5755_vm4 }
 0x11c   : > { %3579 = vmatmul.mubr.msk.bf16.vlgmr.msra.gmra.mrb[16].mxu0 %vm5755_vm4, %v1001_v7  ;;  %v493_v29 = vadd.f32 %v3575_v24, %v4620_v56  ;;  %v484_v52 = vpop.f32.mrb[15].mxu0  ;;  %v1014_v36 = vrot.slane %v1012_v21, 2  ;;  %v1017_v27 = vrot.slane %v1015_v3, 3  ;;  %vm1704_vm2 = vsmask.f32 256 }
 0x11d   : > { %3595 = vmatpush3.bf16.msra.mxu0 %v4112_v11  ;;  %v485_v1 = vadd.f32 %v4620_v56, %v484_v52  ;;  %v1005_v7 = vrot.slane %v1003_v42, 2  ;;  %v1008_v9 = vrot.slane %v1006_v43, 3  ;;  %v4799_v28 = vsel %vm1684_vm0, %v4733_v15, 0  ;;  %v530_v20 = vld [vmem:[#allocation2 + $0x40] sm:$0x1f] }
 0x11e   : > { %vm1685_vm1 = vcmp.ne.s16.totalorder %v4712_v62, 0  ;;  %3612 = vmatprep.subr.bf16.mxu0 %v4033_v25  ;;  %v510_v21 = vmax.f32 %v490_v44, 0.0  ;;  %v511_v3 = vmax.f32 %v493_v29, 0.0  ;;  %v1018_v24 = vor.u32 %v1017_v27, %v1014_v36 }
 0x11f   : > { %vm1686_vm7 = vcmp.ne.s16.totalorder %v4727_v53, 0  ;;  %v5756_v11 = vshll.u32 %v4535_v45, 16  ;;  %v508_v48 = vmax.f32 %v482_v4, 0.0  ;;  %v509_v42 = vmax.f32 %v485_v1, 0.0 }
 0x120   : > { %v1009_v25 = vor.u32 %v1008_v9, %v1005_v7  ;;  %v1929_v44 = vor.u32 %v1927_v5, %v4757_v14  ;;  %v519_v27 = vpack.c.bf16 %v511_v3, %v510_v21  ;;  %vm1438_vm0 = vcmp.ne.s16.totalorder %v4652_v37, 0 }
 0x121   : > { %v4807_v56 = vor.u32 %v5756_v11, %v4755_v2  ;;  %v1710_v36 = vshrl.u32 %v4799_v28, 16  ;;  %v4818_v43 = vrot.slane %v1439_v54, 3  ;;  %v1932_v4 = vshrl.u32 %v4550_v46, 16  ;;  %v4829_v5 = vld [vmem:[#allocation2 + $0x30] sm:$0xff] }
 0x122   : > { %v518_v29 = vpack.c.bf16 %v509_v42, %v508_v48  ;;  %v1010_v52 = vsel %vm975_vm3, %v4748_v47, %v1009_v25  ;;  %v1019_v11 = vsel %vm975_vm3, %v1009_v25, %v1018_v24  ;;  %v4827_v1 = vsel %vm1435_vm14, %v4767_v49, 0  ;;  %v4835_v7 = vld [vmem:[#allocation2 + $0x28] sm:$0xff]  ;;  %vm5762_vm14 = vmmov %vm5755_vm4 }
 0x123   : > { %5759 = vst [vmem:[#allocation16_spill] sm:$0xff] %v4818_v43  ;;  %5760 = vst [vmem:[#allocation17_spill] sm:$0xff] %v4827_v1  ;;  %vm955_vm9 = vcmp.ne.s16.totalorder %v4647_v60, 0  ;;  %v531_v54 = vsel %vm4811_vm5, %v519_v27, %v530_v20  ;;  %3582 = vmatprep.mubr.msk.bf16.mxu0 %vm5761_vm15, %v1010_v52  ;;  %v4840_v47 = vsel %vm1437_vm8, %v4829_v5, 0  ;;  %v1030_v63 = vshrl.u32 %v4829_v5, 16 }
 0x124   : > { %v1033_v9 = vshll.u32 %v4829_v5, 16  ;;  %532 = vst [vmem:[#allocation2 + $0x40] sm:$0x1f] %v531_v54  ;;  %526 = vst.msk [vmem:[#allocation2 + $0x38] sm:$0xff] %vm5762_vm14, %v518_v29  ;;  %3583 = vmatmul.mubr.msk.bf16.gmra.mrb[20].mxu0 %vm5755_vm4, %v1019_v11  ;;  %v1444_v21 = vsel %vm1436_vm13, %v4835_v7, 0  ;;  %v1470_v3 = vrot.slane %v4840_v47, 3 }
 0x125   : > { %v1021_v48 = vshrl.u32 %v4835_v7, 16  ;;  %v1024_v59 = vshll.u32 %v4835_v7, 16  ;;  %v5636_v0 = vrot.slane %v4827_v1, 3  ;;  %v1468_v20 = vrot.slane %v1444_v21, 3  ;;  %vm5765_vm14 = vmmov %vm5755_vm4 }
 0x126   : > { %v1032_v42 = vrot.slane %v1030_v63, 2  ;;  %v1035_v25 = vrot.slane %v1033_v9, 3  ;;  %vm1687_vm8 = vcmp.ne.s16.totalorder %v4687_v61, 0  ;;  %v1935_v52 = vshll.u32 %v4550_v46, 16  ;;  %v4865_v63 = vld [vmem:[%s5614_s5 + $0x20] sm:$0xff]  }
 0x127   : > { %v1023_v27 = vrot.slane %v1021_v48, 2  ;;  %v1026_v29 = vrot.slane %v1024_v59, 3  ;;  %vm5763_vm13 = vcmask 1044480   ;;  %vm1688_vm15 = vcmp.ne.s16.totalorder %v4694_v51, 0 }
 0x128   : > { %v1469_v11 = vsel %vm5763_vm13, %v5636_v0, %v1468_v20  ;;  %vm5764_vm5 = vmmov %vm5763_vm13  ;;  %v4860_v47 = vor.u32 %v1035_v25, %v1032_v42  ;;  %v1956_v9 = vshrl.u32 %v4602_v34, 16  ;;  %vm956_vm4 = vcmp.ne.s16.totalorder %v4717_v17, 0 }
 0x129   : > { %v1471_v54 = vsel %vm5764_vm5, %v1468_v20, %v1470_v3  ;;  %3622 = vmatprep.mubr.msk.bf16.mxu1 %vm5765_vm14, %v1469_v11  ;;  %v1027_v21 = vor.u32 %v1026_v29, %v1023_v27  ;;  %v4873_v48 = vsel %vm1704_vm2, %v4755_v2, %v1929_v44  ;;  %v5766_v59 = vshll.u32 %v4596_v22, 16  ;;  %vm5767_vm13 = vmmov %vm5765_vm14  ;;  %v3919_v29 = vld [vmem:[%s5614_s5 + $0x18] sm:$0xff]  }
 0x12a   : > { %v4882_v42 = vrot.slane %v1948_v41, 7  ;;  %3623 = vmatmul.mubr.msk.bf16.vlgmr.msra.gmra.mrb[0].mxu1 %vm5767_vm13, %v1471_v54  ;;  %v4885_v25 = vrot.slane %v1710_v36, 7  ;;  %v4890_v27 = vsel %vm1685_vm1, %v4724_v30, 0  ;;  %v4892_v2 = vrot.slane %v1932_v4, 7  ;;  %vm5768_vm14 = vmmov %vm5767_vm13 }
 0x12b   : > { %v4878_v20 = vor.u32 %v5766_v59, %v4759_v23  ;;  %v1951_v44 = vshll.u32 %v4593_v12, 16  ;;  %3631 = vmatpush3.bf16.msra.mxu1 %v3919_v29  ;;  %v1028_v41 = vsel %vm975_vm3, %v1018_v24, %v1027_v21  ;;  %v1037_v36 = vsel %vm975_vm3, %v1027_v21, %v4860_v47  ;;  %v4908_v11 = vld [vmem:[#allocation2 + $0x38] sm:$0xff] }
 0x12c   : > { %v1695_v62 = vsel %vm1686_vm7, %v4776_v31, 0  ;;  %vm957_vm1 = vcmp.ne.s16.totalorder %v4722_v35, 0  ;;  %vm1689_vm5 = vcmp.ne.s16.totalorder %v4697_v16, 0  ;;  %v1959_v4 = vshll.u32 %v4602_v34, 16  ;;  %3586 = vmatprep.mubr.msk.bf16.mxu0 %vm5768_vm14, %v1028_v41  ;;  %v4911_v24 = vld [vmem:[#allocation2 + $0x38] sm:$0x7f]  ;;  %3648 = vmatprep.subr.bf16.mxu1 %v4865_v63  ;;  %vm5771_vm7 = vmmov %vm5768_vm14 }
 0x12d   : > { %v1713_v54 = vshll.u32 %v4799_v28, 16  ;;  %vm1690_vm13 = vcmp.ne.s16.totalorder %v4706_v38, 0  ;;  %v5769_v53 = vrot.slane %v4548_v50, 5  ;;  %v4922_v59 = vrot.slane %v1956_v9, 7  ;;  %3587 = vmatmul.mubr.msk.bf16.gmra.mrb[24].mxu0 %vm5771_vm7, %v1037_v36  ;;  %vm5773_vm14 = vmmov %vm5771_vm7  ;;  %v5016_v16 = vld [vmem:[%s5614_s5 + $0x28] sm:$0xff]  }
 0x12e   : > { %v1964_v29 = vshrl.u32 %v4555_v55, 16  ;;  %v1446_v28 = vsel %vm1438_vm0, %v4908_v11, 0  ;;  %v1039_v41 = vshrl.u32 %v4911_v24, 16  ;;  %v1042_v0 = vshll.u32 %v4911_v24, 16 }
 0x12f   : > { %v4920_v21 = vsel %vm5648_vm12, %v5769_v53, %v5638_v18  ;;  %v1718_v1 = vshrl.u32 %v4890_v27, 16  ;;  %v1472_v50 = vrot.slane %v1446_v28, 3  ;;  %v1715_v53 = vor.u32 %v1713_v54, %v4885_v25 }
 0x130   : > { %5770 = vst [vmem:[#allocation18_spill] sm:$0xff] %v4920_v21  ;;  %v4936_v9 = vsel %vm955_vm9, %v4733_v15, 0  ;;  %v1726_v18 = vshrl.u32 %v1695_v62, 16  ;;  %v1041_v36 = vrot.slane %v1039_v41, 2  ;;  %v1044_v43 = vrot.slane %v1042_v0, 3 }
 0x131   : > { %v1937_v37 = vor.u32 %v1935_v52, %v4892_v2  ;;  %v1972_v45 = vshrl.u32 %v4559_v58, 16  ;;  %vm5772_vm0 = vcmask 1044480   ;;  %v1953_v34 = vor.u32 %v1951_v44, %v4882_v42 }
 0x132   : > { %v1473_v21 = vsel %vm5772_vm0, %v1470_v3, %v1472_v50  ;;  %v4942_v19 = vrot.slane %v1964_v29, 7  ;;  %v1967_v54 = vshll.u32 %v4555_v55, 16  ;;  %v1045_v60 = vor.u32 %v1044_v43, %v1041_v36  ;;  %vm5774_vm0 = vmmov %vm5773_vm14 }
 0x133   : > { %3626 = vmatprep.mubr.msk.bf16.mxu1 %vm5773_vm14, %v1473_v21  ;;  %v1184_v28 = vrot.slane %v4936_v9, 2  ;;  %v1720_v12 = vrot.slane %v1718_v1, 7  ;;  %v1696_v0 = vsel %vm1687_vm8, %v4767_v49, 0  ;;  %vm958_vm9 = vcmp.ne.s16.totalorder %v4674_v8, 0  ;;  %vm5775_vm14 = vmmov %vm5774_vm0 }
 0x134   : > { %vm959_vm7 = vcmp.ne.s16.totalorder %v4690_v26, 0  ;;  %3627 = vmatmul.mubr.msk.bf16.gmra.mrb[4].mxu1 %vm5774_vm0, %v1472_v50  ;;  %v1716_v3 = vsel %vm1704_vm2, %v4654_v39, %v1715_v53  ;;  %v4955_v52 = vrot.slane %v1726_v18, 7  ;;  %v1961_v43 = vor.u32 %v1959_v4, %v4922_v59 }
 0x135   : > { %v1975_v44 = vshll.u32 %v4559_v58, 16  ;;  %3632 = vmatprep.mubr.msk.bf16.mxu1 %vm5775_vm14, %v1716_v3  ;;  %v1046_v61 = vsel %vm975_vm3, %v4860_v47, %v1045_v60  ;;  %v1721_v1 = vshll.u32 %v4890_v27, 16  ;;  %v4966_v21 = vsel %vm1688_vm15, %v4835_v7, 0  ;;  %vm5776_vm3 = vmmov %vm5774_vm0 }
 0x136   : > { %vm1691_vm8 = vcmp.ne.s16.totalorder %v4708_v32, 0  ;;  %v1974_v39 = vrot.slane %v1972_v45, 7  ;;  %3590 = vmatprep.mubr.msk.bf16.mxu0 %vm5774_vm0, %v1046_v61  ;;  %v1729_v18 = vshll.u32 %v1695_v62, 16  ;;  %v964_v4 = vsel %vm956_vm4, %v4724_v30, 0  ;;  %vm5779_vm4 = vmmov %vm5774_vm0 }
 0x137   : > { %v1734_v29 = vshrl.u32 %v1696_v0, 16  ;;  %v1969_v47 = vor.u32 %v1967_v54, %v4942_v19  ;;  %3591 = vmatmul.mubr.msk.bf16.gmra.mrb[28].mxu0 %vm5776_vm3, %v1045_v60  ;;  %v1185_v51 = vsel %vm1182_vm11, %v4656_v40, %v1184_v28  ;;  %v1723_v27 = vor.u32 %v1721_v1, %v1720_v12 }
 0x138   : > { %vm960_vm15 = vcmp.ne.s16.totalorder %v4700_v13, 0  ;;  %v4981_v45 = vsel %vm1704_vm2, %v4892_v2, %v4878_v20  ;;  %v5777_v62 = vrot.slane %v4596_v22, 5  ;;  %v5778_v17 = vrot.slane %v4550_v46, 5  ;;  %3596 = vmatprep.mubr.msk.bf16.mxu0 %vm5779_vm4, %v1185_v51  ;;  %vm5786_vm4 = vmmov %vm5776_vm3  ;;  %v5790_v51 = vld [vmem:[#allocation5_spill] sm:$0xff] }
 0x139   : > { %v1731_v50 = vor.u32 %v1729_v18, %v4955_v52  ;;  %v4995_v40 = vsel %vm957_vm1, %v4776_v31, 0  ;;  %v1742_v53 = vshrl.u32 %v4966_v21, 16  ;;  %v1698_v20 = vsel %vm1689_vm5, %v4829_v5, 0  ;;  %v5058_v18 = vld [vmem:[%s5612_s3] sm:$0xff]  }
 0x13a   : > { %v4988_v41 = vsel %vm5648_vm12, %v5778_v17, %v5777_v62  ;;  %vm961_vm14 = vcmp.ne.s16.totalorder %v4703_v57, 0  ;;  %vm1979_vm0 = vcmp.ne.s16.totalorder %v4807_v56, 0  ;;  %v1186_v2 = vrot.slane %v964_v4, 2  ;;  %v3920_v17 = vld [vmem:[%s5614_s5 + $0x10] sm:$0xff]  }
 0x13b   : > { %v5006_v9 = vsel %vm1690_vm13, %v4908_v11, 0  ;;  %v5010_v35 = vsel %vm1704_vm2, %v4757_v14, %v1937_v37  ;;  %v1977_v36 = vor.u32 %v1975_v44, %v1974_v39  ;;  %v1736_v54 = vrot.slane %v1734_v29, 7  ;;  %v1618_v39 = vld [vmem:[#allocation2 + $0x40] sm:$0xf] }
 0x13c   : > { %vm1980_vm1 = vcmp.ne.s16.totalorder %v4873_v48, 0  ;;  %v5020_v60 = vsel %vm1704_vm2, %v4759_v23, %v1953_v34  ;;  %v5024_v38 = vsel %vm1704_vm2, %v4882_v42, %v1961_v43  ;;  %v5028_v14 = vsel %vm1704_vm2, %v4922_v59, %v1969_v47 }
 0x13d   : > { %v1724_v37 = vsel %vm1704_vm2, %v4885_v25, %v1723_v27  ;;  %v1188_v3 = vrot.slane %v4995_v40, 2  ;;  %v1750_v44 = vshrl.u32 %v1698_v20, 16  ;;  %v5780_v61 = vrot.slane %v4441_v6, 3  ;;  %v5050_v6 = vld [vmem:[#allocation2 + $0x48] sm:$0x3]  ;;  %v5793_v40 = vld [vmem:[#allocation8_spill] sm:$0xff] }
 0x13e   : > { %v5783_v34 = vrot.slane %v4491_v33, 3  ;;  %3633 = vmatmul.mubr.msk.bf16.vlgmr.msra.gmra.mrb[8].mxu1 %vm5776_vm3, %v1724_v37  ;;  %v1732_v42 = vsel %vm1704_vm2, %v1720_v12, %v1731_v50  ;;  %v1737_v25 = vshll.u32 %v1696_v0, 16  ;;  %v5047_v59 = vrot.slane %v1742_v53, 7  ;;  %v5787_v0 = vld [vmem:[#allocation3_spill] sm:$0xff]  ;;  %v5794_v37 = vld [vmem:[#allocation9_spill] sm:$0xff] }
 0x13f   : > { %vm5035_vm5 = vcmp.ne.s16.totalorder %v5780_v61, 0  ;;  %v1758_v43 = vshrl.u32 %v5006_v9, 16  ;;  %3649 = vmatpush3.bf16.msra.mxu1 %v4865_v63  ;;  %3636 = vmatprep.mubr.msk.bf16.mxu1 %vm5786_vm4, %v1732_v42  ;;  %v1187_v33 = vsel %vm1182_vm11, %v1184_v28, %v1186_v2  ;;  %v5062_v12 = vsel %vm1704_vm2, %v4942_v19, %v1977_v36  ;;  %v5788_v19 = vld [vmem:[#allocation4_spill] sm:$0xff]  ;;  %v5792_v50 = vld [vmem:[#allocation7_spill] sm:$0xff] }
 0x140   : > { %vm5041_vm13 = vcmp.ne.s16.totalorder %v5783_v34, 0  ;;  %vm2229_vm3 = vcmp.ne.s16.totalorder %v4496_v10, 0  ;;  %v1739_v4 = vor.u32 %v1737_v25, %v1736_v54  ;;  %v1745_v63 = vshll.u32 %v4966_v21, 16  ;;  %3666 = vmatprep.subr.bf16.mxu1 %v5016_v16 }
 0x141   : > { %v966_v28 = vsel %vm958_vm9, %v4767_v49, 0  ;;  %v5073_v29 = vsel %vm959_vm7, %v4835_v7, 0  ;;  %vm1981_vm4 = vcmp.ne.s16.totalorder %v5010_v35, 0  ;;  %vm2231_vm6 = vcmp.ne.s16.totalorder %v5788_v19, 0 }
 0x142   : > { %vm5789_vm12 = vcmask 130048   ;;  %v1189_v47 = vsel %vm1182_vm11, %v1186_v2, %v1188_v3  ;;  %v1752_v21 = vrot.slane %v1750_v44, 7  ;;  %vm2232_vm10 = vcmp.ne.s16.totalorder %v5790_v51, 0 }
 0x143   : > { %3597 = vmatmul.mubr.msk.bf16.vlgmr.msra.gmra.mrb[16].mxu0 %vm5789_vm12, %v1187_v33  ;;  %v2245_v8 = vsel %vm5041_vm13, %v5050_v6, 0  ;;  %vm5791_vm9 = vmmov %vm5789_vm12  ;;  %v1747_v26 = vor.u32 %v1745_v63, %v5047_v59  ;;  %v5086_v27 = vrot.slane %v1758_v43, 7  ;;  %v5090_v62 = vsel %vm1691_vm8, %v1618_v39, 0  ;;  %v5126_v43 = vld [vmem:[#allocation2 + $0x10] sm:$0xff]  ;;  %v5142_v63 = vld [vmem:[#allocation2 + $0x18] sm:$0xff] }
 0x144   : > { %3600 = vmatprep.mubr.msk.bf16.mxu0 %vm5791_vm9, %v1189_v47  ;;  %3613 = vmatpush3.bf16.msra.mxu0 %v3920_v17  ;;  %vm2233_vm12 = vcmp.ne.s16.totalorder %v5792_v50, 0  ;;  %vm2234_vm7 = vcmp.ne.s16.totalorder %v5793_v40, 0  ;;  %v1190_v53 = vrot.slane %v966_v28, 2  ;;  %v5649_v2 = vrot.slane %v5073_v29, 2  ;;  %vm5795_vm8 = vmmov %vm5791_vm9  ;;  %v5799_v28 = vld [vmem:[#allocation14_spill] sm:$0xff]  ;;  %v5151_v17 = vld [vmem:[#allocation2 + $0x20] sm:$0xff] }
 0x145   : > { %v1753_v36 = vshll.u32 %v1698_v20, 16  ;;  %3720 = vmatprep.subr.bf16.mxu0 %v5058_v18  ;;  %vm2235_vm13 = vcmp.ne.s16.totalorder %v5794_v37, 0  ;;  %v1740_v32 = vsel %vm1704_vm2, %v4955_v52, %v1739_v4  ;;  %v1761_v44 = vshll.u32 %v5006_v9, 16  ;;  %v5121_v9 = vld [vmem:[#allocation2 + $0x8] sm:$0xe0]  ;;  %v5798_v4 = vld [vmem:[#allocation15_spill] sm:$0xff] }
 0x146   : > { %v5106_v61 = vsel %vm960_vm15, %v4829_v5, 0  ;;  %v5108_v34 = vrot.slane %v2245_v8, 5  ;;  %v5113_v20 = vsel %vm961_vm14, %v4911_v24, 0  ;;  %v1766_v42 = vshrl.u32 %v5090_v62, 16  ;;  %3637 = vmatmul.mubr.msk.bf16.gmra.mrb[12].mxu1 %vm5795_vm8, %v1740_v32  ;;  %v5796_v24 = vld [vmem:[#allocation13_spill] sm:$0xff]  ;;  %vm5797_vm15 = vmmov %vm5795_vm8  ;;  %v5810_v37 = vld [vmem:[#allocation6_spill] sm:$0xff] }
 0x147   : > { %v1755_v23 = vor.u32 %v1753_v36, %v1752_v21  ;;  %v5119_v52 = vsel %vm1979_vm0, %v4733_v15, 0  ;;  %v1748_v13 = vsel %vm1704_vm2, %v1736_v54, %v1747_v26  ;;  %v1763_v25 = vor.u32 %v1761_v44, %v5086_v27  ;;  %v5801_v44 = vld [vmem:[#allocation18_spill] sm:$0xff] }
 0x148   : > { %v2652_v57 = vrot.slane %v4596_v22, 2  ;;  %3640 = vmatprep.mubr.msk.bf16.mxu1 %vm5797_vm15, %v1748_v13  ;;  %v1191_v56 = vsel %vm1182_vm11, %v1188_v3, %v1190_v53  ;;  %v1193_v39 = vsel %vm1182_vm11, %v1190_v53, %v5649_v2  ;;  %v5138_v54 = vsel %vm1980_vm1, %v4724_v30, 0  ;;  %v5153_v53 = vld [vmem:[#allocation2 + $0x28] sm:$0xff]  ;;  %vm5800_vm1 = vmmov %vm5795_vm8 }
 0x149   : > { %vm1432_vm14 = vcmp.ne.s16.totalorder %v5798_v4, 0  ;;  %vm1982_vm0 = vcmp.ne.s16.totalorder %v4981_v45, 0  ;;  %v1194_v8 = vrot.slane %v5106_v61, 2  ;;  %v2001_v26 = vshll.u32 %v5119_v52, 16  ;;  %vm5802_vm8 = vmmov %vm5800_vm1 }
 0x14a   : > { %v2237_v48 = vsel %vm5035_vm5, %v5121_v9, 0  ;;  %v1756_v36 = vsel %vm1704_vm2, %v5047_v59, %v1755_v23  ;;  %v1768_v32 = vrot.slane %v1766_v42, 7  ;;  %vm1433_vm9 = vcmp.ne.s16.totalorder %v5801_v44, 0  ;;  %v5168_v59 = vld [vmem:[#allocation2 + $0x30] sm:$0xff]  ;;  %v5170_v23 = vld [vmem:[#allocation2 + $0x38] sm:$0xff]  ;;  %v5172_v42 = vld [vmem:[#allocation2 + $0x40] sm:$0xff] }
 0x14b   : > { %3601 = vmatmul.mubr.msk.bf16.gmra.mrb[20].mxu0 %vm5800_vm1, %v1191_v56  ;;  %v2238_v61 = vsel %vm2229_vm3, %v5126_v43, 0  ;;  %v2258_v13 = vrot.slane %v2237_v48, 5  ;;  %v1764_v1 = vsel %vm1704_vm2, %v1752_v21, %v1763_v25  ;;  %v2006_v47 = vshll.u32 %v5138_v54, 16 }
 0x14c   : > { %3604 = vmatprep.mubr.msk.bf16.mxu0 %vm5802_vm8, %v1193_v39  ;;  %v2259_v33 = vrot.slane %v2238_v61, 5  ;;  %vm5803_vm5 = vcmp.ne.s16.totalorder %v5787_v0, 0  ;;  %v1989_v10 = vsel %vm1981_vm4, %v4776_v31, 0  ;;  %v2240_v21 = vsel %vm2231_vm6, %v5151_v17, 0  ;;  %vm5806_vm6 = vmmov %vm5802_vm8 }
 0x14d   : > { %v2239_v56 = vsel %vm5803_vm5, %v5142_v63, 0  ;;  %v2241_v0 = vsel %vm2232_vm10, %v5153_v53, 0  ;;  %v2003_v25 = vrot.slane %v2001_v26, 1  ;;  %vm1434_vm3 = vcmp.ne.s16.totalorder %v4988_v41, 0  ;;  %vm5809_vm5 = vmmov %vm5806_vm6 }
 0x14e   : > { %v2261_v39 = vrot.slane %v2239_v56, 5  ;;  %vm1983_vm15 = vcmp.ne.s16.totalorder %v5020_v60, 0  ;;  %vm5804_vm1 = vcmask 1042432   ;;  %v2263_v61 = vrot.slane %v2240_v21, 5  ;;  %3641 = vmatmul.mubr.msk.bf16.gmra.mrb[0].mxu1 %vm5806_vm6, %v1756_v36  ;;  %vm5818_vm6 = vmmov %vm5809_vm5 }
 0x14f   : > { %v5186_v48 = vsel %vm5804_vm1, %v2258_v13, %v2259_v33  ;;  %v2265_v35 = vrot.slane %v2241_v0, 5  ;;  %vm5805_vm4 = vmmov %vm5804_vm1  ;;  %v2242_v19 = vsel %vm2233_vm12, %v5168_v59, 0  ;;  %v2243_v51 = vsel %vm2234_vm7, %v5170_v23, 0  ;;  %3644 = vmatprep.mubr.msk.bf16.mxu1 %vm5809_vm5, %v1764_v1 }
 0x150   : > { %v5189_v56 = vsel %vm5805_vm4, %v2259_v33, %v2261_v39  ;;  %v2244_v26 = vsel %vm2235_vm13, %v5172_v42, 0  ;;  %vm5807_vm10 = vmmov %vm5804_vm1  ;;  %v2267_v21 = vrot.slane %v2242_v19, 5  ;;  %v2269_v0 = vrot.slane %v2243_v51, 5 }
 0x151   : > { %v5202_v13 = vsel %vm5807_vm10, %v2261_v39, %v2263_v61  ;;  %vm5808_vm8 = vmmov %vm5804_vm1  ;;  %v1769_v50 = vshll.u32 %v5090_v62, 16  ;;  %v2014_v40 = vshll.u32 %v1989_v10, 16  ;;  %vm1984_vm12 = vcmp.ne.s16.totalorder %v5024_v38, 0 }
 0x152   : > { %v5205_v33 = vsel %vm5808_vm8, %v2263_v61, %v2265_v35  ;;  %v2271_v3 = vrot.slane %v2244_v26, 5  ;;  %v5811_v2 = vrot.slane %v5810_v37, 2  ;;  %v5814_v39 = vrot.slane %v4550_v46, 2  ;;  %vm5816_vm13 = vmmov %vm5804_vm1  ;;  %v5817_v26 = vld [vmem:[#allocation10_spill] sm:$0xff] }
 0x153   : > { %v5815_v1 = vrot.slane %v5073_v29, 2  ;;  %v1999_v19 = vshrl.u32 %v5119_v52, 16  ;;  %v5228_v51 = vsel %vm5816_vm13, %v2265_v35, %v2267_v21  ;;  %vm2663_vm4 = vcmp.ne.s16.totalorder %v5817_v26, 0  ;;  %vm5820_vm10 = vmmov %vm5804_vm1 }
 0x154   : > { %vm5212_vm7 = vcmp.ne.s16.totalorder %v5811_v2, 0  ;;  %v5221_v61 = vsel %vm1182_vm11, %v5814_v39, %v2652_v57  ;;  %v5231_v2 = vsel %vm5804_vm1, %v2267_v21, %v2269_v0  ;;  %v5819_v46 = vrot.slane %v5113_v20, 2  ;;  %vm5821_vm8 = vmmov %vm5804_vm1 }
 0x155   : > { %v1195_v62 = vsel %vm1182_vm11, %v5815_v1, %v1194_v8  ;;  %v1771_v39 = vor.u32 %v1769_v50, %v1768_v32  ;;  %v5239_v29 = vsel %vm5820_vm10, %v2269_v0, %v2271_v3  ;;  %v5243_v52 = vsel %vm5821_vm8, %v2271_v3, %v5108_v34  ;;  %v5822_v0 = vld [vmem:[#allocation11_spill] sm:$0xff]  ;;  %v2646_v3 = vld [vmem:[#allocation2 + $0x48] sm:$0x7] }
 0x156   : > { %3605 = vmatmul.mubr.msk.bf16.gmra.mrb[24].mxu0 %vm5818_vm6, %v1195_v62  ;;  %v1197_v37 = vsel %vm1182_vm11, %v1194_v8, %v5819_v46  ;;  %v2004_v35 = vor.u32 %v2003_v25, %v1999_v19  ;;  %v2008_v21 = vrot.slane %v2006_v47, 1  ;;  %v1440_v1 = vsel %vm1432_vm14, %v4733_v15, 0 }
 0x157   : > { %3608 = vmatprep.mubr.msk.bf16.mxu0 %vm5809_vm5, %v1197_v37  ;;  %v5252_v8 = vsel %vm1982_vm0, %v4767_v49, 0  ;;  %v2016_v32 = vrot.slane %v2014_v40, 1  ;;  %vm1985_vm13 = vcmp.ne.s16.totalorder %v5028_v14, 0  ;;  %vm2664_vm1 = vcmp.ne.s16.totalorder %v5822_v0, 0  ;;  %vm5831_vm0 = vmmov %vm5809_vm5 }
 0x158   : > { %v5823_v34 = vrot.slane %v5796_v24, 2  ;;  %v5824_v4 = vrot.slane %v4559_v58, 2  ;;  %v2010_v45 = vshrl.u32 %v5138_v54, 16  ;;  %v5271_v50 = vsel %vm1433_vm9, %v4724_v30, 0  ;;  %vm5833_vm10 = vmmov %vm5831_vm0 }
 0x159   : > { %v5827_v40 = vrot.slane %v5799_v28, 2  ;;  %v5829_v62 = vrot.slane %v4555_v55, 2  ;;  %v1772_v54 = vsel %vm1704_vm2, %v5086_v27, %v1771_v39  ;;  %v1460_v46 = vrot.slane %v1440_v1, 3  ;;  %v2645_v39 = vld [vmem:[#allocation2 + $0x8] sm:$0xc0]  ;;  %v5836_v1 = vld [vmem:[#allocation16_spill] sm:$0xff] }
 0x15a   : > { %v2655_v47 = vsel %vm1182_vm11, %v2652_v57, %v5823_v34  ;;  %vm5263_vm14 = vcmp.ne.s16.totalorder %v5824_v4, 0  ;;  %v5828_v22 = vmov %v5823_v34  ;;  %v2018_v37 = vshrl.u32 %v1989_v10, 16  ;;  %3645 = vmatmul.mubr.msk.bf16.gmra.mrb[4].mxu1 %vm5831_vm0, %v1772_v54 }
 0x15b   : > { %v2657_v57 = vsel %vm1182_vm11, %v5828_v22, %v5827_v40  ;;  %v5830_v58 = vmov %v5827_v40  ;;  %v2022_v44 = vshll.u32 %v5252_v8, 16  ;;  %vm5832_vm9 = vsmask.f32 7424 }
 0x15c   : > { %v2659_v19 = vsel %vm1182_vm11, %v5830_v58, %v5829_v62  ;;  %v2009_v34 = vsel %vm5832_vm9, %v2004_v35, %v2008_v21  ;;  %v2012_v24 = vor.u32 %v2010_v45, %v2008_v21  ;;  %vm2665_vm6 = vcmp.ne.s16.totalorder %v5221_v61, 0  ;;  %v5834_v35 = vld [vmem:[#allocation12_spill] sm:$0xff] }
 0x15d   : > { %v2679_v55 = vsel %vm5263_vm14, %v2646_v3, 0  ;;  %3650 = vmatprep.mubr.msk.bf16.mxu1 %vm5833_vm10, %v2009_v34  ;;  %v2020_v28 = vor.u32 %v2018_v37, %v2016_v32  ;;  %v1462_v4 = vrot.slane %v5271_v50, 3  ;;  %v5296_v27 = vsel %vm1434_vm3, %v4776_v31, 0  ;;  %vm5839_vm3 = vmmov %vm5831_vm0  ;;  %v5323_v37 = vld [vmem:[%s5614_s5 + $0x30] sm:$0xff]  }
 0x15e   : > { %v1991_v10 = vsel %vm1983_vm15, %v4835_v7, 0  ;;  %vm2666_vm11 = vcmp.ne.s16.totalorder %v2655_v47, 0  ;;  %vm2667_vm8 = vcmp.ne.s16.totalorder %v2657_v57, 0  ;;  %vm2668_vm5 = vcmp.ne.s16.totalorder %v2659_v19, 0 }
 0x15f   : > { %vm2669_vm14 = vcmp.ne.s16.totalorder %v5834_v35, 0  ;;  %v5835_v21 = vrot.slane %v5113_v20, 2  ;;  %vm5837_vm9 = vcmask 1044480   ;;  %vm5838_vm10 = vsmask.f32 7424 }
 0x160   : > { %v1461_v3 = vsel %vm5837_vm9, %v5836_v1, %v1460_v46  ;;  %v2017_v41 = vsel %vm5838_vm10, %v2012_v24, %v2016_v32  ;;  %v2024_v25 = vrot.slane %v2022_v44, 1  ;;  %v2707_v45 = vrot.slane %v2679_v55, 6  ;;  %vm5840_vm15 = vmmov %vm5838_vm10 }
 0x161   : > { %3609 = vmatmul.mubr.msk.bf16.gmra.mrb[28].mxu0 %vm5831_vm0, %v5835_v21  ;;  %v1464_v60 = vrot.slane %v5296_v27, 3  ;;  %v2030_v50 = vshll.u32 %v1991_v10, 16  ;;  %v1992_v40 = vsel %vm1984_vm12, %v4829_v5, 0  ;;  %v2671_v20 = vsel %vm5212_vm7, %v2645_v39, 0  ;;  %vm5841_vm0 = vmmov %vm5837_vm9 }
 0x162   : > { %3614 = vmatprep.mubr.msk.bf16.mxu0 %vm5839_vm3, %v1461_v3  ;;  %v2025_v22 = vsel %vm5840_vm15, %v2020_v28, %v2024_v25  ;;  %v1463_v62 = vsel %vm5841_vm0, %v1460_v46, %v1462_v4  ;;  %v2672_v32 = vsel %vm2663_vm4, %v5126_v43, 0  ;;  %v2692_v58 = vrot.slane %v2671_v20, 6  ;;  %vm5842_vm12 = vmmov %vm5839_vm3  ;;  %v845_v20 = vld [vmem:[#allocation2 + $0x40] sm:$0x1f] }
 0x163   : > { %v2034_v54 = vshrl.u32 %v1991_v10, 16  ;;  %v2693_v38 = vrot.slane %v2672_v32, 6  ;;  %v2673_v36 = vsel %vm2664_vm1, %v5142_v63, 0  ;;  %v2674_v46 = vsel %vm2665_vm6, %v5151_v17, 0  ;;  %3651 = vmatmul.mubr.msk.bf16.vlgmr.msra.gmra.mrb[8].mxu1 %vm5842_vm12, %v2017_v41  ;;  %vm5844_vm4 = vmmov %vm5839_vm3 }
 0x164   : > { %v2038_v44 = vshll.u32 %v1992_v40, 16  ;;  %v2695_v34 = vrot.slane %v2673_v36, 6  ;;  %v2697_v26 = vrot.slane %v2674_v46, 6  ;;  %v2675_v24 = vsel %vm2666_vm11, %v5153_v53, 0  ;;  %3667 = vmatpush3.bf16.msra.mxu1 %v5016_v16  ;;  %3654 = vmatprep.mubr.msk.bf16.mxu1 %vm5844_vm4, %v2025_v22  ;;  %vm5848_vm11 = vmmov %vm5839_vm3 }
 0x165   : > { %v2032_v55 = vrot.slane %v2030_v50, 1  ;;  %v1993_v28 = vsel %vm1985_vm13, %v4908_v11, 0  ;;  %vm5843_vm7 = vcmask 1041408   ;;  %v2699_v27 = vrot.slane %v2675_v24, 6  ;;  %3684 = vmatprep.subr.bf16.mxu1 %v5323_v37  ;;  %vm5849_vm9 = vmmov %vm5841_vm0 }
 0x166   : > { %v5338_v0 = vsel %vm5843_vm7, %v2692_v58, %v2693_v38  ;;  %vm5845_vm1 = vmmov %vm5843_vm7  ;;  %v2676_v10 = vsel %vm2667_vm8, %v5168_v59, 0  ;;  %v2677_v14 = vsel %vm2668_vm5, %v5170_v23, 0  ;;  %v2678_v1 = vsel %vm2669_vm14, %v5172_v42, 0 }
 0x167   : > { %v5343_v61 = vsel %vm5845_vm1, %v2693_v38, %v2695_v34  ;;  %vm5846_vm6 = vmmov %vm5845_vm1  ;;  %v2701_v16 = vrot.slane %v2676_v10, 6  ;;  %v2703_v21 = vrot.slane %v2677_v14, 6  ;;  %v1465_v3 = vsel %vm5849_vm9, %v1462_v4, %v1464_v60  ;;  %v5858_v38 = vld [vmem:[#allocation17_spill] sm:$0xff] }
 0x168   : > { %v5346_v47 = vsel %vm5846_vm6, %v2695_v34, %v2697_v26  ;;  %vm5847_vm13 = vmmov %vm5845_vm1  ;;  %v2026_v57 = vshrl.u32 %v5252_v8, 16  ;;  %vm1986_vm8 = vcmp.ne.s16.totalorder %v5062_v12, 0  ;;  %v2705_v19 = vrot.slane %v2678_v1, 6 }
 0x169   : > { %v5354_v39 = vsel %vm5847_vm13, %v2697_v26, %v2699_v27  ;;  %3615 = vmatmul.mubr.msk.bf16.vlgmr.msra.gmra.mrb[16].mxu0 %vm5848_vm11, %v1463_v62  ;;  %vm5850_vm5 = vmmov %vm5839_vm3  ;;  %v2036_v41 = vor.u32 %v2034_v54, %v2032_v55  ;;  %v2046_v50 = vshll.u32 %v1993_v28, 16  ;;  %v2040_v8 = vrot.slane %v2038_v44, 1 }
 0x16a   : > { %3618 = vmatprep.mubr.msk.bf16.mxu0 %vm5850_vm5, %v1465_v3  ;;  %3721 = vmatpush3.bf16.msra.mxu0 %v5058_v18  ;;  %vm5851_vm10 = vmmov %vm5845_vm1  ;;  %v2028_v62 = vor.u32 %v2026_v57, %v2024_v25  ;;  %vm5855_vm0 = vsmask.f32 7424  ;;  %v1994_v58 = vsel %vm1986_vm8, %v845_v20, 0  ;;  %v5859_v36 = vrot.slane %v5858_v38, 3 }
 0x16b   : > { %v5366_v22 = vsel %vm5851_vm10, %v2699_v27, %v2701_v16  ;;  %vm5852_vm14 = vmmov %vm5845_vm1  ;;  %v2048_v54 = vrot.slane %v2046_v50, 1  ;;  %v2050_v46 = vshrl.u32 %v1993_v28, 16  ;;  %v2054_v34 = vshll.u32 %v1994_v58, 16 }
 0x16c   : > { %v5369_v35 = vsel %vm5852_vm14, %v2701_v16, %v2703_v21  ;;  %vm5853_vm3 = vmmov %vm5845_vm1  ;;  %v2033_v32 = vsel %vm5855_vm0, %v2028_v62, %v2032_v55  ;;  %v2470_v3 = vshll.u32 %v5168_v59, 16 }
 0x16d   : > { %v5372_v4 = vsel %vm5853_vm3, %v2703_v21, %v2705_v19  ;;  %vm5854_vm15 = vmmov %vm5845_vm1  ;;  %v2052_v44 = vor.u32 %v2050_v46, %v2048_v54  ;;  %v2056_v24 = vrot.slane %v2054_v34, 1  ;;  %v2461_v21 = vshll.u32 %v5153_v53, 16 }
 0x16e   : > { %v5375_v12 = vsel %vm5854_vm15, %v2705_v19, %v2707_v45  ;;  %vm5856_vm12 = vmmov %vm5844_vm4  ;;  %v2042_v45 = vshrl.u32 %v1992_v40, 16 }
 0x16f   : > { %3655 = vmatmul.mubr.msk.bf16.gmra.mrb[12].mxu1 %vm5856_vm12, %v2033_v32  ;;  %vm5857_vm7 = vmmov %vm5855_vm0 }
 0x170   : > { %v2041_v18 = vsel %vm5857_vm7, %v2036_v41, %v2040_v8  ;;  %vm5860_vm1 = vmmov %vm5849_vm9  ;;  %v2044_v26 = vor.u32 %v2042_v45, %v2040_v8  ;;  %v2479_v8 = vshll.u32 %v5170_v23, 16  ;;  %v2497_v45 = vshll.u32 %v5050_v6, 16 }
 0x171   : > { %3658 = vmatprep.mubr.msk.bf16.mxu1 %vm5844_vm4, %v2041_v18  ;;  %v1467_v25 = vsel %vm5860_vm1, %v1464_v60, %v5859_v36  ;;  %vm5861_vm6 = vmmov %vm5844_vm4  ;;  %v2058_v60 = vshrl.u32 %v1994_v58, 16  ;;  %v2488_v58 = vshll.u32 %v5172_v42, 16 }
 0x172   : > { %3619 = vmatmul.mubr.msk.bf16.gmra.mrb[20].mxu0 %vm5861_vm6, %v1467_v25  ;;  %vm5862_vm13 = vmmov %vm5844_vm4  ;;  %v2481_v38 = vrot.slane %v2479_v8, 6 }
 0x173   : > { %3722 = vmatprep.mubr.msk.bf16.mxu0 %vm5862_vm13, %v4733_v15  ;;  %vm5863_vm11 = vmmov %vm5855_vm0  ;;  %v2060_v40 = vor.u32 %v2058_v60, %v2056_v24  ;;  %v2423_v15 = vshrl.u32 %v5121_v9, 16  ;;  %v2490_v46 = vrot.slane %v2488_v58, 6 }
 0x174   : > { %v2049_v55 = vsel %vm5863_vm11, %v2044_v26, %v2048_v54  ;;  %vm5864_vm9 = vmmov %vm5844_vm4 }
 0x175   : > { %vm5865_vm8 = vmmov %vm5855_vm0 }
 0x176   : > { %v2057_v27 = vsel %vm5865_vm8, %v2052_v44, %v2056_v24  ;;  %vm5866_vm5 = vmmov %vm5844_vm4  ;;  %v2499_v24 = vrot.slane %v2497_v45, 6 }
 0x177   : > { %3659 = vmatmul.mubr.msk.bf16.gmra.mrb[0].mxu1 %vm5864_vm9, %v2049_v55  ;;  %vm5867_vm10 = vmmov %vm5844_vm4 }
 0x178   : > { %3662 = vmatprep.mubr.msk.bf16.mxu1 %vm5866_vm5, %v2057_v27  ;;  %vm5868_vm14 = vmmov %vm5844_vm4 }
 0x179   : > { %vm5869_vm3 = vmmov %vm5844_vm4 }
 0x17a   : > { %3723 = vmatmul.mubr.msk.bf16.vlgmr.msra.gmra.mrb[32].mxu0 %vm5867_vm10, %v4724_v30  ;;  %vm5870_vm15 = vmmov %vm5869_vm3  ;;  %v3918_v30 = vld [vmem:[%s5614_s5 + $0x38] sm:$0xff]   ;;  %vm2421_vm10 = vsmask.f32 2304 }
 0x17b   : > { %3726 = vmatprep.mubr.msk.bf16.mxu0 %vm5868_vm14, %v4776_v31  ;;  %vm5871_vm0 = vmmov %vm5869_vm3  ;;  %v2431_v31 = vshrl.u32 %v5126_v43, 16 }
 0x17c   : > { %vm5872_vm12 = vmmov %vm5871_vm0 }
 0x17d   : > { %vm5873_vm7 = vmmov %vm5871_vm0 }
 0x17e   : > { %vm5874_vm4 = vmmov %vm5871_vm0 }
 0x17f   : > { %3663 = vmatmul.mubr.msk.bf16.gmra.mrb[4].mxu1 %vm5869_vm3, %v2060_v40  ;;  %vm5875_vm1 = vmmov %vm5871_vm0 }
 0x180   : > { %3668 = vmatprep.mubr.msk.bf16.mxu1 %vm5870_vm15, %v5186_v48  ;;  %vm5876_vm6 = vmmov %vm5871_vm0  ;;  %v2433_v48 = vrot.slane %v2431_v31, 5 }
 0x181   : > { %vm5877_vm13 = vmmov %vm5871_vm0 }
 0x182   : > { %3727 = vmatmul.mubr.msk.bf16.gmra.mrb[36].mxu0 %vm5871_vm0, %v4767_v49  ;;  %vm5878_vm11 = vmmov %vm5871_vm0  ;;  %v2426_v49 = vshll.u32 %v5121_v9, 16 }
 0x183   : > { %3730 = vmatprep.mubr.msk.bf16.mxu0 %vm5872_vm12, %v4835_v7  ;;  %vm5879_vm9 = vmmov %vm5871_vm0  ;;  %v2434_v7 = vshll.u32 %v5126_v43, 16  ;;  %v2452_v43 = vshll.u32 %v5151_v17, 16 }
 0x184   : > { %vm5880_vm8 = vmmov %vm5871_vm0 }
 0x185   : > { %vm5881_vm5 = vmmov %vm5871_vm0 }
 0x186   : > { %vm5882_vm14 = vmmov %vm5871_vm0 }
 0x187   : > { %3669 = vmatmul.mubr.msk.bf16.vlgmr.msra.gmra.mrb[8].mxu1 %vm5873_vm7, %v5189_v56  ;;  %v2436_v56 = vrot.slane %v2434_v7, 6  ;;  %vm5883_vm3 = vmmov %vm5871_vm0 }
 0x188   : > { %3685 = vmatpush3.bf16.msra.mxu1 %v5323_v37  ;;  %3672 = vmatprep.mubr.msk.bf16.mxu1 %vm5874_vm4, %v5202_v13  ;;  %v2440_v13 = vshrl.u32 %v5142_v63, 16  ;;  %v2449_v37 = vshrl.u32 %v5151_v17, 16  ;;  %v2467_v17 = vshrl.u32 %v5168_v59, 16  ;;  %vm5884_vm15 = vmmov %vm5871_vm0  ;;  %v2485_v59 = vshrl.u32 %v5172_v42, 16 }
 0x189   : > { %3702 = vmatprep.subr.bf16.mxu1 %v3918_v30  ;;  %v2437_v9 = vor.u32 %v2436_v56, %v2433_v48  ;;  %vm5885_vm12 = vmmov %vm5871_vm0 }
 0x18a   : > { %3731 = vmatmul.mubr.msk.bf16.gmra.mrb[40].mxu0 %vm5875_vm1, %v4829_v5  ;;  %v2425_v5 = vrot.slane %v2423_v15, 5  ;;  %v2442_v28 = vrot.slane %v2440_v13, 5  ;;  %v2451_v14 = vrot.slane %v2449_v37, 5  ;;  %v2469_v50 = vrot.slane %v2467_v17, 5  ;;  %vm5886_vm7 = vmmov %vm5871_vm0 }
 0x18b   : > { %3734 = vmatprep.mubr.msk.bf16.mxu0 %vm5876_vm6, %v4908_v11  ;;  %v2428_v11 = vrot.slane %v2426_v49, 6  ;;  %v2487_v25 = vrot.slane %v2485_v59, 5  ;;  %vm5887_vm4 = vmmov %vm5871_vm0 }
 0x18c   : > { %vm5888_vm1 = vmmov %vm5871_vm0 }
 0x18d   : > { %v2491_v44 = vor.u32 %v2490_v46, %v2487_v25  ;;  %vm5889_vm6 = vmmov %vm5871_vm0 }
 0x18f   : > { %3673 = vmatmul.mubr.msk.bf16.gmra.mrb[12].mxu1 %vm5877_vm13, %v5205_v33  ;;  %v2443_v33 = vshll.u32 %v5142_v63, 16  ;;  %v2458_v63 = vshrl.u32 %v5153_v53, 16  ;;  %v2476_v53 = vshrl.u32 %v5170_v23, 16  ;;  %v2494_v23 = vshrl.u32 %v5050_v6, 16  ;;  %vm5890_vm13 = vmmov %vm5871_vm0 }
 0x190   : > { %3676 = vmatprep.mubr.msk.bf16.mxu1 %vm5878_vm11, %v5228_v51  ;;  %v2429_v51 = vor.u32 %v2428_v11, %v2425_v5  ;;  %vm5891_vm11 = vmmov %vm5871_vm0 }
 0x191   : > { %v2460_v19 = vrot.slane %v2458_v63, 5  ;;  %v2478_v54 = vrot.slane %v2476_v53, 5  ;;  %v2496_v26 = vrot.slane %v2494_v23, 5 }
 0x192   : > { %3735 = vmatmul.mubr.msk.bf16.gmra.mrb[44].mxu0 %vm5879_vm9, %v845_v20  ;;  %v2438_v10 = vsel %vm2421_vm10, %v2429_v51, %v2437_v9  ;;  %v2472_v20 = vrot.slane %v2470_v3, 6  ;;  %vm5892_vm9 = vmmov %vm5871_vm0 }
 0x193   : > { %v2482_v34 = vor.u32 %v2481_v38, %v2478_v54  ;;  %v2500_v27 = vor.u32 %v2499_v24, %v2496_v26 }
 0x194   : > { %v2473_v32 = vor.u32 %v2472_v20, %v2469_v50 }
 0x195   : > { %v2492_v55 = vsel %vm2421_vm10, %v2482_v34, %v2491_v44  ;;  %v2501_v60 = vsel %vm2421_vm10, %v2491_v44, %v2500_v27 }
 0x196   : > { %v2483_v42 = vsel %vm2421_vm10, %v2473_v32, %v2482_v34 }
 0x197   : > { %3677 = vmatmul.mubr.msk.bf16.gmra.mrb[0].mxu1 %vm5880_vm8, %v5231_v2  ;;  %v2445_v2 = vrot.slane %v2443_v33, 6  ;;  %vm5893_vm8 = vmmov %vm5871_vm0 }
 0x198   : > { %3680 = vmatprep.mubr.msk.bf16.mxu1 %vm5881_vm5, %v5239_v29  ;;  %v2454_v29 = vrot.slane %v2452_v43, 6  ;;  %vm5894_vm5 = vmmov %vm5871_vm0 }
 0x199   : > { %v2446_v16 = vor.u32 %v2445_v2, %v2442_v28 }
 0x19a   : > { %v2455_v1 = vor.u32 %v2454_v29, %v2451_v14 }
 0x19b   : > { %v2447_v57 = vsel %vm2421_vm10, %v2437_v9, %v2446_v16 }
 0x19c   : > { %v2456_v41 = vsel %vm2421_vm10, %v2446_v16, %v2455_v1 }
 0x19f   : > { %3681 = vmatmul.mubr.msk.bf16.gmra.mrb[4].mxu1 %vm5882_vm14, %v5243_v52  ;;  %v2463_v52 = vrot.slane %v2461_v21, 6  ;;  %vm5895_vm14 = vmmov %vm5871_vm0 }
 0x1a0   : > { %3686 = vmatprep.mubr.msk.bf16.mxu1 %vm5883_vm3, %v2438_v10  ;;  %vm5897_vm3 = vmmov %vm5871_vm0 }
 0x1a1   : > { %v2464_v62 = vor.u32 %v2463_v52, %v2460_v19 }
 0x1a3   : > { %v2465_v18 = vsel %vm2421_vm10, %v2455_v1, %v2464_v62  ;;  %v2474_v36 = vsel %vm2421_vm10, %v2464_v62, %v2473_v32  ;;  %vm5896_vm10 = vmmov %vm5871_vm0 }
 0x1a7   : > { %3687 = vmatmul.mubr.msk.bf16.vlgmr.msra.gmra.mrb[8].mxu1 %vm5884_vm15, %v2447_v57  ;;  %vm2916_vm15 = vcmask 523264  }
 0x1a8   : > { %3703 = vmatpush3.bf16.msra.mxu1 %v3918_v30  ;;  %3690 = vmatprep.mubr.msk.bf16.mxu1 %vm5871_vm0, %v2456_v41  ;;  %vm3172_vm0 = vcmask 1040384  }
 0x1af   : > { %3691 = vmatmul.mubr.msk.bf16.gmra.mrb[12].mxu1 %vm5885_vm12, %v2465_v18  ;;  %vm3173_vm12 = vmand %vm3172_vm0, %vm1704_vm2 }
 0x1b0   : > { %3694 = vmatprep.mubr.msk.bf16.mxu1 %vm5886_vm7, %v2474_v36 }
 0x1b7   : > { %3695 = vmatmul.mubr.msk.bf16.gmra.mrb[0].mxu1 %vm5887_vm4, %v2483_v42 }
 0x1b8   : > { %3698 = vmatprep.mubr.msk.bf16.mxu1 %vm5888_vm1, %v2492_v55 }
 0x1bf   : > { %3699 = vmatmul.mubr.msk.bf16.gmra.mrb[4].mxu1 %vm5889_vm6, %v2501_v60 }
 0x1c0   : > { %3704 = vmatprep.mubr.msk.bf16.mxu1 %vm5890_vm13, %v5338_v0 }
 0x1c7   : > { %3705 = vmatmul.mubr.msk.bf16.vlgmr.msra.gmra.mrb[8].mxu1 %vm5891_vm11, %v5343_v61 }
 0x1c8   : > { %3708 = vmatprep.mubr.msk.bf16.mxu1 %vm5892_vm9, %v5346_v47 }
 0x1cf   : > { %3709 = vmatmul.mubr.msk.bf16.gmra.mrb[12].mxu1 %vm5893_vm8, %v5354_v39 }
 0x1d0   : > { %3712 = vmatprep.mubr.msk.bf16.mxu1 %vm5894_vm5, %v5366_v22 }
 0x1d7   : > { %3713 = vmatmul.mubr.msk.bf16.gmra.mrb[0].mxu1 %vm5895_vm14, %v5369_v35 }
 0x1d8   : > { %3716 = vmatprep.mubr.msk.bf16.mxu1 %vm5896_vm10, %v5372_v4 }
 0x1df   : > { %3717 = vmatmul.mubr.msk.bf16.gmra.mrb[4].mxu1 %vm5897_vm3, %v5375_v12 }
 0x229   : > { %v3606_v6 = vpop.f32.mrb[24].mxu0 }
 0x22a   : > { %v1294_v0 = vpop.f32.mrb[25].mxu0 }
 0x22b   : > { %v3607_v61 = vpop.f32.mrb[26].mxu0 }
 0x22c   : > { %v1297_v40 = vpop.f32.mrb[27].mxu0 }
 0x234   : > { %v5475_v47 = vpop.f32.mrb[28].mxu0 }
 0x235   : > { %v5477_v30 = vpop.f32.mrb[29].mxu0 }
 0x236   : > { %v5479_v39 = vpop.f32.mrb[30].mxu0 }
 0x237   : > { %v5481_v22 = vpop.f32.mrb[31].mxu0 }
 0x23c   : > { %v3616_v15 = vpop.f32.mrb[16].mxu0 }
 0x23d   : > { %v1538_v35 = vpop.f32.mrb[17].mxu0 }
 0x23e   : > { %v3617_v49 = vpop.f32.mrb[18].mxu0 }
 0x23f   : > { %v1541_v31 = vpop.f32.mrb[19].mxu0 }
 0x245   : > { %v3620_v4 = vpop.f32.mrb[20].mxu0 }
 0x246   : > { %v1554_v7 = vpop.f32.mrb[21].mxu0 }
 0x247   : > { %v3621_v5 = vpop.f32.mrb[22].mxu0 }
 0x248   : > { %v1557_v12 = vpop.f32.mrb[23].mxu0 }
 0x24d   : > { %v5483_v11 = vpop.f32.mrb[32].mxu0 }
 0x24e   : > { %v5485_v48 = vpop.f32.mrb[33].mxu0 }
 0x24f   : > { %v5487_v56 = vpop.f32.mrb[34].mxu0 }
 0x250   : > { %v5489_v13 = vpop.f32.mrb[35].mxu0 }
 0x255   : > { %v5491_v33 = vpop.f32.mrb[36].mxu0 }
 0x256   : > { %v5493_v51 = vpop.f32.mrb[37].mxu0 }
 0x257   : > { %v5495_v9 = vpop.f32.mrb[38].mxu0 }
 0x258   : > { %v5497_v37 = vpop.f32.mrb[39].mxu0 }
 0x25d   : > { %v5499_v43 = vpop.f32.mrb[40].mxu0 }
 0x25e   : > { %v5501_v28 = vpop.f32.mrb[41].mxu0 }
 0x25f   : > { %v5503_v2 = vpop.f32.mrb[42].mxu0 }
 0x260   : > { %v5505_v10 = vpop.f32.mrb[43].mxu0 }
 0x265   : > { %v5507_v14 = vpop.f32.mrb[44].mxu0 }
 0x266   : > { %v5509_v29 = vpop.f32.mrb[45].mxu0 }
 0x267   : > { %v5511_v16 = vpop.f32.mrb[46].mxu0 }
 0x268   : > { %v5513_v63 = vpop.f32.mrb[47].mxu0 }
 0x29a   : > { %v3706_v21 = vpop.f32.mrb[8].mxu1 }
 0x29b   : > { %v3740_v1 = vadd.f32 %v3706_v21, %v3616_v15  ;;  %v2773_v17 = vpop.f32.mrb[9].mxu1 }
 0x29c   : > { %v3741_v3 = vadd.f32 %v2773_v17, %v1538_v35  ;;  %v3707_v57 = vpop.f32.mrb[10].mxu1 }
 0x29d   : > { %v3742_v19 = vadd.f32 %v3707_v57, %v3617_v49  ;;  %v2776_v52 = vpop.f32.mrb[11].mxu1  ;;  %2872 = vrot.lane.b32.xlu1 %v3740_v1, %s3930_s24 }
 0x29e   : > { %v3743_v41 = vadd.f32 %v2776_v52, %v1541_v31  ;;  %2868 = vrot.lane.b32.xlu0 %v3741_v3, %s3930_s24 }
 0x2a1   : > { %2870 = vrot.lane.b32.xlu1 %v3743_v41, %s3930_s24 }
 0x2a2   : > { %v3710_v50 = vpop.f32.mrb[12].mxu1  ;;  %2874 = vrot.lane.b32.xlu0 %v3742_v19, %s3930_s24 }
 0x2a3   : > { %v3744_v20 = vadd.f32 %v3710_v50, %v3620_v4  ;;  %v2789_v62 = vpop.f32.mrb[13].mxu1 }
 0x2a4   : > { %v3745_v53 = vadd.f32 %v2789_v62, %v1554_v7  ;;  %v3711_v8 = vpop.f32.mrb[14].mxu1 }
 0x2a5   : > { %v3746_v32 = vadd.f32 %v3711_v8, %v3621_v5  ;;  %v2792_v59 = vpop.f32.mrb[15].mxu1  ;;  %2880 = vrot.lane.b32.xlu1 %v3744_v20, %s3930_s24 }
 0x2a6   : > { %v3747_v58 = vadd.f32 %v2792_v59, %v1557_v12 }
 0x2a7   : > { %2882 = vrot.lane.b32.xlu0 %v3746_v32, %s3930_s24 }
 0x2a9   : > { %2876 = vrot.lane.b32.xlu1 %v3745_v53, %s3930_s24 }
 0x2aa   : > { %v3714_v18 = vpop.f32.mrb[0].mxu1 }
 0x2ab   : > { %v3748_v54 = vadd.f32 %v3714_v18, %v3606_v6  ;;  %v2805_v38 = vpop.f32.mrb[1].mxu1  ;;  %2878 = vrot.lane.b32.xlu0 %v3747_v58, %s3930_s24 }
 0x2ac   : > { %v3749_v36 = vadd.f32 %v2805_v38, %v1294_v0  ;;  %v3715_v25 = vpop.f32.mrb[2].mxu1 }
 0x2ad   : > { %v3750_v46 = vadd.f32 %v3715_v25, %v3607_v61  ;;  %v2808_v34 = vpop.f32.mrb[3].mxu1  ;;  %2888 = vrot.lane.b32.xlu1 %v3748_v54, %s3930_s24 }
 0x2ae   : > { %v3751_v23 = vadd.f32 %v2808_v34, %v1297_v40 }
 0x2af   : > { %2890 = vrot.lane.b32.xlu0 %v3750_v46, %s3930_s24 }
 0x2b1   : > { %2884 = vrot.lane.b32.xlu1 %v3749_v36, %s3930_s24 }
 0x2b2   : > { %v3718_v45 = vpop.f32.mrb[4].mxu1 }
 0x2b3   : > { %v3752_v44 = vadd.f32 %v3718_v45, %v5475_v47  ;;  %v2821_v42 = vpop.f32.mrb[5].mxu1  ;;  %2886 = vrot.lane.b32.xlu0 %v3751_v23, %s3930_s24  ;;  %v5540_v47 = vld [vmem:[%s5613_s4] ss:$0 sm:$0xff] }
 0x2b4   : > { %v3753_v26 = vadd.f32 %v2821_v42, %v5477_v30  ;;  %v3719_v24 = vpop.f32.mrb[6].mxu1 }
 0x2b5   : > { %v3754_v55 = vadd.f32 %v3719_v24, %v5479_v39  ;;  %v2824_v27 = vpop.f32.mrb[7].mxu1 }
 0x2b6   : > { %v3755_v60 = vadd.f32 %v2824_v27, %v5481_v22  ;;  %2892 = vrot.lane.b32.xlu1 %v3753_v26, %s3930_s24 }
 0x2b7   : > { %2898 = vrot.lane.b32.xlu0 %v3754_v55, %s3930_s24 }
 0x2ba   : > { %2896 = vrot.lane.b32.xlu1 %v3752_v44, %s3930_s24 }
 0x2bb   : > { %2894 = vrot.lane.b32.xlu0 %v3755_v60, %s3930_s24 }
 0x30f   : > { %v2873_v6 = vpop.permute.xlu1 %2872 }
 0x310   : > { %v2919_v0 = vsel %vm2916_vm15, 0.0, %v2873_v6  ;;  %v2869_v61 = vpop.permute.xlu0 %2868 }
 0x311   : > { %v2917_v40 = vsel %vm2916_vm15, 0.0, %v2869_v61  ;;  %v3000_v30 = vadd.f32 %v5483_v11, %v2919_v0 }
 0x312   : > { %v2992_v39 = vadd.f32 %v5485_v48, %v2917_v40 }
 0x313   : > { %v2871_v22 = vpop.permute.xlu1 %2870  ;;  %v3063_v7 = vadd.f32 %v5540_v47, %v3000_v30 }
 0x314   : > { %v2918_v15 = vsel %vm2916_vm15, 0.0, %v2871_v22  ;;  %v2875_v35 = vpop.permute.xlu0 %2874  ;;  %v3061_v49 = vadd.f32 %v5540_v47, %v2992_v39 }
 0x315   : > { %v2995_v31 = vadd.f32 %v5489_v13, %v2918_v15  ;;  %v2920_v4 = vsel %vm2916_vm15, 0.0, %v2875_v35  ;;  %v3079_v19 = vmax.f32 %v3063_v7, 0.0 }
 0x316   : > { %v3003_v5 = vadd.f32 %v5487_v56, %v2920_v4  ;;  %v3077_v1 = vmax.f32 %v3061_v49, 0.0 }
 0x317   : > { %v3062_v12 = vadd.f32 %v5540_v47, %v2995_v31  ;;  %v2881_v11 = vpop.permute.xlu1 %2880 }
 0x318   : > { %v3064_v48 = vadd.f32 %v5540_v47, %v3003_v5  ;;  %v2923_v21 = vsel %vm2916_vm15, 0.0, %v2881_v11 }
 0x319   : > { %v3078_v17 = vmax.f32 %v3062_v12, 0.0  ;;  %v3016_v3 = vadd.f32 %v5491_v33, %v2923_v21  ;;  %v2883_v57 = vpop.permute.xlu0 %2882 }
 0x31a   : > { %v3080_v56 = vmax.f32 %v3064_v48, 0.0  ;;  %v2924_v13 = vsel %vm2916_vm15, 0.0, %v2883_v57 }
 0x31b   : > { %v3409_v52 = vpack.c.bf16 %v3078_v17, %v3077_v1  ;;  %v3067_v41 = vadd.f32 %v5540_v47, %v3016_v3  ;;  %v3019_v50 = vadd.f32 %v5495_v9, %v2924_v13  ;;  %v2877_v20 = vpop.permute.xlu1 %2876  ;;  %v3174_v3 = vld [vmem:[%s5559_s30 + $0x3c] sm:$0x1] }
 0x31c   : > { %v3414_v33 = vpack.c.bf16 %v3080_v56, %v3079_v19  ;;  %v2921_v62 = vsel %vm2916_vm15, 0.0, %v2877_v20 }
 0x31d   : > { %3410 = vst [vmem:[%s5559_s30] sm:$0xff] %v3409_v52   ;;  %v3068_v53 = vadd.f32 %v5540_v47, %v3019_v50  ;;  %v3008_v8 = vadd.f32 %v5493_v51, %v2921_v62  ;;  %v2879_v32 = vpop.permute.xlu0 %2878  ;;  %v3083_v58 = vmax.f32 %v3067_v41, 0.0 }
 0x31e   : > { %3441 = vst [vmem:[%s5559_s30 + $0x8] sm:$0xff] %v3414_v33   ;;  %v2922_v59 = vsel %vm2916_vm15, 0.0, %v2879_v32 }
 0x31f   : > { %v3084_v18 = vmax.f32 %v3068_v53, 0.0  ;;  %v3065_v54 = vadd.f32 %v5540_v47, %v3008_v8  ;;  %v3011_v9 = vadd.f32 %v5497_v37, %v2922_v59  ;;  %v2889_v38 = vpop.permute.xlu1 %2888 }
 0x320   : > { %v2927_v36 = vsel %vm2916_vm15, 0.0, %v2889_v38 }
 0x321   : > { %v3424_v25 = vpack.c.bf16 %v3084_v18, %v3083_v58  ;;  %v3066_v46 = vadd.f32 %v5540_v47, %v3011_v9  ;;  %v3032_v34 = vadd.f32 %v5499_v43, %v2927_v36  ;;  %v2891_v51 = vpop.permute.xlu0 %2890  ;;  %v3081_v45 = vmax.f32 %v3065_v54, 0.0 }
 0x322   : > { %v2928_v23 = vsel %vm2916_vm15, 0.0, %v2891_v51 }
 0x323   : > { %3443 = vst [vmem:[%s5559_s30 + $0x18] sm:$0xff] %v3424_v25   ;;  %v3082_v44 = vmax.f32 %v3066_v46, 0.0  ;;  %v3071_v42 = vadd.f32 %v5540_v47, %v3032_v34  ;;  %v3035_v26 = vadd.f32 %v5503_v2, %v2928_v23  ;;  %v2885_v37 = vpop.permute.xlu1 %2884 }
 0x324   : > { %v2925_v24 = vsel %vm2916_vm15, 0.0, %v2885_v37 }
 0x325   : > { %v3419_v55 = vpack.c.bf16 %v3082_v44, %v3081_v45  ;;  %v3072_v27 = vadd.f32 %v5540_v47, %v3035_v26  ;;  %v3024_v60 = vadd.f32 %v5501_v28, %v2925_v24  ;;  %v2887_v43 = vpop.permute.xlu0 %2886  ;;  %v3087_v0 = vmax.f32 %v3071_v42, 0.0 }
 0x326   : > { %v2926_v6 = vsel %vm2916_vm15, 0.0, %v2887_v43 }
 0x327   : > { %3442 = vst [vmem:[%s5559_s30 + $0x10] sm:$0xff] %v3419_v55   ;;  %v3088_v61 = vmax.f32 %v3072_v27, 0.0  ;;  %v3069_v40 = vadd.f32 %v5540_v47, %v3024_v60  ;;  %v3027_v30 = vadd.f32 %v5505_v10, %v2926_v6 }
 0x328   : > { %v2893_v2 = vpop.permute.xlu1 %2892 }
 0x329   : > { %v3434_v39 = vpack.c.bf16 %v3088_v61, %v3087_v0  ;;  %v3070_v22 = vadd.f32 %v5540_v47, %v3027_v30  ;;  %v2929_v15 = vsel %vm2916_vm15, 0.0, %v2893_v2  ;;  %v2899_v35 = vpop.permute.xlu0 %2898  ;;  %v3085_v49 = vmax.f32 %v3069_v40, 0.0 }
 0x32a   : > { %v2932_v28 = vsel %vm2916_vm15, 0.0, %v2899_v35  ;;  %v3040_v4 = vadd.f32 %v5509_v29, %v2929_v15 }
 0x32b   : > { %3445 = vst [vmem:[%s5559_s30 + $0x28] sm:$0xff] %v3434_v39   ;;  %v3086_v31 = vmax.f32 %v3070_v22, 0.0  ;;  %v3051_v7 = vadd.f32 %v5511_v16, %v2932_v28 }
 0x32c   : > { %v2897_v5 = vpop.permute.xlu1 %2896  ;;  %v3073_v17 = vadd.f32 %v5540_v47, %v3040_v4 }
 0x32d   : > { %v3429_v10 = vpack.c.bf16 %v3086_v31, %v3085_v49  ;;  %v3076_v12 = vadd.f32 %v5540_v47, %v3051_v7  ;;  %v2931_v11 = vsel %vm2916_vm15, 0.0, %v2897_v5  ;;  %v2895_v48 = vpop.permute.xlu0 %2894 }
 0x32e   : > { %v3048_v21 = vadd.f32 %v5507_v14, %v2931_v11  ;;  %v2930_v1 = vsel %vm2916_vm15, 0.0, %v2895_v48  ;;  %v3089_v14 = vmax.f32 %v3073_v17, 0.0 }
 0x32f   : > { %3444 = vst [vmem:[%s5559_s30 + $0x20] sm:$0xff] %v3429_v10   ;;  %v3092_v29 = vmax.f32 %v3076_v12, 0.0  ;;  %v3043_v16 = vadd.f32 %v5513_v63, %v2930_v1 }
 0x330   : > { %v3075_v57 = vadd.f32 %v5540_v47, %v3048_v21 }
 0x331   : > { %v3405_v19 = vpack.c.bf16 %v3092_v29, %v3092_v29  ;;  %v3074_v56 = vadd.f32 %v5540_v47, %v3043_v16 }
 0x332   : > { %v3091_v13 = vmax.f32 %v3075_v57, 0.0 }
 0x333   : > { %v3175_v52 = vsel %vm3173_vm12, %v3405_v19, %v3174_v3  ;;  %v3090_v41 = vmax.f32 %v3074_v56, 0.0 }
 0x334   : > { %3176 = vst [vmem:[%s5559_s30 + $0x3c] sm:$0x1] %v3175_v52  ;;  %v3404_v50 = vpack.c.bf16 %v3091_v13, %v3091_v13 }
 0x335   : > { %v3439_v20 = vpack.c.bf16 %v3090_v41, %v3089_v14 }
 0x336   : > { %3171 = vst [vmem:[%s5559_s30 + $0x38] sm:$0xf] %v3404_v50 }
 0x337   : > { %3446 = vst [vmem:[%s5559_s30 + $0x30] sm:$0xff] %v3439_v20  }
 0x338 PF: > { %s16_s21 = sadd.s32 1, %s3927_s21  }
 0x339   : > { %p13_p4 = scmp.ge.s32.totalorder %s16_s21, 4  }
 0x33b   :  { %15 = sbr.rel (!%p13_p4) target bundleno = 1 (0x1), region = 81 }

// kernel: squeezenet11_forward.15
= control target key start
LH: loop header
LB: loop body
LE: loop exit
PB: predicated region body
PF: predicated region fallthrough
CT: control target
= control target key end

     0   :  { %s1877_s21 = smov 0   ;;  %s2194_s0 = inlined_call_operand.vmem [shape: bf16[2,4,256], index: 0, kind: input, shape index: {}]   ;;  %s2195_s1 = inlined_call_operand.vmem [shape: bf16[256,48], index: 1, kind: input, shape index: {}]   ;;  %s2196_s2 = inlined_call_operand.vmem [shape: f32[1,48], index: 2, kind: input, shape index: {}]   ;;  %s2197_s3 = inlined_call_operand.vmem [shape: bf16[48,384], index: 3, kind: input, shape index: {}]   ;;  %s2198_s4 = inlined_call_operand.vmem [shape: f32[1,384], index: 4, kind: input, shape index: {}]   ;;  %s2199_s5 = inlined_call_operand.vmem [shape: bf16[8,48,192], index: 5, kind: input, shape index: {}]   ;;  %s2200_s6 = inlined_call_operand.vmem [shape: bf16[2,4,384], index: 6, kind: output, shape index: {}]  }
   0x1 LB: > { %s1512_s22 = sadd.s32 4294967295, %s1835_s21   ;;  %p1516_p0 = scmp.ge.s32.totalorder %s1835_s21, 1  ;;  %s1835_s21 = sphi %s1877_s21, %s16_s21  }
   0x2   : > { %p212_p1 = scmp.lt.s32.totalorder %s1835_s21, 3 }
   0x4   : > { %p213_p2 = pnand %p1516_p0, %p212_p1 }
   0x5   : > { %v1729_v0 = vld [vmem:[%s2195_s1 + $0x40] sm:$0xff] (!%p213_p2)   ;;  %v1731_v2 = vld [vmem:[%s2195_s1 + $0x48] sm:$0xff] (!%p213_p2)   ;;  %p242_p3 = scmp.lt.s32.totalorder (!%p213_p2), %s1512_s22, 1  ;;  %v1733_v4 = vld [vmem:[%s2195_s1 + $0x50] sm:$0xff] (!%p213_p2)   ;;  %v1837_v19 = vmov (!%p213_p2), 0   ;;  %vm255_vm0 = vcmask (!%p213_p2), 392192   ;;  %v450_v33 = vlaneseq (!%p213_p2) }
   0x6   : > { %216 = sbr.rel (%p213_p2) target bundleno = 683 (0x2ab), region = 44  ;;  %v1730_v1 = vld [vmem:[%s2195_s1] sm:$0xff] (!%p213_p2)   ;;  %1653 = vmatprep.subr.bf16.mxu0 (!%p213_p2), %v1729_v0  ;;  %v1732_v3 = vld [vmem:[%s2195_s1 + $0x8] sm:$0xff] (!%p213_p2)   ;;  %v1734_v5 = vld [vmem:[%s2195_s1 + $0x10] sm:$0xff] (!%p213_p2)   ;;  %783 = vmatprep.mubr.bf16.mxu1 (!%p213_p2), %v1837_v19  ;;  %256 = vst.msk [vmem:[#allocation2] sm:$0xff] (!%p213_p2), %vm255_vm0, %v1837_v19  ;;  %vm257_vm1 = vcmask (!%p213_p2), 392194  }
   0x7   : > { %1654 = vmatpush3.bf16.msra.mxu0 (!%p213_p2), %v1730_v1  ;;  %v1735_v6 = vld [vmem:[%s2195_s1 + $0x58] sm:$0xff] (!%p213_p2)   ;;  %v1737_v8 = vld [vmem:[%s2195_s1 + $0x60] sm:$0xff] (!%p213_p2)   ;;  %v1739_v10 = vld [vmem:[%s2195_s1 + $0x68] sm:$0xff] (!%p213_p2)   ;;  %258 = vst.msk [vmem:[#allocation2 + $0x8] sm:$0xfc] (!%p213_p2), %vm257_vm1, %v1837_v19  ;;  %v1986_v34 = vshrl.u32 (!%p213_p2), %v450_v33, 7 }
   0x8   : > { %1655 = vmatprep.subr.bf16.mxu0 (!%p213_p2), %v1731_v2  ;;  %v1736_v7 = vld [vmem:[%s2195_s1 + $0x18] sm:$0xff] (!%p213_p2)   ;;  %v1738_v9 = vld [vmem:[%s2195_s1 + $0x20] sm:$0xff] (!%p213_p2)   ;;  %v1740_v12 = vld [vmem:[%s2195_s1 + $0x28] sm:$0xff] (!%p213_p2)   ;;  %vm448_vm6 = vcmask (!%p213_p2), 386048   ;;  %vm515_vm10 = vcmask (!%p213_p2), 1040384   ;;  %s1840_s19 = smov (!%p213_p2), 64  }
   0x9   : > { %v1741_v14 = vld [vmem:[%s2195_s1 + $0x70] sm:$0xff] (!%p213_p2)   ;;  %v1743_v16 = vld [vmem:[%s2195_s1 + $0x78] sm:$0xff] (!%p213_p2)   ;;  %v1748_v21 = vld [vmem:[%s2199_s5 + $0x40] ss:$8 sps:$4 sm:$0xff] (!%p213_p2)   ;;  %v456_v35 = vand.u32 (!%p213_p2), 1, %v1986_v34 }
   0xa   : > { %v1742_v15 = vld [vmem:[%s2195_s1 + $0x30] sm:$0xff] (!%p213_p2)   ;;  %v1744_v17 = vld [vmem:[%s2195_s1 + $0x38] sm:$0xff] (!%p213_p2)   ;;  %v1750_v22 = vld [vmem:[%s2199_s5 + $0x44] ss:$8 sps:$4 sm:$0xff] (!%p213_p2)   ;;  %vm705_vm13 = vsmask.f32 (!%p213_p2), 256 }
   0xb   : > { %1656 = vmatpush3.bf16.msra.mxu0 (!%p213_p2), %v1732_v3  ;;  %v1747_v18 = vld [vmem:[%s2199_s5 + $0x34] ss:$8 sps:$4 sm:$0xff] (!%p213_p2)   ;;  %v1745_v20 = vld [vmem:[%s2199_s5 + $0x30] ss:$8 sps:$4 sm:$0xff] (!%p213_p2)   ;;  %v1751_v23 = vld [vmem:[%s2199_s5 + $0x64] ss:$8 sps:$4 sm:$0xff] (!%p213_p2)  }
   0xc   : > { %1657 = vmatprep.subr.bf16.mxu0 (!%p213_p2), %v1733_v4  ;;  %v1753_v24 = vld [vmem:[%s2199_s5 + $0x60] ss:$8 sps:$4 sm:$0xff] (!%p213_p2)   ;;  %v1756_v25 = vld [vmem:[%s2199_s5 + $0x54] ss:$8 sps:$4 sm:$0xff] (!%p213_p2)   ;;  %751 = vmatprep.subr.bf16.mxu1 (!%p213_p2), %v1751_v23  ;;  %v1754_v27 = vld [vmem:[%s2199_s5 + $0x50] ss:$8 sps:$4 sm:$0xff] (!%p213_p2)  }
   0xd   : > { %s2206_s22 = smov (!%p242_p3, %s1512_s22), 1  ;;  %v1757_v26 = vld [vmem:[%s2199_s5 + $0x74] ss:$8 sps:$4 sm:$0xff]   ;;  %752 = vmatpush1.bf16.msra.mxu1 %v1753_v24  ;;  %v1759_v28 = vld [vmem:[%s2199_s5 + $0x70] ss:$8 sps:$4 sm:$0xff]   ;;  %vm464_vm2 = vcmp.ne.s32.totalorder %v456_v35, 0 }
   0xe   : > { %s1652_s13 = sshll.u32 %s2206_s22, 2  ;;  %753 = vmatprep.subr.bf16.mxu1 %v1757_v26  ;;  %v1762_v29 = vld [vmem:[%s2199_s5 + $0x4] ss:$8 sps:$4 sm:$0xff]   ;;  %v1765_v31 = vld [vmem:[%s2199_s5 + $0x80] ss:$8 sps:$4 sm:$0xff]   ;;  %vm465_vm3 = vcmp.ne.s32.totalorder %v456_v35, 1  ;;  %vm483_vm4 = vmpackc.low %vm464_vm2, %vm464_vm2 }
   0xf   : > { %1658 = vmatpush3.bf16.msra.mxu0 %v1734_v5  ;;  %s246_s20 = scalar_lea.vmem %s2194_s0, %s1652_s13  ;;  %v1763_v30 = vld [vmem:[%s2199_s5 + $0x84] ss:$8 sps:$4 sm:$0xff]   ;;  %v1771_v32 = vld [vmem:[%s2199_s5 + $0x94] ss:$8 sps:$4 sm:$0xff]   ;;  %vm683_vm5 = vmpackc.low %vm465_vm3, %vm465_vm3  ;;  %v484_v36 = vsel %vm483_vm4, 65537, %v1837_v19  ;;  %vm1839_vm2 = vmmov 0  }
  0x10   : > { %1659 = vmatprep.subr.bf16.mxu0 %v1735_v6  ;;  %v1521_v11 = vld.sshfl [vmem:[%s246_s20] sm:$0x33 pattern:$0x76325410]  ;;  %v684_v37 = vsel %vm683_vm5, 65537, %v1837_v19  ;;  %v1538_v38 = vcombine.low %v484_v36, %v484_v36  ;;  %s1715_s24 = smul.u32 6, %s2206_s22 }
  0x11   : > { %v307_v13 = vcombine.high %v1521_v11, %v1521_v11  ;;  %754 = vmatpush1.bf16.msra.mxu1 %v1759_v28  ;;  %v1559_v39 = vcombine.low %v684_v37, %v684_v37  ;;  %v1520_v41 = vld [vmem:[%s2196_s2] ss:$0 sm:$0xff]  ;;  %v505_v59 = vld [vmem:[#allocation2] sm:$0x80]  ;;  %vm593_vm15 = vsmask.f32 1280 }
  0x12   : > { %755 = vmatprep.subr.bf16.mxu1 %v1763_v30  ;;  %v1994_v45 = vshrl.u32 %v1538_v38, 16  ;;  %v1996_v46 = vshll.u32 %v1538_v38, 16  ;;  %v479_v61 = vld [vmem:[#allocation2] sm:$0xc0]  ;;  %v516_v63 = vrot.slane %v505_v59, 7  ;;  %s251_s27 = scalar_lea.vmem %s2200_s6, %s1715_s24 }
  0x13   : > { %1660 = vmatpush3.bf16.msra.mxu0 %v1736_v7  ;;  %438 = vmatprep.mubr.bf16.mxu0 %v307_v13  ;;  %v1998_v48 = vshll.u32 %v1559_v39, 16  ;;  %v2003_v55 = vshrl.u32 %v1559_v39, 16  ;;  %v1760_v4 = vld [vmem:[%s2199_s5] ss:$8 sps:$4 sm:$0xff]   ;;  %v1777_v24 = vld [vmem:[%s2199_s5 + $0xa4] ss:$8 sps:$4 sm:$0xff]  }
  0x14   : > { %1661 = vmatprep.subr.bf16.mxu0 %v1737_v8  ;;  %v490_v51 = vrot.slane %v1994_v45, 1  ;;  %v493_v52 = vrot.slane %v1996_v46, 2  ;;  %v794_v58 = vrot.slane %v1996_v46, 1  ;;  %v1768_v8 = vld [vmem:[%s2199_s5 + $0x14] ss:$8 sps:$4 sm:$0xff]  }
  0x15   : > { %756 = vmatpush1.bf16.msra.mxu1 %v1765_v31  ;;  %v690_v53 = vrot.slane %v1998_v48, 1  ;;  %v1772_v30 = vld [vmem:[%s2199_s5 + $0x20] ss:$8 sps:$4 sm:$0xff]   ;;  %v1780_v35 = vld [vmem:[%s2197_s3 + $0x4] ss:$12 sps:$4 sm:$0xff]  }
  0x16   : > { %852 = vmatprep.subr.bf16.mxu1 %v1771_v32  ;;  %v494_v56 = vor.u32 %v493_v52, %v490_v51  ;;  %v795_v62 = vor.u32 %v794_v58, %v1994_v45  ;;  %vm2014_vm11 = vcmp.ne.s16.totalorder %v490_v51, 0  ;;  %vm2035_vm14 = vcmp.ne.s16.totalorder %v794_v58, 0  ;;  %v1775_v33 = vld [vmem:[%s2199_s5 + $0xa0] ss:$8 sps:$4 sm:$0xff]   ;;  %v1783_v38 = vld [vmem:[%s2199_s5 + $0xb4] ss:$8 sps:$4 sm:$0xff]  }
  0x17   : > { %1662 = vmatpush3.bf16.msra.mxu0 %v1738_v9  ;;  %v693_v57 = vor.u32 %v2003_v55, %v690_v53  ;;  %vm694_vm7 = vcmp.ne.s16.totalorder %v690_v53, 0  ;;  %v798_v31 = vsel %vm2035_vm14, %v505_v59, 0  ;;  %v896_v32 = vrot.slane %v2003_v55, 7  ;;  %v1784_v53 = vld [vmem:[%s2197_s3 + $0x18] ss:$12 sps:$4 sm:$0xff]  }
  0x18   : > { %1663 = vmatprep.subr.bf16.mxu0 %v1739_v10  ;;  %v696_v60 = vsel %vm694_vm7, %v505_v59, 0  ;;  %vm495_vm8 = vcmp.ne.s16.totalorder %v494_v56, 0  ;;  %vm797_vm12 = vcmp.ne.s16.totalorder %v795_v62, 0  ;;  %v808_v39 = vshrl.u32 %v798_v31, 16  ;;  %v1787_v56 = vld [vmem:[%s2199_s5 + $0xc0] ss:$8 sps:$4 sm:$0xff]  }
  0x19   : > { %vm695_vm9 = vcmp.ne.s16.totalorder %v693_v57, 0  ;;  %v707_v2 = vshrl.u32 %v696_v60, 16  ;;  %v497_v3 = vsel %vm495_vm8, %v479_v61, 0  ;;  %v1792_v57 = vld [vmem:[%s2197_s3 + $0x34] ss:$12 sps:$4 sm:$0xff]   ;;  %v990_v62 = vrot.slane %v1994_v45, 7 }
  0x1a   : > { %v810_v51 = vrot.slane %v808_v39, 7  ;;  %v1795_v58 = vld [vmem:[%s2199_s5 + $0xd4] ss:$8 sps:$4 sm:$0xff]   ;;  %v1820_v31 = vld [vmem:[%s2199_s5 + $0x150] ss:$8 sps:$4 sm:$0xff]  }
  0x1b   : > { %1664 = vmatpush3.bf16.msra.mxu0 %v1740_v12  ;;  %v598_v12 = vshll.u32 %v497_v3, 16  ;;  %v709_v13 = vrot.slane %v707_v2, 7  ;;  %v1790_v61 = vld [vmem:[%s2197_s3 + $0x30] ss:$12 sps:$4 sm:$0xff]   ;;  %v991_v45 = vor.u32 %v990_v62, %v1996_v46  ;;  %v1803_v46 = vld [vmem:[%s2197_s3 + $0x20] ss:$12 sps:$4 sm:$0xff]  }
  0x1c   : > { %1665 = vmatprep.subr.bf16.mxu0 %v1741_v14 }
  0x1d   : > { %v600_v26 = vrot.slane %v598_v12, 7  ;;  %vm992_vm3 = vcmp.ne.s16.totalorder %v991_v45, 0  ;;  %v1418_v45 = vsub.s32 1, %v1986_v34 }
  0x1f   : > { %1666 = vmatpush3.bf16.msra.mxu0 %v1742_v15 }
  0x20   : > { %1667 = vmatprep.subr.bf16.mxu0 %v1743_v16 }
  0x23   : > { %1668 = vmatpush3.bf16.msra.mxu0 %v1744_v17  ;;  %v1766_v17 = vld [vmem:[%s2199_s5 + $0x10] ss:$8 sps:$4 sm:$0xff]  }
  0x24   : > { %552 = vmatprep.subr.bf16.mxu0 %v1747_v18 }
  0x26   : > { %439 = vmatmul.mubr.bf16.vlgmr.msra.gmra.mrb[0].mxu0 %v1521_v11  ;;  %v595_v11 = vshrl.u32 %v497_v3, 16  ;;  %v1799_v3 = vld [vmem:[%s2197_s3 + $0x8] ss:$12 sps:$4 sm:$0xff]  }
  0x27   : > { %584 = vmatprep.mubr.bf16.mxu0 %v1837_v19  ;;  %553 = vmatpush1.bf16.msra.mxu0 %v1745_v20  ;;  %v1769_v20 = vld [vmem:[%s2199_s5 + $0x90] ss:$8 sps:$4 sm:$0xff]  }
  0x28   : > { %554 = vmatprep.subr.bf16.mxu0 %v1750_v22  ;;  %v1774_v22 = vld [vmem:[%s2199_s5 + $0x24] ss:$8 sps:$4 sm:$0xff]  }
  0x2b   : > { %555 = vmatpush1.bf16.msra.mxu0 %v1748_v21 }
  0x2c   : > { %556 = vmatprep.subr.bf16.mxu0 %v1756_v25  ;;  %v597_v25 = vrot.slane %v595_v11, 6  ;;  %v1806_v11 = vld [vmem:[%s2199_s5 + $0x104] ss:$8 sps:$4 sm:$0xff]  }
  0x2e   : > { %v601_v36 = vor.u32 %v600_v26, %v597_v25  ;;  %v1171_v25 = vrot.slane %v2003_v55, 6  ;;  %v1172_v26 = vrot.slane %v1998_v48, 7  ;;  %v1817_v55 = vld [vmem:[%s2199_s5 + $0x140] ss:$8 sps:$4 sm:$0xff]  }
  0x2f   : > { %557 = vmatpush1.bf16.msra.mxu0 %v1754_v27 }
  0x30   : > { %640 = vmatprep.subr.bf16.mxu0 %v1762_v29 }
  0xf9   : > { %v1669_v40 = vpop.f32.mrb[0].mxu0 }
  0xfa   : > { %v1670_v42 = vpop.f32.mrb[1].mxu0 }
  0xfb   : > { %v1671_v43 = vadd.f32 %v1670_v42, %v1669_v40  ;;  %v1672_v44 = vpop.f32.mrb[2].mxu0  ;;  %v897_v42 = vor.u32 %v896_v32, %v1998_v48  ;;  %v1822_v48 = vld [vmem:[%s2199_s5 + $0x154] ss:$8 sps:$4 sm:$0xff]  }
  0xfc   : > { %v1673_v47 = vpop.f32.mrb[3].mxu0  ;;  %v1786_v44 = vld [vmem:[%s2197_s3 + $0x1c] ss:$12 sps:$4 sm:$0xff]  }
  0xfd   : > { %v441_v49 = vadd.f32 %v1671_v43, %v1520_v41  ;;  %v1778_v41 = vld [vmem:[%s2197_s3] ss:$12 sps:$4 sm:$0xff]   ;;  %v1781_v43 = vld [vmem:[%s2199_s5 + $0xb0] ss:$8 sps:$4 sm:$0xff]   ;;  %vm898_vm1 = vcmp.ne.s16.totalorder %v897_v42, 0 }
  0xff   : > { %v446_v50 = vmax.f32 %v441_v49, 0.0 }
 0x101   : > { %v447_v54 = vpack.c.bf16 %v446_v50, %v446_v50  ;;  %v1789_v50 = vld [vmem:[%s2199_s5 + $0xc4] ss:$8 sps:$4 sm:$0xff]  }
 0x103   : > { %449 = vst.msk [vmem:[#allocation2 + $0x8] sm:$0x3] %vm448_vm6, %v447_v54 }
 0x10a   : > { %v480_v0 = vld [vmem:[#allocation2 + $0x8] sm:$0x1] }
 0x10b   : > { %v2008_v1 = vld [vmem:[#allocation2 + $0x8] sm:$0x3]  ;;  %v517_v5 = vrot.slane %v480_v0, 7  ;;  %v498_v16 = vsel %vm2014_vm11, %v480_v0, 0  ;;  %v1798_v0 = vld [vmem:[%s2199_s5 + $0xe4] ss:$8 sps:$4 sm:$0xff]  }
 0x10c   : > { %v697_v6 = vsel %vm695_vm9, %v2008_v1, 0  ;;  %v799_v18 = vsel %vm797_vm12, %v2008_v1, 0  ;;  %v603_v27 = vshll.u32 %v498_v16, 16  ;;  %v895_v54 = vld [vmem:[#allocation2 + $0x8] sm:$0x7] }
 0x10d   : > { %v711_v9 = vshrl.u32 %v697_v6, 16  ;;  %v518_v10 = vsel %vm515_vm10, %v516_v63, %v517_v5  ;;  %v714_v15 = vshll.u32 %v697_v6, 16  ;;  %v812_v29 = vshrl.u32 %v799_v18, 16  ;;  %v1793_v63 = vld [vmem:[%s2199_s5 + $0xd0] ss:$8 sps:$4 sm:$0xff]  }
 0x10e   : > { %1551 = vmatmul.mubr.msk.bf16.vlgmr.msra.gmra.mrb[4].mxu0 %vm255_vm0, %v518_v10  ;;  %v605_v37 = vrot.slane %v603_v27, 7  ;;  %v815_v47 = vshll.u32 %v799_v18, 16  ;;  %v899_v60 = vsel %vm898_vm1, %v895_v54, 0  ;;  %v1796_v5 = vld [vmem:[%s2199_s5 + $0xe0] ss:$8 sps:$4 sm:$0xff]   ;;  %v993_v12 = vsel %vm992_vm3, %v895_v54, 0 }
 0x10f   : > { %v713_v14 = vrot.slane %v711_v9, 7  ;;  %641 = vmatpush1.bf16.msra.mxu0 %v1760_v4  ;;  %672 = vmatprep.mubr.bf16.mxu0 %v1837_v19  ;;  %v814_v40 = vrot.slane %v812_v29, 7  ;;  %v910_v2 = vshll.u32 %v899_v60, 16  ;;  %v1838_v4 = vmov 0.0   ;;  %v1802_v6 = vld [vmem:[%s2199_s5 + $0xf4] ss:$8 sps:$4 sm:$0xff]  }
 0x110   : > { %642 = vmatprep.subr.bf16.mxu0 %v1768_v8  ;;  %v606_v49 = vsel %vm593_vm15, %v601_v36, %v605_v37  ;;  %v908_v8 = vshrl.u32 %v899_v60, 16  ;;  %v1800_v9 = vld [vmem:[%s2199_s5 + $0xf0] ss:$8 sps:$4 sm:$0xff]   ;;  %v1004_v16 = vshll.u32 %v993_v12, 16  ;;  %v1813_v18 = vld [vmem:[%s2199_s5 + $0x124] ss:$8 sps:$4 sm:$0xff]  }
 0x111   : > { %v716_v21 = vor.u32 %v714_v15, %v713_v14  ;;  %v817_v52 = vor.u32 %v815_v47, %v814_v40  ;;  %v912_v7 = vrot.slane %v910_v2, 1  ;;  %v1804_v14 = vld [vmem:[%s2199_s5 + $0x100] ss:$8 sps:$4 sm:$0xff]   ;;  %v1810_v15 = vld [vmem:[%s2199_s5 + $0x114] ss:$8 sps:$4 sm:$0xff]   ;;  %v1414_v2 = vsub.s32 0, %v1986_v34 }
 0x112   : > { %v1819_v27 = vld [vmem:[%s2199_s5 + $0x144] ss:$8 sps:$4 sm:$0xff]   ;;  %v1084_v29 = vld [vmem:[#allocation2 + $0x8] sm:$0x6]  ;;  %v1828_v37 = vld [vmem:[%s2199_s5 + $0x174] ss:$8 sps:$4 sm:$0xff]  }
 0x113   : > { %v717_v28 = vsel %vm705_vm13, %v709_v13, %v716_v21  ;;  %643 = vmatpush1.bf16.msra.mxu0 %v1766_v17  ;;  %v818_v59 = vsel %vm705_vm13, %v810_v51, %v817_v52  ;;  %v913_v10 = vor.u32 %v912_v7, %v908_v8  ;;  %v1807_v13 = vld [vmem:[%s2197_s3 + $0x38] ss:$12 sps:$4 sm:$0xff]   ;;  %v1002_v21 = vshrl.u32 %v993_v12, 16  ;;  %v1823_v36 = vld [vmem:[%s2199_s5 + $0x160] ss:$8 sps:$4 sm:$0xff]  }
 0x114   : > { %1572 = vmatmul.mubr.msk.bf16.vlgmr.msra.gmra.mrb[0].mxu1 %vm255_vm0, %v717_v28  ;;  %644 = vmatprep.subr.bf16.mxu0 %v1774_v22  ;;  %v1808_v17 = vld [vmem:[%s2199_s5 + $0x110] ss:$8 sps:$4 sm:$0xff]   ;;  %v1811_v22 = vld [vmem:[%s2199_s5 + $0x120] ss:$8 sps:$4 sm:$0xff]   ;;  %v1173_v28 = vor.u32 %v1172_v26, %v1171_v25  ;;  %v1093_v32 = vrot.slane %v1084_v29, 1  ;;  %v1422_v7 = vsub.s32 2, %v1986_v34 }
 0x115   : > { %853 = vmatpush1.bf16.msra.mxu1 %v1769_v20  ;;  %884 = vmatprep.mubr.bf16.mxu1 %v1837_v19  ;;  %v1006_v20 = vrot.slane %v1004_v16, 1  ;;  %v1826_v40 = vld [vmem:[%s2199_s5 + $0x170] ss:$8 sps:$4 sm:$0xff]  }
 0x116   : > { %854 = vmatprep.subr.bf16.mxu1 %v1777_v24  ;;  %v1816_v24 = vld [vmem:[%s2199_s5 + $0x134] ss:$8 sps:$4 sm:$0xff]   ;;  %vm1174_vm4 = vcmp.ne.s16.totalorder %v1173_v28, 0 }
 0x117   : > { %645 = vmatpush1.bf16.msra.mxu0 %v1772_v30  ;;  %v1007_v23 = vor.u32 %v1006_v20, %v1002_v21  ;;  %v1170_v30 = vld [vmem:[#allocation2 + $0x8] sm:$0xe] }
 0x118   : > { %1329 = vmatprep.subr.bf16.mxu0 %v1780_v35  ;;  %v1175_v35 = vsel %vm1174_vm4, %v1170_v30, 0 }
 0x119   : > { %855 = vmatpush1.bf16.msra.mxu1 %v1775_v33  ;;  %v1825_v33 = vld [vmem:[%s2199_s5 + $0x164] ss:$8 sps:$4 sm:$0xff]   ;;  %v1187_v39 = vshll.u32 %v1175_v35, 16 }
 0x11a   : > { %856 = vmatprep.subr.bf16.mxu1 %v1783_v38  ;;  %1558 = vmatmul.mubr.msk.bf16.vlgmr.msra.gmra.mrb[4].mxu0 %vm255_vm0, %v606_v49  ;;  %v1184_v38 = vshrl.u32 %v1175_v35, 16 }
 0x11b   : > { %1330 = vmatpush1.bf16.msra.mxu0 %v1778_v41  ;;  %1361 = vmatprep.mubr.bf16.mxu0 %v1837_v19  ;;  %v1189_v42 = vrot.slane %v1187_v39, 2 }
 0x11c   : > { %1331 = vmatprep.subr.bf16.mxu0 %v1786_v44  ;;  %v1186_v41 = vrot.slane %v1184_v38, 1 }
 0x11d   : > { %857 = vmatpush1.bf16.msra.mxu1 %v1781_v43 }
 0x11e   : > { %947 = vmatprep.subr.bf16.mxu1 %v1789_v50  ;;  %v1190_v43 = vor.u32 %v1189_v42, %v1186_v41 }
 0x11f   : > { %1332 = vmatpush1.bf16.msra.mxu0 %v1784_v53 }
 0x120   : > { %1585 = vmatmul.mubr.msk.bf16.vlgmr.msra.gmra.mrb[0].mxu1 %vm255_vm0, %v818_v59  ;;  %1333 = vmatprep.subr.bf16.mxu0 %v1792_v57 }
 0x121   : > { %948 = vmatpush1.bf16.msra.mxu1 %v1787_v56  ;;  %979 = vmatprep.mubr.bf16.mxu1 %v1837_v19 }
 0x122   : > { %949 = vmatprep.subr.bf16.mxu1 %v1795_v58 }
 0x123   : > { %1334 = vmatpush1.bf16.msra.mxu0 %v1790_v61 }
 0x124   : > { %1679 = vmatprep.subr.bf16.mxu0 %v1838_v4 }
 0x125   : > { %950 = vmatpush1.bf16.msra.mxu1 %v1793_v63 }
 0x126   : > { %951 = vmatprep.subr.bf16.mxu1 %v1798_v0  ;;  %1647 = vmatmul.mubr.msk.bf16.vlgmr.msra.gmra.mrb[8].mxu0 %vm255_vm0, %v2008_v1 }
 0x127   : > { %1680 = vmatpush3.bf16.msra.mxu0 %v1799_v3  ;;  %1685 = vmatprep.mubr.msk.bf16.mxu0 %vm1839_vm2, %v1838_v4  ;;  %v1410_v3 = vld [vmem:[%s2198_s4] sm:$0x7] }
 0x128   : > { %1681 = vmatprep.subr.bf16.mxu0 %v1838_v4 }
 0x129   : > { %952 = vmatpush1.bf16.msra.mxu1 %v1796_v5  ;;  %v1419_v5 = vrot.slane %v1410_v3, %v1418_v45 }
 0x12a   : > { %1041 = vmatprep.subr.bf16.mxu1 %v1802_v6 }
 0x12b   : > { %1682 = vmatpush3.bf16.msra.mxu0 %v1803_v46 }
 0x12c   : > { %1598 = vmatmul.mubr.msk.bf16.vlgmr.msra.gmra.mrb[0].mxu1 %vm255_vm0, %v913_v10  ;;  %1683 = vmatprep.subr.bf16.mxu0 %v1838_v4  ;;  %v1415_v4 = vrot.slane %v1410_v3, %v1414_v2 }
 0x12d   : > { %1042 = vmatpush1.bf16.msra.mxu1 %v1800_v9  ;;  %1073 = vmatprep.mubr.bf16.mxu1 %v1837_v19  ;;  %v1841_v9 = vmov 1983009808  }
 0x12e   : > { %1043 = vmatprep.subr.bf16.mxu1 %v1806_v11  ;;  %v1441_v10 = vunpack.c.l.s4 %v1841_v9 }
 0x12f   : > { %1684 = vmatpush3.bf16.msra.mxu0 %v1807_v13  ;;  %v1423_v13 = vrot.slane %v1410_v3, %v1422_v7 }
 0x131   : > { %1044 = vmatpush1.bf16.msra.mxu1 %v1804_v14 }
 0x132   : > { %1045 = vmatprep.subr.bf16.mxu1 %v1810_v15  ;;  %1686 = vmatmul.mubr.msk.bf16.vlgmr.msra.gmra.mrb[12].mxu0 %vm255_vm0, %v2008_v1  ;;  %v1814_v1 = vld [vmem:[%s2199_s5 + $0x130] ss:$8 sps:$4 sm:$0xff]  }
 0x135   : > { %1046 = vmatpush1.bf16.msra.mxu1 %v1808_v17  ;;  %v1442_v17 = vunpack.c.0.s8 %v1441_v10 }
 0x136   : > { %1127 = vmatprep.subr.bf16.mxu1 %v1813_v18 }
 0x138   : > { %1611 = vmatmul.mubr.msk.bf16.vlgmr.msra.gmra.mrb[0].mxu1 %vm255_vm0, %v1007_v23  ;;  %v1445_v23 = vsub.s32 %v1442_v17, %v1986_v34 }
 0x139   : > { %1128 = vmatpush1.bf16.msra.mxu1 %v1811_v22  ;;  %1159 = vmatprep.mubr.bf16.mxu1 %v1837_v19 }
 0x13a   : > { %1129 = vmatprep.subr.bf16.mxu1 %v1816_v24 }
 0x13d   : > { %1130 = vmatpush1.bf16.msra.mxu1 %v1814_v1 }
 0x13e   : > { %1131 = vmatprep.subr.bf16.mxu1 %v1819_v27 }
 0x141   : > { %1132 = vmatpush1.bf16.msra.mxu1 %v1817_v55 }
 0x142   : > { %1224 = vmatprep.subr.bf16.mxu1 %v1822_v48 }
 0x144   : > { %1624 = vmatmul.mubr.msk.bf16.vlgmr.msra.gmra.mrb[0].mxu1 %vm255_vm0, %v1093_v32 }
 0x145   : > { %1225 = vmatpush1.bf16.msra.mxu1 %v1820_v31  ;;  %1256 = vmatprep.mubr.bf16.mxu1 %v1837_v19 }
 0x146   : > { %1226 = vmatprep.subr.bf16.mxu1 %v1825_v33 }
 0x149   : > { %1227 = vmatpush1.bf16.msra.mxu1 %v1823_v36 }
 0x14a   : > { %1228 = vmatprep.subr.bf16.mxu1 %v1828_v37 }
 0x14d   : > { %1229 = vmatpush1.bf16.msra.mxu1 %v1826_v40 }
 0x150   : > { %1637 = vmatmul.mubr.msk.bf16.vlgmr.msra.gmra.mrb[0].mxu1 %vm255_vm0, %v1190_v43  ;;  %vm1273_vm0 = vcmask 523264  }
 0x1ed   : > { %v674_v19 = vpop.f32.mrb[4].mxu0 }
 0x1ee   : > { %v676_v44 = vpop.f32.mrb[5].mxu0 }
 0x1ef   : > { %v678_v47 = vpop.f32.mrb[6].mxu0 }
 0x1f0   : > { %v679_v49 = vpop.f32.mrb[7].mxu0 }
 0x1f9   : > { %v1363_v50 = vpop.f32.mrb[8].mxu0 }
 0x1fa   : > { %v1365_v51 = vpop.f32.mrb[9].mxu0  ;;  %v1427_v8 = vadd.f32 %v1415_v4, %v1363_v50 }
 0x1fb   : > { %v1367_v52 = vpop.f32.mrb[10].mxu0 }
 0x1fc   : > { %v1368_v53 = vpop.f32.mrb[11].mxu0  ;;  %v1430_v16 = vmax.f32 %v1427_v8, 0.0 }
 0x205   : > { %v1404_v54 = vpop.f32.mrb[12].mxu0 }
 0x206   : > { %v1687_v56 = vpop.f32.mrb[13].mxu0 }
 0x207   : > { %v1407_v57 = vpop.f32.mrb[14].mxu0 }
 0x208   : > { %v1688_v58 = vpop.f32.mrb[15].mxu0 }
 0x223   : > { %v1258_v59 = vpop.f32.mrb[0].mxu1 }
 0x224   : > { %v1689_v60 = vadd.f32 %v1258_v59, %v674_v19  ;;  %v1260_v61 = vpop.f32.mrb[1].mxu1 }
 0x225   : > { %v1690_v62 = vadd.f32 %v1260_v61, %v676_v44  ;;  %v1262_v63 = vpop.f32.mrb[2].mxu1 }
 0x226   : > { %1269 = vrot.lane.b32.xlu0 %v1689_v60, %s1840_s19  ;;  %v1263_v0 = vpop.f32.mrb[3].mxu1 }
 0x22a   : > { %1271 = vrot.lane.b32.xlu0 %v1690_v62, %s1840_s19 }
 0x298   : > { %v1270_v6 = vpop.permute.xlu0 %1269 }
 0x299   : > { %v1277_v46 = vsel %vm1273_vm0, 0.0, %v1270_v6 }
 0x29a   : > { %v1366_v11 = vadd.f32 %v1365_v51, %v1277_v46 }
 0x29c   : > { %v1428_v12 = vadd.f32 %v1419_v5, %v1366_v11  ;;  %v1272_v14 = vpop.permute.xlu0 %1271 }
 0x29d   : > { %v1274_v15 = vsel %vm1273_vm0, %v1270_v6, %v1272_v14 }
 0x29e   : > { %v1431_v18 = vmax.f32 %v1428_v12, 0.0  ;;  %v1405_v20 = vadd.f32 %v1404_v54, %v1274_v15 }
 0x2a0   : > { %v1649_v21 = vpack.c.bf16 %v1431_v18, %v1430_v16  ;;  %v1429_v22 = vadd.f32 %v1423_v13, %v1405_v20 }
 0x2a2   : > { %v1432_v24 = vmax.f32 %v1429_v22, 0.0  ;;  %v1446_v26 = vrot.slane %v1649_v21, %v1445_v23 }
 0x2a4   : > { %v1435_v25 = vpack.c.bf16 %v1432_v24, %v1432_v24 }
 0x2a6   : > { %v1453_v1 = vrot.slane %v1435_v25, %v1445_v23 }
 0x2a8   : > { %v1454_v27 = vcombine.low %v1446_v26, %v1453_v1 }
 0x2aa   : > { %1456 = vst [vmem:[%s251_s27] sm:$0x3f] %v1454_v27 }
 0x2ab PF: > { %s16_s21 = sadd.s32 1, %s1835_s21  }
 0x2ac   : > { %p13_p4 = scmp.ge.s32.totalorder %s16_s21, 4  }
 0x2ae   :  { %15 = sbr.rel (!%p13_p4) target bundleno = 1 (0x1), region = 81 }

// kernel: squeezenet11_forward.16
= control target key start
LH: loop header
LB: loop body
LE: loop exit
PB: predicated region body
PF: predicated region fallthrough
CT: control target
= control target key end

     0   :  { %s2035_s21 = smov 0   ;;  %s2399_s0 = inlined_call_operand.vmem [shape: bf16[2,4,384], index: 0, kind: input, shape index: {}]   ;;  %s2400_s1 = inlined_call_operand.vmem [shape: bf16[384,48], index: 1, kind: input, shape index: {}]   ;;  %s2401_s2 = inlined_call_operand.vmem [shape: f32[1,48], index: 2, kind: input, shape index: {}]   ;;  %s2402_s3 = inlined_call_operand.vmem [shape: bf16[48,384], index: 3, kind: input, shape index: {}]   ;;  %s2403_s4 = inlined_call_operand.vmem [shape: f32[1,384], index: 4, kind: input, shape index: {}]   ;;  %s2404_s5 = inlined_call_operand.vmem [shape: bf16[8,48,192], index: 5, kind: input, shape index: {}]   ;;  %s2405_s6 = inlined_call_operand.vmem [shape: bf16[2,4,384], index: 6, kind: output, shape index: {}]  }
   0x1 LB: > { %s1625_s22 = sadd.s32 4294967295, %s1993_s21   ;;  %p1629_p0 = scmp.ge.s32.totalorder %s1993_s21, 1  ;;  %s1993_s21 = sphi %s2035_s21, %s16_s21  }
   0x2   : > { %p212_p1 = scmp.lt.s32.totalorder %s1993_s21, 3 }
   0x4   : > { %p213_p2 = pnand %p1629_p0, %p212_p1 }
   0x5   : > { %v1878_v0 = vld [vmem:[%s2400_s1 + $0x40] sm:$0xff] (!%p213_p2)   ;;  %v1880_v2 = vld [vmem:[%s2400_s1 + $0x48] sm:$0xff] (!%p213_p2)   ;;  %v1882_v4 = vld [vmem:[%s2400_s1 + $0x50] sm:$0xff] (!%p213_p2)   ;;  %p242_p3 = scmp.lt.s32.totalorder (!%p213_p2), %s1625_s22, 1  ;;  %v320_v9 = vlaneseq (!%p213_p2)  ;;  %v1995_v12 = vmov (!%p213_p2), 1983009808  }
   0x6   : > { %216 = sbr.rel (%p213_p2) target bundleno = 729 (0x2d9), region = 44  ;;  %v1879_v1 = vld [vmem:[%s2400_s1] sm:$0xff] (!%p213_p2)   ;;  %1771 = vmatprep.subr.bf16.mxu1 (!%p213_p2), %v1878_v0  ;;  %v1881_v3 = vld [vmem:[%s2400_s1 + $0x8] sm:$0xff] (!%p213_p2)   ;;  %v1883_v5 = vld [vmem:[%s2400_s1 + $0x10] sm:$0xff] (!%p213_p2)   ;;  %v318_v13 = vunpack.c.l.s4 (!%p213_p2), %v1995_v12  ;;  %v1996_v26 = vmov (!%p213_p2), 0.0   ;;  %vm1997_vm0 = vmmov (!%p213_p2), 0  }
   0x7   : > { %1772 = vmatpush3.bf16.msra.mxu1 (!%p213_p2), %v1879_v1  ;;  %v1884_v6 = vld [vmem:[%s2400_s1 + $0x58] sm:$0xff] (!%p213_p2)   ;;  %v1886_v8 = vld [vmem:[%s2400_s1 + $0x60] sm:$0xff] (!%p213_p2)   ;;  %v1888_v11 = vld [vmem:[%s2400_s1 + $0x68] sm:$0xff] (!%p213_p2)   ;;  %v2084_v14 = vshrl.u32 (!%p213_p2), %v320_v9, 7  ;;  %v1998_v38 = vmov (!%p213_p2), 0   ;;  %vm255_vm1 = vcmask (!%p213_p2), 392192  }
   0x8   : > { %1773 = vmatprep.subr.bf16.mxu1 (!%p213_p2), %v1880_v2  ;;  %v1885_v7 = vld [vmem:[%s2400_s1 + $0x18] sm:$0xff] (!%p213_p2)   ;;  %v1887_v10 = vld [vmem:[%s2400_s1 + $0x20] sm:$0xff] (!%p213_p2)   ;;  %v1889_v15 = vld [vmem:[%s2400_s1 + $0x28] sm:$0xff] (!%p213_p2)   ;;  %v319_v17 = vunpack.c.0.s8 (!%p213_p2), %v318_v13  ;;  %697 = vmatprep.mubr.bf16.mxu0 (!%p213_p2), %v1998_v38  ;;  %256 = vst.msk [vmem:[#allocation2] sm:$0xff] (!%p213_p2), %vm255_vm1, %v1998_v38  ;;  %vm257_vm2 = vcmask (!%p213_p2), 392194   ;;  %vm561_vm7 = vcmask (!%p213_p2), 386048  }
   0x9   : > { %v1890_v16 = vld [vmem:[%s2400_s1 + $0x70] sm:$0xff] (!%p213_p2)   ;;  %v1892_v22 = vld [vmem:[%s2400_s1 + $0x78] sm:$0xff] (!%p213_p2)   ;;  %v1895_v25 = vld [vmem:[%s2400_s1 + $0x80] sm:$0xff] (!%p213_p2)   ;;  %258 = vst.msk [vmem:[#allocation2 + $0x8] sm:$0xfc] (!%p213_p2), %vm257_vm2, %v1998_v38  ;;  %v569_v55 = vand.u32 (!%p213_p2), 1, %v2084_v14 }
   0xa   : > { %v2093_v19 = vsub.s32 (!%p213_p2), %v319_v17, %v2084_v14  ;;  %v1891_v20 = vld [vmem:[%s2400_s1 + $0x30] sm:$0xff] (!%p213_p2)   ;;  %v1893_v23 = vld [vmem:[%s2400_s1 + $0x38] sm:$0xff] (!%p213_p2)   ;;  %v1896_v27 = vld [vmem:[%s2400_s1 + $0x88] sm:$0xff] (!%p213_p2)   ;;  %vm628_vm9 = vcmask (!%p213_p2), 1040384   ;;  %vm706_vm12 = vsmask.f32 (!%p213_p2), 1280 }
   0xb   : > { %1774 = vmatpush3.bf16.msra.mxu1 (!%p213_p2), %v1881_v3  ;;  %v1897_v28 = vld [vmem:[%s2400_s1 + $0x90] sm:$0xff] (!%p213_p2)   ;;  %v1898_v29 = vld [vmem:[%s2400_s1 + $0x98] sm:$0xff] (!%p213_p2)   ;;  %v1899_v30 = vld [vmem:[%s2400_s1 + $0xa0] sm:$0xff] (!%p213_p2)   ;;  %vm577_vm3 = vcmp.ne.s32.totalorder (!%p213_p2), %v569_v55, 0  ;;  %vm578_vm5 = vcmp.ne.s32.totalorder (!%p213_p2), %v569_v55, 1  ;;  %s1999_s20 = smov (!%p213_p2), 64  }
   0xc   : > { %1775 = vmatprep.subr.bf16.mxu1 (!%p213_p2), %v1882_v4  ;;  %v1900_v31 = vld [vmem:[%s2400_s1 + $0xa8] sm:$0xff] (!%p213_p2)   ;;  %v1901_v32 = vld [vmem:[%s2400_s1 + $0xb0] sm:$0xff] (!%p213_p2)   ;;  %v1902_v34 = vld [vmem:[%s2400_s1 + $0xb8] sm:$0xff] (!%p213_p2)   ;;  %vm818_vm15 = vsmask.f32 (!%p213_p2), 256 }
   0xd   : > { %s2409_s22 = smov (!%p242_p3, %s1625_s22), 1  ;;  %v1905_v36 = vld [vmem:[%s2402_s3 + $0x4] ss:$12 sps:$4 sm:$0xff]   ;;  %v1903_v37 = vld [vmem:[%s2402_s3] ss:$12 sps:$4 sm:$0xff]   ;;  %vm596_vm4 = vmpackc.low %vm577_vm3, %vm577_vm3 }
   0xe   : > { %s1864_s17 = smul.u32 6, %s2409_s22  ;;  %v1906_v39 = vld [vmem:[%s2404_s5 + $0x34] ss:$8 sps:$4 sm:$0xff]   ;;  %v1908_v41 = vld [vmem:[%s2404_s5 + $0x30] ss:$8 sps:$4 sm:$0xff]   ;;  %v597_v56 = vsel %vm596_vm4, 65537, %v1998_v38  ;;  %vm796_vm6 = vmpackc.low %vm578_vm5, %vm578_vm5 }
   0xf   : > { %1776 = vmatpush3.bf16.msra.mxu1 %v1883_v5  ;;  %v1911_v40 = vld [vmem:[%s2402_s3 + $0x1c] ss:$12 sps:$4 sm:$0xff]   ;;  %v1909_v42 = vld [vmem:[%s2402_s3 + $0x18] ss:$12 sps:$4 sm:$0xff]   ;;  %665 = vmatprep.subr.bf16.mxu0 %v1906_v39  ;;  %v1917_v46 = vld [vmem:[%s2402_s3 + $0x34] ss:$12 sps:$4 sm:$0xff]   ;;  %v1657_v57 = vcombine.low %v597_v56, %v597_v56 }
  0x10   : > { %1777 = vmatprep.subr.bf16.mxu1 %v1884_v6  ;;  %s246_s26 = scalar_lea.vmem %s2399_s0, %s1864_s17  ;;  %666 = vmatpush1.bf16.msra.mxu0 %v1908_v41  ;;  %v1912_v43 = vld [vmem:[%s2404_s5 + $0x44] ss:$8 sps:$4 sm:$0xff]   ;;  %v1914_v44 = vld [vmem:[%s2404_s5 + $0x40] ss:$8 sps:$4 sm:$0xff]   ;;  %v1915_v45 = vld [vmem:[%s2402_s3 + $0x30] ss:$12 sps:$4 sm:$0xff]   ;;  %s251_s27 = scalar_lea.vmem %s2405_s6, %s1864_s17 }
  0x11   : > { %v259_v18 = vld [vmem:[%s246_s26] sm:$0x3f]  ;;  %v1918_v47 = vld [vmem:[%s2404_s5 + $0x54] ss:$8 sps:$4 sm:$0xff]   ;;  %667 = vmatprep.subr.bf16.mxu0 %v1912_v43  ;;  %v1920_v48 = vld [vmem:[%s2404_s5 + $0x50] ss:$8 sps:$4 sm:$0xff]  }
  0x12   : > { %v323_v21 = vrot.slane %v259_v18, %v2093_v19  ;;  %v316_v33 = vcombine.high %v259_v18, %v259_v18  ;;  %v1924_v49 = vld [vmem:[%s2404_s5 + $0x4] ss:$8 sps:$4 sm:$0xff]   ;;  %v1632_v58 = vld [vmem:[%s2401_s2] ss:$0 sm:$0xff]  ;;  %v2190_v60 = vshrl.u32 %v1657_v57, 16  ;;  %v2192_v61 = vshll.u32 %v1657_v57, 16 }
  0x13   : > { %1778 = vmatpush3.bf16.msra.mxu1 %v1885_v7  ;;  %v797_v6 = vsel %vm796_vm6, 65537, %v1998_v38  ;;  %v592_v12 = vld [vmem:[#allocation2] sm:$0xc0]  ;;  %v1921_v13 = vld [vmem:[%s2402_s3 + $0x8] ss:$12 sps:$4 sm:$0xff]  }
  0x14   : > { %1779 = vmatprep.subr.bf16.mxu1 %v1886_v8  ;;  %v331_v24 = vcombine.high %v323_v21, %v323_v21  ;;  %v330_v35 = vrot.slane %v316_v33, %v2093_v19  ;;  %668 = vmatpush1.bf16.msra.mxu0 %v1914_v44  ;;  %v603_v4 = vrot.slane %v2190_v60, 1  ;;  %v606_v5 = vrot.slane %v2192_v61, 2  ;;  %v1926_v33 = vld [vmem:[%s2404_s5 + $0x10] ss:$8 sps:$4 sm:$0xff]   ;;  %v1935_v41 = vld [vmem:[%s2404_s5 + $0x64] ss:$8 sps:$4 sm:$0xff]  }
  0x15   : > { %669 = vmatprep.subr.bf16.mxu0 %v1918_v47  ;;  %v1678_v8 = vcombine.low %v797_v6, %v797_v6  ;;  %v1939_v56 = vld [vmem:[%s2404_s5 + $0x80] ss:$8 sps:$4 sm:$0xff]   ;;  %v1944_v57 = vld [vmem:[%s2404_s5 + $0x94] ss:$8 sps:$4 sm:$0xff]  }
  0x16   : > { %511 = vmatprep.mubr.bf16.mxu1 %v331_v24  ;;  %v607_v9 = vor.u32 %v606_v5, %v603_v4  ;;  %vm2213_vm10 = vcmp.ne.s16.totalorder %v603_v4, 0  ;;  %v1925_v24 = vld [vmem:[%s2402_s3 + $0x20] ss:$12 sps:$4 sm:$0xff]   ;;  %v1950_v6 = vld [vmem:[%s2404_s5 + $0xb4] ss:$8 sps:$4 sm:$0xff]  }
  0x17   : > { %1780 = vmatpush3.bf16.msra.mxu1 %v1887_v10  ;;  %v2197_v10 = vld [vmem:[#allocation2] sm:$0x80]  ;;  %v1945_v5 = vld [vmem:[%s2404_s5 + $0xa0] ss:$8 sps:$4 sm:$0xff]  }
  0x18   : > { %1781 = vmatprep.subr.bf16.mxu1 %v1888_v11  ;;  %670 = vmatpush1.bf16.msra.mxu0 %v1920_v48  ;;  %v2199_v11 = vshll.u32 %v1678_v8, 16  ;;  %vm608_vm8 = vcmp.ne.s16.totalorder %v607_v9, 0 }
  0x19   : > { %753 = vmatprep.subr.bf16.mxu0 %v1924_v49  ;;  %v610_v18 = vsel %vm608_vm8, %v592_v12, 0 }
  0x1b   : > { %1782 = vmatpush3.bf16.msra.mxu1 %v1889_v15  ;;  %v629_v15 = vrot.slane %v2197_v10, 7 }
  0x1c   : > { %1783 = vmatprep.subr.bf16.mxu1 %v1890_v16 }
  0x1f   : > { %1784 = vmatpush3.bf16.msra.mxu1 %v1891_v20  ;;  %v803_v20 = vrot.slane %v2199_v11, 1 }
  0x20   : > { %1785 = vmatprep.subr.bf16.mxu1 %v1892_v22 }
  0x21   : > { %vm807_vm13 = vcmp.ne.s16.totalorder %v803_v20, 0 }
  0x22   : > { %v809_v49 = vsel %vm807_vm13, %v2197_v10, 0 }
  0x23   : > { %1786 = vmatpush3.bf16.msra.mxu1 %v1893_v23 }
  0x24   : > { %1806 = vmatprep.subr.bf16.mxu1 %v1996_v26 }
  0x26   : > { %512 = vmatmul.mubr.bf16.vlgmr.msra.gmra.mrb[0].mxu1 %v323_v21  ;;  %v1922_v21 = vld [vmem:[%s2404_s5] ss:$8 sps:$4 sm:$0xff]  }
  0x27   : > { %1807 = vmatpush3.bf16.msra.mxu1 %v1895_v25  ;;  %1822 = vmatprep.mubr.msk.bf16.mxu1 %vm1997_vm0, %v1996_v26  ;;  %v1928_v25 = vld [vmem:[%s2404_s5 + $0x14] ss:$8 sps:$4 sm:$0xff]  }
  0x28   : > { %1808 = vmatprep.subr.bf16.mxu1 %v1996_v26 }
  0x2b   : > { %1809 = vmatpush3.bf16.msra.mxu1 %v1896_v27  ;;  %v2225_v27 = vshrl.u32 %v1678_v8, 16 }
  0x2c   : > { %1810 = vmatprep.subr.bf16.mxu1 %v1996_v26 }
  0x2d   : > { %v1009_v4 = vrot.slane %v2225_v27, 7 }
  0x2f   : > { %1811 = vmatpush3.bf16.msra.mxu1 %v1897_v28  ;;  %v1010_v9 = vor.u32 %v1009_v4, %v2199_v11 }
  0x30   : > { %1812 = vmatprep.subr.bf16.mxu1 %v1996_v26 }
  0x31   : > { %vm1011_vm2 = vcmp.ne.s16.totalorder %v1010_v9, 0 }
  0x33   : > { %1813 = vmatpush3.bf16.msra.mxu1 %v1898_v29  ;;  %v708_v29 = vshrl.u32 %v610_v18, 16 }
  0x34   : > { %1814 = vmatprep.subr.bf16.mxu1 %v1996_v26 }
  0x37   : > { %1815 = vmatpush3.bf16.msra.mxu1 %v1899_v30  ;;  %v711_v30 = vshll.u32 %v610_v18, 16  ;;  %v1951_v18 = vld [vmem:[%s2404_s5 + $0xc0] ss:$8 sps:$4 sm:$0xff]  }
  0x38   : > { %1816 = vmatprep.subr.bf16.mxu1 %v1996_v26 }
  0x39   : > { %v713_v39 = vrot.slane %v711_v30, 7  ;;  %v1962_v30 = vld [vmem:[%s2404_s5 + $0xf4] ss:$8 sps:$4 sm:$0xff]  }
  0x3b   : > { %1817 = vmatpush3.bf16.msra.mxu1 %v1900_v31 }
  0x3c   : > { %1818 = vmatprep.subr.bf16.mxu1 %v1996_v26 }
  0x3f   : > { %1819 = vmatpush3.bf16.msra.mxu1 %v1901_v32  ;;  %v806_v32 = vor.u32 %v2225_v27, %v803_v20  ;;  %v1956_v20 = vld [vmem:[%s2404_s5 + $0xd4] ss:$8 sps:$4 sm:$0xff]  }
  0x40   : > { %1820 = vmatprep.subr.bf16.mxu1 %v1996_v26 }
  0x41   : > { %vm808_vm11 = vcmp.ne.s16.totalorder %v806_v32, 0 }
  0x43   : > { %1821 = vmatpush3.bf16.msra.mxu1 %v1902_v34  ;;  %v1929_v34 = vld [vmem:[%s2402_s3 + $0x38] ss:$12 sps:$4 sm:$0xff]  }
  0x44   : > { %1442 = vmatprep.subr.bf16.mxu1 %v1905_v36 }
  0x46   : > { %1823 = vmatmul.mubr.bf16.vlgmr.msra.gmra.mrb[4].mxu1 %v330_v35  ;;  %v1932_v35 = vld [vmem:[%s2404_s5 + $0x24] ss:$8 sps:$4 sm:$0xff]  }
  0x47   : > { %1443 = vmatpush1.bf16.msra.mxu1 %v1903_v37  ;;  %1474 = vmatprep.mubr.bf16.mxu1 %v1998_v38  ;;  %v710_v37 = vrot.slane %v708_v29, 6 }
  0x48   : > { %1444 = vmatprep.subr.bf16.mxu1 %v1911_v40  ;;  %v1930_v40 = vld [vmem:[%s2404_s5 + $0x20] ss:$8 sps:$4 sm:$0xff]  }
  0x4b   : > { %1445 = vmatpush1.bf16.msra.mxu1 %v1909_v42  ;;  %v714_v42 = vor.u32 %v713_v39, %v710_v37  ;;  %v1968_v37 = vld [vmem:[%s2404_s5 + $0x114] ss:$8 sps:$4 sm:$0xff]  }
  0x4c   : > { %1446 = vmatprep.subr.bf16.mxu1 %v1917_v46  ;;  %v1938_v46 = vld [vmem:[%s2404_s5 + $0x74] ss:$8 sps:$4 sm:$0xff]  }
  0x4f   : > { %1447 = vmatpush1.bf16.msra.mxu1 %v1915_v45  ;;  %v1933_v45 = vld [vmem:[%s2404_s5 + $0x60] ss:$8 sps:$4 sm:$0xff]  }
  0x50   : > { %1826 = vmatprep.subr.bf16.mxu1 %v1996_v26 }
  0xf9   : > { %v1787_v50 = vpop.f32.mrb[0].mxu1 }
  0xfa   : > { %v1788_v51 = vpop.f32.mrb[1].mxu1 }
  0xfb   : > { %v1789_v52 = vadd.f32 %v1788_v51, %v1787_v50  ;;  %v1790_v53 = vpop.f32.mrb[2].mxu1  ;;  %v1936_v51 = vld [vmem:[%s2404_s5 + $0x70] ss:$8 sps:$4 sm:$0xff]  }
  0xfc   : > { %v1791_v54 = vpop.f32.mrb[3].mxu1 }
  0xfd   : > { %v514_v59 = vadd.f32 %v1789_v52, %v1632_v58  ;;  %v1941_v52 = vld [vmem:[%s2404_s5 + $0x84] ss:$8 sps:$4 sm:$0xff]   ;;  %v820_v54 = vshrl.u32 %v809_v49, 16 }
  0xfe   : > { %v1977_v49 = vld [vmem:[%s2404_s5 + $0x144] ss:$8 sps:$4 sm:$0xff]  }
  0xff   : > { %v822_v58 = vrot.slane %v820_v54, 7 }
 0x119   : > { %v553_v62 = vpop.f32.mrb[4].mxu1 }
 0x11a   : > { %v554_v63 = vadd.f32 %v553_v62, %v514_v59  ;;  %v1824_v0 = vpop.f32.mrb[5].mxu1 }
 0x11b   : > { %v556_v1 = vpop.f32.mrb[6].mxu1  ;;  %v1947_v0 = vld [vmem:[%s2404_s5 + $0xa4] ss:$8 sps:$4 sm:$0xff]  }
 0x11c   : > { %v559_v2 = vmax.f32 %v554_v63, 0.0  ;;  %v1825_v3 = vpop.f32.mrb[7].mxu1  ;;  %v1942_v63 = vld [vmem:[%s2404_s5 + $0x90] ss:$8 sps:$4 sm:$0xff]  }
 0x11e   : > { %v560_v7 = vpack.c.bf16 %v559_v2, %v559_v2 }
 0x120   : > { %562 = vst.msk [vmem:[#allocation2 + $0x8] sm:$0x3] %vm561_vm7, %v560_v7 }
 0x127   : > { %v2205_v16 = vld [vmem:[#allocation2 + $0x8] sm:$0x3] }
 0x128   : > { %v593_v17 = vld [vmem:[#allocation2 + $0x8] sm:$0x1]  ;;  %1766 = vmatmul.mubr.msk.bf16.vlgmr.msra.gmra.mrb[8].mxu1 %vm255_vm1, %v2205_v16  ;;  %v810_v44 = vsel %vm808_vm11, %v2205_v16, 0 }
 0x129   : > { %v630_v23 = vrot.slane %v593_v17, 7  ;;  %1827 = vmatpush3.bf16.msra.mxu1 %v1921_v13  ;;  %1832 = vmatprep.mubr.msk.bf16.mxu1 %vm1997_vm0, %v1996_v26  ;;  %v611_v31 = vsel %vm2213_vm10, %v593_v17, 0  ;;  %v824_v47 = vshrl.u32 %v810_v44, 16  ;;  %v827_v55 = vshll.u32 %v810_v44, 16  ;;  %v1953_v13 = vld [vmem:[%s2404_s5 + $0xc4] ss:$8 sps:$4 sm:$0xff]  }
 0x12a   : > { %1828 = vmatprep.subr.bf16.mxu1 %v1996_v26  ;;  %v716_v36 = vshll.u32 %v611_v31, 16  ;;  %v1008_v17 = vld [vmem:[#allocation2 + $0x8] sm:$0x7] }
 0x12b   : > { %v631_v28 = vsel %vm628_vm9, %v629_v15, %v630_v23  ;;  %v826_v53 = vrot.slane %v824_v47, 7  ;;  %v1012_v22 = vsel %vm1011_vm2, %v1008_v17, 0  ;;  %v1103_v23 = vrot.slane %v2190_v60, 7  ;;  %v1969_v44 = vld [vmem:[%s2404_s5 + $0x120] ss:$8 sps:$4 sm:$0xff]  }
 0x12c   : > { %1670 = vmatmul.mubr.msk.bf16.vlgmr.msra.gmra.mrb[0].mxu0 %vm255_vm1, %v631_v28  ;;  %v718_v43 = vrot.slane %v716_v36, 7  ;;  %v1023_v28 = vshll.u32 %v1012_v22, 16  ;;  %v1021_v32 = vshrl.u32 %v1012_v22, 16  ;;  %v1963_v36 = vld [vmem:[%s2404_s5 + $0x100] ss:$8 sps:$4 sm:$0xff]   ;;  %v1285_v47 = vrot.slane %v2199_v11, 7 }
 0x12d   : > { %754 = vmatpush1.bf16.msra.mxu0 %v1922_v21  ;;  %785 = vmatprep.mubr.bf16.mxu0 %v1998_v38  ;;  %v829_v59 = vor.u32 %v827_v55, %v826_v53  ;;  %v1104_v29 = vor.u32 %v1103_v23, %v2192_v61  ;;  %v1980_v11 = vld [vmem:[%s2404_s5 + $0x154] ss:$8 sps:$4 sm:$0xff]   ;;  %v1978_v53 = vld [vmem:[%s2404_s5 + $0x150] ss:$8 sps:$4 sm:$0xff]   ;;  %v1983_v55 = vld [vmem:[%s2404_s5 + $0x164] ss:$8 sps:$4 sm:$0xff]  }
 0x12e   : > { %1829 = vmatpush3.bf16.msra.mxu1 %v1925_v24  ;;  %755 = vmatprep.subr.bf16.mxu0 %v1928_v25  ;;  %v719_v48 = vsel %vm706_vm12, %v714_v42, %v718_v43  ;;  %v1954_v24 = vld [vmem:[%s2404_s5 + $0xd0] ss:$8 sps:$4 sm:$0xff]   ;;  %v1959_v25 = vld [vmem:[%s2404_s5 + $0xe4] ss:$8 sps:$4 sm:$0xff]   ;;  %v1025_v31 = vrot.slane %v1023_v28, 1  ;;  %v1535_v23 = vsub.s32 2, %v2084_v14 }
 0x12f   : > { %1830 = vmatprep.subr.bf16.mxu1 %v1996_v26  ;;  %v907_v26 = vrot.slane %v2192_v61, 1  ;;  %v830_v2 = vsel %vm818_vm15, %v822_v58, %v829_v59  ;;  %vm1105_vm3 = vcmp.ne.s16.totalorder %v1104_v29, 0  ;;  %v1986_v58 = vld [vmem:[%s2404_s5 + $0x174] ss:$8 sps:$4 sm:$0xff]  }
 0x130   : > { %v1026_v61 = vor.u32 %v1025_v31, %v1021_v32 }
 0x131   : > { %756 = vmatpush1.bf16.msra.mxu0 %v1926_v33  ;;  %v908_v50 = vor.u32 %v907_v26, %v2190_v60  ;;  %vm909_vm0 = vcmp.ne.s16.totalorder %v907_v26, 0  ;;  %v1957_v60 = vld [vmem:[%s2404_s5 + $0xe0] ss:$8 sps:$4 sm:$0xff]   ;;  %v1960_v33 = vld [vmem:[%s2404_s5 + $0xf0] ss:$8 sps:$4 sm:$0xff]  }
 0x132   : > { %1831 = vmatpush3.bf16.msra.mxu1 %v1929_v34  ;;  %757 = vmatprep.subr.bf16.mxu0 %v1932_v35  ;;  %v911_v3 = vsel %vm909_vm0, %v2197_v10, 0  ;;  %v1948_v10 = vld [vmem:[%s2404_s5 + $0xb0] ss:$8 sps:$4 sm:$0xff]   ;;  %v1965_v34 = vld [vmem:[%s2404_s5 + $0x104] ss:$8 sps:$4 sm:$0xff]   ;;  %v1106_v35 = vsel %vm1105_vm3, %v1008_v17, 0 }
 0x133   : > { %vm910_vm14 = vcmp.ne.s16.totalorder %v908_v50, 0  ;;  %v921_v8 = vshrl.u32 %v911_v3, 16  ;;  %v1117_v39 = vshll.u32 %v1106_v35, 16  ;;  %v1115_v43 = vshrl.u32 %v1106_v35, 16  ;;  %v1523_v17 = vld [vmem:[%s2403_s4] sm:$0x7] }
 0x134   : > { %v912_v62 = vsel %vm910_vm14, %v2205_v16, 0 }
 0x135   : > { %758 = vmatpush1.bf16.msra.mxu0 %v1930_v40  ;;  %1833 = vmatmul.mubr.msk.bf16.vlgmr.msra.gmra.mrb[12].mxu1 %vm255_vm1, %v2205_v16  ;;  %v925_v1 = vshrl.u32 %v912_v62, 16  ;;  %v928_v12 = vshll.u32 %v912_v62, 16  ;;  %v923_v15 = vrot.slane %v921_v8, 7  ;;  %v1966_v40 = vld [vmem:[%s2404_s5 + $0x110] ss:$8 sps:$4 sm:$0xff]   ;;  %v1119_v42 = vrot.slane %v1117_v39, 1 }
 0x136   : > { %864 = vmatprep.subr.bf16.mxu0 %v1935_v41  ;;  %v1971_v41 = vld [vmem:[%s2404_s5 + $0x124] ss:$8 sps:$4 sm:$0xff]  }
 0x137   : > { %v927_v7 = vrot.slane %v925_v1, 7  ;;  %v1120_v26 = vor.u32 %v1119_v42, %v1115_v43 }
 0x138   : > { %1677 = vmatmul.mubr.msk.bf16.vlgmr.msra.gmra.mrb[0].mxu0 %vm255_vm1, %v719_v48  ;;  %v1972_v48 = vld [vmem:[%s2404_s5 + $0x130] ss:$8 sps:$4 sm:$0xff]  }
 0x139   : > { %865 = vmatpush1.bf16.msra.mxu0 %v1933_v45  ;;  %896 = vmatprep.mubr.bf16.mxu0 %v1998_v38  ;;  %v930_v16 = vor.u32 %v928_v12, %v927_v7  ;;  %v1974_v45 = vld [vmem:[%s2404_s5 + $0x134] ss:$8 sps:$4 sm:$0xff]  }
 0x13a   : > { %866 = vmatprep.subr.bf16.mxu0 %v1938_v46  ;;  %v1284_v46 = vrot.slane %v2225_v27, 6  ;;  %v1975_v27 = vld [vmem:[%s2404_s5 + $0x140] ss:$8 sps:$4 sm:$0xff]  }
 0x13b   : > { %v931_v21 = vsel %vm818_vm15, %v923_v15, %v930_v16  ;;  %v1527_v16 = vsub.s32 0, %v2084_v14 }
 0x13c   : > { %v1286_v50 = vor.u32 %v1285_v47, %v1284_v46 }
 0x13d   : > { %867 = vmatpush1.bf16.msra.mxu0 %v1936_v51  ;;  %v1197_v51 = vld [vmem:[#allocation2 + $0x8] sm:$0x6] }
 0x13e   : > { %868 = vmatprep.subr.bf16.mxu0 %v1941_v52  ;;  %v1283_v52 = vld [vmem:[#allocation2 + $0x8] sm:$0xe]  ;;  %vm1287_vm4 = vcmp.ne.s16.totalorder %v1286_v50, 0  ;;  %v1206_v54 = vrot.slane %v1197_v51, 1 }
 0x141   : > { %869 = vmatpush1.bf16.msra.mxu0 %v1939_v56  ;;  %v1288_v56 = vsel %vm1287_vm4, %v1283_v52, 0 }
 0x142   : > { %965 = vmatprep.subr.bf16.mxu0 %v1944_v57  ;;  %v1981_v57 = vld [vmem:[%s2404_s5 + $0x160] ss:$8 sps:$4 sm:$0xff]   ;;  %v1297_v59 = vshrl.u32 %v1288_v56, 16  ;;  %v1300_v62 = vshll.u32 %v1288_v56, 16 }
 0x144   : > { %1691 = vmatmul.mubr.msk.bf16.vlgmr.msra.gmra.mrb[0].mxu0 %vm255_vm1, %v830_v2  ;;  %v1302_v1 = vrot.slane %v1300_v62, 2 }
 0x145   : > { %966 = vmatpush1.bf16.msra.mxu0 %v1942_v63  ;;  %997 = vmatprep.mubr.bf16.mxu0 %v1998_v38  ;;  %v1984_v63 = vld [vmem:[%s2404_s5 + $0x170] ss:$8 sps:$4 sm:$0xff]  }
 0x146   : > { %967 = vmatprep.subr.bf16.mxu0 %v1947_v0  ;;  %v1299_v0 = vrot.slane %v1297_v59, 1 }
 0x148   : > { %v1303_v2 = vor.u32 %v1302_v1, %v1299_v0 }
 0x149   : > { %968 = vmatpush1.bf16.msra.mxu0 %v1945_v5 }
 0x14a   : > { %969 = vmatprep.subr.bf16.mxu0 %v1950_v6 }
 0x14d   : > { %970 = vmatpush1.bf16.msra.mxu0 %v1948_v10 }
 0x14e   : > { %1060 = vmatprep.subr.bf16.mxu0 %v1953_v13 }
 0x150   : > { %1704 = vmatmul.mubr.msk.bf16.vlgmr.msra.gmra.mrb[0].mxu0 %vm255_vm1, %v931_v21 }
 0x151   : > { %1061 = vmatpush1.bf16.msra.mxu0 %v1951_v18  ;;  %1092 = vmatprep.mubr.bf16.mxu0 %v1998_v38  ;;  %v1531_v18 = vsub.s32 1, %v2084_v14 }
 0x152   : > { %1062 = vmatprep.subr.bf16.mxu0 %v1956_v20  ;;  %v1528_v20 = vrot.slane %v1523_v17, %v1527_v16 }
 0x153   : > { %v1532_v21 = vrot.slane %v1523_v17, %v1531_v18 }
 0x155   : > { %1063 = vmatpush1.bf16.msra.mxu0 %v1954_v24 }
 0x156   : > { %1064 = vmatprep.subr.bf16.mxu0 %v1959_v25 }
 0x159   : > { %1065 = vmatpush1.bf16.msra.mxu0 %v1957_v60  ;;  %v1536_v60 = vrot.slane %v1523_v17, %v1535_v23 }
 0x15a   : > { %1154 = vmatprep.subr.bf16.mxu0 %v1962_v30 }
 0x15c   : > { %1717 = vmatmul.mubr.msk.bf16.vlgmr.msra.gmra.mrb[0].mxu0 %vm255_vm1, %v1026_v61 }
 0x15d   : > { %1155 = vmatpush1.bf16.msra.mxu0 %v1960_v33  ;;  %1186 = vmatprep.mubr.bf16.mxu0 %v1998_v38 }
 0x15e   : > { %1156 = vmatprep.subr.bf16.mxu0 %v1965_v34 }
 0x161   : > { %1157 = vmatpush1.bf16.msra.mxu0 %v1963_v36 }
 0x162   : > { %1158 = vmatprep.subr.bf16.mxu0 %v1968_v37 }
 0x165   : > { %1159 = vmatpush1.bf16.msra.mxu0 %v1966_v40 }
 0x166   : > { %1240 = vmatprep.subr.bf16.mxu0 %v1971_v41 }
 0x168   : > { %1730 = vmatmul.mubr.msk.bf16.vlgmr.msra.gmra.mrb[0].mxu0 %vm255_vm1, %v1120_v26 }
 0x169   : > { %1241 = vmatpush1.bf16.msra.mxu0 %v1969_v44  ;;  %1272 = vmatprep.mubr.bf16.mxu0 %v1998_v38 }
 0x16a   : > { %1242 = vmatprep.subr.bf16.mxu0 %v1974_v45 }
 0x16d   : > { %1243 = vmatpush1.bf16.msra.mxu0 %v1972_v48 }
 0x16e   : > { %1244 = vmatprep.subr.bf16.mxu0 %v1977_v49 }
 0x171   : > { %1245 = vmatpush1.bf16.msra.mxu0 %v1975_v27 }
 0x172   : > { %1337 = vmatprep.subr.bf16.mxu0 %v1980_v11 }
 0x174   : > { %1743 = vmatmul.mubr.msk.bf16.vlgmr.msra.gmra.mrb[0].mxu0 %vm255_vm1, %v1206_v54 }
 0x175   : > { %1338 = vmatpush1.bf16.msra.mxu0 %v1978_v53  ;;  %1369 = vmatprep.mubr.bf16.mxu0 %v1998_v38 }
 0x176   : > { %1339 = vmatprep.subr.bf16.mxu0 %v1983_v55 }
 0x179   : > { %1340 = vmatpush1.bf16.msra.mxu0 %v1981_v57 }
 0x17a   : > { %1341 = vmatprep.subr.bf16.mxu0 %v1986_v58 }
 0x17d   : > { %1342 = vmatpush1.bf16.msra.mxu0 %v1984_v63 }
 0x180   : > { %1756 = vmatmul.mubr.msk.bf16.vlgmr.msra.gmra.mrb[0].mxu0 %vm255_vm1, %v1303_v2  ;;  %vm1386_vm1 = vcmask 523264  }
 0x1fb   : > { %v1476_v38 = vpop.f32.mrb[8].mxu1 }
 0x1fc   : > { %v1478_v3 = vpop.f32.mrb[9].mxu1  ;;  %v1540_v25 = vadd.f32 %v1528_v20, %v1476_v38 }
 0x1fd   : > { %v1480_v4 = vpop.f32.mrb[10].mxu1 }
 0x1fe   : > { %v1481_v5 = vpop.f32.mrb[11].mxu1  ;;  %v1543_v32 = vmax.f32 %v1540_v25, 0.0 }
 0x208   : > { %v1517_v6 = vpop.f32.mrb[12].mxu1 }
 0x209   : > { %v1834_v7 = vpop.f32.mrb[13].mxu1 }
 0x20a   : > { %v1520_v8 = vpop.f32.mrb[14].mxu1 }
 0x20b   : > { %v1835_v9 = vpop.f32.mrb[15].mxu1 }
 0x253   : > { %v1371_v12 = vpop.f32.mrb[0].mxu0 }
 0x254   : > { %1382 = vrot.lane.b32.xlu0 %v1371_v12, %s1999_s20  ;;  %v1373_v10 = vpop.f32.mrb[1].mxu0 }
 0x255   : > { %v1375_v13 = vpop.f32.mrb[2].mxu0 }
 0x256   : > { %v1376_v15 = vpop.f32.mrb[3].mxu0 }
 0x258   : > { %1384 = vrot.lane.b32.xlu0 %v1373_v10, %s1999_s20 }
 0x2c6   : > { %v1383_v22 = vpop.permute.xlu0 %1382 }
 0x2c7   : > { %v1390_v24 = vsel %vm1386_vm1, 0.0, %v1383_v22 }
 0x2c8   : > { %v1479_v28 = vadd.f32 %v1478_v3, %v1390_v24 }
 0x2ca   : > { %v1541_v29 = vadd.f32 %v1532_v21, %v1479_v28  ;;  %v1385_v30 = vpop.permute.xlu0 %1384 }
 0x2cb   : > { %v1387_v31 = vsel %vm1386_vm1, %v1383_v22, %v1385_v30 }
 0x2cc   : > { %v1544_v33 = vmax.f32 %v1541_v29, 0.0  ;;  %v1518_v61 = vadd.f32 %v1517_v6, %v1387_v31 }
 0x2ce   : > { %v1768_v34 = vpack.c.bf16 %v1544_v33, %v1543_v32  ;;  %v1542_v35 = vadd.f32 %v1536_v60, %v1518_v61 }
 0x2d0   : > { %v1545_v36 = vmax.f32 %v1542_v35, 0.0  ;;  %v1559_v39 = vrot.slane %v1768_v34, %v2093_v19 }
 0x2d2   : > { %v1548_v37 = vpack.c.bf16 %v1545_v36, %v1545_v36 }
 0x2d4   : > { %v1566_v40 = vrot.slane %v1548_v37, %v2093_v19 }
 0x2d6   : > { %v1567_v14 = vcombine.low %v1559_v39, %v1566_v40 }
 0x2d8   : > { %1569 = vst [vmem:[%s251_s27] sm:$0x3f] %v1567_v14 }
 0x2d9 PF: > { %s16_s21 = sadd.s32 1, %s1993_s21  }
 0x2da   : > { %p13_p4 = scmp.ge.s32.totalorder %s16_s21, 4  }
 0x2dc   :  { %15 = sbr.rel (!%p13_p4) target bundleno = 1 (0x1), region = 81 }

// kernel: squeezenet11_forward.17
= control target key start
LH: loop header
LB: loop body
LE: loop exit
PB: predicated region body
PF: predicated region fallthrough
CT: control target
= control target key end

     0   :  { %s2199_s21 = smov 0   ;;  %s2630_s0 = inlined_call_operand.vmem [shape: bf16[2,4,384], index: 0, kind: input, shape index: {}]   ;;  %s2631_s1 = inlined_call_operand.vmem [shape: bf16[384,64], index: 1, kind: input, shape index: {}]   ;;  %s2632_s2 = inlined_call_operand.vmem [shape: f32[1,64], index: 2, kind: input, shape index: {}]   ;;  %s2633_s3 = inlined_call_operand.vmem [shape: bf16[64,512], index: 3, kind: input, shape index: {}]   ;;  %s2634_s4 = inlined_call_operand.vmem [shape: f32[1,512], index: 4, kind: input, shape index: {}]   ;;  %s2635_s5 = inlined_call_operand.vmem [shape: bf16[8,64,256], index: 5, kind: input, shape index: {}]   ;;  %s2636_s6 = inlined_call_operand.vmem [shape: bf16[2,4,512], index: 6, kind: output, shape index: {}]  }
   0x1 LB: > { %s1757_s22 = sadd.s32 4294967295, %s2158_s21   ;;  %p1761_p0 = scmp.ge.s32.totalorder %s2158_s21, 1  ;;  %s2158_s21 = sphi %s2199_s21, %s16_s21  }
   0x2   : > { %p212_p1 = scmp.lt.s32.totalorder %s2158_s21, 3 }
   0x4   : > { %p213_p2 = pnand %p1761_p0, %p212_p1 }
   0x5   : > { %v2007_v0 = vld [vmem:[%s2631_s1 + $0x40] sm:$0xff] (!%p213_p2)   ;;  %v2160_v2 = vmov (!%p213_p2), 0.0   ;;  %v2010_v4 = vld [vmem:[%s2631_s1 + $0x48] sm:$0xff] (!%p213_p2)   ;;  %v2013_v7 = vld [vmem:[%s2631_s1 + $0x50] sm:$0xff] (!%p213_p2)   ;;  %vm2161_vm0 = vmmov (!%p213_p2), 0   ;;  %p242_p3 = scmp.lt.s32.totalorder (!%p213_p2), %s1757_s22, 1  ;;  %v320_v20 = vlaneseq (!%p213_p2) }
   0x6   : > { %216 = sbr.rel (%p213_p2) target bundleno = 565 (0x235), region = 44  ;;  %v2008_v1 = vld [vmem:[%s2631_s1] sm:$0xff] (!%p213_p2)   ;;  %1974 = vmatprep.subr.bf16.mxu1 (!%p213_p2), %v2160_v2  ;;  %1943 = vmatprep.subr.bf16.mxu0 (!%p213_p2), %v2007_v0  ;;  %v2011_v5 = vld [vmem:[%s2631_s1 + $0x8] sm:$0xff] (!%p213_p2)   ;;  %v2014_v8 = vld [vmem:[%s2631_s1 + $0x10] sm:$0xff] (!%p213_p2)   ;;  %v2162_v25 = vmov (!%p213_p2), 1983009808  }
   0x7   : > { %v2009_v3 = vld [vmem:[%s2631_s1 + $0x80] sm:$0xff] (!%p213_p2)   ;;  %1944 = vmatpush3.bf16.msra.mxu0 (!%p213_p2), %v2008_v1  ;;  %v2012_v6 = vld [vmem:[%s2631_s1 + $0x88] sm:$0xff] (!%p213_p2)   ;;  %1990 = vmatprep.mubr.msk.bf16.mxu1 (!%p213_p2), %vm2161_vm0, %v2160_v2  ;;  %v2015_v9 = vld [vmem:[%s2631_s1 + $0x90] sm:$0xff] (!%p213_p2)   ;;  %v318_v26 = vunpack.c.l.s4 (!%p213_p2), %v2162_v25  ;;  %v2290_v27 = vshrl.u32 (!%p213_p2), %v320_v20, 7  ;;  %v2163_v41 = vmov (!%p213_p2), 0   ;;  %vm255_vm1 = vcmask (!%p213_p2), 523264  }
   0x8   : > { %1975 = vmatpush3.bf16.msra.mxu1 (!%p213_p2), %v2009_v3  ;;  %1945 = vmatprep.subr.bf16.mxu0 (!%p213_p2), %v2010_v4  ;;  %v2016_v10 = vld [vmem:[%s2631_s1 + $0x58] sm:$0xff] (!%p213_p2)   ;;  %v2019_v13 = vld [vmem:[%s2631_s1 + $0x60] sm:$0xff] (!%p213_p2)   ;;  %v2022_v16 = vld [vmem:[%s2631_s1 + $0x68] sm:$0xff] (!%p213_p2)   ;;  %256 = vst.msk [vmem:[#allocation2] sm:$0xff] (!%p213_p2), %vm255_vm1, %v2163_v41  ;;  %vm257_vm2 = vcmask (!%p213_p2), 523266   ;;  %vm561_vm8 = vcmask (!%p213_p2), 517120  }
   0x9   : > { %1976 = vmatprep.subr.bf16.mxu1 (!%p213_p2), %v2160_v2  ;;  %v2017_v11 = vld [vmem:[%s2631_s1 + $0x18] sm:$0xff] (!%p213_p2)   ;;  %v2020_v14 = vld [vmem:[%s2631_s1 + $0x20] sm:$0xff] (!%p213_p2)   ;;  %v2023_v17 = vld [vmem:[%s2631_s1 + $0x28] sm:$0xff] (!%p213_p2)   ;;  %v319_v29 = vunpack.c.0.s8 (!%p213_p2), %v318_v26  ;;  %258 = vst.msk [vmem:[#allocation2 + $0x8] sm:$0xfc] (!%p213_p2), %vm257_vm2, %v2163_v41  ;;  %v569_v55 = vand.u32 (!%p213_p2), 1, %v2290_v27 }
   0xa   : > { %v2018_v12 = vld [vmem:[%s2631_s1 + $0x98] sm:$0xff] (!%p213_p2)   ;;  %v2021_v15 = vld [vmem:[%s2631_s1 + $0xa0] sm:$0xff] (!%p213_p2)   ;;  %v2024_v18 = vld [vmem:[%s2631_s1 + $0xa8] sm:$0xff] (!%p213_p2)   ;;  %vm636_vm10 = vcmask (!%p213_p2), 1040384   ;;  %vm724_vm12 = vsmask.f32 (!%p213_p2), 1280 }
   0xb   : > { %1946 = vmatpush3.bf16.msra.mxu0 (!%p213_p2), %v2011_v5  ;;  %v2025_v19 = vld [vmem:[%s2631_s1 + $0x70] sm:$0xff] (!%p213_p2)   ;;  %v2028_v23 = vld [vmem:[%s2631_s1 + $0x78] sm:$0xff] (!%p213_p2)   ;;  %v2300_v32 = vsub.s32 (!%p213_p2), %v319_v29, %v2290_v27  ;;  %v2034_v36 = vld [vmem:[%s2635_s5 + $0x44] ss:$8 sps:$4 sm:$0xff] (!%p213_p2)   ;;  %vm577_vm3 = vcmp.ne.s32.totalorder (!%p213_p2), %v569_v55, 0  ;;  %vm578_vm5 = vcmp.ne.s32.totalorder (!%p213_p2), %v569_v55, 1 }
   0xc   : > { %1977 = vmatpush3.bf16.msra.mxu1 (!%p213_p2), %v2012_v6  ;;  %1947 = vmatprep.subr.bf16.mxu0 (!%p213_p2), %v2013_v7  ;;  %v2026_v21 = vld [vmem:[%s2631_s1 + $0x30] sm:$0xff] (!%p213_p2)   ;;  %v2029_v28 = vld [vmem:[%s2631_s1 + $0x38] sm:$0xff] (!%p213_p2)   ;;  %v2032_v37 = vld [vmem:[%s2635_s5 + $0x40] ss:$8 sps:$4 sm:$0xff] (!%p213_p2)   ;;  %vm848_vm0 = vsmask.f32 (!%p213_p2), 256 }
   0xd   : > { %1978 = vmatprep.subr.bf16.mxu1 %v2160_v2  ;;  %s2642_s22 = smov (!%p242_p3, %s1757_s22), 1  ;;  %v2027_v22 = vld [vmem:[%s2631_s1 + $0xb0] sm:$0xff]   ;;  %v2031_v30 = vld [vmem:[%s2631_s1 + $0xb8] sm:$0xff]   ;;  %v2037_v38 = vld [vmem:[%s2635_s5 + $0x4] ss:$8 sps:$4 sm:$0xff]  }
   0xe   : > { %s1994_s9 = smul.u32 6, %s2642_s22  ;;  %v2035_v39 = vld [vmem:[%s2635_s5] ss:$8 sps:$4 sm:$0xff]   ;;  %v2040_v40 = vld [vmem:[%s2635_s5 + $0x54] ss:$8 sps:$4 sm:$0xff]   ;;  %vm600_vm4 = vmpackc.low %vm577_vm3, %vm577_vm3  ;;  %s1942_s17 = sshll.u32 %s2642_s22, 3 }
   0xf   : > { %1948 = vmatpush3.bf16.msra.mxu0 %v2014_v8  ;;  %v2038_v42 = vld [vmem:[%s2635_s5 + $0x50] ss:$8 sps:$4 sm:$0xff]   ;;  %v2043_v43 = vld [vmem:[%s2635_s5 + $0x14] ss:$8 sps:$4 sm:$0xff]   ;;  %v2044_v45 = vld [vmem:[%s2635_s5 + $0x60] ss:$8 sps:$4 sm:$0xff]   ;;  %s251_s20 = scalar_lea.vmem %s2636_s6, %s1942_s17 }
  0x10   : > { %1979 = vmatpush3.bf16.msra.mxu1 %v2015_v9  ;;  %1949 = vmatprep.subr.bf16.mxu0 %v2016_v10  ;;  %s246_s18 = scalar_lea.vmem %s2630_s0, %s1994_s9  ;;  %v2041_v44 = vld [vmem:[%s2635_s5 + $0x10] ss:$8 sps:$4 sm:$0xff]   ;;  %v2046_v46 = vld [vmem:[%s2635_s5 + $0x64] ss:$8 sps:$4 sm:$0xff]   ;;  %v2047_v48 = vld [vmem:[%s2635_s5 + $0x20] ss:$8 sps:$4 sm:$0xff]  }
  0x11   : > { %1980 = vmatprep.subr.bf16.mxu1 %v2160_v2  ;;  %v259_v24 = vld [vmem:[%s246_s18] sm:$0x3f]  ;;  %v2052_v49 = vld [vmem:[%s2635_s5 + $0x74] ss:$8 sps:$4 sm:$0xff]   ;;  %v2050_v50 = vld [vmem:[%s2635_s5 + $0x70] ss:$8 sps:$4 sm:$0xff]  }
  0x12   : > { %v316_v31 = vcombine.high %v259_v24, %v259_v24  ;;  %v323_v33 = vrot.slane %v259_v24, %v2300_v32  ;;  %v2049_v47 = vld [vmem:[%s2635_s5 + $0x24] ss:$8 sps:$4 sm:$0xff]   ;;  %v2055_v51 = vld [vmem:[%s2635_s5 + $0x34] ss:$8 sps:$4 sm:$0xff]   ;;  %v2053_v53 = vld [vmem:[%s2635_s5 + $0x30] ss:$8 sps:$4 sm:$0xff]  }
  0x13   : > { %1950 = vmatpush3.bf16.msra.mxu0 %v2017_v11  ;;  %v2058_v52 = vld [vmem:[%s2635_s5 + $0x84] ss:$8 sps:$4 sm:$0xff]   ;;  %v601_v56 = vsel %vm600_vm4, 65537, %v2163_v41  ;;  %vm824_vm6 = vmpackc.low %vm578_vm5, %vm578_vm5  ;;  %v1765_v1 = vld [vmem:[%s2632_s2] ss:$0 sm:$0xff] }
  0x14   : > { %1981 = vmatpush3.bf16.msra.mxu1 %v2018_v12  ;;  %1951 = vmatprep.subr.bf16.mxu0 %v2019_v13  ;;  %v330_v34 = vrot.slane %v316_v31, %v2300_v32  ;;  %v331_v35 = vcombine.high %v323_v33, %v323_v33  ;;  %v2061_v54 = vld [vmem:[%s2635_s5 + $0xc4] ss:$8 sps:$4 sm:$0xff]   ;;  %v1790_v57 = vcombine.low %v601_v56, %v601_v56  ;;  %v825_v3 = vsel %vm824_vm6, 65537, %v2163_v41  ;;  %v2056_v29 = vld [vmem:[%s2635_s5 + $0x80] ss:$8 sps:$4 sm:$0xff]  }
  0x15   : > { %1982 = vmatprep.subr.bf16.mxu1 %v2160_v2  ;;  %v1817_v11 = vcombine.low %v825_v3, %v825_v3  ;;  %v596_v13 = vld [vmem:[#allocation2] sm:$0xc0]  ;;  %v2076_v56 = vld [vmem:[%s2635_s5 + $0xb4] ss:$8 sps:$4 sm:$0xff]  }
  0x16   : > { %511 = vmatprep.mubr.bf16.mxu0 %v331_v35  ;;  %v2366_v58 = vshrl.u32 %v1790_v57, 16  ;;  %v2368_v59 = vshll.u32 %v1790_v57, 16  ;;  %v2073_v55 = vld [vmem:[%s2635_s5 + $0xe4] ss:$8 sps:$4 sm:$0xff]  }
  0x17   : > { %1952 = vmatpush3.bf16.msra.mxu0 %v2020_v14 }
  0x18   : > { %1983 = vmatpush3.bf16.msra.mxu1 %v2021_v15  ;;  %1953 = vmatprep.subr.bf16.mxu0 %v2022_v16  ;;  %v607_v60 = vrot.slane %v2366_v58, 1  ;;  %v610_v61 = vrot.slane %v2368_v59, 2  ;;  %v2376_v15 = vshll.u32 %v1817_v11, 16 }
  0x19   : > { %1984 = vmatprep.subr.bf16.mxu1 %v2160_v2 }
  0x1a   : > { %v611_v9 = vor.u32 %v610_v61, %v607_v60  ;;  %vm613_vm9 = vcmp.ne.s16.totalorder %v607_v60, 0 }
  0x1b   : > { %1954 = vmatpush3.bf16.msra.mxu0 %v2023_v17 }
  0x1c   : > { %1985 = vmatpush3.bf16.msra.mxu1 %v2024_v18  ;;  %1955 = vmatprep.subr.bf16.mxu0 %v2025_v19  ;;  %vm612_vm7 = vcmp.ne.s16.totalorder %v611_v9, 0  ;;  %v831_v18 = vrot.slane %v2376_v15, 1  ;;  %v1167_v9 = vrot.slane %v2366_v58, 7 }
  0x1d   : > { %1986 = vmatprep.subr.bf16.mxu1 %v2160_v2  ;;  %v614_v17 = vsel %vm612_vm7, %v596_v13, 0  ;;  %v2080_v13 = vld [vmem:[%s2635_s5 + $0x100] ss:$8 sps:$4 sm:$0xff]  }
  0x1e   : > { %v726_v19 = vshrl.u32 %v614_v17, 16  ;;  %v729_v20 = vshll.u32 %v614_v17, 16  ;;  %vm2404_vm14 = vcmp.ne.s16.totalorder %v831_v18, 0  ;;  %v2088_v17 = vld [vmem:[%s2635_s5 + $0x114] ss:$8 sps:$4 sm:$0xff]  }
  0x1f   : > { %1956 = vmatpush3.bf16.msra.mxu0 %v2026_v21  ;;  %v2379_v21 = vshrl.u32 %v1817_v11, 16 }
  0x20   : > { %1987 = vmatpush3.bf16.msra.mxu1 %v2027_v22  ;;  %1957 = vmatprep.subr.bf16.mxu0 %v2028_v23  ;;  %v624_v22 = vld [vmem:[#allocation2] sm:$0x80]  ;;  %v947_v23 = vrot.slane %v2368_v59, 1  ;;  %v728_v25 = vrot.slane %v726_v19, 6  ;;  %v731_v26 = vrot.slane %v729_v20, 7  ;;  %v1168_v19 = vor.u32 %v1167_v9, %v2368_v59 }
  0x21   : > { %1988 = vmatprep.subr.bf16.mxu1 %v2160_v2  ;;  %v834_v24 = vor.u32 %v2379_v21, %v831_v18  ;;  %v2083_v20 = vld [vmem:[%s2635_s5 + $0x140] ss:$8 sps:$4 sm:$0xff]  }
  0x22   : > { %v948_v31 = vor.u32 %v947_v23, %v2366_v58  ;;  %vm2419_vm15 = vcmp.ne.s16.totalorder %v947_v23, 0  ;;  %v2086_v23 = vld [vmem:[%s2635_s5 + $0x110] ss:$8 sps:$4 sm:$0xff]   ;;  %vm1169_vm3 = vcmp.ne.s16.totalorder %v1168_v19, 0  ;;  %v2142_v19 = vld [vmem:[%s2633_s3 + $0x44] ss:$16 sps:$4 sm:$0xff]  }
  0x23   : > { %1958 = vmatpush3.bf16.msra.mxu0 %v2029_v28  ;;  %v637_v28 = vrot.slane %v624_v22, 7  ;;  %vm836_vm11 = vcmp.ne.s16.totalorder %v834_v24, 0  ;;  %v2091_v24 = vld [vmem:[%s2635_s5 + $0x154] ss:$8 sps:$4 sm:$0xff]   ;;  %v2128_v9 = vld [vmem:[%s2633_s3] ss:$16 sps:$4 sm:$0xff]  }
  0x24   : > { %1989 = vmatpush3.bf16.msra.mxu1 %v2031_v30  ;;  %683 = vmatprep.subr.bf16.mxu0 %v2034_v36  ;;  %v732_v36 = vor.u32 %v731_v26, %v728_v25  ;;  %vm950_vm13 = vcmp.ne.s16.totalorder %v948_v31, 0  ;;  %v2094_v25 = vld [vmem:[%s2635_s5 + $0x124] ss:$8 sps:$4 sm:$0xff]   ;;  %v2100_v31 = vld [vmem:[%s2635_s5 + $0x134] ss:$8 sps:$4 sm:$0xff]  }
  0x25   : > { %781 = vmatprep.subr.bf16.mxu1 %v2037_v38  ;;  %v2064_v38 = vld [vmem:[%s2635_s5 + $0x94] ss:$8 sps:$4 sm:$0xff]  }
  0x26   : > { %512 = vmatmul.mubr.bf16.vlgmr.msra.gmra.mrb[0].mxu0 %v323_v33 }
  0x27   : > { %1991 = vmatmul.mubr.bf16.vlgmr.msra.gmra.mrb[0].mxu1 %v330_v34  ;;  %684 = vmatpush1.bf16.msra.mxu0 %v2032_v37 }
  0x28   : > { %715 = vmatprep.mubr.bf16.mxu0 %v2163_v41  ;;  %813 = vmatprep.mubr.bf16.mxu1 %v2163_v41 }
  0x29   : > { %685 = vmatprep.subr.bf16.mxu0 %v2040_v40  ;;  %782 = vmatpush1.bf16.msra.mxu1 %v2035_v39  ;;  %v2059_v40 = vld [vmem:[%s2635_s5 + $0xc0] ss:$8 sps:$4 sm:$0xff]  }
  0x2a   : > { %783 = vmatprep.subr.bf16.mxu1 %v2043_v43 }
  0x2b   : > { %686 = vmatpush1.bf16.msra.mxu0 %v2038_v42 }
  0x2c   : > { %687 = vmatprep.subr.bf16.mxu0 %v2046_v46 }
  0x2d   : > { %784 = vmatpush1.bf16.msra.mxu1 %v2041_v44  ;;  %v2062_v44 = vld [vmem:[%s2635_s5 + $0x90] ss:$8 sps:$4 sm:$0xff]  }
  0x2e   : > { %785 = vmatprep.subr.bf16.mxu1 %v2049_v47 }
  0x2f   : > { %688 = vmatpush1.bf16.msra.mxu0 %v2044_v45  ;;  %v2067_v45 = vld [vmem:[%s2635_s5 + $0xd4] ss:$8 sps:$4 sm:$0xff]  }
  0x30   : > { %689 = vmatprep.subr.bf16.mxu0 %v2052_v49 }
  0x31   : > { %786 = vmatpush1.bf16.msra.mxu1 %v2047_v48  ;;  %v2070_v48 = vld [vmem:[%s2635_s5 + $0xa4] ss:$8 sps:$4 sm:$0xff]  }
  0x32   : > { %787 = vmatprep.subr.bf16.mxu1 %v2055_v51  ;;  %v2065_v51 = vld [vmem:[%s2635_s5 + $0xd0] ss:$8 sps:$4 sm:$0xff]  }
  0x33   : > { %690 = vmatpush1.bf16.msra.mxu0 %v2050_v50 }
  0x34   : > { %904 = vmatprep.subr.bf16.mxu0 %v2058_v52  ;;  %v837_v52 = vsel %vm2404_vm14, %v624_v22, 0 }
  0x35   : > { %788 = vmatpush1.bf16.msra.mxu1 %v2053_v53  ;;  %v850_v60 = vshrl.u32 %v837_v52, 16  ;;  %v2107_v52 = vld [vmem:[%s2635_s5 + $0x1c0] ss:$8 sps:$4 sm:$0xff]  }
  0x36   : > { %1017 = vmatprep.subr.bf16.mxu1 %v2061_v54  ;;  %v2068_v54 = vld [vmem:[%s2635_s5 + $0xa0] ss:$8 sps:$4 sm:$0xff]  }
  0xf9   : > { %v1959_v62 = vpop.f32.mrb[0].mxu0 }
  0xfa   : > { %v553_v63 = vpop.f32.mrb[0].mxu1  ;;  %v1960_v0 = vpop.f32.mrb[1].mxu0 }
  0xfb   : > { %v1992_v2 = vpop.f32.mrb[1].mxu1  ;;  %v1961_v4 = vadd.f32 %v1960_v0, %v1959_v62  ;;  %v1962_v5 = vpop.f32.mrb[2].mxu0  ;;  %v951_v62 = vsel %vm2419_vm15, %v624_v22, 0  ;;  %v1061_v0 = vrot.slane %v2379_v21, 7 }
  0xfc   : > { %v556_v6 = vpop.f32.mrb[2].mxu1  ;;  %v1963_v7 = vpop.f32.mrb[3].mxu0  ;;  %v2079_v2 = vld [vmem:[%s2635_s5 + $0xf4] ss:$8 sps:$4 sm:$0xff]   ;;  %v963_v5 = vshrl.u32 %v951_v62, 16 }
  0xfd   : > { %v1993_v8 = vpop.f32.mrb[3].mxu1  ;;  %v514_v10 = vadd.f32 %v1961_v4, %v1765_v1  ;;  %v2074_v1 = vld [vmem:[%s2635_s5 + $0xb0] ss:$8 sps:$4 sm:$0xff]   ;;  %v2082_v4 = vld [vmem:[%s2635_s5 + $0x104] ss:$8 sps:$4 sm:$0xff]   ;;  %v852_v7 = vrot.slane %v850_v60, 7 }
  0xfe   : > { %v965_v58 = vrot.slane %v963_v5, 7  ;;  %v2113_v60 = vld [vmem:[%s2635_s5 + $0x1d0] ss:$8 sps:$4 sm:$0xff]   ;;  %v2121_v62 = vld [vmem:[%s2635_s5 + $0x1e4] ss:$8 sps:$4 sm:$0xff]  }
  0xff   : > { %v554_v12 = vadd.f32 %v553_v63, %v514_v10  ;;  %v2071_v63 = vld [vmem:[%s2635_s5 + $0xe0] ss:$8 sps:$4 sm:$0xff]   ;;  %v2077_v10 = vld [vmem:[%s2635_s5 + $0xf0] ss:$8 sps:$4 sm:$0xff]  }
 0x101   : > { %v559_v14 = vmax.f32 %v554_v12, 0.0  ;;  %v1062_v12 = vor.u32 %v1061_v0, %v2376_v15 }
 0x103   : > { %v560_v16 = vpack.c.bf16 %v559_v14, %v559_v14  ;;  %v2085_v14 = vld [vmem:[%s2635_s5 + $0x144] ss:$8 sps:$4 sm:$0xff]   ;;  %vm1063_vm2 = vcmp.ne.s16.totalorder %v1062_v12, 0 }
 0x104   : > { %v2133_v12 = vld [vmem:[%s2633_s3 + $0xc] ss:$16 sps:$4 sm:$0xff]  }
 0x105   : > { %562 = vst.msk [vmem:[#allocation2 + $0x8] sm:$0x3] %vm561_vm8, %v560_v16 }
 0x10c   : > { %v597_v30 = vld [vmem:[#allocation2 + $0x8] sm:$0x1] }
 0x10d   : > { %v638_v33 = vrot.slane %v597_v30, 7  ;;  %v615_v34 = vsel %vm613_vm9, %v597_v30, 0  ;;  %v2387_v35 = vld [vmem:[#allocation2 + $0x8] sm:$0x3]  ;;  %v2097_v30 = vld [vmem:[%s2635_s5 + $0x164] ss:$8 sps:$4 sm:$0xff]  }
 0x10e   : > { %v734_v37 = vshll.u32 %v615_v34, 16  ;;  %v838_v43 = vsel %vm836_vm11, %v2387_v35, 0  ;;  %v952_v50 = vsel %vm950_vm13, %v2387_v35, 0  ;;  %v1060_v22 = vld [vmem:[#allocation2 + $0x8] sm:$0x7] }
 0x10f   : > { %v639_v39 = vsel %vm636_vm10, %v637_v28, %v638_v33  ;;  %v854_v49 = vshrl.u32 %v838_v43, 16  ;;  %v967_v57 = vshrl.u32 %v952_v50, 16  ;;  %v857_v3 = vshll.u32 %v838_v43, 16  ;;  %v2089_v28 = vld [vmem:[%s2635_s5 + $0x150] ss:$8 sps:$4 sm:$0xff]  }
 0x110   : > { %1807 = vmatmul.mubr.msk.bf16.vlgmr.msra.gmra.mrb[4].mxu0 %vm255_vm1, %v639_v39  ;;  %v736_v42 = vrot.slane %v734_v37, 7  ;;  %v970_v11 = vshll.u32 %v952_v50, 16  ;;  %v1064_v26 = vsel %vm1063_vm2, %v1060_v22, 0  ;;  %v1170_v34 = vsel %vm1169_vm3, %v1060_v22, 0  ;;  %v2098_v37 = vld [vmem:[%s2635_s5 + $0x130] ss:$8 sps:$4 sm:$0xff]  }
 0x111   : > { %905 = vmatpush1.bf16.msra.mxu0 %v2056_v29  ;;  %936 = vmatprep.mubr.bf16.mxu0 %v2163_v41  ;;  %v856_v61 = vrot.slane %v854_v49, 7  ;;  %v969_v6 = vrot.slane %v967_v57, 7  ;;  %v2092_v29 = vld [vmem:[%s2635_s5 + $0x120] ss:$8 sps:$4 sm:$0xff]   ;;  %v1077_v33 = vshll.u32 %v1064_v26, 16  ;;  %v1183_v39 = vshll.u32 %v1170_v34, 16 }
 0x112   : > { %v737_v47 = vsel %vm724_vm12, %v732_v36, %v736_v42  ;;  %906 = vmatprep.subr.bf16.mxu0 %v2064_v38  ;;  %v2095_v36 = vld [vmem:[%s2635_s5 + $0x160] ss:$8 sps:$4 sm:$0xff]   ;;  %v2103_v38 = vld [vmem:[%s2635_s5 + $0x174] ss:$8 sps:$4 sm:$0xff]   ;;  %v2106_v42 = vld [vmem:[%s2635_s5 + $0x184] ss:$8 sps:$4 sm:$0xff]  }
 0x113   : > { %1816 = vmatmul.mubr.msk.bf16.vlgmr.msra.gmra.mrb[4].mxu1 %vm255_vm1, %v737_v47  ;;  %v859_v8 = vor.u32 %v857_v3, %v856_v61  ;;  %v972_v16 = vor.u32 %v970_v11, %v969_v6  ;;  %v1372_v43 = vrot.slane %v2379_v21, 6  ;;  %v1075_v46 = vshrl.u32 %v1064_v26, 16  ;;  %v2104_v47 = vld [vmem:[%s2635_s5 + $0x180] ss:$8 sps:$4 sm:$0xff]   ;;  %v2109_v49 = vld [vmem:[%s2635_s5 + $0x1c4] ss:$8 sps:$4 sm:$0xff]  }
 0x114   : > { %1018 = vmatpush1.bf16.msra.mxu1 %v2059_v40  ;;  %1049 = vmatprep.mubr.bf16.mxu1 %v2163_v41  ;;  %v1079_v40 = vrot.slane %v1077_v33, 1  ;;  %v1181_v50 = vshrl.u32 %v1170_v34, 16  ;;  %v1371_v57 = vld [vmem:[#allocation2 + $0x8] sm:$0xe]  ;;  %v2127_v3 = vld [vmem:[%s2635_s5 + $0x1f4] ss:$8 sps:$4 sm:$0xff]  }
 0x115   : > { %907 = vmatpush1.bf16.msra.mxu0 %v2062_v44  ;;  %1019 = vmatprep.subr.bf16.mxu1 %v2067_v45  ;;  %v860_v18 = vsel %vm848_vm0, %v852_v7, %v859_v8  ;;  %v973_v59 = vsel %vm848_vm0, %v965_v58, %v972_v16  ;;  %v1373_v44 = vrot.slane %v2376_v15, 7  ;;  %v2101_v45 = vld [vmem:[%s2635_s5 + $0x170] ss:$8 sps:$4 sm:$0xff]   ;;  %v2112_v15 = vld [vmem:[%s2635_s5 + $0x194] ss:$8 sps:$4 sm:$0xff]  }
 0x116   : > { %908 = vmatprep.subr.bf16.mxu0 %v2070_v48  ;;  %v1185_v48 = vrot.slane %v1183_v39, 1  ;;  %v1080_v21 = vor.u32 %v1079_v40, %v1075_v46  ;;  %v2116_v61 = vld [vmem:[%s2635_s5 + $0x1a0] ss:$8 sps:$4 sm:$0xff]   ;;  %v2130_v6 = vld [vmem:[%s2633_s3 + $0x4] ss:$16 sps:$4 sm:$0xff]  }
 0x117   : > { %v1273_v7 = vld [vmem:[#allocation2 + $0x8] sm:$0x6]  ;;  %v2125_v8 = vld [vmem:[%s2635_s5 + $0x1f0] ss:$8 sps:$4 sm:$0xff]  }
 0x118   : > { %1020 = vmatpush1.bf16.msra.mxu1 %v2065_v51  ;;  %v1374_v51 = vor.u32 %v1373_v44, %v1372_v43  ;;  %v1186_v53 = vor.u32 %v1185_v48, %v1181_v50  ;;  %v2131_v58 = vld [vmem:[%s2633_s3 + $0x8] ss:$16 sps:$4 sm:$0xff]   ;;  %v2140_v22 = vld [vmem:[%s2633_s3 + $0x40] ss:$16 sps:$4 sm:$0xff]  }
 0x119   : > { %909 = vmatpush1.bf16.msra.mxu0 %v2068_v54  ;;  %1021 = vmatprep.subr.bf16.mxu1 %v2073_v55  ;;  %v2110_v54 = vld [vmem:[%s2635_s5 + $0x190] ss:$8 sps:$4 sm:$0xff]   ;;  %v2115_v55 = vld [vmem:[%s2635_s5 + $0x1d4] ss:$8 sps:$4 sm:$0xff]  }
 0x11a   : > { %910 = vmatprep.subr.bf16.mxu0 %v2076_v56  ;;  %v2118_v56 = vld [vmem:[%s2635_s5 + $0x1a4] ss:$8 sps:$4 sm:$0xff]   ;;  %vm1375_vm4 = vcmp.ne.s16.totalorder %v1374_v51, 0  ;;  %v2149_v26 = vld [vmem:[%s2633_s3 + $0x68] ss:$16 sps:$4 sm:$0xff]  }
 0x11b   : > { %v1376_v0 = vsel %vm1375_vm4, %v1371_v57, 0 }
 0x11c   : > { %1022 = vmatpush1.bf16.msra.mxu1 %v2071_v63  ;;  %v2124_v63 = vld [vmem:[%s2635_s5 + $0x1b4] ss:$8 sps:$4 sm:$0xff]   ;;  %v1390_v5 = vshll.u32 %v1376_v0, 16 }
 0x11d   : > { %911 = vmatpush1.bf16.msra.mxu0 %v2074_v1  ;;  %1023 = vmatprep.subr.bf16.mxu1 %v2079_v2  ;;  %v2119_v1 = vld [vmem:[%s2635_s5 + $0x1e0] ss:$8 sps:$4 sm:$0xff]   ;;  %v2122_v2 = vld [vmem:[%s2635_s5 + $0x1b0] ss:$8 sps:$4 sm:$0xff]  }
 0x11e   : > { %1124 = vmatprep.subr.bf16.mxu0 %v2082_v4  ;;  %v1387_v4 = vshrl.u32 %v1376_v0, 16  ;;  %v1392_v11 = vrot.slane %v1390_v5, 2 }
 0x120   : > { %1834 = vmatmul.mubr.msk.bf16.vlgmr.msra.gmra.mrb[8].mxu0 %vm255_vm1, %v860_v18  ;;  %1024 = vmatpush1.bf16.msra.mxu1 %v2077_v10  ;;  %v1389_v10 = vrot.slane %v1387_v4, 1  ;;  %v2139_v18 = vld [vmem:[%s2633_s3 + $0x2c] ss:$16 sps:$4 sm:$0xff]  }
 0x121   : > { %1125 = vmatpush1.bf16.msra.mxu0 %v2080_v13  ;;  %1230 = vmatprep.subr.bf16.mxu1 %v2085_v14  ;;  %v1284_v13 = vrot.slane %v1273_v7, 1  ;;  %v2136_v14 = vld [vmem:[%s2633_s3 + $0x24] ss:$16 sps:$4 sm:$0xff]  }
 0x122   : > { %1126 = vmatprep.subr.bf16.mxu0 %v2088_v17  ;;  %1156 = vmatprep.mubr.bf16.mxu0 %v2163_v41  ;;  %v1393_v16 = vor.u32 %v1392_v11, %v1389_v10  ;;  %v2134_v17 = vld [vmem:[%s2633_s3 + $0x20] ss:$16 sps:$4 sm:$0xff]  }
 0x123   : > { %1851 = vmatmul.mubr.msk.bf16.vlgmr.msra.gmra.mrb[8].mxu1 %vm255_vm1, %v973_v59  ;;  %v2146_v59 = vld [vmem:[%s2633_s3 + $0x60] ss:$16 sps:$4 sm:$0xff]  }
 0x124   : > { %1231 = vmatpush1.bf16.msra.mxu1 %v2083_v20  ;;  %1262 = vmatprep.mubr.bf16.mxu1 %v2163_v41  ;;  %v2137_v20 = vld [vmem:[%s2633_s3 + $0x28] ss:$16 sps:$4 sm:$0xff]  }
 0x125   : > { %1127 = vmatpush1.bf16.msra.mxu0 %v2086_v23  ;;  %1232 = vmatprep.subr.bf16.mxu1 %v2091_v24  ;;  %v2145_v23 = vld [vmem:[%s2633_s3 + $0x4c] ss:$16 sps:$4 sm:$0xff]   ;;  %v2148_v24 = vld [vmem:[%s2633_s3 + $0x64] ss:$16 sps:$4 sm:$0xff]  }
 0x126   : > { %1128 = vmatprep.subr.bf16.mxu0 %v2094_v25  ;;  %v2151_v25 = vld [vmem:[%s2633_s3 + $0x6c] ss:$16 sps:$4 sm:$0xff]  }
 0x128   : > { %1233 = vmatpush1.bf16.msra.mxu1 %v2089_v28 }
 0x129   : > { %1129 = vmatpush1.bf16.msra.mxu0 %v2092_v29  ;;  %1234 = vmatprep.subr.bf16.mxu1 %v2097_v30 }
 0x12a   : > { %1130 = vmatprep.subr.bf16.mxu0 %v2100_v31 }
 0x12c   : > { %1235 = vmatpush1.bf16.msra.mxu1 %v2095_v36 }
 0x12d   : > { %1131 = vmatpush1.bf16.msra.mxu0 %v2098_v37  ;;  %1236 = vmatprep.subr.bf16.mxu1 %v2103_v38 }
 0x12e   : > { %1328 = vmatprep.subr.bf16.mxu0 %v2106_v42 }
 0x130   : > { %1868 = vmatmul.mubr.msk.bf16.vlgmr.msra.gmra.mrb[12].mxu0 %vm255_vm1, %v1080_v21  ;;  %1237 = vmatpush1.bf16.msra.mxu1 %v2101_v45 }
 0x131   : > { %1329 = vmatpush1.bf16.msra.mxu0 %v2104_v47  ;;  %1437 = vmatprep.subr.bf16.mxu1 %v2109_v49 }
 0x132   : > { %1330 = vmatprep.subr.bf16.mxu0 %v2112_v15  ;;  %1360 = vmatprep.mubr.bf16.mxu0 %v2163_v41 }
 0x133   : > { %1885 = vmatmul.mubr.msk.bf16.vlgmr.msra.gmra.mrb[12].mxu1 %vm255_vm1, %v1186_v53 }
 0x134   : > { %1438 = vmatpush1.bf16.msra.mxu1 %v2107_v52  ;;  %1469 = vmatprep.mubr.bf16.mxu1 %v2163_v41 }
 0x135   : > { %1331 = vmatpush1.bf16.msra.mxu0 %v2110_v54  ;;  %1439 = vmatprep.subr.bf16.mxu1 %v2115_v55 }
 0x136   : > { %1332 = vmatprep.subr.bf16.mxu0 %v2118_v56 }
 0x138   : > { %1440 = vmatpush1.bf16.msra.mxu1 %v2113_v60 }
 0x139   : > { %1333 = vmatpush1.bf16.msra.mxu0 %v2116_v61  ;;  %1441 = vmatprep.subr.bf16.mxu1 %v2121_v62 }
 0x13a   : > { %1334 = vmatprep.subr.bf16.mxu0 %v2124_v63 }
 0x13c   : > { %1442 = vmatpush1.bf16.msra.mxu1 %v2119_v1 }
 0x13d   : > { %1335 = vmatpush1.bf16.msra.mxu0 %v2122_v2  ;;  %1443 = vmatprep.subr.bf16.mxu1 %v2127_v3 }
 0x13e   : > { %1563 = vmatprep.subr.bf16.mxu0 %v2130_v6 }
 0x140   : > { %1902 = vmatmul.mubr.msk.bf16.vlgmr.msra.gmra.mrb[16].mxu0 %vm255_vm1, %v1284_v13  ;;  %1444 = vmatpush1.bf16.msra.mxu1 %v2125_v8  ;;  %v1645_v13 = vld [vmem:[%s2634_s4] sm:$0xf] }
 0x141   : > { %1564 = vmatpush1.bf16.msra.mxu0 %v2128_v9  ;;  %1604 = vmatprep.subr.bf16.mxu1 %v2133_v12  ;;  %v1649_v12 = vsub.s32 0, %v2290_v27 }
 0x142   : > { %1565 = vmatprep.subr.bf16.mxu0 %v2136_v14  ;;  %1595 = vmatprep.mubr.bf16.mxu0 %v2163_v41  ;;  %v1653_v14 = vsub.s32 1, %v2290_v27 }
 0x143   : > { %1919 = vmatmul.mubr.msk.bf16.vlgmr.msra.gmra.mrb[16].mxu1 %vm255_vm1, %v1393_v16 }
 0x144   : > { %1605 = vmatpush1.bf16.msra.mxu1 %v2131_v58  ;;  %1636 = vmatprep.mubr.bf16.mxu1 %v2163_v41  ;;  %v2143_v41 = vld [vmem:[%s2633_s3 + $0x48] ss:$16 sps:$4 sm:$0xff]   ;;  %v1650_v58 = vrot.slane %v1645_v13, %v1649_v12  ;;  %v1654_v16 = vrot.slane %v1645_v13, %v1653_v14 }
 0x145   : > { %1566 = vmatpush1.bf16.msra.mxu0 %v2134_v17  ;;  %1606 = vmatprep.subr.bf16.mxu1 %v2139_v18  ;;  %v1657_v17 = vsub.s32 2, %v2290_v27  ;;  %v1661_v18 = vsub.s32 3, %v2290_v27 }
 0x146   : > { %1567 = vmatprep.subr.bf16.mxu0 %v2142_v19 }
 0x148   : > { %1607 = vmatpush1.bf16.msra.mxu1 %v2137_v20 }
 0x149   : > { %1568 = vmatpush1.bf16.msra.mxu0 %v2140_v22  ;;  %1608 = vmatprep.subr.bf16.mxu1 %v2145_v23 }
 0x14a   : > { %1569 = vmatprep.subr.bf16.mxu0 %v2148_v24 }
 0x14c   : > { %1609 = vmatpush1.bf16.msra.mxu1 %v2143_v41  ;;  %v1658_v41 = vrot.slane %v1645_v13, %v1657_v17 }
 0x14d   : > { %1570 = vmatpush1.bf16.msra.mxu0 %v2146_v59  ;;  %1610 = vmatprep.subr.bf16.mxu1 %v2151_v25 }
 0x150   : > { %1936 = vmatmul.mubr.msk.bf16.vlgmr.msra.gmra.mrb[20].mxu0 %vm255_vm1, %v2387_v35  ;;  %1611 = vmatpush1.bf16.msra.mxu1 %v2149_v26 }
 0x153   : > { %1937 = vmatmul.mubr.msk.bf16.vlgmr.msra.gmra.mrb[20].mxu1 %vm255_vm1, %v2387_v35 }
 0x1e3   : > { %v717_v28 = vpop.f32.mrb[4].mxu0 }
 0x1e4   : > { %v719_v29 = vpop.f32.mrb[5].mxu0 }
 0x1e5   : > { %v721_v30 = vpop.f32.mrb[6].mxu0 }
 0x1e6   : > { %v722_v31 = vpop.f32.mrb[7].mxu0  ;;  %v815_v33 = vpop.f32.mrb[4].mxu1 }
 0x1e7   : > { %v816_v34 = vadd.f32 %v815_v33, %v717_v28  ;;  %v817_v36 = vpop.f32.mrb[5].mxu1  ;;  %v1662_v28 = vrot.slane %v1645_v13, %v1661_v18 }
 0x1e8   : > { %v818_v37 = vadd.f32 %v817_v36, %v719_v29  ;;  %v819_v38 = vpop.f32.mrb[6].mxu1 }
 0x1e9   : > { %v820_v39 = vpop.f32.mrb[7].mxu1 }
 0x1f3   : > { %v938_v40 = vpop.f32.mrb[8].mxu0 }
 0x1f4   : > { %v945_v42 = vadd.f32 %v938_v40, %v816_v34  ;;  %v940_v43 = vpop.f32.mrb[9].mxu0 }
 0x1f5   : > { %v946_v44 = vadd.f32 %v940_v43, %v818_v37  ;;  %v942_v45 = vpop.f32.mrb[10].mxu0 }
 0x1f6   : > { %v943_v46 = vpop.f32.mrb[11].mxu0  ;;  %v1051_v47 = vpop.f32.mrb[8].mxu1 }
 0x1f7   : > { %v1058_v48 = vadd.f32 %v1051_v47, %v945_v42  ;;  %v1053_v49 = vpop.f32.mrb[9].mxu1 }
 0x1f8   : > { %v1059_v35 = vadd.f32 %v1053_v49, %v946_v44  ;;  %v1055_v21 = vpop.f32.mrb[10].mxu1 }
 0x1f9   : > { %v1056_v15 = vpop.f32.mrb[11].mxu1 }
 0x203   : > { %v1158_v50 = vpop.f32.mrb[12].mxu0 }
 0x204   : > { %v1165_v51 = vadd.f32 %v1158_v50, %v1058_v48  ;;  %v1160_v52 = vpop.f32.mrb[13].mxu0 }
 0x205   : > { %v1166_v53 = vadd.f32 %v1160_v52, %v1059_v35  ;;  %v1162_v54 = vpop.f32.mrb[14].mxu0 }
 0x206   : > { %v1163_v55 = vpop.f32.mrb[15].mxu0  ;;  %v1264_v56 = vpop.f32.mrb[12].mxu1 }
 0x207   : > { %v1271_v57 = vadd.f32 %v1264_v56, %v1165_v51  ;;  %v1266_v60 = vpop.f32.mrb[13].mxu1 }
 0x208   : > { %v1272_v61 = vadd.f32 %v1266_v60, %v1166_v53  ;;  %v1268_v62 = vpop.f32.mrb[14].mxu1 }
 0x209   : > { %v1269_v63 = vpop.f32.mrb[15].mxu1 }
 0x213   : > { %v1362_v0 = vpop.f32.mrb[16].mxu0 }
 0x214   : > { %v1369_v1 = vadd.f32 %v1362_v0, %v1271_v57  ;;  %v1364_v2 = vpop.f32.mrb[17].mxu0 }
 0x215   : > { %v1370_v3 = vadd.f32 %v1364_v2, %v1272_v61  ;;  %v1366_v4 = vpop.f32.mrb[18].mxu0 }
 0x216   : > { %v1367_v5 = vpop.f32.mrb[19].mxu0  ;;  %v1471_v6 = vpop.f32.mrb[16].mxu1 }
 0x217   : > { %v1478_v7 = vadd.f32 %v1471_v6, %v1369_v1  ;;  %v1473_v8 = vpop.f32.mrb[17].mxu1 }
 0x218   : > { %v1479_v9 = vadd.f32 %v1473_v8, %v1370_v3  ;;  %v1475_v10 = vpop.f32.mrb[18].mxu1 }
 0x219   : > { %v1476_v11 = vpop.f32.mrb[19].mxu1 }
 0x223   : > { %v1597_v19 = vpop.f32.mrb[20].mxu0 }
 0x224   : > { %v1667_v20 = vadd.f32 %v1650_v58, %v1597_v19  ;;  %v1599_v22 = vpop.f32.mrb[21].mxu0 }
 0x225   : > { %v1668_v23 = vadd.f32 %v1654_v16, %v1599_v22  ;;  %v1601_v24 = vpop.f32.mrb[22].mxu0 }
 0x226   : > { %v1671_v59 = vmax.f32 %v1667_v20, 0.0  ;;  %v1602_v25 = vpop.f32.mrb[23].mxu0  ;;  %v1638_v26 = vpop.f32.mrb[20].mxu1 }
 0x227   : > { %v1672_v29 = vmax.f32 %v1668_v23, 0.0  ;;  %v1639_v30 = vadd.f32 %v1638_v26, %v1478_v7  ;;  %v1640_v31 = vpop.f32.mrb[21].mxu1 }
 0x228   : > { %v1641_v33 = vadd.f32 %v1640_v31, %v1479_v9  ;;  %v1642_v34 = vpop.f32.mrb[22].mxu1 }
 0x229   : > { %v1938_v36 = vpack.c.bf16 %v1672_v29, %v1671_v59  ;;  %v1669_v37 = vadd.f32 %v1658_v41, %v1639_v30  ;;  %v1643_v38 = vpop.f32.mrb[23].mxu1 }
 0x22a   : > { %v1670_v27 = vadd.f32 %v1662_v28, %v1641_v33 }
 0x22b   : > { %v1673_v39 = vmax.f32 %v1669_v37, 0.0  ;;  %v1691_v43 = vrot.slane %v1938_v36, %v2300_v32 }
 0x22c   : > { %v1674_v40 = vmax.f32 %v1670_v27, 0.0 }
 0x22e   : > { %v1939_v42 = vpack.c.bf16 %v1674_v40, %v1673_v39 }
 0x230   : > { %v1698_v44 = vrot.slane %v1939_v42, %v2300_v32 }
 0x232   : > { %v1699_v45 = vcombine.low %v1691_v43, %v1698_v44 }
 0x234   : > { %1701 = vst [vmem:[%s251_s20] sm:$0xff] %v1699_v45 }
 0x235 PF: > { %s16_s21 = sadd.s32 1, %s2158_s21  }
 0x236   : > { %p13_p4 = scmp.ge.s32.totalorder %s16_s21, 4  }
 0x238   :  { %15 = sbr.rel (!%p13_p4) target bundleno = 1 (0x1), region = 81 }

// kernel: squeezenet11_forward.19
= control target key start
LH: loop header
LB: loop body
LE: loop exit
PB: predicated region body
PF: predicated region fallthrough
CT: control target
= control target key end

     0   :  { %8 = vsyncpa [#allocation3], 0  ;;  %s1060_s0 = inlined_call_operand.vmem [shape: bf16[2,4,512], index: 0, kind: input, shape index: {}]   ;;  %s1061_s1 = inlined_call_operand.vmem [shape: bf16[512,128], index: 1, kind: input, shape index: {}]   ;;  %s1062_s2 = inlined_call_operand.vmem [shape: f32[1,128], index: 2, kind: input, shape index: {}]   ;;  %s1063_s3 = inlined_call_operand.hbm [shape: f32[2,1,128], index: 3, kind: output, shape index: {}]  }
   0x1   :  { %10 = vsyncpa [#allocation3 + $0x1], 0  ;;  %s861_s12 = smov 0   ;;  %s863_s13 = smov 0  }
   0x2   :  { %s865_s14 = smov 0   ;;  %s867_s15 = smov 0  }
   0x3 LB: > { %s882_s16 = sadd.s32 4294967295, %s837_s15   ;;  %s615_s17 = sadd.s32 4294967294, %s837_s15   ;;  %s837_s15 = sphi %s867_s15, %s1069_s15   ;;  %s833_s14 = sphi %s865_s14, %s1068_s14   ;;  %s829_s13 = sphi %s863_s13, %s1067_s13   ;;  %s825_s12 = sphi %s861_s12, %s1066_s12  }
   0x4   : > { %s886_s18 = sadd.s32 1, %s837_s15   ;;  %s91_s19 = sadd.s32 1, %s833_s14 }
   0x5   : > { %s88_s20 = ssub.s32 %s837_s15, %s886_s18  ;;  %p101_p0 = scmp.ne.s32.totalorder %s833_s14, %s829_s13 }
   0x6   : > { %p89_p1 = scmp.eq.s32.totalorder %s88_s20, 0  ;;  %p102_p2 = scmp.eq.s32.totalorder %s882_s16, 1 }
   0x7   : > { %p107_p3 = scmp.ne.s32.totalorder %s829_s13, %s825_s12  ;;  %p108_p4 = scmp.eq.s32.totalorder %s615_s17, 1 }
   0x8   : > { %s897_s21 = scalar_select %p89_p1, %s833_s14, %s91_s19  }
   0x9   : > { %p899_p5 = por %p102_p2, %p101_p0  ;;  %p903_p6 = por %p108_p4, %p107_p3 }
   0xa   : > { %p618_p7 = scmp.ge.s32.totalorder %s837_s15, 1  ;;  %p140_p8 = scmp.lt.s32.totalorder %s837_s15, 3 }
   0xc   : > { %p141_p9 = pnand %p618_p7, %p140_p8 }
   0xd   : > { %v742_v0 = vld [vmem:[%s1061_s1 + $0x40] sm:$0xff] (!%p141_p9)   ;;  %v746_v4 = vld [vmem:[%s1061_s1 + $0x48] sm:$0xff] (!%p141_p9)   ;;  %v750_v8 = vld [vmem:[%s1061_s1 + $0x50] sm:$0xff] (!%p141_p9)   ;;  %p163_p10 = scmp.lt.s32.totalorder (!%p141_p9), %s882_s16, 1  ;;  %v246_v30 = vlaneseq (!%p141_p9)  ;;  %v839_v34 = vmov (!%p141_p9), 1983009808  }
   0xe   : > { %144 = sbr.rel (%p141_p9) target bundleno = 297 (0x129), region = 32  ;;  %v743_v1 = vld [vmem:[%s1061_s1 + $0xc0] sm:$0xff] (!%p141_p9)   ;;  %658 = vmatprep.subr.bf16.mxu0 (!%p141_p9), %v742_v0  ;;  %v747_v5 = vld [vmem:[%s1061_s1 + $0xc8] sm:$0xff] (!%p141_p9)   ;;  %v751_v9 = vld [vmem:[%s1061_s1 + $0xd0] sm:$0xff] (!%p141_p9)   ;;  %v244_v35 = vunpack.c.l.s4 (!%p141_p9), %v839_v34  ;;  %vm536_vm0 = vcmask (!%p141_p9), 1043456   ;;  %s161_s20 = sand.u32 (!%p141_p9), 1, %s829_s13  }
   0xf   : > { %v744_v2 = vld [vmem:[%s1061_s1] sm:$0xff] (!%p141_p9)   ;;  %680 = vmatprep.subr.bf16.mxu1 (!%p141_p9), %v743_v1  ;;  %v748_v6 = vld [vmem:[%s1061_s1 + $0x8] sm:$0xff] (!%p141_p9)   ;;  %v752_v10 = vld [vmem:[%s1061_s1 + $0x10] sm:$0xff] (!%p141_p9)   ;;  %v247_v36 = vshrl.u32 (!%p141_p9), %v246_v30, 7  ;;  %s654_s24 = sshll.u32 (!%p141_p9), %s882_s16, 4  ;;  %s548_s30 = scalar_lea.sflag (!%p141_p9), [#allocation3], %s161_s20 }
  0x10   : > { %v745_v3 = vld [vmem:[%s1061_s1 + $0x80] sm:$0xff] (!%p141_p9)   ;;  %659 = vmatpush3.bf16.msra.mxu0 (!%p141_p9), %v744_v2  ;;  %v749_v7 = vld [vmem:[%s1061_s1 + $0x88] sm:$0xff] (!%p141_p9)   ;;  %v753_v11 = vld [vmem:[%s1061_s1 + $0x90] sm:$0xff] (!%p141_p9)   ;;  %v245_v37 = vunpack.c.0.s8 (!%p141_p9), %v244_v35  ;;  %s1018_s29 = scalar_lea.hbm (!%p141_p9), %s1063_s3, %s654_s24 }
  0x11   : > { %681 = vmatpush3.bf16.msra.mxu1 (!%p141_p9), %v745_v3  ;;  %660 = vmatprep.subr.bf16.mxu0 (!%p141_p9), %v746_v4  ;;  %v754_v12 = vld [vmem:[%s1061_s1 + $0x58] sm:$0xff] (!%p141_p9)   ;;  %v758_v16 = vld [vmem:[%s1061_s1 + $0x60] sm:$0xff] (!%p141_p9)   ;;  %v762_v20 = vld [vmem:[%s1061_s1 + $0x68] sm:$0xff] (!%p141_p9)  }
  0x12   : > { %682 = vmatprep.subr.bf16.mxu1 (!%p141_p9), %v747_v5  ;;  %v755_v13 = vld [vmem:[%s1061_s1 + $0xd8] sm:$0xff] (!%p141_p9)   ;;  %v759_v17 = vld [vmem:[%s1061_s1 + $0xe0] sm:$0xff] (!%p141_p9)   ;;  %v763_v21 = vld [vmem:[%s1061_s1 + $0xe8] sm:$0xff] (!%p141_p9)   ;;  %v248_v39 = vsub.s32 (!%p141_p9), %v245_v37, %v247_v36 }
  0x13   : > { %v756_v14 = vld [vmem:[%s1061_s1 + $0x18] sm:$0xff] (!%p141_p9)   ;;  %v760_v18 = vld [vmem:[%s1061_s1 + $0x20] sm:$0xff] (!%p141_p9)   ;;  %v764_v22 = vld [vmem:[%s1061_s1 + $0x28] sm:$0xff] (!%p141_p9)  }
  0x14   : > { %661 = vmatpush3.bf16.msra.mxu0 (!%p141_p9), %v748_v6  ;;  %v757_v15 = vld [vmem:[%s1061_s1 + $0x98] sm:$0xff] (!%p141_p9)   ;;  %v761_v19 = vld [vmem:[%s1061_s1 + $0xa0] sm:$0xff] (!%p141_p9)   ;;  %v765_v23 = vld [vmem:[%s1061_s1 + $0xa8] sm:$0xff] (!%p141_p9)  }
  0x15   : > { %683 = vmatpush3.bf16.msra.mxu1 %v749_v7  ;;  %662 = vmatprep.subr.bf16.mxu0 %v750_v8  ;;  %s164_s7 = scalar_select %p163_p10, %s882_s16, 1  ;;  %v766_v24 = vld [vmem:[%s1061_s1 + $0x70] sm:$0xff]   ;;  %v770_v28 = vld [vmem:[%s1061_s1 + $0x78] sm:$0xff]   ;;  %v621_v46 = vld [vmem:[%s1062_s2] ss:$0 sm:$0xff] }
  0x16   : > { %684 = vmatprep.subr.bf16.mxu1 %v751_v9  ;;  %v767_v25 = vld [vmem:[%s1061_s1 + $0xf0] sm:$0xff]   ;;  %v771_v29 = vld [vmem:[%s1061_s1 + $0xf8] sm:$0xff]   ;;  %s840_s16 = smov [#allocation2]  }
  0x17   : > { %v768_v26 = vld [vmem:[%s1061_s1 + $0x30] sm:$0xff]   ;;  %s657_s25 = sshll.u32 %s164_s7, 3  ;;  %v772_v31 = vld [vmem:[%s1061_s1 + $0x38] sm:$0xff]   ;;  %s779_s5 = sshll.u32 %s840_s16, 4  ;;  %s780_s5 = int_to_ptr.vmem [resolvable:$false] %s779_s5 }
  0x18   : > { %663 = vmatpush3.bf16.msra.mxu0 %v752_v10  ;;  %v769_v27 = vld [vmem:[%s1061_s1 + $0xb0] sm:$0xff]   ;;  %s167_s8 = scalar_lea.vmem %s1060_s0, %s657_s25  ;;  %v773_v32 = vld [vmem:[%s1061_s1 + $0xb8] sm:$0xff]   ;;  %s162_s25 = scalar_lea.vmem [#allocation2], %s161_s20 }
  0x19   : > { %685 = vmatpush3.bf16.msra.mxu1 %v753_v11  ;;  %664 = vmatprep.subr.bf16.mxu0 %v754_v12  ;;  %v169_v33 = vld [vmem:[%s167_s8] sm:$0xff]  ;;  %s560_s26 = sshll.u32 %s162_s25, 4  ;;  %s781_s6 = scalar_lea.vmem %s780_s5, 32  ;;  %s1020_s26 = int_to_ptr.vmem [resolvable:$true] %s560_s26 }
  0x1a   : > { %686 = vmatprep.subr.bf16.mxu1 %v755_v13  ;;  %v242_v38 = vcombine.high %v169_v33, %v169_v33  ;;  %v249_v40 = vrot.slane %v169_v33, %v248_v39  ;;  %s775_s4 = scalar_lea.vmem %s1020_s26, 16  ;;  %p782_p0 = scmp.lt.s32.totalorder %s1020_s26, %s780_s5 }
  0x1b   : > { %p776_p11 = scmp.ne.s32.totalorder %s1020_s26, %s775_s4  ;;  %p783_p1 = scmp.lt.s32.totalorder %s781_s6, %s775_s4 }
  0x1c   : > { %665 = vmatpush3.bf16.msra.mxu0 %v756_v14  ;;  %v256_v41 = vrot.slane %v242_v38, %v248_v39  ;;  %v257_v42 = vcombine.high %v249_v40, %v249_v40 }
  0x1d   : > { %687 = vmatpush3.bf16.msra.mxu1 %v757_v15  ;;  %666 = vmatprep.subr.bf16.mxu0 %v758_v16  ;;  %p777_p12 = pnand %p776_p11, %p899_p5  ;;  %p784_p2 = por %p783_p1, %p782_p0 }
  0x1e   : > { %688 = vmatprep.subr.bf16.mxu1 %v759_v17  ;;  %v258_v43 = vcombine.high %v256_v41, %v256_v41  ;;  %487 = vmatprep.mubr.bf16.mxu0 %v257_v42 }
  0x1f   : > { %p778_p13 = pneg %p777_p12 }
  0x20   : > { %667 = vmatpush3.bf16.msra.mxu0 %v760_v18  ;;  %527 = vmatprep.mubr.bf16.mxu1 %v258_v43 }
  0x21   : > { %689 = vmatpush3.bf16.msra.mxu1 %v761_v19  ;;  %668 = vmatprep.subr.bf16.mxu0 %v762_v20  ;;  %p785_p3 = pnand %p784_p2, %p778_p13 }
  0x22   : > { %690 = vmatprep.subr.bf16.mxu1 %v763_v21 }
  0x24   : > { %669 = vmatpush3.bf16.msra.mxu0 %v764_v22 }
  0x25   : > { %691 = vmatpush3.bf16.msra.mxu1 %v765_v23  ;;  %670 = vmatprep.subr.bf16.mxu0 %v766_v24 }
  0x26   : > { %692 = vmatprep.subr.bf16.mxu1 %v767_v25 }
  0x28   : > { %671 = vmatpush3.bf16.msra.mxu0 %v768_v26 }
  0x29   : > { %693 = vmatpush3.bf16.msra.mxu1 %v769_v27  ;;  %672 = vmatprep.subr.bf16.mxu0 %v770_v28 }
  0x2a   : > { %694 = vmatprep.subr.bf16.mxu1 %v771_v29 }
  0x2c   : > { %673 = vmatpush3.bf16.msra.mxu0 %v772_v31 }
  0x2d   : > { %695 = vmatpush3.bf16.msra.mxu1 %v773_v32 }
  0x2f   : > { %488 = vmatmul.mubr.bf16.vlgmr.msra.gmra.mrb[0].mxu0 %v249_v40 }
  0x30   : > { %528 = vmatmul.mubr.bf16.vlgmr.msra.gmra.mrb[0].mxu1 %v256_v41 }
 0x102   : > { %v674_v44 = vpop.f32.mrb[0].mxu0 }
 0x103   : > { %v696_v45 = vpop.f32.mrb[0].mxu1  ;;  %v675_v47 = vpop.f32.mrb[1].mxu0 }
 0x104   : > { %v697_v48 = vpop.f32.mrb[1].mxu1  ;;  %v676_v49 = vadd.f32 %v675_v47, %v674_v44  ;;  %v677_v51 = vpop.f32.mrb[2].mxu0 }
 0x105   : > { %v698_v50 = vadd.f32 %v697_v48, %v696_v45  ;;  %v699_v52 = vpop.f32.mrb[2].mxu1  ;;  %v678_v53 = vpop.f32.mrb[3].mxu0 }
 0x106   : > { %v700_v54 = vpop.f32.mrb[3].mxu1  ;;  %v490_v55 = vadd.f32 %v676_v49, %v621_v46 }
 0x108   : > { %v530_v56 = vadd.f32 %v698_v50, %v490_v55 }
 0x10a   : > { %v535_v57 = vmax.f32 %v530_v56, 0.0 }
 0x10c   : > { %v537_v58 = vsel %vm536_vm0, %v535_v57, 0.0 }
 0x10d   : > { %v538_v59 = vrot.slane %v537_v58, 4 }
 0x10f   : > { %v539_v60 = vadd.f32 %v538_v59, %v537_v58 }
 0x111   : > { %v540_v61 = vrot.slane %v539_v60, 2 }
 0x113   : > { %v541_v62 = vadd.f32 %v540_v61, %v539_v60 }
 0x115   : > { %v542_v63 = vrot.slane %v541_v62, 1 }
 0x117   : > { %v543_v0 = vadd.f32 %v542_v63, %v541_v62 }
 0x119   : > { %v545_v1 = vmul.f32 0.25, %v543_v0 }
 0x11b   : > { %546 = vst [vmem:[%s162_s25] sm:$0x1] %v545_v1 }
 0x11c   : > { %788 = shalt.err (!%p785_p3)
}
 0x11d   : > { %s789_s8 = scalar_lea.hbm %s1018_s29, 16  ;;  %s793_s10 = scalar_lea.hbm %s1063_s3, 32 }
 0x11e   : > { %p790_p4 = scmp.ne.s32.totalorder %s1018_s29, %s789_s8  ;;  %p794_p9 = scmp.lt.u32.totalorder %s1018_s29, %s1063_s3 }
 0x11f   : > { %p795_p10 = scmp.lt.u32.totalorder %s793_s10, %s789_s8  ;;  %p797_p12 = scmp.lt.u32.totalorder %s789_s8, %s1018_s29 }
 0x120   : > { %p791_p7 = pnand %p790_p4, %p899_p5 }
 0x121   : > { %p796_p11 = por %p795_p10, %p794_p9 }
 0x122   : > { %p792_p8 = pneg %p791_p7 }
 0x123   : > { %p798_p13 = por %p797_p12, %p796_p11 }
 0x125   : > { %p799_p0 = pnand %p798_p13, %p792_p8 }
 0x127   : > { %802 = shalt.err (!%p799_p0)
}
 0x128   : > { %702 = dma.vmem_to_hbm [thread:$0]  (%p899_p5), %s1020_s26, 16, %s1018_s29, %s548_s30  }
 0x129 PF: > { %p708_p1 = scmp.ge.s32.totalorder %s837_s15, 2  ;;  %s572_s19 = sand.u32 1, %s825_s12  }
 0x12a   : > { %s573_s20 = scalar_lea.sflag [#allocation3], %s572_s19 }
 0x12b   : > { %p705_p2 = pnand %p708_p1, %p903_p6 }
 0x12d   : > { %820 = dma.done.wait (!%p705_p2), %s573_s20, 16  }
 0x12e   : > { %822 = vsyncadd (!%p705_p2), %s573_s20, 4294967280  ;;  %p13_p3 = scmp.ge.s32.totalorder %s886_s18, 4   ;;  %s1066_s12 = smov %s829_s13 }
 0x12f   : > { %s1067_s13 = smov %s833_s14  ;;  %s1068_s14 = smov %s897_s21 }
 0x130   : > { %s1069_s15 = smov %s886_s18  ;;  %15 = sbr.rel (!%p13_p3) target bundleno = 3 (0x3), region = 67 }
 0x137   :  { %577 = vsyncpa [#allocation3], 1 }
 0x138   :  { %579 = vsyncpa [#allocation3 + $0x1], 1 }

// kernel: squeezenet11_forward.18
= control target key start
LH: loop header
LB: loop body
LE: loop exit
PB: predicated region body
PF: predicated region fallthrough
CT: control target
= control target key end

     0   :  { %s2271_s21 = smov 0   ;;  %s2720_s0 = inlined_call_operand.vmem [shape: bf16[2,4,512], index: 0, kind: input, shape index: {}]   ;;  %s2721_s1 = inlined_call_operand.vmem [shape: bf16[512,64], index: 1, kind: input, shape index: {}]   ;;  %s2722_s2 = inlined_call_operand.vmem [shape: f32[1,64], index: 2, kind: input, shape index: {}]   ;;  %s2723_s3 = inlined_call_operand.vmem [shape: bf16[64,512], index: 3, kind: input, shape index: {}]   ;;  %s2724_s4 = inlined_call_operand.vmem [shape: f32[1,512], index: 4, kind: input, shape index: {}]   ;;  %s2725_s5 = inlined_call_operand.vmem [shape: bf16[8,64,256], index: 5, kind: input, shape index: {}]   ;;  %s2726_s6 = inlined_call_operand.vmem [shape: bf16[2,4,512], index: 6, kind: output, shape index: {}]  }
   0x1 LB: > { %s1823_s22 = sadd.s32 4294967295, %s2232_s21   ;;  %p1827_p0 = scmp.ge.s32.totalorder %s2232_s21, 1  ;;  %s2232_s21 = sphi %s2271_s21, %s16_s21  }
   0x2   : > { %p212_p1 = scmp.lt.s32.totalorder %s2232_s21, 3 }
   0x4   : > { %p213_p2 = pnand %p1827_p0, %p212_p1 }
   0x5   : > { %v2073_v0 = vld [vmem:[%s2721_s1 + $0x40] sm:$0xff] (!%p213_p2)   ;;  %v2077_v4 = vld [vmem:[%s2721_s1 + $0x48] sm:$0xff] (!%p213_p2)   ;;  %v2081_v8 = vld [vmem:[%s2721_s1 + $0x50] sm:$0xff] (!%p213_p2)   ;;  %p242_p3 = scmp.lt.s32.totalorder (!%p213_p2), %s1823_s22, 1  ;;  %v336_v30 = vlaneseq (!%p213_p2)  ;;  %v2234_v34 = vmov (!%p213_p2), 1983009808  }
   0x6   : > { %216 = sbr.rel (%p213_p2) target bundleno = 566 (0x236), region = 44  ;;  %v2074_v1 = vld [vmem:[%s2721_s1 + $0xc0] sm:$0xff] (!%p213_p2)   ;;  %2019 = vmatprep.subr.bf16.mxu0 (!%p213_p2), %v2073_v0  ;;  %v2078_v5 = vld [vmem:[%s2721_s1 + $0xc8] sm:$0xff] (!%p213_p2)   ;;  %v2082_v9 = vld [vmem:[%s2721_s1 + $0xd0] sm:$0xff] (!%p213_p2)   ;;  %v334_v35 = vunpack.c.l.s4 (!%p213_p2), %v2234_v34  ;;  %v2235_v49 = vmov (!%p213_p2), 0   ;;  %vm255_vm0 = vcmask (!%p213_p2), 523264  }
   0x7   : > { %v2075_v2 = vld [vmem:[%s2721_s1] sm:$0xff] (!%p213_p2)   ;;  %2041 = vmatprep.subr.bf16.mxu1 (!%p213_p2), %v2074_v1  ;;  %v2079_v6 = vld [vmem:[%s2721_s1 + $0x8] sm:$0xff] (!%p213_p2)   ;;  %v2083_v10 = vld [vmem:[%s2721_s1 + $0x10] sm:$0xff] (!%p213_p2)   ;;  %v2387_v36 = vshrl.u32 (!%p213_p2), %v336_v30, 7  ;;  %256 = vst.msk [vmem:[#allocation2] sm:$0xff] (!%p213_p2), %vm255_vm0, %v2235_v49  ;;  %vm257_vm1 = vcmask (!%p213_p2), 523266  }
   0x8   : > { %v2076_v3 = vld [vmem:[%s2721_s1 + $0x80] sm:$0xff] (!%p213_p2)   ;;  %2020 = vmatpush3.bf16.msra.mxu0 (!%p213_p2), %v2075_v2  ;;  %v2080_v7 = vld [vmem:[%s2721_s1 + $0x88] sm:$0xff] (!%p213_p2)   ;;  %v2084_v11 = vld [vmem:[%s2721_s1 + $0x90] sm:$0xff] (!%p213_p2)   ;;  %v335_v37 = vunpack.c.0.s8 (!%p213_p2), %v334_v35  ;;  %258 = vst.msk [vmem:[#allocation2 + $0x8] sm:$0xfc] (!%p213_p2), %vm257_vm1, %v2235_v49  ;;  %vm627_vm7 = vcmask (!%p213_p2), 517120  }
   0x9   : > { %2042 = vmatpush3.bf16.msra.mxu1 (!%p213_p2), %v2076_v3  ;;  %2021 = vmatprep.subr.bf16.mxu0 (!%p213_p2), %v2077_v4  ;;  %v2085_v12 = vld [vmem:[%s2721_s1 + $0x58] sm:$0xff] (!%p213_p2)   ;;  %v2089_v16 = vld [vmem:[%s2721_s1 + $0x60] sm:$0xff] (!%p213_p2)   ;;  %v2093_v20 = vld [vmem:[%s2721_s1 + $0x68] sm:$0xff] (!%p213_p2)   ;;  %v635_v63 = vand.u32 (!%p213_p2), 1, %v2387_v36  ;;  %vm702_vm9 = vcmask (!%p213_p2), 1040384  }
   0xa   : > { %2043 = vmatprep.subr.bf16.mxu1 (!%p213_p2), %v2078_v5  ;;  %v2086_v13 = vld [vmem:[%s2721_s1 + $0xd8] sm:$0xff] (!%p213_p2)   ;;  %v2090_v17 = vld [vmem:[%s2721_s1 + $0xe0] sm:$0xff] (!%p213_p2)   ;;  %v2094_v21 = vld [vmem:[%s2721_s1 + $0xe8] sm:$0xff] (!%p213_p2)   ;;  %v2390_v39 = vsub.s32 (!%p213_p2), %v335_v37, %v2387_v36  ;;  %vm790_vm11 = vsmask.f32 (!%p213_p2), 1280 }
   0xb   : > { %v2087_v14 = vld [vmem:[%s2721_s1 + $0x18] sm:$0xff] (!%p213_p2)   ;;  %v2091_v18 = vld [vmem:[%s2721_s1 + $0x20] sm:$0xff] (!%p213_p2)   ;;  %v2095_v22 = vld [vmem:[%s2721_s1 + $0x28] sm:$0xff] (!%p213_p2)   ;;  %vm643_vm2 = vcmp.ne.s32.totalorder (!%p213_p2), %v635_v63, 0  ;;  %vm644_vm4 = vcmp.ne.s32.totalorder (!%p213_p2), %v635_v63, 1 }
   0xc   : > { %2022 = vmatpush3.bf16.msra.mxu0 (!%p213_p2), %v2079_v6  ;;  %v2088_v15 = vld [vmem:[%s2721_s1 + $0x98] sm:$0xff] (!%p213_p2)   ;;  %v2092_v19 = vld [vmem:[%s2721_s1 + $0xa0] sm:$0xff] (!%p213_p2)   ;;  %v2096_v23 = vld [vmem:[%s2721_s1 + $0xa8] sm:$0xff] (!%p213_p2)   ;;  %vm914_vm15 = vsmask.f32 (!%p213_p2), 256 }
   0xd   : > { %2044 = vmatpush3.bf16.msra.mxu1 %v2080_v7  ;;  %2023 = vmatprep.subr.bf16.mxu0 %v2081_v8  ;;  %s2732_s22 = smov (!%p242_p3, %s1823_s22), 1  ;;  %v2097_v24 = vld [vmem:[%s2721_s1 + $0x70] sm:$0xff]   ;;  %v2101_v28 = vld [vmem:[%s2721_s1 + $0x78] sm:$0xff]   ;;  %v2108_v44 = vld [vmem:[%s2725_s5 + $0x44] ss:$8 sps:$4 sm:$0xff]  }
   0xe   : > { %2045 = vmatprep.subr.bf16.mxu1 %v2082_v9  ;;  %v2098_v25 = vld [vmem:[%s2721_s1 + $0xf0] sm:$0xff]   ;;  %s2017_s9 = sshll.u32 %s2732_s22, 3  ;;  %v2102_v29 = vld [vmem:[%s2721_s1 + $0xf8] sm:$0xff]   ;;  %v2106_v45 = vld [vmem:[%s2725_s5 + $0x40] ss:$8 sps:$4 sm:$0xff]  }
   0xf   : > { %v2099_v26 = vld [vmem:[%s2721_s1 + $0x30] sm:$0xff]   ;;  %s246_s18 = scalar_lea.vmem %s2720_s0, %s2017_s9  ;;  %v2103_v31 = vld [vmem:[%s2721_s1 + $0x38] sm:$0xff]   ;;  %v2111_v46 = vld [vmem:[%s2725_s5 + $0x4] ss:$8 sps:$4 sm:$0xff]   ;;  %s251_s23 = scalar_lea.vmem %s2726_s6, %s2017_s9 }
  0x10   : > { %2024 = vmatpush3.bf16.msra.mxu0 %v2083_v10  ;;  %v2100_v27 = vld [vmem:[%s2721_s1 + $0xb0] sm:$0xff]   ;;  %v2104_v32 = vld [vmem:[%s2721_s1 + $0xb8] sm:$0xff]   ;;  %v259_v33 = vld [vmem:[%s246_s18] sm:$0xff] }
  0x11   : > { %2046 = vmatpush3.bf16.msra.mxu1 %v2084_v11  ;;  %2025 = vmatprep.subr.bf16.mxu0 %v2085_v12  ;;  %v332_v38 = vcombine.high %v259_v33, %v259_v33  ;;  %v339_v40 = vrot.slane %v259_v33, %v2390_v39  ;;  %v2109_v47 = vld [vmem:[%s2725_s5] ss:$8 sps:$4 sm:$0xff]   ;;  %v2114_v48 = vld [vmem:[%s2725_s5 + $0x54] ss:$8 sps:$4 sm:$0xff]   ;;  %v2112_v50 = vld [vmem:[%s2725_s5 + $0x50] ss:$8 sps:$4 sm:$0xff]  }
  0x12   : > { %2047 = vmatprep.subr.bf16.mxu1 %v2086_v13  ;;  %v2117_v51 = vld [vmem:[%s2725_s5 + $0x14] ss:$8 sps:$4 sm:$0xff]   ;;  %v2115_v52 = vld [vmem:[%s2725_s5 + $0x10] ss:$8 sps:$4 sm:$0xff]   ;;  %v2118_v53 = vld [vmem:[%s2725_s5 + $0x60] ss:$8 sps:$4 sm:$0xff]  }
  0x13   : > { %v346_v41 = vrot.slane %v332_v38, %v2390_v39  ;;  %v347_v42 = vcombine.high %v339_v40, %v339_v40  ;;  %v2120_v54 = vld [vmem:[%s2725_s5 + $0x64] ss:$8 sps:$4 sm:$0xff]   ;;  %v2121_v56 = vld [vmem:[%s2725_s5 + $0x20] ss:$8 sps:$4 sm:$0xff]   ;;  %v2126_v57 = vld [vmem:[%s2725_s5 + $0x74] ss:$8 sps:$4 sm:$0xff]  }
  0x14   : > { %2026 = vmatpush3.bf16.msra.mxu0 %v2087_v14  ;;  %v2123_v55 = vld [vmem:[%s2725_s5 + $0x24] ss:$8 sps:$4 sm:$0xff]   ;;  %v2124_v58 = vld [vmem:[%s2725_s5 + $0x70] ss:$8 sps:$4 sm:$0xff]   ;;  %v2129_v59 = vld [vmem:[%s2725_s5 + $0x34] ss:$8 sps:$4 sm:$0xff]  }
  0x15   : > { %2048 = vmatpush3.bf16.msra.mxu1 %v2088_v15  ;;  %2027 = vmatprep.subr.bf16.mxu0 %v2089_v16  ;;  %v348_v43 = vcombine.high %v346_v41, %v346_v41  ;;  %v2132_v60 = vld [vmem:[%s2725_s5 + $0x84] ss:$8 sps:$4 sm:$0xff]   ;;  %v2127_v61 = vld [vmem:[%s2725_s5 + $0x30] ss:$8 sps:$4 sm:$0xff]   ;;  %vm666_vm3 = vmpackc.low %vm643_vm2, %vm643_vm2 }
  0x16   : > { %2049 = vmatprep.subr.bf16.mxu1 %v2090_v17  ;;  %577 = vmatprep.mubr.bf16.mxu0 %v347_v42  ;;  %v2135_v62 = vld [vmem:[%s2725_s5 + $0xc4] ss:$8 sps:$4 sm:$0xff]   ;;  %v667_v0 = vsel %vm666_vm3, 65537, %v2235_v49  ;;  %vm890_vm5 = vmpackc.low %vm644_vm4, %vm644_vm4  ;;  %v1832_v8 = vld [vmem:[%s2722_s2] ss:$0 sm:$0xff] }
  0x17   : > { %617 = vmatprep.mubr.bf16.mxu1 %v348_v43  ;;  %v1865_v1 = vcombine.low %v667_v0, %v667_v0  ;;  %v891_v11 = vsel %vm890_vm5, 65537, %v2235_v49  ;;  %v2130_v38 = vld [vmem:[%s2725_s5 + $0x80] ss:$8 sps:$4 sm:$0xff]   ;;  %v2147_v0 = vld [vmem:[%s2725_s5 + $0xe4] ss:$8 sps:$4 sm:$0xff]  }
  0x18   : > { %2028 = vmatpush3.bf16.msra.mxu0 %v2091_v18  ;;  %v2142_v63 = vld [vmem:[%s2725_s5 + $0xa0] ss:$8 sps:$4 sm:$0xff]  }
  0x19   : > { %2050 = vmatpush3.bf16.msra.mxu1 %v2092_v19  ;;  %2029 = vmatprep.subr.bf16.mxu0 %v2093_v20  ;;  %v2455_v2 = vshrl.u32 %v1865_v1, 16  ;;  %v2457_v3 = vshll.u32 %v1865_v1, 16  ;;  %v1892_v20 = vcombine.low %v891_v11, %v891_v11  ;;  %v2150_v1 = vld [vmem:[%s2725_s5 + $0xb4] ss:$8 sps:$4 sm:$0xff]  }
  0x1a   : > { %2051 = vmatprep.subr.bf16.mxu1 %v2094_v21  ;;  %v2153_v11 = vld [vmem:[%s2725_s5 + $0xf4] ss:$8 sps:$4 sm:$0xff]  }
  0x1b   : > { %v673_v4 = vrot.slane %v2455_v2, 1  ;;  %v676_v5 = vrot.slane %v2457_v3, 2  ;;  %v2468_v30 = vshrl.u32 %v1892_v20, 16 }
  0x1c   : > { %2030 = vmatpush3.bf16.msra.mxu0 %v2095_v22  ;;  %v662_v22 = vld [vmem:[#allocation2] sm:$0xc0] }
  0x1d   : > { %2052 = vmatpush3.bf16.msra.mxu1 %v2096_v23  ;;  %2031 = vmatprep.subr.bf16.mxu0 %v2097_v24  ;;  %v677_v18 = vor.u32 %v676_v5, %v673_v4  ;;  %v2465_v24 = vshll.u32 %v1892_v20, 16  ;;  %vm679_vm8 = vcmp.ne.s16.totalorder %v673_v4, 0 }
  0x1e   : > { %2053 = vmatprep.subr.bf16.mxu1 %v2098_v25 }
  0x1f   : > { %vm678_vm6 = vcmp.ne.s16.totalorder %v677_v18, 0  ;;  %v1233_v18 = vrot.slane %v2455_v2, 7 }
  0x20   : > { %2032 = vmatpush3.bf16.msra.mxu0 %v2099_v26  ;;  %v680_v26 = vsel %vm678_vm6, %v662_v22, 0  ;;  %v2154_v22 = vld [vmem:[%s2725_s5 + $0x100] ss:$8 sps:$4 sm:$0xff]  }
  0x21   : > { %2054 = vmatpush3.bf16.msra.mxu1 %v2100_v27  ;;  %2033 = vmatprep.subr.bf16.mxu0 %v2101_v28  ;;  %v897_v27 = vrot.slane %v2465_v24, 1  ;;  %v792_v28 = vshrl.u32 %v680_v26, 16 }
  0x22   : > { %2055 = vmatprep.subr.bf16.mxu1 %v2102_v29  ;;  %v795_v29 = vshll.u32 %v680_v26, 16  ;;  %v2162_v26 = vld [vmem:[%s2725_s5 + $0x114] ss:$8 sps:$4 sm:$0xff]  }
  0x23   : > { %v900_v33 = vor.u32 %v2468_v30, %v897_v27  ;;  %v794_v34 = vrot.slane %v792_v28, 6  ;;  %vm2493_vm13 = vcmp.ne.s16.totalorder %v897_v27, 0  ;;  %v1234_v28 = vor.u32 %v1233_v18, %v2457_v3  ;;  %v2202_v18 = vld [vmem:[%s2723_s3] ss:$16 sps:$4 sm:$0xff]  }
  0x24   : > { %2034 = vmatpush3.bf16.msra.mxu0 %v2103_v31  ;;  %v690_v31 = vld [vmem:[#allocation2] sm:$0x80]  ;;  %v797_v35 = vrot.slane %v795_v29, 7  ;;  %v2157_v29 = vld [vmem:[%s2725_s5 + $0x140] ss:$8 sps:$4 sm:$0xff]  }
  0x25   : > { %2056 = vmatpush3.bf16.msra.mxu1 %v2104_v32  ;;  %749 = vmatprep.subr.bf16.mxu0 %v2108_v44  ;;  %v1013_v32 = vrot.slane %v2457_v3, 1  ;;  %v703_v37 = vrot.slane %v690_v31, 7  ;;  %vm902_vm10 = vcmp.ne.s16.totalorder %v900_v33, 0  ;;  %v2165_v33 = vld [vmem:[%s2725_s5 + $0x154] ss:$8 sps:$4 sm:$0xff]   ;;  %vm1235_vm2 = vcmp.ne.s16.totalorder %v1234_v28, 0 }
  0x26   : > { %847 = vmatprep.subr.bf16.mxu1 %v2111_v46  ;;  %v2216_v28 = vld [vmem:[%s2723_s3 + $0x44] ss:$16 sps:$4 sm:$0xff]  }
  0x27   : > { %578 = vmatmul.mubr.bf16.vlgmr.msra.gmra.mrb[0].mxu0 %v339_v40  ;;  %vm2508_vm14 = vcmp.ne.s16.totalorder %v1013_v32, 0 }
  0x28   : > { %618 = vmatmul.mubr.bf16.vlgmr.msra.gmra.mrb[0].mxu1 %v346_v41  ;;  %750 = vmatpush1.bf16.msra.mxu0 %v2106_v45  ;;  %v1014_v41 = vor.u32 %v1013_v32, %v2455_v2  ;;  %v798_v45 = vor.u32 %v797_v35, %v794_v34  ;;  %v2160_v32 = vld [vmem:[%s2725_s5 + $0x110] ss:$8 sps:$4 sm:$0xff]   ;;  %v2168_v34 = vld [vmem:[%s2725_s5 + $0x124] ss:$8 sps:$4 sm:$0xff]  }
  0x29   : > { %781 = vmatprep.mubr.bf16.mxu0 %v2235_v49  ;;  %879 = vmatprep.mubr.bf16.mxu1 %v2235_v49 }
  0x2a   : > { %751 = vmatprep.subr.bf16.mxu0 %v2114_v48  ;;  %848 = vmatpush1.bf16.msra.mxu1 %v2109_v47  ;;  %v2138_v47 = vld [vmem:[%s2725_s5 + $0x94] ss:$8 sps:$4 sm:$0xff]   ;;  %vm1016_vm12 = vcmp.ne.s16.totalorder %v1014_v41, 0 }
  0x2b   : > { %849 = vmatprep.subr.bf16.mxu1 %v2117_v51  ;;  %v2174_v41 = vld [vmem:[%s2725_s5 + $0x134] ss:$8 sps:$4 sm:$0xff]  }
  0x2c   : > { %752 = vmatpush1.bf16.msra.mxu0 %v2112_v50  ;;  %v2133_v50 = vld [vmem:[%s2725_s5 + $0xc0] ss:$8 sps:$4 sm:$0xff]  }
  0x2d   : > { %753 = vmatprep.subr.bf16.mxu0 %v2120_v54  ;;  %v2141_v54 = vld [vmem:[%s2725_s5 + $0xd4] ss:$8 sps:$4 sm:$0xff]  }
  0x2e   : > { %850 = vmatpush1.bf16.msra.mxu1 %v2115_v52 }
  0x2f   : > { %851 = vmatprep.subr.bf16.mxu1 %v2123_v55 }
  0x30   : > { %754 = vmatpush1.bf16.msra.mxu0 %v2118_v53  ;;  %v2136_v53 = vld [vmem:[%s2725_s5 + $0x90] ss:$8 sps:$4 sm:$0xff]  }
  0x31   : > { %755 = vmatprep.subr.bf16.mxu0 %v2126_v57  ;;  %v2144_v57 = vld [vmem:[%s2725_s5 + $0xa4] ss:$8 sps:$4 sm:$0xff]  }
  0x32   : > { %852 = vmatpush1.bf16.msra.mxu1 %v2121_v56 }
  0x33   : > { %853 = vmatprep.subr.bf16.mxu1 %v2129_v59 }
  0x34   : > { %756 = vmatpush1.bf16.msra.mxu0 %v2124_v58 }
  0x35   : > { %970 = vmatprep.subr.bf16.mxu0 %v2132_v60  ;;  %v2139_v60 = vld [vmem:[%s2725_s5 + $0xd0] ss:$8 sps:$4 sm:$0xff]  }
  0x36   : > { %854 = vmatpush1.bf16.msra.mxu1 %v2127_v61  ;;  %v903_v61 = vsel %vm2493_vm13, %v690_v31, 0 }
  0x37   : > { %1083 = vmatprep.subr.bf16.mxu1 %v2135_v62  ;;  %v916_v5 = vshrl.u32 %v903_v61, 16  ;;  %v2181_v61 = vld [vmem:[%s2725_s5 + $0x1c0] ss:$8 sps:$4 sm:$0xff]  }
  0xfa   : > { %v2035_v6 = vpop.f32.mrb[0].mxu0 }
  0xfb   : > { %v2057_v7 = vpop.f32.mrb[0].mxu1  ;;  %v2036_v9 = vpop.f32.mrb[1].mxu0 }
  0xfc   : > { %v2058_v10 = vpop.f32.mrb[1].mxu1  ;;  %v2037_v12 = vadd.f32 %v2036_v9, %v2035_v6  ;;  %v2038_v14 = vpop.f32.mrb[2].mxu0  ;;  %v1127_v9 = vrot.slane %v2468_v30, 7 }
  0xfd   : > { %v2059_v13 = vadd.f32 %v2058_v10, %v2057_v7  ;;  %v2060_v15 = vpop.f32.mrb[2].mxu1  ;;  %v2039_v16 = vpop.f32.mrb[3].mxu0  ;;  %v1017_v7 = vsel %vm2508_vm14, %v690_v31, 0  ;;  %v2148_v10 = vld [vmem:[%s2725_s5 + $0xb0] ss:$8 sps:$4 sm:$0xff]  }
  0xfe   : > { %v2061_v17 = vpop.f32.mrb[3].mxu1  ;;  %v580_v19 = vadd.f32 %v2037_v12, %v1832_v8  ;;  %v2145_v8 = vld [vmem:[%s2725_s5 + $0xe0] ss:$8 sps:$4 sm:$0xff]   ;;  %v1029_v14 = vshrl.u32 %v1017_v7, 16  ;;  %v918_v16 = vrot.slane %v916_v5, 7 }
  0xff   : > { %v2187_v5 = vld [vmem:[%s2725_s5 + $0x1d0] ss:$8 sps:$4 sm:$0xff]   ;;  %v2195_v7 = vld [vmem:[%s2725_s5 + $0x1e4] ss:$8 sps:$4 sm:$0xff]  }
 0x100   : > { %v620_v21 = vadd.f32 %v2059_v13, %v580_v19  ;;  %v2156_v13 = vld [vmem:[%s2725_s5 + $0x104] ss:$8 sps:$4 sm:$0xff]   ;;  %v2151_v19 = vld [vmem:[%s2725_s5 + $0xf0] ss:$8 sps:$4 sm:$0xff]   ;;  %v1031_v2 = vrot.slane %v1029_v14, 7 }
 0x102   : > { %v625_v23 = vmax.f32 %v620_v21, 0.0  ;;  %v1128_v21 = vor.u32 %v1127_v9, %v2465_v24 }
 0x104   : > { %v626_v25 = vpack.c.bf16 %v625_v23, %v625_v23  ;;  %v2159_v23 = vld [vmem:[%s2725_s5 + $0x144] ss:$8 sps:$4 sm:$0xff]   ;;  %vm1129_vm1 = vcmp.ne.s16.totalorder %v1128_v21, 0 }
 0x105   : > { %v2207_v21 = vld [vmem:[%s2723_s3 + $0xc] ss:$16 sps:$4 sm:$0xff]  }
 0x106   : > { %628 = vst.msk [vmem:[#allocation2 + $0x8] sm:$0x3] %vm627_vm7, %v626_v25 }
 0x10d   : > { %v663_v40 = vld [vmem:[#allocation2 + $0x8] sm:$0x1] }
 0x10e   : > { %v704_v42 = vrot.slane %v663_v40, 7  ;;  %v681_v43 = vsel %vm679_vm8, %v663_v40, 0  ;;  %v2476_v44 = vld [vmem:[#allocation2 + $0x8] sm:$0x3]  ;;  %v2171_v40 = vld [vmem:[%s2725_s5 + $0x164] ss:$8 sps:$4 sm:$0xff]  }
 0x10f   : > { %v800_v46 = vshll.u32 %v681_v43, 16  ;;  %v904_v52 = vsel %vm902_vm10, %v2476_v44, 0  ;;  %v1018_v59 = vsel %vm1016_vm12, %v2476_v44, 0  ;;  %v1126_v31 = vld [vmem:[#allocation2 + $0x8] sm:$0x7] }
 0x110   : > { %v705_v48 = vsel %vm702_vm9, %v703_v37, %v704_v42  ;;  %v920_v58 = vshrl.u32 %v904_v52, 16  ;;  %v1033_v4 = vshrl.u32 %v1018_v59, 16  ;;  %v923_v12 = vshll.u32 %v904_v52, 16  ;;  %v2163_v37 = vld [vmem:[%s2725_s5 + $0x150] ss:$8 sps:$4 sm:$0xff]  }
 0x111   : > { %1882 = vmatmul.mubr.msk.bf16.vlgmr.msra.gmra.mrb[4].mxu0 %vm255_vm0, %v705_v48  ;;  %v802_v51 = vrot.slane %v800_v46, 7  ;;  %v1036_v20 = vshll.u32 %v1018_v59, 16  ;;  %v1130_v35 = vsel %vm1129_vm1, %v1126_v31, 0  ;;  %v1236_v43 = vsel %vm1235_vm2, %v1126_v31, 0  ;;  %v2172_v46 = vld [vmem:[%s2725_s5 + $0x130] ss:$8 sps:$4 sm:$0xff]  }
 0x112   : > { %971 = vmatpush1.bf16.msra.mxu0 %v2130_v38  ;;  %1002 = vmatprep.mubr.bf16.mxu0 %v2235_v49  ;;  %v922_v6 = vrot.slane %v920_v58, 7  ;;  %v1035_v15 = vrot.slane %v1033_v4, 7  ;;  %v2166_v38 = vld [vmem:[%s2725_s5 + $0x120] ss:$8 sps:$4 sm:$0xff]   ;;  %v1143_v42 = vshll.u32 %v1130_v35, 16  ;;  %v1249_v48 = vshll.u32 %v1236_v43, 16 }
 0x113   : > { %v803_v56 = vsel %vm790_vm11, %v798_v45, %v802_v51  ;;  %972 = vmatprep.subr.bf16.mxu0 %v2138_v47  ;;  %v2169_v45 = vld [vmem:[%s2725_s5 + $0x160] ss:$8 sps:$4 sm:$0xff]   ;;  %v2177_v47 = vld [vmem:[%s2725_s5 + $0x174] ss:$8 sps:$4 sm:$0xff]   ;;  %v2180_v51 = vld [vmem:[%s2725_s5 + $0x184] ss:$8 sps:$4 sm:$0xff]  }
 0x114   : > { %1891 = vmatmul.mubr.msk.bf16.vlgmr.msra.gmra.mrb[4].mxu1 %vm255_vm0, %v803_v56  ;;  %v925_v17 = vor.u32 %v923_v12, %v922_v6  ;;  %v1038_v25 = vor.u32 %v1036_v20, %v1035_v15  ;;  %v1438_v52 = vrot.slane %v2468_v30, 6  ;;  %v1141_v55 = vshrl.u32 %v1130_v35, 16  ;;  %v2178_v56 = vld [vmem:[%s2725_s5 + $0x180] ss:$8 sps:$4 sm:$0xff]   ;;  %v2183_v58 = vld [vmem:[%s2725_s5 + $0x1c4] ss:$8 sps:$4 sm:$0xff]  }
 0x115   : > { %1084 = vmatpush1.bf16.msra.mxu1 %v2133_v50  ;;  %1115 = vmatprep.mubr.bf16.mxu1 %v2235_v49  ;;  %v1145_v50 = vrot.slane %v1143_v42, 1  ;;  %v1247_v59 = vshrl.u32 %v1236_v43, 16  ;;  %v1437_v4 = vld [vmem:[#allocation2 + $0x8] sm:$0xe]  ;;  %v2201_v12 = vld [vmem:[%s2725_s5 + $0x1f4] ss:$8 sps:$4 sm:$0xff]  }
 0x116   : > { %973 = vmatpush1.bf16.msra.mxu0 %v2136_v53  ;;  %1085 = vmatprep.subr.bf16.mxu1 %v2141_v54  ;;  %v926_v27 = vsel %vm914_vm15, %v918_v16, %v925_v17  ;;  %v1039_v3 = vsel %vm914_vm15, %v1031_v2, %v1038_v25  ;;  %v1439_v53 = vrot.slane %v2465_v24, 7  ;;  %v2175_v54 = vld [vmem:[%s2725_s5 + $0x170] ss:$8 sps:$4 sm:$0xff]   ;;  %v2186_v24 = vld [vmem:[%s2725_s5 + $0x194] ss:$8 sps:$4 sm:$0xff]  }
 0x117   : > { %974 = vmatprep.subr.bf16.mxu0 %v2144_v57  ;;  %v1251_v57 = vrot.slane %v1249_v48, 1  ;;  %v1146_v30 = vor.u32 %v1145_v50, %v1141_v55  ;;  %v2190_v6 = vld [vmem:[%s2725_s5 + $0x1a0] ss:$8 sps:$4 sm:$0xff]   ;;  %v2204_v15 = vld [vmem:[%s2723_s3 + $0x4] ss:$16 sps:$4 sm:$0xff]  }
 0x118   : > { %v1339_v16 = vld [vmem:[#allocation2 + $0x8] sm:$0x6]  ;;  %v2199_v17 = vld [vmem:[%s2725_s5 + $0x1f0] ss:$8 sps:$4 sm:$0xff]  }
 0x119   : > { %1086 = vmatpush1.bf16.msra.mxu1 %v2139_v60  ;;  %v1440_v60 = vor.u32 %v1439_v53, %v1438_v52  ;;  %v1252_v62 = vor.u32 %v1251_v57, %v1247_v59  ;;  %v2205_v2 = vld [vmem:[%s2723_s3 + $0x8] ss:$16 sps:$4 sm:$0xff]   ;;  %v2214_v31 = vld [vmem:[%s2723_s3 + $0x40] ss:$16 sps:$4 sm:$0xff]  }
 0x11a   : > { %975 = vmatpush1.bf16.msra.mxu0 %v2142_v63  ;;  %1087 = vmatprep.subr.bf16.mxu1 %v2147_v0  ;;  %v2184_v63 = vld [vmem:[%s2725_s5 + $0x190] ss:$8 sps:$4 sm:$0xff]   ;;  %v2189_v0 = vld [vmem:[%s2725_s5 + $0x1d4] ss:$8 sps:$4 sm:$0xff]  }
 0x11b   : > { %976 = vmatprep.subr.bf16.mxu0 %v2150_v1  ;;  %v2192_v1 = vld [vmem:[%s2725_s5 + $0x1a4] ss:$8 sps:$4 sm:$0xff]   ;;  %vm1441_vm3 = vcmp.ne.s16.totalorder %v1440_v60, 0  ;;  %v2223_v35 = vld [vmem:[%s2723_s3 + $0x68] ss:$16 sps:$4 sm:$0xff]  }
 0x11c   : > { %v1442_v9 = vsel %vm1441_vm3, %v1437_v4, 0 }
 0x11d   : > { %1088 = vmatpush1.bf16.msra.mxu1 %v2145_v8  ;;  %v2198_v8 = vld [vmem:[%s2725_s5 + $0x1b4] ss:$8 sps:$4 sm:$0xff]   ;;  %v1456_v14 = vshll.u32 %v1442_v9, 16 }
 0x11e   : > { %977 = vmatpush1.bf16.msra.mxu0 %v2148_v10  ;;  %1089 = vmatprep.subr.bf16.mxu1 %v2153_v11  ;;  %v2193_v10 = vld [vmem:[%s2725_s5 + $0x1e0] ss:$8 sps:$4 sm:$0xff]   ;;  %v2196_v11 = vld [vmem:[%s2725_s5 + $0x1b0] ss:$8 sps:$4 sm:$0xff]  }
 0x11f   : > { %1190 = vmatprep.subr.bf16.mxu0 %v2156_v13  ;;  %v1453_v13 = vshrl.u32 %v1442_v9, 16  ;;  %v1458_v20 = vrot.slane %v1456_v14, 2 }
 0x121   : > { %1909 = vmatmul.mubr.msk.bf16.vlgmr.msra.gmra.mrb[8].mxu0 %vm255_vm0, %v926_v27  ;;  %1090 = vmatpush1.bf16.msra.mxu1 %v2151_v19  ;;  %v1455_v19 = vrot.slane %v1453_v13, 1  ;;  %v2213_v27 = vld [vmem:[%s2723_s3 + $0x2c] ss:$16 sps:$4 sm:$0xff]  }
 0x122   : > { %1191 = vmatpush1.bf16.msra.mxu0 %v2154_v22  ;;  %1296 = vmatprep.subr.bf16.mxu1 %v2159_v23  ;;  %v1350_v22 = vrot.slane %v1339_v16, 1  ;;  %v2210_v23 = vld [vmem:[%s2723_s3 + $0x24] ss:$16 sps:$4 sm:$0xff]  }
 0x123   : > { %1192 = vmatprep.subr.bf16.mxu0 %v2162_v26  ;;  %1222 = vmatprep.mubr.bf16.mxu0 %v2235_v49  ;;  %v1459_v25 = vor.u32 %v1458_v20, %v1455_v19  ;;  %v2208_v26 = vld [vmem:[%s2723_s3 + $0x20] ss:$16 sps:$4 sm:$0xff]  }
 0x124   : > { %1926 = vmatmul.mubr.msk.bf16.vlgmr.msra.gmra.mrb[8].mxu1 %vm255_vm0, %v1039_v3  ;;  %v2220_v3 = vld [vmem:[%s2723_s3 + $0x60] ss:$16 sps:$4 sm:$0xff]  }
 0x125   : > { %1297 = vmatpush1.bf16.msra.mxu1 %v2157_v29  ;;  %1328 = vmatprep.mubr.bf16.mxu1 %v2235_v49  ;;  %v2211_v29 = vld [vmem:[%s2723_s3 + $0x28] ss:$16 sps:$4 sm:$0xff]  }
 0x126   : > { %1193 = vmatpush1.bf16.msra.mxu0 %v2160_v32  ;;  %1298 = vmatprep.subr.bf16.mxu1 %v2165_v33  ;;  %v2219_v32 = vld [vmem:[%s2723_s3 + $0x4c] ss:$16 sps:$4 sm:$0xff]   ;;  %v2222_v33 = vld [vmem:[%s2723_s3 + $0x64] ss:$16 sps:$4 sm:$0xff]  }
 0x127   : > { %1194 = vmatprep.subr.bf16.mxu0 %v2168_v34  ;;  %v2225_v34 = vld [vmem:[%s2723_s3 + $0x6c] ss:$16 sps:$4 sm:$0xff]  }
 0x129   : > { %1299 = vmatpush1.bf16.msra.mxu1 %v2163_v37 }
 0x12a   : > { %1195 = vmatpush1.bf16.msra.mxu0 %v2166_v38  ;;  %1300 = vmatprep.subr.bf16.mxu1 %v2171_v40 }
 0x12b   : > { %1196 = vmatprep.subr.bf16.mxu0 %v2174_v41 }
 0x12d   : > { %1301 = vmatpush1.bf16.msra.mxu1 %v2169_v45 }
 0x12e   : > { %1197 = vmatpush1.bf16.msra.mxu0 %v2172_v46  ;;  %1302 = vmatprep.subr.bf16.mxu1 %v2177_v47 }
 0x12f   : > { %1394 = vmatprep.subr.bf16.mxu0 %v2180_v51 }
 0x131   : > { %1943 = vmatmul.mubr.msk.bf16.vlgmr.msra.gmra.mrb[12].mxu0 %vm255_vm0, %v1146_v30  ;;  %1303 = vmatpush1.bf16.msra.mxu1 %v2175_v54 }
 0x132   : > { %1395 = vmatpush1.bf16.msra.mxu0 %v2178_v56  ;;  %1503 = vmatprep.subr.bf16.mxu1 %v2183_v58 }
 0x133   : > { %1396 = vmatprep.subr.bf16.mxu0 %v2186_v24  ;;  %1426 = vmatprep.mubr.bf16.mxu0 %v2235_v49 }
 0x134   : > { %1960 = vmatmul.mubr.msk.bf16.vlgmr.msra.gmra.mrb[12].mxu1 %vm255_vm0, %v1252_v62 }
 0x135   : > { %1504 = vmatpush1.bf16.msra.mxu1 %v2181_v61  ;;  %1535 = vmatprep.mubr.bf16.mxu1 %v2235_v49 }
 0x136   : > { %1397 = vmatpush1.bf16.msra.mxu0 %v2184_v63  ;;  %1505 = vmatprep.subr.bf16.mxu1 %v2189_v0 }
 0x137   : > { %1398 = vmatprep.subr.bf16.mxu0 %v2192_v1 }
 0x139   : > { %1506 = vmatpush1.bf16.msra.mxu1 %v2187_v5 }
 0x13a   : > { %1399 = vmatpush1.bf16.msra.mxu0 %v2190_v6  ;;  %1507 = vmatprep.subr.bf16.mxu1 %v2195_v7 }
 0x13b   : > { %1400 = vmatprep.subr.bf16.mxu0 %v2198_v8 }
 0x13d   : > { %1508 = vmatpush1.bf16.msra.mxu1 %v2193_v10 }
 0x13e   : > { %1401 = vmatpush1.bf16.msra.mxu0 %v2196_v11  ;;  %1509 = vmatprep.subr.bf16.mxu1 %v2201_v12 }
 0x13f   : > { %1629 = vmatprep.subr.bf16.mxu0 %v2204_v15 }
 0x141   : > { %1977 = vmatmul.mubr.msk.bf16.vlgmr.msra.gmra.mrb[16].mxu0 %vm255_vm0, %v1350_v22  ;;  %1510 = vmatpush1.bf16.msra.mxu1 %v2199_v17  ;;  %v1711_v22 = vld [vmem:[%s2724_s4] sm:$0xf] }
 0x142   : > { %1630 = vmatpush1.bf16.msra.mxu0 %v2202_v18  ;;  %1670 = vmatprep.subr.bf16.mxu1 %v2207_v21  ;;  %v1715_v21 = vsub.s32 0, %v2387_v36 }
 0x143   : > { %1631 = vmatprep.subr.bf16.mxu0 %v2210_v23  ;;  %1661 = vmatprep.mubr.bf16.mxu0 %v2235_v49  ;;  %v1719_v23 = vsub.s32 1, %v2387_v36 }
 0x144   : > { %1994 = vmatmul.mubr.msk.bf16.vlgmr.msra.gmra.mrb[16].mxu1 %vm255_vm0, %v1459_v25 }
 0x145   : > { %1671 = vmatpush1.bf16.msra.mxu1 %v2205_v2  ;;  %1702 = vmatprep.mubr.bf16.mxu1 %v2235_v49  ;;  %v2217_v49 = vld [vmem:[%s2723_s3 + $0x48] ss:$16 sps:$4 sm:$0xff]   ;;  %v1716_v2 = vrot.slane %v1711_v22, %v1715_v21  ;;  %v1720_v25 = vrot.slane %v1711_v22, %v1719_v23 }
 0x146   : > { %1632 = vmatpush1.bf16.msra.mxu0 %v2208_v26  ;;  %1672 = vmatprep.subr.bf16.mxu1 %v2213_v27  ;;  %v1723_v26 = vsub.s32 2, %v2387_v36  ;;  %v1727_v27 = vsub.s32 3, %v2387_v36 }
 0x147   : > { %1633 = vmatprep.subr.bf16.mxu0 %v2216_v28 }
 0x149   : > { %1673 = vmatpush1.bf16.msra.mxu1 %v2211_v29 }
 0x14a   : > { %1634 = vmatpush1.bf16.msra.mxu0 %v2214_v31  ;;  %1674 = vmatprep.subr.bf16.mxu1 %v2219_v32 }
 0x14b   : > { %1635 = vmatprep.subr.bf16.mxu0 %v2222_v33 }
 0x14d   : > { %1675 = vmatpush1.bf16.msra.mxu1 %v2217_v49  ;;  %v1724_v49 = vrot.slane %v1711_v22, %v1723_v26 }
 0x14e   : > { %1636 = vmatpush1.bf16.msra.mxu0 %v2220_v3  ;;  %1676 = vmatprep.subr.bf16.mxu1 %v2225_v34 }
 0x151   : > { %2011 = vmatmul.mubr.msk.bf16.vlgmr.msra.gmra.mrb[20].mxu0 %vm255_vm0, %v2476_v44  ;;  %1677 = vmatpush1.bf16.msra.mxu1 %v2223_v35 }
 0x154   : > { %2012 = vmatmul.mubr.msk.bf16.vlgmr.msra.gmra.mrb[20].mxu1 %vm255_vm0, %v2476_v44 }
 0x1e4   : > { %v783_v37 = vpop.f32.mrb[4].mxu0 }
 0x1e5   : > { %v785_v38 = vpop.f32.mrb[5].mxu0 }
 0x1e6   : > { %v787_v40 = vpop.f32.mrb[6].mxu0 }
 0x1e7   : > { %v788_v41 = vpop.f32.mrb[7].mxu0  ;;  %v881_v42 = vpop.f32.mrb[4].mxu1 }
 0x1e8   : > { %v882_v43 = vadd.f32 %v881_v42, %v783_v37  ;;  %v883_v45 = vpop.f32.mrb[5].mxu1  ;;  %v1728_v37 = vrot.slane %v1711_v22, %v1727_v27 }
 0x1e9   : > { %v884_v46 = vadd.f32 %v883_v45, %v785_v38  ;;  %v885_v47 = vpop.f32.mrb[6].mxu1 }
 0x1ea   : > { %v886_v48 = vpop.f32.mrb[7].mxu1 }
 0x1f4   : > { %v1004_v50 = vpop.f32.mrb[8].mxu0 }
 0x1f5   : > { %v1011_v51 = vadd.f32 %v1004_v50, %v882_v43  ;;  %v1006_v52 = vpop.f32.mrb[9].mxu0 }
 0x1f6   : > { %v1012_v53 = vadd.f32 %v1006_v52, %v884_v46  ;;  %v1008_v54 = vpop.f32.mrb[10].mxu0 }
 0x1f7   : > { %v1009_v55 = vpop.f32.mrb[11].mxu0  ;;  %v1117_v56 = vpop.f32.mrb[8].mxu1 }
 0x1f8   : > { %v1124_v57 = vadd.f32 %v1117_v56, %v1011_v51  ;;  %v1119_v58 = vpop.f32.mrb[9].mxu1 }
 0x1f9   : > { %v1125_v44 = vadd.f32 %v1119_v58, %v1012_v53  ;;  %v1121_v30 = vpop.f32.mrb[10].mxu1 }
 0x1fa   : > { %v1122_v24 = vpop.f32.mrb[11].mxu1 }
 0x204   : > { %v1224_v59 = vpop.f32.mrb[12].mxu0 }
 0x205   : > { %v1231_v60 = vadd.f32 %v1224_v59, %v1124_v57  ;;  %v1226_v61 = vpop.f32.mrb[13].mxu0 }
 0x206   : > { %v1232_v62 = vadd.f32 %v1226_v61, %v1125_v44  ;;  %v1228_v63 = vpop.f32.mrb[14].mxu0 }
 0x207   : > { %v1229_v0 = vpop.f32.mrb[15].mxu0  ;;  %v1330_v1 = vpop.f32.mrb[12].mxu1 }
 0x208   : > { %v1337_v4 = vadd.f32 %v1330_v1, %v1231_v60  ;;  %v1332_v5 = vpop.f32.mrb[13].mxu1 }
 0x209   : > { %v1338_v6 = vadd.f32 %v1332_v5, %v1232_v62  ;;  %v1334_v7 = vpop.f32.mrb[14].mxu1 }
 0x20a   : > { %v1335_v8 = vpop.f32.mrb[15].mxu1 }
 0x214   : > { %v1428_v9 = vpop.f32.mrb[16].mxu0 }
 0x215   : > { %v1435_v10 = vadd.f32 %v1428_v9, %v1337_v4  ;;  %v1430_v11 = vpop.f32.mrb[17].mxu0 }
 0x216   : > { %v1436_v12 = vadd.f32 %v1430_v11, %v1338_v6  ;;  %v1432_v13 = vpop.f32.mrb[18].mxu0 }
 0x217   : > { %v1433_v14 = vpop.f32.mrb[19].mxu0  ;;  %v1537_v15 = vpop.f32.mrb[16].mxu1 }
 0x218   : > { %v1544_v16 = vadd.f32 %v1537_v15, %v1435_v10  ;;  %v1539_v17 = vpop.f32.mrb[17].mxu1 }
 0x219   : > { %v1545_v18 = vadd.f32 %v1539_v17, %v1436_v12  ;;  %v1541_v19 = vpop.f32.mrb[18].mxu1 }
 0x21a   : > { %v1542_v20 = vpop.f32.mrb[19].mxu1 }
 0x224   : > { %v1663_v28 = vpop.f32.mrb[20].mxu0 }
 0x225   : > { %v1733_v29 = vadd.f32 %v1716_v2, %v1663_v28  ;;  %v1665_v31 = vpop.f32.mrb[21].mxu0 }
 0x226   : > { %v1734_v32 = vadd.f32 %v1720_v25, %v1665_v31  ;;  %v1667_v33 = vpop.f32.mrb[22].mxu0 }
 0x227   : > { %v1737_v3 = vmax.f32 %v1733_v29, 0.0  ;;  %v1668_v34 = vpop.f32.mrb[23].mxu0  ;;  %v1704_v35 = vpop.f32.mrb[20].mxu1 }
 0x228   : > { %v1738_v38 = vmax.f32 %v1734_v32, 0.0  ;;  %v1705_v40 = vadd.f32 %v1704_v35, %v1544_v16  ;;  %v1706_v41 = vpop.f32.mrb[21].mxu1 }
 0x229   : > { %v1707_v42 = vadd.f32 %v1706_v41, %v1545_v18  ;;  %v1708_v43 = vpop.f32.mrb[22].mxu1 }
 0x22a   : > { %v2013_v45 = vpack.c.bf16 %v1738_v38, %v1737_v3  ;;  %v1735_v46 = vadd.f32 %v1724_v49, %v1705_v40  ;;  %v1709_v47 = vpop.f32.mrb[23].mxu1 }
 0x22b   : > { %v1736_v36 = vadd.f32 %v1728_v37, %v1707_v42 }
 0x22c   : > { %v1739_v48 = vmax.f32 %v1735_v46, 0.0  ;;  %v1757_v52 = vrot.slane %v2013_v45, %v2390_v39 }
 0x22d   : > { %v1740_v50 = vmax.f32 %v1736_v36, 0.0 }
 0x22f   : > { %v2014_v51 = vpack.c.bf16 %v1740_v50, %v1739_v48 }
 0x231   : > { %v1764_v53 = vrot.slane %v2014_v51, %v2390_v39 }
 0x233   : > { %v1765_v54 = vcombine.low %v1757_v52, %v1764_v53 }
 0x235   : > { %1767 = vst [vmem:[%s251_s23] sm:$0xff] %v1765_v54 }
 0x236 PF: > { %s16_s21 = sadd.s32 1, %s2232_s21  }
 0x237   : > { %p13_p4 = scmp.ge.s32.totalorder %s16_s21, 4  }
 0x239   :  { %15 = sbr.rel (!%p13_p4) target bundleno = 1 (0x1), region = 81 }

</bundles_post_ra>
